<compile_context>
chip_gen: v7x
topology: tpu7x:2x2x1
jax: 0.10.0
libtpu: 0.0.40
codegen_flags: <defaults>
</compile_context>

<pallas_src>
import functools

import jax
import jax.numpy as jnp
import numpy as np
from jax import lax
from jax.experimental import pallas as pl
from jax.experimental.pallas import tpu as pltpu


def _round_up(x, m):
    return (x + m - 1) // m * m


# K-tile cap for fc1 weight streaming (bf16 w3 block = tk * 64 * 2 bytes).
# 16384 is safe inside v7x's 64 MiB VMEM; on v5e/v6e (128 MiB) this can be
# raised to 32768 to further cut per-step pipeline overhead.
FC1_TK_CAP = 16384


def _fc1_k_tiling(D, cap=FC1_TK_CAP):
    """Return (tk, D_pad): 128-aligned fc1 K tile and zero-padded K extent."""
    tk = min(_round_up(D, 128), _round_up(cap, 128))
    return tk, _round_up(D, tk)


# --------------------------------------------------------------------------
# Fused conv1(3x3,pad1)+ReLU -> conv2(3x3,pad1)+ReLU, channels-major layout.
# One grid step = (batch element, row tile).  The wrapper supplies a row tile
# of the input padded by 2 on every spatial side (halo for the two stacked
# 3x3 convs), so each grid step is fully self-contained.
# --------------------------------------------------------------------------
def _fused_conv_kernel(x_ref, w1_ref, b1_ref, w2_ref, b2_ref, o_ref, *,
                       TR, W, Cin):
    # x_ref : (Cin, TR+4, W+4)  bf16 padded input row tile (channels-major)
    # w1_ref: (32, 9*Cin)       bf16 conv1 weights, cols ordered (kh, kw, ci)
    # b1_ref: (32, 1)           f32
    # w2_ref: (64, 288)         bf16 conv2 weights, cols ordered (kh, kw, ci)
    # b2_ref: (64, 1)           f32
    # o_ref : (64, TR*W)        bf16 conv2 output, channels-major (lane-dense)
    Hc, Wc = TR + 2, W + 2                       # conv1 region needed by conv2
    t = pl.program_id(1)
    nT = pl.num_programs(1)

    x = x_ref[...]                               # (Cin, TR+4, W+4) bf16

    # ---- conv1: one MXU matmul (32, 9*Cin) @ (9*Cin, Hc*Wc), f32 acc ----
    taps1 = [x[:, dh:dh + Hc, dw:dw + Wc].reshape(Cin, Hc * Wc)
             for dh in range(3) for dw in range(3)]
    p1 = jnp.concatenate(taps1, axis=0)          # (9*Cin, Hc*Wc) bf16
    h1 = jnp.dot(w1_ref[...], p1, preferred_element_type=jnp.float32)
    h1 = jnp.maximum(h1 + b1_ref[...], 0.0)      # bias + ReLU (f32)
    h1 = h1.reshape(32, Hc, Wc)

    # Zero the one-element ring that corresponds to conv2's zero padding
    # (positions outside the original image).  Interior row-tile boundaries
    # keep real conv1 values (their halo rows came from neighbouring rows).
    r = lax.broadcasted_iota(jnp.int32, (Hc, Wc), 0)
    c = lax.broadcasted_iota(jnp.int32, (Hc, Wc), 1)
    valid = (c >= 1) & (c <= W)
    valid &= (r >= 1) | (t > 0)
    valid &= (r <= TR) | (t < nT - 1)
    h1 = jnp.where(valid[None, :, :], h1, 0.0).astype(jnp.bfloat16)

    # ---- conv2: one MXU matmul (64, 288) @ (288, TR*W), f32 acc ----
    taps2 = [h1[:, dh:dh + TR, dw:dw + W].reshape(32, TR * W)
             for dh in range(3) for dw in range(3)]
    p2 = jnp.concatenate(taps2, axis=0)          # (288, TR*W) bf16
    y = jnp.dot(w2_ref[...], p2, preferred_element_type=jnp.float32)
    y = jnp.maximum(y + b2_ref[...], 0.0)        # bias + ReLU
    o_ref[...] = y.astype(o_ref.dtype)           # bf16, lane-dense minor dim


def fused_conv(x_nchw_bf16, w1, b1, w2, b2, *, TR):
    N, Cin, H, W = x_nchw_bf16.shape
    assert H % TR == 0
    T = H // TR
    # Pad by 2 on each spatial side and gather overlapping row tiles so every
    # grid step owns its own halo (input is tiny: Cin channels only).
    x_pad = jnp.pad(x_nchw_bf16, ((0, 0), (0, 0), (2, 2), (2, 2)))
    rows = jnp.arange(T)[:, None] * TR + jnp.arange(TR + 4)[None, :]
    x_tiles = x_pad[:, :, rows, :]               # (N, Cin, T, TR+4, W+4)

    kernel = functools.partial(_fused_conv_kernel, TR=TR, W=W, Cin=Cin)
    return pl.pallas_call(
        kernel,
        out_shape=jax.ShapeDtypeStruct((N, T, 64, TR * W), jnp.bfloat16),
        grid_spec=pltpu.PrefetchScalarGridSpec(
            num_scalar_prefetch=0,
            grid=(N, T),
            in_specs=[
                pl.BlockSpec((None, Cin, None, TR + 4, W + 4),
                             lambda n, t: (n, 0, t, 0, 0)),
                pl.BlockSpec((32, 9 * Cin), lambda n, t: (0, 0)),
                pl.BlockSpec((32, 1), lambda n, t: (0, 0)),
                pl.BlockSpec((64, 288), lambda n, t: (0, 0)),
                pl.BlockSpec((64, 1), lambda n, t: (0, 0)),
            ],
            out_specs=pl.BlockSpec((None, None, 64, TR * W),
                                   lambda n, t: (n, t, 0, 0)),
        ),
        compiler_params=pltpu.CompilerParams(
            dimension_semantics=("parallel", "parallel"),
            vmem_limit_bytes=48 << 20),
    )(x_tiles, w1, b1, w2, b2)


# --------------------------------------------------------------------------
# Fused MLP head: fc1 (128-aligned K tiles, bf16 weight streaming, f32 acc)
# + ReLU + fc2, with the 128 fc1 outputs split into column slabs on a
# "parallel" grid axis (both TCs on v7x stream disjoint weight halves).
# --------------------------------------------------------------------------
def _mlp_kernel(x_ref, w3_ref, b3_ref, w4_ref, o_ref, acc_ref):
    k = pl.program_id(1)

    @pl.when(k == 0)
    def _():
        acc_ref[...] = jnp.zeros_like(acc_ref)

    # fc1 partial product: bf16 operands on the MXU, f32 accumulation.
    acc_ref[...] += jnp.dot(x_ref[...], w3_ref[...],
                            preferred_element_type=jnp.float32)

    @pl.when(k == pl.num_programs(1) - 1)
    def _():
        h = jnp.maximum(acc_ref[...] + b3_ref[...], 0.0)       # fc1 + ReLU
        o_ref[...] = jnp.dot(h, w4_ref[...],                   # fused fc2 slab
                             preferred_element_type=jnp.float32
                             ).astype(o_ref.dtype)


def mlp_head(h, w3, b3, w4):
    # h : (N, D) bf16 flattened conv output
    # w3: (C_TILES, D_pad, MC) bf16, b3: (C_TILES, 1, MC) f32
    # w4: (C_TILES, MC, out)   f32
    N, D = h.shape
    C_TILES, D_pad, MC = w3.shape
    out_size = w4.shape[-1]
    tk, d_pad_chk = _fc1_k_tiling(D)
    assert d_pad_chk == D_pad and D_pad % tk == 0
    if D_pad > D:                                 # zero pad K (zero w3 rows too)
        h = jnp.pad(h, ((0, 0), (0, D_pad - D)))

    partial = pl.pallas_call(
        _mlp_kernel,
        out_shape=jax.ShapeDtypeStruct((C_TILES, N, out_size), jnp.float32),
        grid_spec=pltpu.PrefetchScalarGridSpec(
            num_scalar_prefetch=0,
            grid=(C_TILES, D_pad // tk),
            in_specs=[
                pl.BlockSpec((N, tk), lambda c, k: (0, k)),
                pl.BlockSpec((None, tk, MC), lambda c, k: (c, k, 0)),
                pl.BlockSpec((None, 1, MC), lambda c, k: (c, 0, 0)),
                pl.BlockSpec((None, MC, out_size), lambda c, k: (c, 0, 0)),
            ],
            out_specs=pl.BlockSpec((None, N, out_size), lambda c, k: (c, 0, 0)),
            scratch_shapes=[pltpu.VMEM((N, MC), jnp.float32)],
        ),
        compiler_params=pltpu.CompilerParams(
            dimension_semantics=("parallel", "arbitrary"),
            vmem_limit_bytes=48 << 20),
    )(h, w3, b3, w4)
    return partial.sum(axis=0)                    # (N, out); fc2 bias by caller


# --------------------------------------------------------------------------
# Parameters: synthetic PyTorch-layout params + one-time kernel re-layout.
# --------------------------------------------------------------------------
def init_torch_params(key, input_channels, H, W, output_size):
    """Synthetic params in PyTorch layouts (OIHW conv, (out,in) linear)."""
    ks = jax.random.split(key, 8)

    def u(k, shape, fan_in):
        bound = 1.0 / float(np.sqrt(fan_in))
        return jax.random.uniform(k, shape, jnp.float32, -bound, bound)

    fc1_in = 64 * H * W                    # 64 * 177 * 177 in the real module
    return {
        "conv1.w": u(ks[0], (32, input_channels, 3, 3), input_channels * 9),
        "conv1.b": u(ks[1], (32,), input_channels * 9),
        "conv2.w": u(ks[2], (64, 32, 3, 3), 32 * 9),
        "conv2.b": u(ks[3], (64,), 32 * 9),
        "fc1.w": u(ks[4], (128, fc1_in), fc1_in),
        "fc1.b": u(ks[5], (128,), fc1_in),
        "fc2.w": u(ks[6], (output_size, 128), 128),
        "fc2.b": u(ks[7], (output_size,), 128),
    }


def prepare_params(tp, H, W, TR, *, c_tiles=2):
    """One-time host-side re-layout of the PyTorch parameters."""
    assert H % TR == 0 and 128 % c_tiles == 0
    Cin = tp["conv1.w"].shape[1]
    T = H // TR
    out_size = tp["fc2.w"].shape[0]
    MC = 128 // c_tiles

    # Conv weights OIHW -> (cout, kh*kw*cin) for channels-major (M,K)@(K,N).
    w1 = jnp.transpose(tp["conv1.w"], (0, 2, 3, 1)).reshape(32, 9 * Cin)
    w2 = jnp.transpose(tp["conv2.w"], (0, 2, 3, 1)).reshape(64, 9 * 32)

    # fc1 weight rows permuted once to match the conv kernel's output order
    # (row-tile, channel, row-in-tile, col), zero-padded in K to a multiple of
    # the 128-aligned K tile, and column-split into c_tiles slabs.
    D = 64 * H * W
    _, D_pad = _fc1_k_tiling(D)
    w3 = tp["fc1.w"].reshape(128, 64, T, TR, W)          # (o, c, t, r, w)
    w3 = jnp.transpose(w3, (2, 1, 3, 4, 0)).reshape(D, 128)
    w3 = jnp.pad(w3, ((0, D_pad - D), (0, 0)))
    w3 = jnp.transpose(w3.reshape(D_pad, c_tiles, MC), (1, 0, 2))

    return {
        "w1": w1.astype(jnp.bfloat16), "b1": tp["conv1.b"].reshape(32, 1),
        "w2": w2.astype(jnp.bfloat16), "b2": tp["conv2.b"].reshape(64, 1),
        "w3": w3.astype(jnp.bfloat16),                     # (c_tiles, D_pad, MC)
        "b3": tp["fc1.b"].reshape(c_tiles, 1, MC),
        "w4": jnp.transpose(tp["fc2.w"], (1, 0)).reshape(c_tiles, MC, out_size),
        "b4": tp["fc2.b"].reshape(1, out_size),
    }


@functools.partial(jax.jit, static_argnames=("TR",))
def forward_pallas(prepared, x_nchw, *, TR):
    N = x_nchw.shape[0]
    h = fused_conv(x_nchw.astype(jnp.bfloat16),
                   prepared["w1"], prepared["b1"],
                   prepared["w2"], prepared["b2"], TR=TR)
    h = h.reshape(N, -1)                          # bf16, contiguous, no relayout
    out = mlp_head(h, prepared["w3"], prepared["b3"], prepared["w4"])
    return out + prepared["b4"]                   # fc2 bias


# Pure-JAX reference on the PyTorch-layout params.  It mirrors the kernel's
# intentional precision choices (bf16 conv/fc1 operands, f32 accumulation);
# the structure follows the PyTorch module exactly.
def forward_ref(tp, x_nchw):
    bf = jnp.bfloat16
    x = x_nchw.astype(bf)
    w1 = tp["conv1.w"].astype(bf)
    w2 = tp["conv2.w"].astype(bf)
    dn = ("NCHW", "OIHW", "NCHW")
    h = lax.conv_general_dilated(
        x, w1, (1, 1), "SAME",
        dimension_numbers=lax.conv_dimension_numbers(x.shape, w1.shape, dn),
        preferred_element_type=jnp.float32)
    h = jnp.maximum(h + tp["conv1.b"][None, :, None, None], 0.0).astype(bf)
    h = lax.conv_general_dilated(
        h, w2, (1, 1), "SAME",
        dimension_numbers=lax.conv_dimension_numbers(h.shape, w2.shape, dn),
        preferred_element_type=jnp.float32)
    h = jnp.maximum(h + tp["conv2.b"][None, :, None, None], 0.0).astype(bf)
    h = h.reshape(h.shape[0], -1)                 # PyTorch (NCHW) flatten
    h = jnp.dot(h, tp["fc1.w"].T.astype(bf),
                preferred_element_type=jnp.float32) + tp["fc1.b"]
    h = jnp.maximum(h, 0.0)
    return jnp.dot(h, tp["fc2.w"].T, precision=lax.Precision.HIGHEST,
                   preferred_element_type=jnp.float32) + tp["fc2.b"]


if __name__ == "__main__":
    # Small shapes consistent with the module (original uses 177x177 spatial).
    N, C, H, W = 2, 4, 16, 16
    OUTPUT_SIZE = 8
    # Conv row tile (divisor of H); small here so the multi-tile halo path is
    # exercised.  For the real 177x177 pick by VMEM budget: TR=3 on v7x
    # (64 MiB VMEM), TR=59 on v5e/v6e (128 MiB VMEM).
    TR = 8

    key = jax.random.PRNGKey(0)
    kx, kp = jax.random.split(key)
    x = jax.random.normal(kx, (N, C, H, W), dtype=jnp.float32)
    torch_params = init_torch_params(kp, C, H, W, OUTPUT_SIZE)
    prepared = prepare_params(torch_params, H, W, TR)

    out = forward_pallas(prepared, x, TR=TR)
    out = jax.block_until_ready(out)
    assert out.shape == (N, OUTPUT_SIZE)

    ref = jax.block_until_ready(forward_ref(torch_params, x))
    np.testing.assert_allclose(np.asarray(out), np.asarray(ref),
                               rtol=1e-2, atol=1e-2)

    print("KERNEL_OK")
</pallas_src>

<mosaic_0001>
module attributes {stable_mosaic.version = 11 : i64} {
  func.func @_fused_conv_kernel(%arg0: i32, %arg1: i32, %arg2: memref<1x4x1x12x20xbf16, #tpu.memory_space<vmem>>, %arg3: memref<32x36xbf16, #tpu.memory_space<vmem>>, %arg4: memref<32x1xf32, #tpu.memory_space<vmem>>, %arg5: memref<64x288xbf16, #tpu.memory_space<vmem>>, %arg6: memref<64x1xf32, #tpu.memory_space<vmem>>, %arg7: memref<1x1x64x128xbf16, #tpu.memory_space<vmem>>) attributes {dimension_semantics = [#tpu.dimension_semantics<parallel>, #tpu.dimension_semantics<parallel>], iteration_bounds = array<i64: 2, 2>, scalar_prefetch = 0 : i64, scratch_operands = 0 : i64, tpu.core_type = #tpu.core_type<tc>, window_params = [{transform_indices = @transform_0, window_bounds = array<i64: 1, 4, 1, 12, 20>}, {pipeline_mode = #tpu.pipeline_mode<synchronous>, transform_indices = @transform_1, window_bounds = array<i64: 32, 36>}, {pipeline_mode = #tpu.pipeline_mode<synchronous>, transform_indices = @transform_2, window_bounds = array<i64: 32, 1>}, {pipeline_mode = #tpu.pipeline_mode<synchronous>, transform_indices = @transform_3, window_bounds = array<i64: 64, 288>}, {pipeline_mode = #tpu.pipeline_mode<synchronous>, transform_indices = @transform_4, window_bounds = array<i64: 64, 1>}, {transform_indices = @transform_5, window_bounds = array<i64: 1, 1, 64, 128>}]} {
    %c0 = arith.constant 0 : index
    %c0_0 = arith.constant 0 : index
    %c0_1 = arith.constant 0 : index
    %c0_2 = arith.constant 0 : index
    %c0_3 = arith.constant 0 : index
    %0 = vector.load %arg2[%c0, %c0_0, %c0_1, %c0_2, %c0_3] : memref<1x4x1x12x20xbf16, #tpu.memory_space<vmem>>, vector<1x4x1x12x20xbf16>
    %1 = vector.shape_cast %0 : vector<1x4x1x12x20xbf16> to vector<4x12x20xbf16>
    %2 = vector.extract_strided_slice %1 {offsets = [0, 0, 0], sizes = [4, 10, 18], strides = [1, 1, 1]} : vector<4x12x20xbf16> to vector<4x10x18xbf16>
    %3 = vector.shape_cast %2 : vector<4x10x18xbf16> to vector<4x180xbf16>
    %4 = vector.extract_strided_slice %1 {offsets = [0, 0, 1], sizes = [4, 10, 18], strides = [1, 1, 1]} : vector<4x12x20xbf16> to vector<4x10x18xbf16>
    %5 = vector.shape_cast %4 : vector<4x10x18xbf16> to vector<4x180xbf16>
    %6 = vector.extract_strided_slice %1 {offsets = [0, 0, 2], sizes = [4, 10, 18], strides = [1, 1, 1]} : vector<4x12x20xbf16> to vector<4x10x18xbf16>
    %7 = vector.shape_cast %6 : vector<4x10x18xbf16> to vector<4x180xbf16>
    %8 = vector.extract_strided_slice %1 {offsets = [0, 1, 0], sizes = [4, 10, 18], strides = [1, 1, 1]} : vector<4x12x20xbf16> to vector<4x10x18xbf16>
    %9 = vector.shape_cast %8 : vector<4x10x18xbf16> to vector<4x180xbf16>
    %10 = vector.extract_strided_slice %1 {offsets = [0, 1, 1], sizes = [4, 10, 18], strides = [1, 1, 1]} : vector<4x12x20xbf16> to vector<4x10x18xbf16>
    %11 = vector.shape_cast %10 : vector<4x10x18xbf16> to vector<4x180xbf16>
    %12 = vector.extract_strided_slice %1 {offsets = [0, 1, 2], sizes = [4, 10, 18], strides = [1, 1, 1]} : vector<4x12x20xbf16> to vector<4x10x18xbf16>
    %13 = vector.shape_cast %12 : vector<4x10x18xbf16> to vector<4x180xbf16>
    %14 = vector.extract_strided_slice %1 {offsets = [0, 2, 0], sizes = [4, 10, 18], strides = [1, 1, 1]} : vector<4x12x20xbf16> to vector<4x10x18xbf16>
    %15 = vector.shape_cast %14 : vector<4x10x18xbf16> to vector<4x180xbf16>
    %16 = vector.extract_strided_slice %1 {offsets = [0, 2, 1], sizes = [4, 10, 18], strides = [1, 1, 1]} : vector<4x12x20xbf16> to vector<4x10x18xbf16>
    %17 = vector.shape_cast %16 : vector<4x10x18xbf16> to vector<4x180xbf16>
    %18 = vector.extract_strided_slice %1 {offsets = [0, 2, 2], sizes = [4, 10, 18], strides = [1, 1, 1]} : vector<4x12x20xbf16> to vector<4x10x18xbf16>
    %19 = vector.shape_cast %18 : vector<4x10x18xbf16> to vector<4x180xbf16>
    %20 = tpu.concatenate %3, %5, %7, %9, %11, %13, %15, %17, %19 in 0 : vector<4x180xbf16>, vector<4x180xbf16>, vector<4x180xbf16>, vector<4x180xbf16>, vector<4x180xbf16>, vector<4x180xbf16>, vector<4x180xbf16>, vector<4x180xbf16>, vector<4x180xbf16> -> vector<36x180xbf16>
    %c0_4 = arith.constant 0 : index
    %c0_5 = arith.constant 0 : index
    %21 = vector.load %arg3[%c0_4, %c0_5] : memref<32x36xbf16, #tpu.memory_space<vmem>>, vector<32x36xbf16>
    %cst = arith.constant dense<0.000000e+00> : vector<32x180xf32>
    %22 = tpu.matmul %21, %20, %cst {dimension_numbers = #tpu.dot_dimension_numbers<[1], [0], [0], [1], [0, 0, 1, 1], [], []>} : vector<32x36xbf16>, vector<36x180xbf16>, vector<32x180xf32> -> vector<32x180xf32>
    %c0_6 = arith.constant 0 : index
    %c0_7 = arith.constant 0 : index
    %23 = vector.load %arg4[%c0_6, %c0_7] : memref<32x1xf32, #tpu.memory_space<vmem>>, vector<32x1xf32>
    %24 = vector.broadcast %23 : vector<32x1xf32> to vector<32x180xf32>
    %25 = arith.addf %22, %24 : vector<32x180xf32>
    %cst_8 = arith.constant 0.000000e+00 : f32
    %26 = vector.broadcast %cst_8 : f32 to vector<32x180xf32>
    %27 = arith.maximumf %25, %26 : vector<32x180xf32>
    %28 = vector.shape_cast %27 : vector<32x180xf32> to vector<32x10x18xf32>
    %29 = tpu.iota {dimensions = array<i32: 0>} : vector<10x18xi32>
    %30 = tpu.iota {dimensions = array<i32: 1>} : vector<10x18xi32>
    %c1_i32 = arith.constant 1 : i32
    %31 = vector.broadcast %c1_i32 : i32 to vector<10x18xi32>
    %32 = arith.cmpi sge, %30, %31 : vector<10x18xi32>
    %c16_i32 = arith.constant 16 : i32
    %33 = vector.broadcast %c16_i32 : i32 to vector<10x18xi32>
    %34 = arith.cmpi sle, %30, %33 : vector<10x18xi32>
    %35 = arith.andi %32, %34 : vector<10x18xi1>
    %c1_i32_9 = arith.constant 1 : i32
    %36 = vector.broadcast %c1_i32_9 : i32 to vector<10x18xi32>
    %37 = arith.cmpi sge, %29, %36 : vector<10x18xi32>
    %c0_i32 = arith.constant 0 : i32
    %38 = arith.cmpi sgt, %arg1, %c0_i32 : i32
    %39 = vector.broadcast %38 : i1 to vector<10x18xi1>
    %40 = arith.ori %37, %39 : vector<10x18xi1>
    %41 = arith.andi %35, %40 : vector<10x18xi1>
    %c8_i32 = arith.constant 8 : i32
    %42 = vector.broadcast %c8_i32 : i32 to vector<10x18xi32>
    %43 = arith.cmpi sle, %29, %42 : vector<10x18xi32>
    %c1_i32_10 = arith.constant 1 : i32
    %44 = arith.cmpi slt, %arg1, %c1_i32_10 : i32
    %45 = vector.broadcast %44 : i1 to vector<10x18xi1>
    %46 = arith.ori %43, %45 : vector<10x18xi1>
    %47 = arith.andi %41, %46 : vector<10x18xi1>
    %48 = vector.shape_cast %47 : vector<10x18xi1> to vector<1x10x18xi1>
    %cst_11 = arith.constant 0.000000e+00 : f32
    %49 = vector.shape_cast %48 : vector<1x10x18xi1> to vector<1x10x18xi1>
    %50 = vector.broadcast %49 : vector<1x10x18xi1> to vector<32x10x18xi1>
    %51 = vector.broadcast %cst_11 : f32 to vector<32x10x18xf32>
    %52 = arith.select %50, %28, %51 : vector<32x10x18xi1>, vector<32x10x18xf32>
    %53 = arith.truncf %52 : vector<32x10x18xf32> to vector<32x10x18xbf16>
    %54 = vector.extract_strided_slice %53 {offsets = [0, 0, 0], sizes = [32, 8, 16], strides = [1, 1, 1]} : vector<32x10x18xbf16> to vector<32x8x16xbf16>
    %55 = vector.shape_cast %54 : vector<32x8x16xbf16> to vector<32x128xbf16>
    %56 = vector.extract_strided_slice %53 {offsets = [0, 0, 1], sizes = [32, 8, 16], strides = [1, 1, 1]} : vector<32x10x18xbf16> to vector<32x8x16xbf16>
    %57 = vector.shape_cast %56 : vector<32x8x16xbf16> to vector<32x128xbf16>
    %58 = vector.extract_strided_slice %53 {offsets = [0, 0, 2], sizes = [32, 8, 16], strides = [1, 1, 1]} : vector<32x10x18xbf16> to vector<32x8x16xbf16>
    %59 = vector.shape_cast %58 : vector<32x8x16xbf16> to vector<32x128xbf16>
    %60 = vector.extract_strided_slice %53 {offsets = [0, 1, 0], sizes = [32, 8, 16], strides = [1, 1, 1]} : vector<32x10x18xbf16> to vector<32x8x16xbf16>
    %61 = vector.shape_cast %60 : vector<32x8x16xbf16> to vector<32x128xbf16>
    %62 = vector.extract_strided_slice %53 {offsets = [0, 1, 1], sizes = [32, 8, 16], strides = [1, 1, 1]} : vector<32x10x18xbf16> to vector<32x8x16xbf16>
    %63 = vector.shape_cast %62 : vector<32x8x16xbf16> to vector<32x128xbf16>
    %64 = vector.extract_strided_slice %53 {offsets = [0, 1, 2], sizes = [32, 8, 16], strides = [1, 1, 1]} : vector<32x10x18xbf16> to vector<32x8x16xbf16>
    %65 = vector.shape_cast %64 : vector<32x8x16xbf16> to vector<32x128xbf16>
    %66 = vector.extract_strided_slice %53 {offsets = [0, 2, 0], sizes = [32, 8, 16], strides = [1, 1, 1]} : vector<32x10x18xbf16> to vector<32x8x16xbf16>
    %67 = vector.shape_cast %66 : vector<32x8x16xbf16> to vector<32x128xbf16>
    %68 = vector.extract_strided_slice %53 {offsets = [0, 2, 1], sizes = [32, 8, 16], strides = [1, 1, 1]} : vector<32x10x18xbf16> to vector<32x8x16xbf16>
    %69 = vector.shape_cast %68 : vector<32x8x16xbf16> to vector<32x128xbf16>
    %70 = vector.extract_strided_slice %53 {offsets = [0, 2, 2], sizes = [32, 8, 16], strides = [1, 1, 1]} : vector<32x10x18xbf16> to vector<32x8x16xbf16>
    %71 = vector.shape_cast %70 : vector<32x8x16xbf16> to vector<32x128xbf16>
    %72 = tpu.concatenate %55, %57, %59, %61, %63, %65, %67, %69, %71 in 0 : vector<32x128xbf16>, vector<32x128xbf16>, vector<32x128xbf16>, vector<32x128xbf16>, vector<32x128xbf16>, vector<32x128xbf16>, vector<32x128xbf16>, vector<32x128xbf16>, vector<32x128xbf16> -> vector<288x128xbf16>
    %c0_12 = arith.constant 0 : index
    %c0_13 = arith.constant 0 : index
    %73 = vector.load %arg5[%c0_12, %c0_13] : memref<64x288xbf16, #tpu.memory_space<vmem>>, vector<64x288xbf16>
    %cst_14 = arith.constant dense<0.000000e+00> : vector<64x128xf32>
    %74 = tpu.matmul %73, %72, %cst_14 {dimension_numbers = #tpu.dot_dimension_numbers<[1], [0], [0], [1], [0, 0, 1, 1], [], []>} : vector<64x288xbf16>, vector<288x128xbf16>, vector<64x128xf32> -> vector<64x128xf32>
    %c0_15 = arith.constant 0 : index
    %c0_16 = arith.constant 0 : index
    %75 = vector.load %arg6[%c0_15, %c0_16] : memref<64x1xf32, #tpu.memory_space<vmem>>, vector<64x1xf32>
    %76 = vector.broadcast %75 : vector<64x1xf32> to vector<64x128xf32>
    %77 = arith.addf %74, %76 : vector<64x128xf32>
    %cst_17 = arith.constant 0.000000e+00 : f32
    %78 = vector.broadcast %cst_17 : f32 to vector<64x128xf32>
    %79 = arith.maximumf %77, %78 : vector<64x128xf32>
    %80 = arith.truncf %79 : vector<64x128xf32> to vector<64x128xbf16>
    %c0_18 = arith.constant 0 : index
    %c0_19 = arith.constant 0 : index
    %c0_20 = arith.constant 0 : index
    %c0_21 = arith.constant 0 : index
    %81 = vector.load %arg7[%c0_18, %c0_19, %c0_20, %c0_21] : memref<1x1x64x128xbf16, #tpu.memory_space<vmem>>, vector<1x1x64x128xbf16>
    %82 = vector.shape_cast %81 : vector<1x1x64x128xbf16> to vector<64x128xbf16>
    %83 = vector.shape_cast %80 : vector<64x128xbf16> to vector<1x1x64x128xbf16>
    tpu.vector_store %arg7[%c0_18, %c0_19, %c0_20, %c0_21], %83 {strides = array<i32>} : memref<1x1x64x128xbf16, #tpu.memory_space<vmem>>, vector<1x1x64x128xbf16>,
    return
  }
  func.func @transform_0(%arg0: i32, %arg1: i32) -> (i32, i32, i32, i32, i32) {
    %c0_i32 = arith.constant 0 : i32
    %c0_i32_0 = arith.constant 0 : i32
    %c0_i32_1 = arith.constant 0 : i32
    %c0_i32_2 = arith.constant 0 : i32
    return %arg0, %c0_i32, %arg1, %c0_i32_0, %c0_i32_1 : i32, i32, i32, i32, i32
  }
  func.func @transform_1(%arg0: i32, %arg1: i32) -> (i32, i32) {
    %c0_i32 = arith.constant 0 : i32
    %c0_i32_0 = arith.constant 0 : i32
    %c0_i32_1 = arith.constant 0 : i32
    return %c0_i32, %c0_i32_0 : i32, i32
  }
  func.func @transform_2(%arg0: i32, %arg1: i32) -> (i32, i32) {
    %c0_i32 = arith.constant 0 : i32
    %c0_i32_0 = arith.constant 0 : i32
    %c0_i32_1 = arith.constant 0 : i32
    return %c0_i32, %c0_i32_0 : i32, i32
  }
  func.func @transform_3(%arg0: i32, %arg1: i32) -> (i32, i32) {
    %c0_i32 = arith.constant 0 : i32
    %c0_i32_0 = arith.constant 0 : i32
    %c0_i32_1 = arith.constant 0 : i32
    return %c0_i32, %c0_i32_0 : i32, i32
  }
  func.func @transform_4(%arg0: i32, %arg1: i32) -> (i32, i32) {
    %c0_i32 = arith.constant 0 : i32
    %c0_i32_0 = arith.constant 0 : i32
    %c0_i32_1 = arith.constant 0 : i32
    return %c0_i32, %c0_i32_0 : i32, i32
  }
  func.func @transform_5(%arg0: i32, %arg1: i32) -> (i32, i32, i32, i32) {
    %c0_i32 = arith.constant 0 : i32
    %c0_i32_0 = arith.constant 0 : i32
    %c0_i32_1 = arith.constant 0 : i32
    return %arg0, %arg1, %c0_i32, %c0_i32_0 : i32, i32, i32, i32
  }
}

module attributes {stable_mosaic.version = 11 : i64} {
  func.func @_mlp_kernel(%arg0: i32, %arg1: i32, %arg2: memref<2x16384xbf16, #tpu.memory_space<vmem>>, %arg3: memref<1x16384x64xbf16, #tpu.memory_space<vmem>>, %arg4: memref<1x1x64xf32, #tpu.memory_space<vmem>>, %arg5: memref<1x64x8xf32, #tpu.memory_space<vmem>>, %arg6: memref<1x2x8xf32, #tpu.memory_space<vmem>>, %arg7: memref<2x64xf32, #tpu.memory_space<vmem>>) attributes {dimension_semantics = [#tpu.dimension_semantics<parallel>, #tpu.dimension_semantics<arbitrary>], iteration_bounds = array<i64: 2, 1>, scalar_prefetch = 0 : i64, scratch_operands = 1 : i64, tpu.core_type = #tpu.core_type<tc>, window_params = [{transform_indices = @transform_0, window_bounds = array<i64: 2, 16384>}, {transform_indices = @transform_1, window_bounds = array<i64: 1, 16384, 64>}, {transform_indices = @transform_2, window_bounds = array<i64: 1, 1, 64>}, {transform_indices = @transform_3, window_bounds = array<i64: 1, 64, 8>}, {transform_indices = @transform_4, window_bounds = array<i64: 1, 2, 8>}]} {
    %c0_i32 = arith.constant 0 : i32
    %0 = arith.cmpi eq, %arg1, %c0_i32 : i32
    %1 = arith.extui %0 : i1 to i32
    %c0_i32_0 = arith.constant 0 : i32
    %2 = arith.cmpi ne, %1, %c0_i32_0 : i32
    scf.if %2 {
      %cst_11 = arith.constant 0.000000e+00 : f32
      %13 = vector.broadcast %cst_11 : f32 to vector<2x64xf32>
      %c0_12 = arith.constant 0 : index
      %c0_13 = arith.constant 0 : index
      %14 = vector.load %arg7[%c0_12, %c0_13] : memref<2x64xf32, #tpu.memory_space<vmem>>, vector<2x64xf32>
      tpu.vector_store %arg7[%c0_12, %c0_13], %13 {strides = array<i32>} : memref<2x64xf32, #tpu.memory_space<vmem>>, vector<2x64xf32>,
    } else {
    }
    %c0 = arith.constant 0 : index
    %c0_1 = arith.constant 0 : index
    %3 = vector.load %arg7[%c0, %c0_1] : memref<2x64xf32, #tpu.memory_space<vmem>>, vector<2x64xf32>
    %c0_2 = arith.constant 0 : index
    %c0_3 = arith.constant 0 : index
    %4 = vector.load %arg2[%c0_2, %c0_3] : memref<2x16384xbf16, #tpu.memory_space<vmem>>, vector<2x16384xbf16>
    %c0_4 = arith.constant 0 : index
    %c0_5 = arith.constant 0 : index
    %c0_6 = arith.constant 0 : index
    %5 = vector.load %arg3[%c0_4, %c0_5, %c0_6] : memref<1x16384x64xbf16, #tpu.memory_space<vmem>>, vector<1x16384x64xbf16>
    %6 = vector.shape_cast %5 : vector<1x16384x64xbf16> to vector<16384x64xbf16>
    %cst = arith.constant dense<0.000000e+00> : vector<2x64xf32>
    %7 = tpu.matmul %4, %6, %cst {dimension_numbers = #tpu.dot_dimension_numbers<[1], [0], [0], [1], [0, 0, 1, 1], [], []>} : vector<2x16384xbf16>, vector<16384x64xbf16>, vector<2x64xf32> -> vector<2x64xf32>
    %8 = arith.addf %3, %7 : vector<2x64xf32>
    %c0_7 = arith.constant 0 : index
    %c0_8 = arith.constant 0 : index
    %9 = vector.load %arg7[%c0_7, %c0_8] : memref<2x64xf32, #tpu.memory_space<vmem>>, vector<2x64xf32>
    tpu.vector_store %arg7[%c0_7, %c0_8], %8 {strides = array<i32>} : memref<2x64xf32, #tpu.memory_space<vmem>>, vector<2x64xf32>,
    %c0_i32_9 = arith.constant 0 : i32
    %10 = arith.cmpi eq, %arg1, %c0_i32_9 : i32
    %11 = arith.extui %10 : i1 to i32
    %c0_i32_10 = arith.constant 0 : i32
    %12 = arith.cmpi ne, %11, %c0_i32_10 : i32
    scf.if %12 {
      %c0_11 = arith.constant 0 : index
      %c0_12 = arith.constant 0 : index
      %13 = vector.load %arg7[%c0_11, %c0_12] : memref<2x64xf32, #tpu.memory_space<vmem>>, vector<2x64xf32>
      %c0_13 = arith.constant 0 : index
      %c0_14 = arith.constant 0 : index
      %c0_15 = arith.constant 0 : index
      %14 = vector.load %arg4[%c0_13, %c0_14, %c0_15] : memref<1x1x64xf32, #tpu.memory_space<vmem>>, vector<1x1x64xf32>
      %15 = vector.shape_cast %14 : vector<1x1x64xf32> to vector<1x64xf32>
      %16 = vector.broadcast %15 : vector<1x64xf32> to vector<2x64xf32>
      %17 = arith.addf %13, %16 : vector<2x64xf32>
      %cst_16 = arith.constant 0.000000e+00 : f32
      %18 = vector.broadcast %cst_16 : f32 to vector<2x64xf32>
      %19 = arith.maximumf %17, %18 : vector<2x64xf32>
      %c0_17 = arith.constant 0 : index
      %c0_18 = arith.constant 0 : index
      %c0_19 = arith.constant 0 : index
      %20 = vector.load %arg5[%c0_17, %c0_18, %c0_19] : memref<1x64x8xf32, #tpu.memory_space<vmem>>, vector<1x64x8xf32>
      %21 = vector.shape_cast %20 : vector<1x64x8xf32> to vector<64x8xf32>
      %cst_20 = arith.constant dense<0.000000e+00> : vector<2x8xf32>
      %22 = tpu.matmul %19, %21, %cst_20 {dimension_numbers = #tpu.dot_dimension_numbers<[1], [0], [0], [1], [0, 0, 1, 1], [], []>} : vector<2x64xf32>, vector<64x8xf32>, vector<2x8xf32> -> vector<2x8xf32>
      %c0_21 = arith.constant 0 : index
      %c0_22 = arith.constant 0 : index
      %c0_23 = arith.constant 0 : index
      %23 = vector.load %arg6[%c0_21, %c0_22, %c0_23] : memref<1x2x8xf32, #tpu.memory_space<vmem>>, vector<1x2x8xf32>
      %24 = vector.shape_cast %23 : vector<1x2x8xf32> to vector<2x8xf32>
      %25 = vector.shape_cast %22 : vector<2x8xf32> to vector<1x2x8xf32>
      tpu.vector_store %arg6[%c0_21, %c0_22, %c0_23], %25 {strides = array<i32>} : memref<1x2x8xf32, #tpu.memory_space<vmem>>, vector<1x2x8xf32>,
    } else {
    }
    return
  }
  func.func @transform_0(%arg0: i32, %arg1: i32) -> (i32, i32) {
    %c0_i32 = arith.constant 0 : i32
    %c0_i32_0 = arith.constant 0 : i32
    return %c0_i32, %arg1 : i32, i32
  }
  func.func @transform_1(%arg0: i32, %arg1: i32) -> (i32, i32, i32) {
    %c0_i32 = arith.constant 0 : i32
    %c0_i32_0 = arith.constant 0 : i32
    return %arg0, %arg1, %c0_i32 : i32, i32, i32
  }
  func.func @transform_2(%arg0: i32, %arg1: i32) -> (i32, i32, i32) {
    %c0_i32 = arith.constant 0 : i32
    %c0_i32_0 = arith.constant 0 : i32
    %c0_i32_1 = arith.constant 0 : i32
    return %arg0, %c0_i32, %c0_i32_0 : i32, i32, i32
  }
  func.func @transform_3(%arg0: i32, %arg1: i32) -> (i32, i32, i32) {
    %c0_i32 = arith.constant 0 : i32
    %c0_i32_0 = arith.constant 0 : i32
    %c0_i32_1 = arith.constant 0 : i32
    return %arg0, %c0_i32, %c0_i32_0 : i32, i32, i32
  }
  func.func @transform_4(%arg0: i32, %arg1: i32) -> (i32, i32, i32) {
    %c0_i32 = arith.constant 0 : i32
    %c0_i32_0 = arith.constant 0 : i32
    %c0_i32_1 = arith.constant 0 : i32
    return %arg0, %c0_i32, %c0_i32_0 : i32, i32, i32
  }
}

</mosaic_0001>

<bundles_post_ra>
// kernel: forward_pallas.2
= control target key start
LH: loop header
LB: loop body
LE: loop exit
PB: predicated region body
PF: predicated region fallthrough
CT: control target
= control target key end

     0   :  { %10 = vsyncpa [#allocation4], 0  ;;  %s13540_s0 = inlined_call_operand.vmem [shape: bf16[2,4,2,12,20], index: 0, kind: input, shape index: {}]   ;;  %s13541_s1 = inlined_call_operand.hbm [shape: bf16[32,36], index: 1, kind: input, shape index: {}]   ;;  %s13542_s2 = inlined_call_operand.vmem [shape: f32[32,1], index: 2, kind: input, shape index: {}]   ;;  %s13543_s3 = inlined_call_operand.hbm [shape: bf16[64,288], index: 3, kind: input, shape index: {}]   ;;  %s13544_s4 = inlined_call_operand.vmem [shape: f32[64,1], index: 4, kind: input, shape index: {}]   ;;  %s13545_s5 = inlined_call_operand.vmem [shape: bf16[2,2,64,128], index: 5, kind: output, shape index: {}]  }
   0x1   :  { %11 = vsyncpa [#allocation6], 0  ;;  %s8700_s18 = smov 0   ;;  %s8702_s19 = smov 0  }
   0x2   :  { %s8704_s20 = smov 0   ;;  %s8706_s21 = smov 0  }
   0x3   :  { %s8708_s22 = smov 0   ;;  %s8710_s23 = smov 0  }
   0x4   :  { %s8712_s24 = smov 0  }
   0x5 LB: > { %s8139_s25 = sadd.s32 4294967295, %s8634_s24   ;;  %s26_s26 = sadd.s32 1, %s8626_s22  ;;  %s8634_s24 = sphi %s8712_s24, %s17_s24   ;;  %s8630_s23 = sphi %s8710_s23, %s14538_s23   ;;  %s8626_s22 = sphi %s8708_s22, %s14537_s22   ;;  %s8622_s21 = sphi %s8706_s21, %s14536_s21   ;;  %s8618_s20 = sphi %s8704_s20, %s14535_s20   ;;  %s8614_s19 = sphi %s8702_s19, %s14534_s19   ;;  %s8610_s18 = sphi %s8700_s18, %s14533_s18  }
   0x6   : > { %p27_p0 = scmp.ge.s32.totalorder %s26_s26, 2  ;;  %s29_s27 = sadd.s32 1, %s8630_s23 }
   0x7   : > { %s38_s28 = sadd.s32 1, %s8614_s19  ;;  %p45_p1 = scmp.ne.s32.totalorder %s8614_s19, %s8610_s18 }
   0x8   : > { %s14540_s26 = smov (%p27_p0, %s26_s26), 0  ;;  %s14542_s27 = smov (!%p27_p0, %s29_s27), %s8630_s23 }
   0x9   : > { %13828 = sst [smem:[#allocation9_spill]] %s14540_s26  ;;  %s34_s29 = ssub.s32 %s8626_s22, %s14540_s26 }
   0xa   : > { %p46_p2 = scmp.eq.s32.totalorder %s8634_s24, 0  ;;  %p31_p3 = scmp.ge.s32.totalorder %s14542_s27, 2 }
   0xb   : > { %p8141_p4 = scmp.ge.s32.totalorder %s8634_s24, 1  ;;  %p174_p6 = scmp.lt.s32.totalorder %s8634_s24, 5 }
   0xc   : > { %p8748_p5 = por %p46_p2, %p45_p1  ;;  %s14544_s27 = smov (%p31_p3, %s14542_s27), 0 }
   0xd   : > { %13830 = sst [smem:[#allocation10_spill]] %s14544_s27  ;;  %p8755_p7 = pnand %p8141_p4, %p174_p6 }
   0xe   : > { %s13829_s30 = scalar_select %p8748_p5, 1, 0 }
   0xf   : > { %s13831_s6 = scalar_select %p8755_p7, 1, 0 }
  0x10   : > { %s33_s7 = ssub.s32 %s8630_s23, %s14544_s27  ;;  %p8761_p8 = scmp.eq.s32.totalorder %s8139_s25, 0 }
  0x11   : > { %s35_s9 = sor.u32 %s34_s29, %s33_s7  ;;  %p8385_p9 = pneg %p8755_p7 }
  0x12   : > { %s13832_s8 = scalar_select %p8761_p8, 1, 0 }
  0x13   : > { %p36_p10 = scmp.eq.s32.totalorder %s35_s9, 0  ;;  %s8636_s10 = smov [#allocation3]  }
  0x14   : > { %s186_s11 = sshll.u32 %s8636_s10, 4  ;;  %p8769_p11 = pnand %p8761_p8, %p8385_p9  ;;  %s187_s11 = int_to_ptr.vmem [resolvable:$true] %s186_s11 }
  0x15   : > { %s8774_s13 = scalar_select %p36_p10, %s8614_s19, %s38_s28  }
  0x16   : > { %s8516_s16 = scalar_lea.hbm %s13541_s1, 256  ;;  %p8518_p13 = pneg %p8769_p11 }
  0x17   : > { %13834 = sst [smem:[#allocation11_spill]] %s8774_s13  ;;  %p8517_p12 = scmp.ne.s32.totalorder %s13541_s1, %s8516_s16 }
  0x18   : > { %p8523_p2 = scmp.lt.u32.totalorder %s8516_s16, %s13541_s1 }
  0x19   : > { %p8519_p0 = pnand %p8518_p13, %p8517_p12 }
  0x1b   : > { %p8520_p1 = pneg %p8519_p0 }
  0x1d   : > { %p8525_p3 = pnand %p8523_p2, %p8520_p1 }
  0x1f   : > { %8528 = shalt.err (!%p8525_p3)
}
  0x20   : > { %s8529_s28 = scalar_lea.vmem %s187_s11, 256  ;;  %p8537_p10 = scmp.lt.s32.totalorder %s187_s11, %s187_s11 }
  0x21   : > { %p8530_p4 = scmp.ne.s32.totalorder %s187_s11, %s8529_s28  ;;  %p8538_p8 = scmp.lt.s32.totalorder %s8529_s28, %s8529_s28 }
  0x23   : > { %p8532_p6 = pnand %p8530_p4, %p8518_p13  ;;  %p8539_p7 = por %p8538_p8, %p8537_p10 }
  0x25   : > { %p8533_p9 = pneg %p8532_p6 }
  0x27   : > { %p8540_p5 = pnand %p8539_p7, %p8533_p9 }
  0x29   : > { %8543 = shalt.err (!%p8540_p5)
}
  0x2a   : > { %s8637_s9 = smov 64   ;;  %s8638_s10 = smov 4  }
  0x2b   : > { %8388 = dma.hbm_to_vmem [thread:$0]  (!%p8769_p11), %s13541_s1, 256, %s187_s11, [#allocation4], %s8637_s9, %s8637_s9, %s8638_s10  }
  0x2c   : > { %s8639_s16 = smov [#allocation5]   ;;  %s8544_s7 = scalar_lea.hbm %s13543_s3, 1536 }
  0x2d   : > { %s202_s17 = sshll.u32 %s8639_s16, 4  ;;  %p8545_p5 = scmp.ne.s32.totalorder %s13543_s3, %s8544_s7  ;;  %s203_s17 = int_to_ptr.vmem [resolvable:$true] %s202_s17 }
  0x2e   : > { %p8551_p12 = scmp.lt.u32.totalorder %s8544_s7, %s13543_s3 }
  0x2f   : > { %p8547_p7 = pnand %p8545_p5, %p8518_p13 }
  0x31   : > { %p8548_p8 = pneg %p8547_p7 }
  0x33   : > { %p8553_p0 = pnand %p8551_p12, %p8548_p8 }
  0x35   : > { %8556 = shalt.err (!%p8553_p0)
}
  0x36   : > { %s8557_s11 = scalar_lea.vmem %s203_s17, 1536  ;;  %p8565_p4 = scmp.lt.s32.totalorder %s203_s17, %s203_s17 }
  0x37   : > { %p8558_p1 = scmp.ne.s32.totalorder %s203_s17, %s8557_s11  ;;  %p8566_p6 = scmp.lt.s32.totalorder %s8557_s11, %s8557_s11 }
  0x39   : > { %p8560_p2 = pnand %p8558_p1, %p8518_p13  ;;  %p8567_p9 = por %p8566_p6, %p8565_p4 }
  0x3b   : > { %p8561_p3 = pneg %p8560_p2 }
  0x3d   : > { %p8568_p10 = pnand %p8567_p9, %p8561_p3 }
  0x3f   : > { %8571 = shalt.err (!%p8568_p10)
}
  0x40   : > { %s8640_s27 = smov 192   ;;  %s8641_s9 = smov 12  }
  0x41   : > { %8391 = dma.hbm_to_vmem [thread:$0]  (!%p8769_p11), %s13543_s3, 1536, %s203_s17, [#allocation6], %s8640_s27, %s8640_s27, %s8641_s9  }
  0x42   : > { %p8144_p5 = scmp.ge.s32.totalorder %s8634_s24, 4 }
  0x43   : > { %p13835_p7 = scmp.ne.s32.totalorder (!%p8144_p5), %s13829_s30, 0 }
  0x44   : > { %215 = sbr.rel (%p8144_p5) target bundleno = 84 (0x54), region = 32 }
  0x4b   : > { %218 = sbr.rel (!%p13835_p7) target bundleno = 84 (0x54), region = 36  ;;  %s220_s10 = sand.u32 (%p13835_p7), 1, %s8614_s19  }
  0x4c   : > { %s8146_s14 = sshll.u32 (%p13835_p7), %s8626_s22, 1  ;;  %s8145_s15 = sshll.u32 (%p13835_p7), %s220_s10, 5 }
  0x4d   : > { %s8147_s16 = sshll.u32 (%p13835_p7), %s8630_s23, 4  ;;  %s222_s17 = scalar_lea.vmem (%p13835_p7), [#allocation2], %s8145_s15 }
  0x4e   : > { %s225_s25 = sadd.s32 (%p13835_p7), %s8147_s16, %s8146_s14 }
  0x4f   : > { %s8148_s29 = sshll.u32 (%p13835_p7), %s225_s25, 2 }
  0x50   : > { %s227_s28 = scalar_lea.vmem (%p13835_p7), %s13540_s0, %s8148_s29 }
  0x51   : > { %v243_v0 = vld [vmem:[%s227_s28] sm:$0xff] (%p13835_p7)   ;;  %v247_v1 = vld [vmem:[%s227_s28 + $0x10] sm:$0xff] (%p13835_p7)  }
  0x52   : > { %v251_v2 = vld [vmem:[%s227_s28 + $0x20] sm:$0xff]   ;;  %244 = vst [vmem:[%s222_s17] sm:$0xff] %v243_v0   ;;  %248 = vst [vmem:[%s222_s17 + $0x8] sm:$0xff] %v247_v1   ;;  %v255_v3 = vld [vmem:[%s227_s28 + $0x30] sm:$0xff]  }
  0x53   : > { %252 = vst [vmem:[%s222_s17 + $0x10] sm:$0xff] %v251_v2   ;;  %256 = vst [vmem:[%s222_s17 + $0x18] sm:$0xff] %v255_v3  }
  0x54 PF: > { %p13836_p11 = scmp.ne.s32.totalorder %s13831_s6, 0 }
  0x56   : > { %300 = sbr.rel (%p13836_p11) target bundleno = 2124 (0x84c), region = 77 }
  0x5d   : > { %s303_s30 = sand.u32 1, %s8610_s18   ;;  %p13837_p13 = scmp.ne.s32.totalorder %s13832_s8, 0 }
  0x5e   : > { %s8150_s11 = sshll.u32 %s303_s30, 5 }
  0x5f   : > { %s8830_s27 = scalar_lea.vmem [#allocation2], %s8150_s11 }
  0x60   : > { %8601 = dma.done.wait (%p13837_p13), [#allocation4], 256  }
  0x61   : > { %8603 = vsyncadd (%p13837_p13), [#allocation4], 4294967040 }
  0x62   : > { %8605 = dma.done.wait (%p13837_p13), [#allocation6], 1536  }
  0x63   : > { %8607 = vsyncadd (%p13837_p13), [#allocation6], 4294965760  ;;  %v363_v4 = vlaneseq  ;;  %v8642_v5 = vmov 1934713408   ;;  %v8643_v8 = vmov 1983009808  }
  0x64   : > { %v377_v6 = vunpack.c.l.s4 %v8642_v5  ;;  %v361_v9 = vunpack.c.l.s4 %v8643_v8  ;;  %v8644_v10 = vmov 0   ;;  %v8850_v14 = vld [vmem:[%s8830_s27] sm:$0xf]  ;;  %v8853_v15 = vld [vmem:[%s8830_s27 + $0x8] sm:$0xf]  ;;  %s8645_s18 = smov 127  }
  0x65   : > { %v8841_v7 = vshrl.u32 %v363_v4, 7  ;;  %2259 = vmatprep.mubr.bf16.mxu0 %v8644_v10  ;;  %8486 = vset.pattern.permute.xlu1 %v8644_v10  ;;  %v8856_v16 = vld [vmem:[%s8830_s27 + $0x4] sm:$0x3]  ;;  %v924_v17 = vshrl.u32 %v8850_v14, 16  ;;  %v8864_v18 = vld [vmem:[%s8830_s27 + $0xc] sm:$0x3] }
  0x66   : > { %8487 = vset.pattern.permute.xlu0 %v8644_v10  ;;  %v362_v11 = vunpack.c.0.s8 %v361_v9  ;;  %v378_v12 = vunpack.c.0.s8 %v377_v6  ;;  %542 = vrot.lane.b32.xlu1 %v8850_v14, %s8645_s18  ;;  %v8867_v19 = vld [vmem:[%s8830_s27 + $0x14] sm:$0x3]  ;;  %v8870_v20 = vld [vmem:[%s8830_s27 + $0x1c] sm:$0x3]  ;;  %v927_v23 = vshll.u32 %v8850_v14, 16  ;;  %v943_v24 = vshrl.u32 %v8853_v15, 16 }
  0x67   : > { %544 = vrot.lane.b32.xlu0 %v8856_v16, %s8645_s18  ;;  %v8880_v25 = vld [vmem:[%s8830_s27 + $0x10] sm:$0xf]  ;;  %v946_v27 = vshll.u32 %v8853_v15, 16  ;;  %v424_v28 = vcombine.low %v8856_v16, %v8867_v19  ;;  %v432_v29 = vcombine.low %v8864_v18, %v8870_v20  ;;  %v8890_v30 = vld [vmem:[%s8830_s27 + $0x18] sm:$0xf]  ;;  %v8894_v32 = vrot.slane %v924_v17, 4 }
  0x68   : > { %v8847_v13 = vsub.s32 %v362_v11, %v8841_v7  ;;  %v8873_v21 = vsub.s32 %v378_v12, %v8841_v7  ;;  %v929_v38 = vrot.slane %v927_v23, 5  ;;  %v8902_v39 = vrot.slane %v943_v24, 4  ;;  %s8646_s6 = smov 16   ;;  %s8647_s8 = smov 34  }
  0x69   : > { %v948_v49 = vrot.slane %v946_v27, 5  ;;  %vm920_vm0 = vsmask.f32 3328  ;;  %v933_v1 = vshll.u32 %v8856_v16, 16  ;;  %v952_v11 = vshll.u32 %v8864_v18, 16  ;;  %s8648_s9 = smov 72  }
  0x6a   : > { %v366_v22 = vrot.slane %v8850_v14, %v8847_v13  ;;  %v398_v26 = vrot.slane %v8853_v15, %v8847_v13  ;;  %v373_v31 = vrot.slane %v8880_v25, %v8847_v13  ;;  %546 = vrot.lane.b32.xlu1 %v8853_v15, %s8645_s18  ;;  %v405_v33 = vrot.slane %v8890_v30, %v8847_v13  ;;  %s8649_s26 = smov 18   ;;  %s8650_s13 = smov 108  }
  0x6b   : > { %v431_v34 = vrot.slane %v424_v28, %v8873_v21  ;;  %v439_v35 = vrot.slane %v432_v29, %v8873_v21  ;;  %v930_v6 = vor.u32 %v929_v38, %v8894_v32  ;;  %v949_v8 = vor.u32 %v948_v49, %v8902_v39  ;;  %s8651_s10 = smov 36   ;;  %s8652_s14 = smov 54  }
  0x6c   : > { %v375_v36 = vcombine.high %v366_v22, %v373_v31  ;;  %v374_v37 = vcombine.low %v366_v22, %v373_v31  ;;  %v407_v40 = vcombine.high %v398_v26, %v405_v33  ;;  %v406_v41 = vcombine.low %v398_v26, %v405_v33  ;;  %s8653_s15 = smov 90   ;;  %s8654_s16 = smov 126  }
  0x6d   : > { %v466_v42 = vpack.i.b16 %v439_v35, %v431_v34  ;;  %v467_v43 = vshrl.u32 %v431_v34, 16  ;;  %v468_v44 = vshrl.u32 %v439_v35, 16  ;;  %v962_v23 = vshrl.u32 %v8880_v25, 16  ;;  %s8663_s25 = smov 94   ;;  %p3235_p8 = scmp.gt.s32.totalorder %s8618_s20, 0 }
  0x6e   : > { %v389_v45 = vrot.slane %v375_v36, %v8873_v21  ;;  %v421_v46 = vrot.slane %v407_v40, %v8873_v21  ;;  %v8907_v47 = vrot.slane %v374_v37, %v8873_v21  ;;  %v8910_v48 = vrot.slane %v406_v41, %v8873_v21  ;;  %p344_p12 = scmp.lt.s32.totalorder %s8618_s20, 1  ;;  %s8665_s7 = smov 32  }
  0x6f   : > { %v8163_v50 = vcombine.low %v466_v42, %v466_v42  ;;  %v469_v51 = vpack.i.b16 %v468_v44, %v467_v43  ;;  %v965_v27 = vshll.u32 %v8880_v25, 16  ;;  %v971_v28 = vshll.u32 %v8867_v19, 16  ;;  %s3236_s29 = scalar_select %p3235_p8, 1, 0 }
  0x70   : > { %v391_v52 = vcombine.high %v389_v45, %v8644_v10  ;;  %v454_v53 = vpack.i.b16 %v421_v46, %v389_v45  ;;  %v443_v54 = vshrl.u32 %v8907_v47, 16  ;;  %v444_v55 = vshrl.u32 %v8910_v48, 16  ;;  %s9726_s12 = scalar_select %p344_p12, 1, 0 }
  0x71   : > { %v423_v56 = vcombine.high %v421_v46, %v8644_v10  ;;  %500 = vrot.lane.b32.xlu1 %v8163_v50, %s8646_s6  ;;  %v8164_v57 = vcombine.low %v469_v51, %v469_v51  ;;  %v390_v58 = vcombine.high %v8907_v47, %v8644_v10  ;;  %v422_v59 = vcombine.high %v8910_v48, %v8644_v10  ;;  %s8666_s28 = smov 64   ;;  %s8667_s17 = smov 96  }
  0x72   : > { %v455_v60 = vshrl.u32 %v389_v45, 16  ;;  %v8159_v61 = vcombine.low %v454_v53, %v454_v53  ;;  %v445_v62 = vpack.i.b16 %v444_v55, %v443_v54  ;;  %v456_v0 = vshrl.u32 %v421_v46, 16  ;;  %s8668_s30 = smov 48   ;;  %s8669_s11 = smov 80  }
  0x73   : > { %v460_v63 = vpack.i.b16 %v423_v56, %v391_v52  ;;  %504 = vrot.lane.b32.xlu0 %v8164_v57, %s8647_s8  ;;  %v448_v2 = vpack.i.b16 %v422_v59, %v390_v58  ;;  %v449_v3 = vshrl.u32 %v390_v58, 16  ;;  %v450_v5 = vshrl.u32 %v422_v59, 16  ;;  %p342_p0 = scmp.lt.s32.totalorder %s8622_s21, 1  ;;  %s14546_s20 = smov (!%p344_p12, %s8618_s20), 1 }
  0x74   : > { %v8156_v9 = vcombine.low %v445_v62, %v445_v62  ;;  %v461_v22 = vshrl.u32 %v391_v52, 16  ;;  %v457_v24 = vpack.i.b16 %v456_v0, %v455_v60  ;;  %v462_v26 = vshrl.u32 %v423_v56, 16 }
  0x75   : > { %484 = vrot.lane.b32.xlu1 %v8159_v61, %s8648_s9  ;;  %v8161_v12 = vcombine.low %v460_v63, %v460_v63  ;;  %v451_v17 = vpack.i.b16 %v450_v5, %v449_v3  ;;  %v8157_v29 = vcombine.low %v448_v2, %v448_v2  ;;  %v964_v31 = vrot.slane %v962_v23, 4  ;;  %s14548_s21 = smov (!%p342_p0, %s8622_s21), 1 }
  0x76   : > { %v981_v32 = vshrl.u32 %v8890_v30, 16  ;;  %v984_v33 = vshll.u32 %v8890_v30, 16  ;;  %v8933_v34 = vrot.slane %v933_v1, 5  ;;  %vm921_vm1 = vsmask.f32 7440 }
  0x77   : > { %472 = vrot.lane.b32.xlu0 %v8156_v9, %s8649_s26  ;;  %v967_v35 = vrot.slane %v965_v27, 5  ;;  %v990_v36 = vshll.u32 %v8870_v20, 16  ;;  %v931_v37 = vrot.slane %v930_v6, 4  ;;  %v8158_v38 = vcombine.low %v451_v17, %v451_v17  ;;  %vm922_vm2 = vmor %vm920_vm0, %vm921_vm1 }
  0x78   : > { %v983_v39 = vrot.slane %v981_v32, 4  ;;  %v986_v40 = vrot.slane %v984_v33, 5  ;;  %v950_v41 = vrot.slane %v949_v8, 4  ;;  %v954_v42 = vrot.slane %v952_v11, 5 }
  0x79   : > { %492 = vrot.lane.b32.xlu1 %v8161_v12, %s8650_s13  ;;  %v968_v43 = vor.u32 %v967_v35, %v964_v31  ;;  %v973_v44 = vrot.slane %v971_v28, 5  ;;  %v8160_v45 = vcombine.low %v457_v24, %v457_v24  ;;  %v463_v46 = vpack.i.b16 %v462_v26, %v461_v22 }
  0x7a   : > { %v987_v49 = vor.u32 %v986_v40, %v983_v39  ;;  %v992_v50 = vrot.slane %v990_v36, 5  ;;  %v442_v52 = vpack.i.b16 %v8910_v48, %v8907_v47  ;;  %v8944_v54 = vsel %vm922_vm2, %v931_v37, %v8933_v34 }
  0x7b   : > { %476 = vrot.lane.b32.xlu0 %v8157_v29, %s8651_s10  ;;  %v969_v51 = vrot.slane %v968_v43, 4  ;;  %v8946_v55 = vsel %vm922_vm2, %v950_v41, %v954_v42  ;;  %v8162_v57 = vcombine.low %v463_v46, %v463_v46  ;;  %v1006_v59 = vrot.slane %v8944_v54, %v8847_v13 }
  0x7c   : > { %v988_v53 = vrot.slane %v987_v49, 4  ;;  %v1040_v61 = vrot.slane %v8946_v55, %v8847_v13  ;;  %v937_v63 = vshrl.u32 %v8856_v16, 16  ;;  %v956_v0 = vshrl.u32 %v8864_v18, 16 }
  0x7d   : > { %480 = vrot.lane.b32.xlu1 %v8158_v38, %s8652_s14  ;;  %v8948_v56 = vsel %vm922_vm2, %v969_v51, %v973_v44  ;;  %v975_v1 = vshrl.u32 %v8867_v19, 16  ;;  %v994_v2 = vshrl.u32 %v8870_v20, 16  ;;  %vm506_vm3 = vcmask 146432  }
  0x7e   : > { %v8951_v58 = vsel %vm922_vm2, %v988_v53, %v992_v50  ;;  %v1014_v60 = vrot.slane %v8948_v56, %v8847_v13  ;;  %v939_v6 = vrot.slane %v937_v63, 4  ;;  %v958_v8 = vrot.slane %v956_v0, 4 }
  0x7f   : > { %488 = vrot.lane.b32.xlu0 %v8160_v45, %s8653_s15  ;;  %v1048_v62 = vrot.slane %v8951_v58, %v8847_v13  ;;  %v977_v9 = vrot.slane %v975_v1, 4  ;;  %v996_v11 = vrot.slane %v994_v2, 4  ;;  %vm510_vm4 = vcmask 293888  }
  0x80   : > { %v1015_v3 = vcombine.low %v1006_v59, %v1014_v60  ;;  %v940_v22 = vor.u32 %v939_v6, %v8933_v34  ;;  %v959_v23 = vor.u32 %v958_v8, %v954_v42  ;;  %v1016_v26 = vcombine.high %v1006_v59, %v1014_v60 }
  0x81   : > { %550 = vrot.lane.b32.xlu1 %v8880_v25, %s8645_s18  ;;  %v1049_v5 = vcombine.low %v1040_v61, %v1048_v62  ;;  %v978_v24 = vor.u32 %v977_v9, %v973_v44  ;;  %v1050_v27 = vcombine.high %v1040_v61, %v1048_v62  ;;  %v997_v28 = vor.u32 %v996_v11, %v992_v50 }
  0x82   : > { %v8975_v12 = vrot.slane %v1015_v3, %v8873_v21  ;;  %v941_v34 = vrot.slane %v940_v22, 4  ;;  %v1030_v35 = vrot.slane %v1016_v26, %v8873_v21  ;;  %v960_v36 = vrot.slane %v959_v23, 4 }
  0x83   : > { %496 = vrot.lane.b32.xlu0 %v8162_v57, %s8654_s16  ;;  %v8978_v17 = vrot.slane %v1049_v5, %v8873_v21  ;;  %v8996_v37 = vrot.slane %v978_v24, 4  ;;  %v1064_v41 = vrot.slane %v1050_v27, %v8873_v21  ;;  %vm513_vm5 = vcmask 441344  }
  0x84   : > { %v1031_v32 = vcombine.high %v8975_v12, %v8644_v10  ;;  %v1102_v42 = vshrl.u32 %v1030_v35, 16  ;;  %v1032_v43 = vcombine.high %v1030_v35, %v8644_v10  ;;  %vm516_vm6 = vcmask 588800  }
  0x85   : > { %554 = vrot.lane.b32.xlu1 %v8890_v30, %s8645_s18  ;;  %v1089_v29 = vpack.i.b16 %v8978_v17, %v8975_v12  ;;  %v1091_v31 = vshrl.u32 %v8978_v17, 16  ;;  %v1065_v33 = vcombine.high %v8978_v17, %v8644_v10  ;;  %v1069_v44 = vcombine.low %v941_v34, %v8996_v37 }
  0x86   : > { %v1096_v39 = vshrl.u32 %v1031_v32, 16  ;;  %v1103_v49 = vshrl.u32 %v1064_v41, 16  ;;  %v1066_v50 = vcombine.high %v1064_v41, %v8644_v10  ;;  %v1108_v51 = vshrl.u32 %v1032_v43, 16 }
  0x87   : > { %548 = vrot.lane.b32.xlu0 %v8864_v18, %s8645_s18  ;;  %v1097_v40 = vshrl.u32 %v1065_v33, 16  ;;  %v1101_v1 = vpack.i.b16 %v1064_v41, %v1030_v35  ;;  %vm519_vm7 = vcmask 736256   ;;  %vm522_vm8 = vcmask 883712  }
  0x88   : > { %v1104_v57 = vpack.i.b16 %v1103_v49, %v1102_v42  ;;  %v1109_v59 = vshrl.u32 %v1066_v50, 16  ;;  %vm528_vm9 = vcmask 130048   ;;  %vm525_vm10 = vcmask 1031168  }
  0x89   : > { %733 = vrot.lane.b32.xlu1 %v8856_v16, %s8654_s16  ;;  %v1090_v16 = vshrl.u32 %v8975_v12, 16  ;;  %v8186_v5 = vcombine.low %v1101_v1, %v1101_v1  ;;  %vm531_vm11 = vcmask 277504   ;;  %vm2148_vm12 = vcmask 1041408  }
  0x8a   : > { %v8187_v61 = vcombine.low %v1104_v57, %v1104_v57  ;;  %v1110_v62 = vpack.i.b16 %v1109_v59, %v1108_v51  ;;  %vm2153_vm13 = vcmask 1043456   ;;  %vm2158_vm14 = vcmask 1045504  }
  0x8b   : > { %552 = vrot.lane.b32.xlu0 %v8867_v19, %s8645_s18  ;;  %v1092_v38 = vpack.i.b16 %v1091_v31, %v1090_v16  ;;  %vm1550_vm15 = vcmask 1042432   ;;  %vm1551_vm0 = vcmask 1046532   ;;  %vm2384_vm2 = vcmask 15360  }
  0x8c   : > { %v8189_v2 = vcombine.low %v1110_v62, %v1110_v62  ;;  %vm9352_vm1 = vmor %vm1550_vm15, %vm1551_vm0  ;;  %vm3707_vm15 = vcmask 261120   ;;  %vm3712_vm0 = vcmask 392192  }
  0x8d   : > { %737 = vrot.lane.b32.xlu1 %v8864_v18, %s8654_s16  ;;  %v8998_v18 = vrot.slane %v997_v28, 4  ;;  %v8183_v46 = vcombine.low %v1092_v38, %v1092_v38 }
  0x8f   : > { %556 = vrot.lane.b32.xlu0 %v8870_v20, %s8645_s18  ;;  %v1079_v45 = vcombine.low %v960_v36, %v8998_v18 }
  0x91   : > { %741 = vrot.lane.b32.xlu1 %v8867_v19, %s8654_s16  ;;  %v1098_v19 = vpack.i.b16 %v1097_v40, %v1096_v39  ;;  %v1086_v60 = vrot.slane %v1079_v45, %v8873_v21 }
  0x93   : > { %731 = vrot.lane.b32.xlu0 %v8850_v14, %s8654_s16  ;;  %v1076_v14 = vrot.slane %v1069_v44, %v8873_v21  ;;  %v8185_v53 = vcombine.low %v1098_v19, %v1098_v19 }
  0x95   : > { %745 = vrot.lane.b32.xlu1 %v8870_v20, %s8654_s16  ;;  %v1095_v20 = vpack.i.b16 %v1065_v33, %v1031_v32  ;;  %v1114_v63 = vshrl.u32 %v1076_v14, 16  ;;  %v1113_v9 = vpack.i.b16 %v1086_v60, %v1076_v14 }
  0x97   : > { %735 = vrot.lane.b32.xlu0 %v8853_v15, %s8654_s16  ;;  %v1115_v15 = vshrl.u32 %v1086_v60, 16  ;;  %v8184_v0 = vcombine.low %v1095_v20, %v1095_v20 }
  0x99   : > { %1119 = vrot.lane.b32.xlu1 %v8183_v46, %s8649_s26  ;;  %v1116_v3 = vpack.i.b16 %v1115_v15, %v1114_v63 }
  0x9b   : > { %739 = vrot.lane.b32.xlu0 %v8880_v25, %s8654_s16  ;;  %v1107_v25 = vpack.i.b16 %v1066_v50, %v1032_v43  ;;  %v8191_v6 = vcombine.low %v1116_v3, %v1116_v3 }
  0x9d   : > { %1127 = vrot.lane.b32.xlu1 %v8185_v53, %s8652_s14  ;;  %v8188_v8 = vcombine.low %v1107_v25, %v1107_v25 }
  0x9f   : > { %743 = vrot.lane.b32.xlu0 %v8890_v30, %s8654_s16  ;;  %v8190_v30 = vcombine.low %v1113_v9, %v1113_v9 }
  0xa1   : > { %1135 = vrot.lane.b32.xlu1 %v8187_v61, %s8653_s15 }
  0xa3   : > { %1123 = vrot.lane.b32.xlu0 %v8184_v0, %s8651_s10 }
  0xa5   : > { %1143 = vrot.lane.b32.xlu1 %v8189_v2, %s8654_s16 }
  0xa7   : > { %1131 = vrot.lane.b32.xlu0 %v8186_v5, %s8648_s9 }
  0xa9   : > { %1151 = vrot.lane.b32.xlu1 %v8191_v6, %s8647_s8 }
  0xab   : > { %1139 = vrot.lane.b32.xlu0 %v8188_v8, %s8650_s13 }
  0xad   : > { %1174 = vrot.lane.b32.xlu1 %v941_v34, %s8645_s18 }
  0xaf   : > { %1147 = vrot.lane.b32.xlu0 %v8190_v30, %s8646_s6 }
  0xb1   : > { %1178 = vrot.lane.b32.xlu1 %v960_v36, %s8645_s18 }
  0xb3   : > { %1172 = vrot.lane.b32.xlu0 %v8944_v54, %s8645_s18 }
  0xb5   : > { %1182 = vrot.lane.b32.xlu1 %v8996_v37, %s8645_s18 }
  0xb7   : > { %1176 = vrot.lane.b32.xlu0 %v8946_v55, %s8645_s18 }
  0xb9   : > { %1186 = vrot.lane.b32.xlu1 %v8998_v18, %s8645_s18 }
  0xbb   : > { %1180 = vrot.lane.b32.xlu0 %v8948_v56, %s8645_s18 }
  0xbd   : > { %1361 = vrot.lane.b32.xlu1 %v8944_v54, %s8654_s16 }
  0xbf   : > { %1184 = vrot.lane.b32.xlu0 %v8951_v58, %s8645_s18 }
  0xc1   : > { %1365 = vrot.lane.b32.xlu1 %v8946_v55, %s8654_s16 }
  0xc3   : > { %1363 = vrot.lane.b32.xlu0 %v941_v34, %s8654_s16 }
  0xc5   : > { %1369 = vrot.lane.b32.xlu1 %v8948_v56, %s8654_s16 }
  0xc7   : > { %1367 = vrot.lane.b32.xlu0 %v960_v36, %s8654_s16 }
  0xd8   : > { %v543_v11 = vpop.permute.xlu1 %542 }
  0xd9   : > { %v545_v23 = vpop.permute.xlu0 %544  ;;  %v565_v34 = vrot.slane %v543_v11, %v8847_v13 }
  0xdc   : > { %v547_v22 = vpop.permute.xlu1 %546 }
  0xdd   : > { %v599_v36 = vrot.slane %v547_v22, %v8847_v13 }
  0xe3   : > { %v9050_v24 = vpop.permute.xlu1 %500 }
  0xe5   : > { %v9052_v26 = vpop.permute.xlu0 %504 }
  0xe7   : > { %v9054_v54 = vpop.permute.xlu1 %484 }
  0xe9   : > { %v9056_v27 = vpop.permute.xlu0 %472 }
  0xeb   : > { %v9058_v28 = vpop.permute.xlu1 %492 }
  0xed   : > { %v9060_v55 = vpop.permute.xlu0 %476 }
  0xef   : > { %v9062_v16 = vpop.permute.xlu1 %480 }
  0xf1   : > { %v9064_v56 = vpop.permute.xlu0 %488 }
  0xf3   : > { %v551_v31 = vpop.permute.xlu1 %550 }
  0xf4   : > { %v573_v32 = vrot.slane %v551_v31, %v8847_v13 }
  0xf5   : > { %v9067_v33 = vpop.permute.xlu0 %496 }
  0xf6   : > { %v574_v39 = vcombine.low %v565_v34, %v573_v32  ;;  %v575_v51 = vcombine.high %v565_v34, %v573_v32 }
  0xf7   : > { %v555_v35 = vpop.permute.xlu1 %554 }
  0xf8   : > { %v607_v38 = vrot.slane %v555_v35, %v8847_v13  ;;  %v9076_v44 = vrot.slane %v574_v39, %v8873_v21  ;;  %v9086_v62 = vrot.slane %v575_v51, %v8873_v21 }
  0xf9   : > { %v549_v40 = vpop.permute.xlu0 %548 }
  0xfa   : > { %v608_v41 = vcombine.low %v599_v36, %v607_v38  ;;  %v609_v46 = vcombine.high %v599_v36, %v607_v38  ;;  %v9102_v36 = vcombine.high %v9076_v44, %v8644_v10 }
  0xfb   : > { %v734_v42 = vpop.permute.xlu1 %733 }
  0xfc   : > { %v9073_v43 = vrot.slane %v608_v41, %v8873_v21  ;;  %v9081_v57 = vrot.slane %v609_v46, %v8873_v21 }
  0xfd   : > { %v553_v45 = vpop.permute.xlu0 %552 }
  0xfe   : > { %v648_v49 = vpack.i.b16 %v9073_v43, %v9076_v44  ;;  %v628_v50 = vcombine.low %v545_v23, %v553_v45  ;;  %v660_v1 = vpack.i.b16 %v9081_v57, %v9086_v62  ;;  %v9097_v11 = vcombine.high %v9073_v43, %v8644_v10 }
  0xff   : > { %v738_v19 = vpop.permute.xlu1 %737  ;;  %v9110_v45 = vcombine.high %v9081_v57, %v8644_v10 }
 0x100   : > { %v635_v60 = vrot.slane %v628_v50, %v8873_v21  ;;  %v8168_v30 = vcombine.low %v660_v1, %v660_v1  ;;  %v654_v50 = vpack.i.b16 %v9097_v11, %v9102_v36 }
 0x101   : > { %v557_v14 = vpop.permute.xlu0 %556 }
 0x102   : > { %v638_v53 = vcombine.low %v549_v40, %v557_v14  ;;  %v673_v22 = vshrl.u32 %v635_v60, 16  ;;  %v9117_v14 = vcombine.high %v9086_v62, %v8644_v10 }
 0x103   : > { %v742_v59 = vpop.permute.xlu1 %741 }
 0x104   : > { %v645_v20 = vrot.slane %v638_v53, %v8873_v21  ;;  %v817_v61 = vcombine.low %v734_v42, %v742_v59 }
 0x105   : > { %v732_v63 = vpop.permute.xlu0 %731 }
 0x106   : > { %v672_v15 = vpack.i.b16 %v645_v20, %v635_v60  ;;  %v824_v2 = vrot.slane %v817_v61, %v8873_v21  ;;  %v674_v6 = vshrl.u32 %v645_v20, 16  ;;  %v754_v34 = vrot.slane %v732_v63, %v8847_v13 }
 0x107   : > { %v746_v0 = vpop.permute.xlu1 %745 }
 0x108   : > { %v827_v3 = vcombine.low %v738_v19, %v746_v0  ;;  %v8172_v5 = vcombine.low %v672_v15, %v672_v15  ;;  %v862_v23 = vshrl.u32 %v824_v2, 16  ;;  %v675_v41 = vpack.i.b16 %v674_v6, %v673_v22 }
 0x109   : > { %v736_v25 = vpop.permute.xlu0 %735  ;;  %v666_v15 = vpack.i.b16 %v9110_v45, %v9117_v14 }
 0x10a   : > { %v834_v8 = vrot.slane %v827_v3, %v8873_v21  ;;  %706 = vrot.lane.b32.xlu0 %v8172_v5, %s8646_s6  ;;  %v788_v53 = vrot.slane %v736_v25, %v8847_v13  ;;  %v8173_v20 = vcombine.low %v675_v41, %v675_v41  ;;  %v650_v5 = vshrl.u32 %v9073_v43, 16 }
 0x10b   : > { %v9093_v9 = vpop.permute.xlu1 %1119  ;;  %v8170_v22 = vcombine.low %v666_v15, %v666_v15  ;;  %v662_v41 = vshrl.u32 %v9081_v57, 16 }
 0x10c   : > { %v863_v31 = vshrl.u32 %v834_v8, 16  ;;  %v861_v32 = vpack.i.b16 %v834_v8, %v824_v2  ;;  %v8166_v2 = vcombine.low %v654_v50, %v654_v50 }
 0x10d   : > { %v740_v35 = vpop.permute.xlu0 %739 }
 0x10e   : > { %v762_v38 = vrot.slane %v740_v35, %v8847_v13  ;;  %690 = vrot.lane.b32.xlu0 %v8168_v30, %s8648_s9  ;;  %v8181_v39 = vcombine.low %v861_v32, %v861_v32  ;;  %v864_v40 = vpack.i.b16 %v863_v31, %v862_v23  ;;  %v649_v31 = vshrl.u32 %v9076_v44, 16 }
 0x10f   : > { %v9106_v42 = vpop.permute.xlu1 %1127 }
 0x110   : > { %v763_v46 = vcombine.low %v754_v34, %v762_v38  ;;  %895 = vrot.lane.b32.xlu1 %v8181_v39, %s8646_s6  ;;  %v8182_v19 = vcombine.low %v864_v40, %v864_v40  ;;  %v764_v59 = vcombine.high %v754_v34, %v762_v38  ;;  %v651_v40 = vpack.i.b16 %v650_v5, %v649_v31 }
 0x111   : > { %v744_v51 = vpop.permute.xlu0 %743 }
 0x112   : > { %v796_v60 = vrot.slane %v744_v51, %v8847_v13  ;;  %899 = vrot.lane.b32.xlu0 %v8182_v19, %s8647_s8  ;;  %v9123_v61 = vrot.slane %v763_v46, %v8873_v21  ;;  %v778_v25 = vrot.slane %v764_v59, %v8873_v21 }
 0x113   : > { %v9125_v63 = vpop.permute.xlu1 %1135 }
 0x114   : > { %v797_v0 = vcombine.low %v788_v53, %v796_v60  ;;  %v798_v1 = vcombine.high %v788_v53, %v796_v60  ;;  %710 = vrot.lane.b32.xlu1 %v8173_v20, %s8647_s8  ;;  %v838_v23 = vshrl.u32 %v9123_v61, 16  ;;  %v850_v51 = vshrl.u32 %v778_v25, 16 }
 0x115   : > { %v9130_v3 = vpop.permute.xlu0 %1123  ;;  %v779_v53 = vcombine.high %v9123_v61, %v8644_v10  ;;  %v661_v60 = vshrl.u32 %v9086_v62, 16 }
 0x116   : > { %v9135_v6 = vrot.slane %v797_v0, %v8873_v21  ;;  %v812_v8 = vrot.slane %v798_v1, %v8873_v21  ;;  %682 = vrot.lane.b32.xlu0 %v8166_v2, %s8651_s10  ;;  %v8165_v2 = vcombine.low %v651_v40, %v651_v40 }
 0x117   : > { %v9139_v30 = vpop.permute.xlu1 %1143  ;;  %v663_v5 = vpack.i.b16 %v662_v41, %v661_v60 }
 0x118   : > { %v849_v32 = vpack.i.b16 %v812_v8, %v778_v25  ;;  %v839_v34 = vshrl.u32 %v9135_v6, 16  ;;  %v851_v35 = vshrl.u32 %v812_v8, 16  ;;  %v813_v38 = vcombine.high %v9135_v6, %v8644_v10 }
 0x119   : > { %v9146_v39 = vpop.permute.xlu0 %1131  ;;  %v837_v46 = vpack.i.b16 %v9135_v6, %v9123_v61  ;;  %v814_v0 = vcombine.high %v812_v8, %v8644_v10  ;;  %v8169_v8 = vcombine.low %v663_v5, %v663_v5  ;;  %v668_v5 = vshrl.u32 %v9110_v45, 16 }
 0x11a   : > { %698 = vrot.lane.b32.xlu0 %v8170_v22, %s8650_s13  ;;  %v8177_v19 = vcombine.low %v849_v32, %v849_v32  ;;  %v840_v50 = vpack.i.b16 %v839_v34, %v838_v23  ;;  %v852_v15 = vpack.i.b16 %v851_v35, %v850_v51  ;;  %v845_v57 = vshrl.u32 %v813_v38, 16 }
 0x11b   : > { %v9154_v59 = vpop.permute.xlu1 %1151  ;;  %v844_v22 = vshrl.u32 %v779_v53, 16  ;;  %v780_v23 = vcombine.high %v778_v25, %v8644_v10  ;;  %v857_v34 = vshrl.u32 %v814_v0, 16  ;;  %v843_v35 = vpack.i.b16 %v813_v38, %v779_v53 }
 0x11c   : > { %879 = vrot.lane.b32.xlu1 %v8177_v19, %s8648_s9  ;;  %v8174_v20 = vcombine.low %v840_v50, %v840_v50  ;;  %v8178_v62 = vcombine.low %v852_v15, %v852_v15  ;;  %v656_v15 = vshrl.u32 %v9097_v11, 16  ;;  %v655_v38 = vshrl.u32 %v9102_v36, 16 }
 0x11d   : > { %v9159_v1 = vpop.permute.xlu0 %1139  ;;  %v846_v32 = vpack.i.b16 %v845_v57, %v844_v22  ;;  %v856_v50 = vshrl.u32 %v780_v23, 16  ;;  %v8175_v25 = vcombine.low %v843_v35, %v843_v35 }
 0x11e   : > { %867 = vrot.lane.b32.xlu0 %v8174_v20, %s8649_s26  ;;  %v855_v20 = vpack.i.b16 %v814_v0, %v780_v23 }
 0x11f   : > { %v1175_v31 = vpop.permute.xlu1 %1174  ;;  %v8176_v40 = vcombine.low %v846_v32, %v846_v32  ;;  %v858_v41 = vpack.i.b16 %v857_v34, %v856_v50  ;;  %v657_v32 = vpack.i.b16 %v656_v15, %v655_v38 }
 0x120   : > { %678 = vrot.lane.b32.xlu1 %v8165_v2, %s8649_s26 }
 0x121   : > { %v9164_v19 = vpop.permute.xlu0 %1147  ;;  %v8180_v22 = vcombine.low %v858_v41, %v858_v41  ;;  %v8167_v50 = vcombine.low %v657_v32, %v657_v32 }
 0x122   : > { %883 = vrot.lane.b32.xlu0 %v8178_v62, %s8653_s15  ;;  %v8179_v62 = vcombine.low %v855_v20, %v855_v20 }
 0x123   : > { %v1179_v51 = vpop.permute.xlu1 %1178 }
 0x124   : > { %694 = vrot.lane.b32.xlu1 %v8169_v8, %s8653_s15  ;;  %v667_v8 = vshrl.u32 %v9117_v14, 16 }
 0x125   : > { %v1173_v60 = vpop.permute.xlu0 %1172 }
 0x126   : > { %875 = vrot.lane.b32.xlu0 %v8176_v40, %s8652_s14  ;;  %v1195_v35 = vrot.slane %v1173_v60, %v8847_v13 }
 0x127   : > { %v1183_v57 = vpop.permute.xlu1 %1182 }
 0x128   : > { %v1258_v2 = vcombine.low %v1175_v31, %v1183_v57  ;;  %871 = vrot.lane.b32.xlu1 %v8175_v25, %s8651_s10  ;;  %v669_v31 = vpack.i.b16 %v668_v5, %v667_v8 }
 0x129   : > { %v1177_v53 = vpop.permute.xlu0 %1176 }
 0x12a   : > { %891 = vrot.lane.b32.xlu0 %v8180_v22, %s8654_s16  ;;  %v1265_v0 = vrot.slane %v1258_v2, %v8873_v21  ;;  %v8171_v15 = vcombine.low %v669_v31, %v669_v31 }
 0x12b   : > { %v1187_v34 = vpop.permute.xlu1 %1186 }
 0x12c   : > { %v1268_v11 = vcombine.low %v1179_v51, %v1187_v34  ;;  %887 = vrot.lane.b32.xlu1 %v8179_v62, %s8650_s13  ;;  %v1303_v40 = vshrl.u32 %v1265_v0, 16  ;;  %v1229_v51 = vrot.slane %v1177_v53, %v8847_v13 }
 0x12d   : > { %v1181_v23 = vpop.permute.xlu0 %1180 }
 0x12e   : > { %v1275_v36 = vrot.slane %v1268_v11, %v8873_v21  ;;  %v1203_v45 = vrot.slane %v1181_v23, %v8847_v13 }
 0x130   : > { %v1304_v41 = vshrl.u32 %v1275_v36, 16  ;;  %v1204_v25 = vcombine.low %v1195_v35, %v1203_v45  ;;  %686 = vrot.lane.b32.xlu1 %v8167_v50, %s8652_s14  ;;  %v1205_v14 = vcombine.high %v1195_v35, %v1203_v45  ;;  %v1302_v22 = vpack.i.b16 %v1275_v36, %v1265_v0 }
 0x131   : > { %v1185_v20 = vpop.permute.xlu0 %1184 }
 0x132   : > { %v1237_v57 = vrot.slane %v1185_v20, %v8847_v13  ;;  %v1305_v2 = vpack.i.b16 %v1304_v41, %v1303_v40  ;;  %v9184_v60 = vrot.slane %v1204_v25, %v8873_v21  ;;  %v1219_v32 = vrot.slane %v1205_v14, %v8873_v21 }
 0x133   : > { %v8199_v53 = vcombine.low %v1302_v22, %v1302_v22 }
 0x134   : > { %v1238_v38 = vcombine.low %v1229_v51, %v1237_v57  ;;  %v1239_v5 = vcombine.high %v1229_v51, %v1237_v57  ;;  %702 = vrot.lane.b32.xlu1 %v8171_v15, %s8654_s16  ;;  %v8200_v62 = vcombine.low %v1305_v2, %v1305_v2  ;;  %v1279_v0 = vshrl.u32 %v9184_v60, 16 }
 0x135   : > { %v1220_v11 = vcombine.high %v9184_v60, %v8644_v10  ;;  %v1291_v45 = vshrl.u32 %v1219_v32, 16  ;;  %v1221_v51 = vcombine.high %v1219_v32, %v8644_v10 }
 0x136   : > { %v9189_v34 = vrot.slane %v1238_v38, %v8873_v21  ;;  %v1253_v8 = vrot.slane %v1239_v5, %v8873_v21  ;;  %1340 = vrot.lane.b32.xlu0 %v8200_v62, %s8647_s8 }
 0x137   : > { %v1285_v38 = vshrl.u32 %v1220_v11, 16 }
 0x138   : > { %1336 = vrot.lane.b32.xlu1 %v8199_v53, %s8646_s6  ;;  %v1290_v23 = vpack.i.b16 %v1253_v8, %v1219_v32  ;;  %v1280_v31 = vshrl.u32 %v9189_v34, 16  ;;  %v1254_v35 = vcombine.high %v9189_v34, %v8644_v10  ;;  %v1292_v36 = vshrl.u32 %v1253_v8, 16 }
 0x139   : > { %v1278_v50 = vpack.i.b16 %v9189_v34, %v9184_v60  ;;  %v1255_v14 = vcombine.high %v1253_v8, %v8644_v10 }
 0x13a   : > { %v8195_v40 = vcombine.low %v1290_v23, %v1290_v23  ;;  %v1281_v41 = vpack.i.b16 %v1280_v31, %v1279_v0  ;;  %v1284_v25 = vpack.i.b16 %v1254_v35, %v1220_v11  ;;  %v1293_v15 = vpack.i.b16 %v1292_v36, %v1291_v45  ;;  %v9217_v11 = vpop.permute.xlu0 %1363 }
 0x13b   : > { %v1286_v57 = vshrl.u32 %v1254_v35, 16  ;;  %v1296_v22 = vpack.i.b16 %v1255_v14, %v1221_v51  ;;  %v1298_v53 = vshrl.u32 %v1255_v14, 16  ;;  %v1297_v0 = vshrl.u32 %v1221_v51, 16  ;;  %v9219_v35 = vpop.permute.xlu1 %1361 }
 0x13c   : > { %1320 = vrot.lane.b32.xlu1 %v8195_v40, %s8648_s9  ;;  %v8192_v20 = vcombine.low %v1281_v41, %v1281_v41  ;;  %v8193_v2 = vcombine.low %v1284_v25, %v1284_v25  ;;  %v8196_v5 = vcombine.low %v1293_v15, %v1293_v15 }
 0x13d   : > { %v1287_v62 = vpack.i.b16 %v1286_v57, %v1285_v38  ;;  %v8197_v8 = vcombine.low %v1296_v22, %v1296_v22  ;;  %v1299_v31 = vpack.i.b16 %v1298_v53, %v1297_v0  ;;  %v509_v38 = vsel %vm506_vm3, %v442_v52, %v9056_v27 }
 0x13e   : > { %1308 = vrot.lane.b32.xlu0 %v8192_v20, %s8649_s26  ;;  %v9221_v36 = vpop.permute.xlu0 %1367 }
 0x13f   : > { %v8194_v23 = vcombine.low %v1287_v62, %v1287_v62  ;;  %v8198_v32 = vcombine.low %v1299_v31, %v1299_v31  ;;  %v9223_v45 = vpop.permute.xlu1 %1365  ;;  %v1155_v62 = vsel %vm506_vm3, %v1089_v29, %v9093_v9 }
 0x140   : > { %1312 = vrot.lane.b32.xlu1 %v8193_v2, %s8651_s10  ;;  %v1157_v47 = vsel %vm510_vm4, %v1155_v62, %v9130_v3 }
 0x141   : > { %v1159_v29 = vsel %vm513_vm5, %v1157_v47, %v9106_v42 }
 0x142   : > { %1324 = vrot.lane.b32.xlu0 %v8196_v5, %s8653_s15  ;;  %v512_v5 = vsel %vm510_vm4, %v509_v38, %v9060_v55  ;;  %v1161_v61 = vsel %vm516_vm6, %v1159_v29, %v9146_v39  ;;  %v9321_v29 = vrot.slane %v9223_v45, %v8847_v13 }
 0x143   : > { %v9225_v41 = vpop.permute.xlu1 %1369  ;;  %v515_v27 = vsel %vm513_vm5, %v512_v5, %v9062_v16 }
 0x144   : > { %1328 = vrot.lane.b32.xlu1 %v8197_v8, %s8650_s13  ;;  %v518_v9 = vsel %vm516_vm6, %v515_v27, %v9054_v54 }
 0x145   : > { %v521_v42 = vsel %vm519_vm7, %v518_v9, %v9064_v56 }
 0x146   : > { %1316 = vrot.lane.b32.xlu0 %v8194_v23, %s8652_s14  ;;  %v524_v56 = vsel %vm522_vm8, %v521_v42, %v9058_v28 }
 0x148   : > { %1373 = vrot.lane.b32.xlu1 %v8951_v58, %s8654_s16 }
 0x14a   : > { %1332 = vrot.lane.b32.xlu0 %v8198_v32, %s8654_s16 }
 0x14e   : > { %1371 = vrot.lane.b32.xlu0 %v8996_v37, %s8654_s16 }
 0x152   : > { %1375 = vrot.lane.b32.xlu0 %v8998_v18, %s8654_s16 }
 0x17c   : > { %v707_v40 = vpop.permute.xlu0 %706 }
 0x180   : > { %v691_v58 = vpop.permute.xlu0 %690 }
 0x182   : > { %v896_v25 = vpop.permute.xlu1 %895 }
 0x184   : > { %v900_v14 = vpop.permute.xlu0 %899 }
 0x186   : > { %v711_v15 = vpop.permute.xlu1 %710 }
 0x188   : > { %v683_v20 = vpop.permute.xlu0 %682 }
 0x18c   : > { %v699_v37 = vpop.permute.xlu0 %698 }
 0x18e   : > { %v880_v51 = vpop.permute.xlu1 %879 }
 0x190   : > { %v868_v57 = vpop.permute.xlu0 %867 }
 0x191   : > { %v903_v53 = vsel %vm506_vm3, %v837_v46, %v868_v57  ;;  %v1163_v46 = vsel %vm519_vm7, %v1161_v61, %v9125_v63  ;;  %v1169_v63 = vsel %vm528_vm9, %v9139_v30, %v9164_v19 }
 0x192   : > { %v679_v18 = vpop.permute.xlu1 %678  ;;  %v1165_v39 = vsel %vm522_vm8, %v1163_v46, %v9159_v1  ;;  %v530_v1 = vsel %vm528_vm9, %v9067_v33, %v9050_v24  ;;  %v1171_v57 = vsel %vm531_vm11, %v1169_v63, %v9154_v59  ;;  %v8511_v63 = vld [vmem:[%s8830_s27 + $0xc] sm:$0x3] }
 0x193   : > { %v714_v16 = vsel %vm506_vm3, %v648_v49, %v679_v18  ;;  %v1167_v32 = vsel %vm525_vm10, %v1165_v39, %v9139_v30  ;;  %v527_v30 = vsel %vm525_vm10, %v524_v56, %v9067_v33  ;;  %v2135_v59 = vrot.slane %v1171_v57, 2  ;;  %v8509_v39 = vld [vmem:[%s8830_s27 + $0x4] sm:$0x3]  ;;  %v8514_v57 = vld [vmem:[%s8830_s27 + $0x18] sm:$0xf] }
 0x194   : > { %v884_v2 = vpop.permute.xlu0 %883  ;;  %v716_v0 = vsel %vm510_vm4, %v714_v16, %v683_v20 }
 0x196   : > { %v695_v22 = vpop.permute.xlu1 %694 }
 0x198   : > { %v876_v48 = vpop.permute.xlu0 %875 }
 0x19a   : > { %v872_v8 = vpop.permute.xlu1 %871 }
 0x19b   : > { %v905_v52 = vsel %vm510_vm4, %v903_v53, %v872_v8 }
 0x19c   : > { %v907_v12 = vsel %vm513_vm5, %v905_v52, %v876_v48  ;;  %v892_v6 = vpop.permute.xlu0 %891  ;;  %v9309_v48 = vrot.slane %v9219_v35, %v8847_v13  ;;  %v9313_v52 = vrot.slane %v9225_v41, %v8847_v13 }
 0x19d   : > { %v909_v17 = vsel %vm516_vm6, %v907_v12, %v880_v51  ;;  %v917_v49 = vsel %vm528_vm9, %v892_v6, %v896_v25 }
 0x19e   : > { %v888_v55 = vpop.permute.xlu1 %887  ;;  %v911_v3 = vsel %vm519_vm7, %v909_v17, %v884_v2  ;;  %v919_v28 = vsel %vm531_vm11, %v917_v49, %v900_v14  ;;  %v533_v14 = vsel %vm531_vm11, %v530_v1, %v9052_v26  ;;  %v1393_v12 = vcombine.low %v9309_v48, %v9313_v52 }
 0x19f   : > { %v913_v43 = vsel %vm522_vm8, %v911_v3, %v888_v55  ;;  %v2131_v38 = vrot.slane %v919_v28, 4 }
 0x1a0   : > { %v915_v25 = vsel %vm525_vm10, %v913_v43, %v892_v6  ;;  %v9327_v35 = vrot.slane %v1393_v12, %v8873_v21  ;;  %v1555_v43 = vrot.slane %v8509_v39, 5 }
 0x1a1   : > { %v2130_v2 = vrot.slane %v915_v25, 4 }
 0x1a2   : > { %v687_v54 = vpop.permute.xlu1 %686  ;;  %v1468_v16 = vshrl.u32 %v9327_v35, 16  ;;  %v9339_v45 = vcombine.high %v9327_v35, %v8644_v10 }
 0x1a3   : > { %v718_v44 = vsel %vm513_vm5, %v716_v0, %v687_v54  ;;  %v8508_v54 = vld [vmem:[%s8830_s27] sm:$0xf] }
 0x1a4   : > { %v720_v23 = vsel %vm516_vm6, %v718_v44, %v691_v58  ;;  %v8210_v0 = vrot.slane %v8508_v54, 9 }
 0x1a5   : > { %v722_v31 = vsel %vm519_vm7, %v720_v23, %v695_v22  ;;  %v8510_v23 = vld [vmem:[%s8830_s27 + $0x8] sm:$0xf] }
 0x1a6   : > { %v703_v58 = vpop.permute.xlu1 %702  ;;  %v724_v20 = vsel %vm522_vm8, %v722_v31, %v699_v37  ;;  %v2134_v37 = vrot.slane %v1167_v32, 2  ;;  %v8211_v56 = vrot.slane %v8510_v23, 9  ;;  %v1560_v31 = vrot.slane %v8511_v63, 5 }
 0x1a7   : > { %v726_v51 = vsel %vm525_vm10, %v724_v20, %v703_v58  ;;  %v728_v19 = vsel %vm528_vm9, %v703_v58, %v707_v40  ;;  %v1556_v25 = vsel %vm9352_vm1, %v8210_v0, %v1555_v43  ;;  %v8512_v58 = vld [vmem:[%s8830_s27 + $0x10] sm:$0xf]  ;;  %v1474_v0 = vshrl.u32 %v9339_v45, 16 }
 0x1a8   : > { %v730_v24 = vsel %vm531_vm11, %v728_v19, %v711_v15  ;;  %v2126_v18 = vrot.slane %v726_v51, 6  ;;  %v9334_v61 = vpop.permute.xlu0 %1340  ;;  %v8212_v20 = vrot.slane %v8512_v58, 9  ;;  %v1561_v28 = vsel %vm9352_vm1, %v8211_v56, %v1560_v31  ;;  %v8513_v51 = vld [vmem:[%s8830_s27 + $0x14] sm:$0x3] }
 0x1a9   : > { %v2127_v22 = vrot.slane %v730_v24, 6  ;;  %v1565_v19 = vrot.slane %v8513_v51, 5  ;;  %v8213_v24 = vrot.slane %v8514_v57, 9  ;;  %v1580_v12 = vrot.slane %v1556_v25, %v8847_v13 }
 0x1aa   : > { %v9295_v40 = vpop.permute.xlu1 %1336  ;;  %v2150_v5 = vsel %vm2148_vm12, %v527_v30, %v2126_v18  ;;  %v8515_v18 = vld [vmem:[%s8830_s27 + $0x1c] sm:$0x3]  ;;  %s8655_s27 = smov 110  }
 0x1ab   : > { %v2152_v15 = vsel %vm2148_vm12, %v533_v14, %v2127_v22  ;;  %v2155_v62 = vsel %vm2153_vm13, %v2150_v5, %v2130_v2  ;;  %v1570_v30 = vrot.slane %v8515_v18, 5  ;;  %v1566_v22 = vsel %vm9352_vm1, %v8212_v20, %v1565_v19 }
 0x1ac   : > { %v2157_v53 = vsel %vm2153_vm13, %v2152_v15, %v2131_v38  ;;  %v2160_v33 = vsel %vm2158_vm14, %v2155_v62, %v2134_v37  ;;  %v9386_v5 = vrot.slane %v1555_v43, 4  ;;  %v9394_v62 = vrot.slane %v1565_v19, 4 }
 0x1ad   : > { %v2163_v8 = vsel %vm2158_vm14, %v2157_v53, %v2135_v59  ;;  %v1571_v14 = vsel %vm9352_vm1, %v8213_v24, %v1570_v30  ;;  %v9388_v59 = vrot.slane %v1560_v31, 4  ;;  %v9396_v53 = vrot.slane %v1570_v30, 4 }
 0x1ae   : > { %v9303_v47 = vpop.permute.xlu1 %1320  ;;  %2227 = vmatprep.subr.bf16.mxu0 %v2163_v8  ;;  %v1394_v8 = vcombine.high %v9309_v48, %v9313_v52  ;;  %vm3717_vm1 = vcmask 523264  }
 0x1af   : > { %2228 = vmatpush1.bf16.msra.mxu0 %v2160_v33 }
 0x1b0   : > { %v9350_v44 = vpop.permute.xlu0 %1308  ;;  %v1408_v48 = vrot.slane %v1394_v8, %v8873_v21 }
 0x1b2   : > { %v9305_v26 = vpop.permute.xlu1 %1312  ;;  %v1410_v56 = vcombine.high %v1408_v48, %v8644_v10 }
 0x1b4   : > { %v9368_v2 = vpop.permute.xlu0 %1324  ;;  %v1486_v24 = vshrl.u32 %v1410_v56, 16 }
 0x1b6   : > { %v9315_v27 = vpop.permute.xlu1 %1328 }
 0x1b8   : > { %v9378_v37 = vpop.permute.xlu0 %1316 }
 0x1ba   : > { %v1374_v17 = vpop.permute.xlu1 %1373 }
 0x1bb   : > { %v9324_v55 = vrot.slane %v1374_v17, %v8847_v13  ;;  %v1588_v17 = vrot.slane %v1566_v22, %v8847_v13 }
 0x1bc   : > { %v9382_v38 = vpop.permute.xlu0 %1332 }
 0x1bd   : > { %v1427_v41 = vcombine.low %v9321_v29, %v9324_v55  ;;  %v1428_v33 = vcombine.high %v9321_v29, %v9324_v55  ;;  %v1589_v52 = vcombine.low %v1580_v12, %v1588_v17  ;;  %v1590_v20 = vcombine.high %v1580_v12, %v1588_v17 }
 0x1bf   : > { %v9332_v9 = vrot.slane %v1427_v41, %v8873_v21  ;;  %v1614_v41 = vrot.slane %v1561_v28, %v8847_v13  ;;  %v9422_v23 = vrot.slane %v1589_v52, %v8873_v21  ;;  %v1604_v12 = vrot.slane %v1590_v20, %v8873_v21 }
 0x1c0   : > { %v1372_v15 = vpop.permute.xlu0 %1371 }
 0x1c1   : > { %v1469_v3 = vshrl.u32 %v9332_v9, 16  ;;  %v9344_v6 = vcombine.high %v9332_v9, %v8644_v10  ;;  %v1605_v51 = vcombine.high %v9422_v23, %v8644_v10  ;;  %v1664_v18 = vshrl.u32 %v9422_v23, 16 }
 0x1c3   : > { %v1470_v42 = vpack.i.b16 %v1469_v3, %v1468_v16  ;;  %v1473_v46 = vpack.i.b16 %v9344_v6, %v9339_v45  ;;  %v1622_v16 = vrot.slane %v1571_v14, %v8847_v13  ;;  %v1442_v3 = vrot.slane %v1428_v33, %v8873_v21 }
 0x1c4   : > { %v1376_v29 = vpop.permute.xlu0 %1375  ;;  %v1475_v55 = vshrl.u32 %v9344_v6, 16 }
 0x1c5   : > { %v8201_v1 = vcombine.low %v1470_v42, %v1470_v42  ;;  %v8202_v32 = vcombine.low %v1473_v46, %v1473_v46  ;;  %v1623_v42 = vcombine.low %v1614_v41, %v1622_v16  ;;  %v1447_v46 = vcombine.low %v9217_v11, %v1372_v15 }
 0x1c6   : > { %v1457_v54 = vcombine.low %v9221_v36, %v1376_v29  ;;  %v1479_v39 = vpack.i.b16 %v1442_v3, %v1408_v48  ;;  %v1476_v43 = vpack.i.b16 %v1475_v55, %v1474_v0  ;;  %v1481_v49 = vshrl.u32 %v1442_v3, 16 }
 0x1c7   : > { %1497 = vrot.lane.b32.xlu1 %v8201_v1, %s8649_s26  ;;  %1501 = vrot.lane.b32.xlu0 %v8202_v32, %s8651_s10  ;;  %v1444_v6 = vcombine.high %v1442_v3, %v8644_v10  ;;  %v9426_v63 = vrot.slane %v1623_v42, %v8873_v21  ;;  %v1454_v31 = vrot.slane %v1447_v46, %v8873_v21  ;;  %v1480_v36 = vshrl.u32 %v1408_v48, 16 }
 0x1c8   : > { %v1464_v11 = vrot.slane %v1457_v54, %v8873_v21  ;;  %v8204_v45 = vcombine.low %v1479_v39, %v1479_v39  ;;  %v8203_v1 = vcombine.low %v1476_v43, %v1476_v43  ;;  %v1643_v55 = vcombine.low %v9386_v5, %v9394_v62 }
 0x1c9   : > { %v1482_v32 = vpack.i.b16 %v1481_v49, %v1480_v36  ;;  %v1487_v58 = vshrl.u32 %v1444_v6, 16  ;;  %v1639_v19 = vcombine.high %v9426_v63, %v8644_v10  ;;  %v1665_v30 = vshrl.u32 %v9426_v63, 16 }
 0x1ca   : > { %v1491_v57 = vpack.i.b16 %v1464_v11, %v1454_v31  ;;  %v1653_v48 = vcombine.low %v9388_v59, %v9396_v53  ;;  %v1676_v0 = vshrl.u32 %v1604_v12, 16  ;;  %v1606_v49 = vcombine.high %v1604_v12, %v8644_v10 }
 0x1cb   : > { %1746 = vrot.lane.b32.xlu1 %v1556_v25, %s8645_s18  ;;  %1750 = vrot.lane.b32.xlu0 %v1561_v28, %s8645_s18  ;;  %v8205_v15 = vcombine.low %v1482_v32, %v1482_v32  ;;  %v1488_v8 = vpack.i.b16 %v1487_v58, %v1486_v24  ;;  %v1666_v29 = vpack.i.b16 %v1665_v30, %v1664_v18 }
 0x1cc   : > { %v8208_v3 = vcombine.low %v1491_v57, %v1491_v57  ;;  %v1669_v46 = vpack.i.b16 %v1639_v19, %v1605_v51  ;;  %v1650_v36 = vrot.slane %v1643_v55, %v8873_v21 }
 0x1cd   : > { %v8207_v42 = vcombine.low %v1488_v8, %v1488_v8  ;;  %v8214_v43 = vcombine.low %v1666_v29, %v1666_v29 }
 0x1ce   : > { %v1688_v20 = vshrl.u32 %v1650_v36, 16 }
 0x1cf   : > { %1754 = vrot.lane.b32.xlu1 %v1566_v22, %s8645_s18  ;;  %1758 = vrot.lane.b32.xlu0 %v1571_v14, %s8645_s18 }
 0x1d3   : > { %1935 = vrot.lane.b32.xlu1 %v1556_v25, %s8654_s16  ;;  %1939 = vrot.lane.b32.xlu0 %v1561_v28, %s8654_s16  ;;  %v1485_v25 = vpack.i.b16 %v1444_v6, %v1410_v56  ;;  %v1624_v28 = vcombine.high %v1614_v41, %v1622_v16  ;;  %v1670_v41 = vshrl.u32 %v1605_v51, 16  ;;  %v1671_v16 = vshrl.u32 %v1639_v19, 16 }
 0x1d5   : > { %v8206_v33 = vcombine.low %v1485_v25, %v1485_v25  ;;  %v1638_v17 = vrot.slane %v1624_v28, %v8873_v21  ;;  %v1672_v54 = vpack.i.b16 %v1671_v16, %v1670_v41 }
 0x1d7   : > { %1943 = vrot.lane.b32.xlu1 %v1566_v22, %s8654_s16  ;;  %1947 = vrot.lane.b32.xlu0 %v1571_v14, %s8654_s16  ;;  %v1492_v22 = vshrl.u32 %v1454_v31, 16  ;;  %v1493_v14 = vshrl.u32 %v1464_v11, 16  ;;  %v1677_v39 = vshrl.u32 %v1638_v17, 16  ;;  %v1640_v6 = vcombine.high %v1638_v17, %v8644_v10 }
 0x1d8   : > { %v1675_v31 = vpack.i.b16 %v1638_v17, %v1604_v12 }
 0x1d9   : > { %v1494_v52 = vpack.i.b16 %v1493_v14, %v1492_v22  ;;  %v1683_v11 = vshrl.u32 %v1640_v6, 16  ;;  %v1681_v32 = vpack.i.b16 %v1640_v6, %v1606_v49 }
 0x1db   : > { %1748 = vrot.lane.b32.xlu1 %v9386_v5, %s8645_s18  ;;  %1752 = vrot.lane.b32.xlu0 %v9388_v59, %s8645_s18  ;;  %v8209_v56 = vcombine.low %v1494_v52, %v1494_v52  ;;  %v8219_v51 = vcombine.low %v1681_v32, %v1681_v32 }
 0x1df   : > { %1756 = vrot.lane.b32.xlu1 %v9394_v62, %s8645_s18  ;;  %1760 = vrot.lane.b32.xlu0 %v9396_v53, %s8645_s18 }
 0x1e3   : > { %1937 = vrot.lane.b32.xlu1 %v9386_v5, %s8654_s16  ;;  %1941 = vrot.lane.b32.xlu0 %v9388_v59, %s8654_s16  ;;  %v8215_v5 = vcombine.low %v1669_v46, %v1669_v46  ;;  %v1678_v59 = vpack.i.b16 %v1677_v39, %v1676_v0 }
 0x1e5   : > { %v8218_v25 = vcombine.low %v1678_v59, %v1678_v59 }
 0x1e7   : > { %1945 = vrot.lane.b32.xlu1 %v9394_v62, %s8654_s16  ;;  %1949 = vrot.lane.b32.xlu0 %v9396_v53, %s8654_s16  ;;  %v8216_v62 = vcombine.low %v1672_v54, %v1672_v54  ;;  %v1682_v53 = vshrl.u32 %v1606_v49, 16 }
 0x1e9   : > { %v1684_v58 = vpack.i.b16 %v1683_v11, %v1682_v53 }
 0x1eb   : > { %1505 = vrot.lane.b32.xlu1 %v8203_v1, %s8652_s14  ;;  %1509 = vrot.lane.b32.xlu0 %v8204_v45, %s8648_s9  ;;  %v1660_v45 = vrot.slane %v1653_v48, %v8873_v21  ;;  %v8217_v1 = vcombine.low %v1675_v31, %v1675_v31  ;;  %v8220_v19 = vcombine.low %v1684_v58, %v1684_v58 }
 0x1ed   : > { %v1689_v28 = vshrl.u32 %v1660_v45, 16  ;;  %v1687_v57 = vpack.i.b16 %v1660_v45, %v1650_v36 }
 0x1ef   : > { %1513 = vrot.lane.b32.xlu1 %v8205_v15, %s8653_s15  ;;  %1517 = vrot.lane.b32.xlu0 %v8206_v33, %s8650_s13  ;;  %v1690_v24 = vpack.i.b16 %v1689_v28, %v1688_v20  ;;  %v8221_v18 = vcombine.low %v1687_v57, %v1687_v57 }
 0x1f1   : > { %v8222_v30 = vcombine.low %v1690_v24, %v1690_v24 }
 0x1f3   : > { %1521 = vrot.lane.b32.xlu1 %v8207_v42, %s8654_s16  ;;  %1525 = vrot.lane.b32.xlu0 %v8208_v3, %s8646_s6 }
 0x1f7   : > { %1529 = vrot.lane.b32.xlu1 %v8209_v56, %s8647_s8  ;;  %1693 = vrot.lane.b32.xlu0 %v8214_v43, %s8649_s26 }
 0x1fb   : > { %1697 = vrot.lane.b32.xlu1 %v8215_v5, %s8651_s10  ;;  %1701 = vrot.lane.b32.xlu0 %v8216_v62, %s8652_s14 }
 0x1ff   : > { %1705 = vrot.lane.b32.xlu1 %v8217_v1, %s8648_s9  ;;  %1709 = vrot.lane.b32.xlu0 %v8218_v25, %s8653_s15 }
 0x203   : > { %1713 = vrot.lane.b32.xlu1 %v8219_v51, %s8650_s13  ;;  %1717 = vrot.lane.b32.xlu0 %v8220_v19, %s8654_s16 }
 0x207   : > { %1721 = vrot.lane.b32.xlu1 %v8221_v18, %s8646_s6  ;;  %1725 = vrot.lane.b32.xlu0 %v8222_v30, %s8647_s8 }
 0x239   : > { %v9466_v22 = vpop.permute.xlu1 %1497  ;;  %v9468_v14 = vpop.permute.xlu0 %1501 }
 0x23d   : > { %v1747_v15 = vpop.permute.xlu1 %1746  ;;  %v1751_v33 = vpop.permute.xlu0 %1750 }
 0x23e   : > { %v1769_v17 = vrot.slane %v1747_v15, %v8847_v13  ;;  %v1803_v41 = vrot.slane %v1751_v33, %v8847_v13 }
 0x241   : > { %v1755_v8 = vpop.permute.xlu1 %1754  ;;  %v1759_v12 = vpop.permute.xlu0 %1758 }
 0x242   : > { %v1777_v16 = vrot.slane %v1755_v8, %v8847_v13  ;;  %v1811_v3 = vrot.slane %v1759_v12, %v8847_v13  ;;  %v1344_v12 = vsel %vm506_vm3, %v1278_v50, %v9350_v44  ;;  %v1467_v50 = vpack.i.b16 %v9332_v9, %v9327_v35 }
 0x243   : > { %v1346_v34 = vsel %vm510_vm4, %v1344_v12, %v9305_v26 }
 0x244   : > { %v1778_v29 = vcombine.low %v1769_v17, %v1777_v16  ;;  %v1779_v55 = vcombine.high %v1769_v17, %v1777_v16  ;;  %v1812_v48 = vcombine.low %v1803_v41, %v1811_v3  ;;  %v1813_v52 = vcombine.high %v1803_v41, %v1811_v3 }
 0x245   : > { %v1936_v42 = vpop.permute.xlu1 %1935  ;;  %v1940_v46 = vpop.permute.xlu0 %1939 }
 0x246   : > { %v9475_v54 = vrot.slane %v1778_v29, %v8873_v21  ;;  %v1793_v0 = vrot.slane %v1779_v55, %v8873_v21  ;;  %v9479_v39 = vrot.slane %v1812_v48, %v8873_v21  ;;  %v1827_v43 = vrot.slane %v1813_v52, %v8873_v21 }
 0x247   : > { %v9483_v49 = vrot.slane %v1936_v42, %v8847_v13  ;;  %v9486_v6 = vrot.slane %v1940_v46, %v8847_v13 }
 0x248   : > { %v1853_v56 = vshrl.u32 %v9475_v54, 16  ;;  %v1854_v5 = vshrl.u32 %v9479_v39, 16  ;;  %v1795_v62 = vcombine.high %v1793_v0, %v8644_v10  ;;  %v1829_v31 = vcombine.high %v1827_v43, %v8644_v10 }
 0x249   : > { %v1944_v59 = vpop.permute.xlu1 %1943  ;;  %v1948_v53 = vpop.permute.xlu0 %1947  ;;  %v1794_v11 = vcombine.high %v9475_v54, %v8644_v10  ;;  %v1828_v36 = vcombine.high %v9479_v39, %v8644_v10  ;;  %v1865_v25 = vshrl.u32 %v1793_v0, 16  ;;  %v1866_v51 = vshrl.u32 %v1827_v43, 16 }
 0x24a   : > { %v1966_v45 = vrot.slane %v1944_v59, %v8847_v13  ;;  %v2000_v1 = vrot.slane %v1948_v53, %v8847_v13  ;;  %v1855_v32 = vpack.i.b16 %v1854_v5, %v1853_v56  ;;  %v1864_v8 = vpack.i.b16 %v1827_v43, %v1793_v0 }
 0x24b   : > { %v1858_v58 = vpack.i.b16 %v1828_v36, %v1794_v11  ;;  %v1859_v20 = vshrl.u32 %v1794_v11, 16  ;;  %v1860_v28 = vshrl.u32 %v1828_v36, 16  ;;  %v1867_v17 = vpack.i.b16 %v1866_v51, %v1865_v25 }
 0x24c   : > { %v1967_v19 = vcombine.low %v9483_v49, %v1966_v45  ;;  %v2001_v57 = vcombine.low %v9486_v6, %v2000_v1  ;;  %v8223_v30 = vcombine.low %v1855_v32, %v1855_v32  ;;  %v1871_v41 = vshrl.u32 %v1795_v62, 16 }
 0x24d   : > { %v1749_v24 = vpop.permute.xlu1 %1748  ;;  %v1753_v18 = vpop.permute.xlu0 %1752  ;;  %v8224_v15 = vcombine.low %v1858_v58, %v1858_v58  ;;  %v1861_v33 = vpack.i.b16 %v1860_v28, %v1859_v20  ;;  %v1872_v16 = vshrl.u32 %v1829_v31, 16  ;;  %v8226_v42 = vcombine.low %v1864_v8, %v1864_v8 }
 0x24e   : > { %1882 = vrot.lane.b32.xlu1 %v8223_v30, %s8649_s26  ;;  %v9508_v3 = vrot.slane %v1967_v19, %v8873_v21  ;;  %v9511_v29 = vrot.slane %v2001_v57, %v8873_v21  ;;  %v1968_v0 = vcombine.high %v9483_v49, %v1966_v45  ;;  %v2002_v43 = vcombine.high %v9486_v6, %v2000_v1 }
 0x24f   : > { %1886 = vrot.lane.b32.xlu0 %v8224_v15, %s8651_s10  ;;  %v8225_v52 = vcombine.low %v1861_v33, %v1861_v33  ;;  %v1873_v60 = vpack.i.b16 %v1872_v16, %v1871_v41  ;;  %v8227_v56 = vcombine.low %v1867_v17, %v1867_v17  ;;  %v1870_v11 = vpack.i.b16 %v1829_v31, %v1795_v62 }
 0x250   : > { %v1983_v5 = vcombine.high %v9508_v3, %v8644_v10  ;;  %v2017_v26 = vcombine.high %v9511_v29, %v8644_v10  ;;  %v2042_v6 = vshrl.u32 %v9508_v3, 16  ;;  %v2043_v36 = vshrl.u32 %v9511_v29, 16 }
 0x251   : > { %v1757_v55 = vpop.permute.xlu1 %1756  ;;  %v1761_v48 = vpop.permute.xlu0 %1760  ;;  %v8229_v49 = vcombine.low %v1873_v60, %v1873_v60  ;;  %v1348_v45 = vsel %vm513_vm5, %v1346_v34, %v9378_v37  ;;  %v1533_v58 = vsel %vm506_vm3, %v1467_v50, %v9466_v22  ;;  %v1982_v20 = vrot.slane %v1968_v0, %v8873_v21 }
 0x252   : > { %v1832_v44 = vcombine.low %v1749_v24, %v1757_v55  ;;  %v1842_v46 = vcombine.low %v1753_v18, %v1761_v48  ;;  %1890 = vrot.lane.b32.xlu1 %v8225_v52, %s8652_s14  ;;  %v2016_v28 = vrot.slane %v2002_v43, %v8873_v21  ;;  %v2048_v31 = vshrl.u32 %v1983_v5, 16 }
 0x253   : > { %1894 = vrot.lane.b32.xlu0 %v8226_v42, %s8648_s9  ;;  %v2049_v51 = vshrl.u32 %v2017_v26, 16  ;;  %v1852_v37 = vpack.i.b16 %v9479_v39, %v9475_v54  ;;  %v8228_v18 = vcombine.low %v1870_v11, %v1870_v11  ;;  %v2044_v30 = vpack.i.b16 %v2043_v36, %v2042_v6 }
 0x254   : > { %v1839_v59 = vrot.slane %v1832_v44, %v8873_v21  ;;  %v1849_v35 = vrot.slane %v1842_v46, %v8873_v21  ;;  %v2041_v22 = vpack.i.b16 %v9511_v29, %v9508_v3  ;;  %v1350_v15 = vsel %vm516_vm6, %v1348_v45, %v9303_v47 }
 0x255   : > { %v1938_v9 = vpop.permute.xlu1 %1937  ;;  %v1942_v53 = vpop.permute.xlu0 %1941  ;;  %v1535_v33 = vsel %vm510_vm4, %v1533_v58, %v9468_v14  ;;  %v1984_v8 = vcombine.high %v1982_v20, %v8644_v10  ;;  %v2018_v12 = vcombine.high %v2016_v28, %v8644_v10  ;;  %v2050_v17 = vpack.i.b16 %v2049_v51, %v2048_v31 }
 0x256   : > { %v1877_v1 = vshrl.u32 %v1839_v59, 16  ;;  %v1876_v32 = vpack.i.b16 %v1849_v35, %v1839_v59  ;;  %v1878_v25 = vshrl.u32 %v1849_v35, 16  ;;  %1898 = vrot.lane.b32.xlu1 %v8227_v56, %s8653_s15  ;;  %v2047_v41 = vpack.i.b16 %v2017_v26, %v1983_v5 }
 0x257   : > { %1906 = vrot.lane.b32.xlu0 %v8229_v49, %s8654_s16  ;;  %v2054_v16 = vshrl.u32 %v1982_v20, 16  ;;  %v2055_v55 = vshrl.u32 %v2016_v28, 16  ;;  %v8232_v47 = vcombine.low %v2044_v30, %v2044_v30  ;;  %v1352_v50 = vsel %vm519_vm7, %v1350_v15, %v9368_v2  ;;  %v2183_v30 = vld [vmem:[%s13542_s2] sm:$0xff]  ;;  %v2184_v15 = vld [vmem:[%s13542_s2 + $0x8] sm:$0xff] }
 0x258   : > { %v8230_v62 = vcombine.low %v1876_v32, %v1876_v32  ;;  %v1879_v19 = vpack.i.b16 %v1878_v25, %v1877_v1  ;;  %v2053_v44 = vpack.i.b16 %v2016_v28, %v1982_v20  ;;  %v8234_v46 = vcombine.low %v2050_v17, %v2050_v17 }
 0x259   : > { %v1946_v57 = vpop.permute.xlu1 %1945  ;;  %v1950_v24 = vpop.permute.xlu0 %1949  ;;  %v8233_v0 = vcombine.low %v2047_v41, %v2047_v41  ;;  %v2056_v43 = vpack.i.b16 %v2055_v55, %v2054_v16  ;;  %v2060_v56 = vshrl.u32 %v1984_v8, 16  ;;  %v1354_v49 = vsel %vm522_vm8, %v1352_v50, %v9315_v27 }
 0x25a   : > { %1910 = vrot.lane.b32.xlu1 %v8230_v62, %s8646_s6  ;;  %v2021_v48 = vcombine.low %v1938_v9, %v1946_v57  ;;  %v2031_v52 = vcombine.low %v1942_v53, %v1950_v24  ;;  %v8231_v34 = vcombine.low %v1879_v19, %v1879_v19  ;;  %v2061_v9 = vshrl.u32 %v2018_v12, 16 }
 0x25b   : > { %1902 = vrot.lane.b32.xlu0 %v8228_v18, %s8650_s13  ;;  %v8236_v11 = vcombine.low %v2056_v43, %v2056_v43  ;;  %v8235_v6 = vcombine.low %v2053_v44, %v2053_v44  ;;  %v2059_v36 = vpack.i.b16 %v2018_v12, %v1984_v8  ;;  %v1356_v62 = vsel %vm525_vm10, %v1354_v49, %v9382_v38  ;;  %v2186_v8 = vld [vmem:[%s13542_s2 + $0x18] sm:$0xff] }
 0x25c   : > { %v2028_v5 = vrot.slane %v2021_v48, %v8873_v21  ;;  %v2038_v26 = vrot.slane %v2031_v52, %v8873_v21  ;;  %v2062_v58 = vpack.i.b16 %v2061_v9, %v2060_v56 }
 0x25d   : > { %v1506_v42 = vpop.permute.xlu1 %1505  ;;  %v1510_v60 = vpop.permute.xlu0 %1509  ;;  %v8237_v27 = vcombine.low %v2059_v36, %v2059_v36 }
 0x25e   : > { %v1537_v14 = vsel %vm513_vm5, %v1535_v33, %v1506_v42  ;;  %1914 = vrot.lane.b32.xlu1 %v8231_v34, %s8647_s8  ;;  %v2066_v45 = vshrl.u32 %v2028_v5, 16  ;;  %v2067_v1 = vshrl.u32 %v2038_v26, 16  ;;  %v2065_v31 = vpack.i.b16 %v2038_v26, %v2028_v5  ;;  %v2185_v33 = vld [vmem:[%s13542_s2 + $0x10] sm:$0xff] }
 0x25f   : > { %2071 = vrot.lane.b32.xlu0 %v8232_v47, %s8649_s26  ;;  %v1539_v59 = vsel %vm516_vm6, %v1537_v14, %v1510_v60  ;;  %v8238_v19 = vcombine.low %v2062_v58, %v2062_v58  ;;  %v1663_v42 = vpack.i.b16 %v9426_v63, %v9422_v23  ;;  %s8658_s26 = smov 74  }
 0x260   : > { %v2068_v51 = vpack.i.b16 %v2067_v1, %v2066_v45  ;;  %v8239_v24 = vcombine.low %v2065_v31, %v2065_v31 }
 0x261   : > { %v1514_v35 = vpop.permute.xlu1 %1513  ;;  %v1518_v2 = vpop.permute.xlu0 %1517 }
 0x262   : > { %v1541_v53 = vsel %vm519_vm7, %v1539_v59, %v1514_v35  ;;  %2075 = vrot.lane.b32.xlu1 %v8233_v0, %s8651_s10  ;;  %v8240_v18 = vcombine.low %v2068_v51, %v2068_v51  ;;  %s8660_s10 = smov 38  }
 0x263   : > { %2079 = vrot.lane.b32.xlu0 %v8234_v46, %s8652_s14  ;;  %v1543_v32 = vsel %vm522_vm8, %v1541_v53, %v1518_v2  ;;  %s8661_s14 = smov 20  }
 0x265   : > { %v1522_v25 = vpop.permute.xlu1 %1521  ;;  %v1526_v12 = vpop.permute.xlu0 %1525 }
 0x266   : > { %v1545_v20 = vsel %vm525_vm10, %v1543_v32, %v1522_v25  ;;  %2083 = vrot.lane.b32.xlu1 %v8235_v6, %s8648_s9  ;;  %v1547_v6 = vsel %vm528_vm9, %v1522_v25, %v1526_v12  ;;  %s8657_s9 = smov 92  }
 0x267   : > { %v2138_v28 = vrot.slane %v1545_v20, 6  ;;  %2087 = vrot.lane.b32.xlu0 %v8236_v11, %s8653_s15  ;;  %v1358_v20 = vsel %vm528_vm9, %v9382_v38, %v9295_v40  ;;  %s8662_s15 = smov 112  }
 0x269   : > { %v2166_v57 = vsel %vm2148_vm12, %v1356_v62, %v2138_v28  ;;  %v1530_v17 = vpop.permute.xlu1 %1529  ;;  %v1694_v41 = vpop.permute.xlu0 %1693 }
 0x26a   : > { %2091 = vrot.lane.b32.xlu1 %v8237_v27, %s8650_s13  ;;  %v1729_v34 = vsel %vm506_vm3, %v1663_v42, %v1694_v41  ;;  %v1549_v54 = vsel %vm531_vm11, %v1547_v6, %v1530_v17  ;;  %s8659_s13 = smov 56  }
 0x26b   : > { %2095 = vrot.lane.b32.xlu0 %v8238_v19, %s8654_s16  ;;  %v2139_v28 = vrot.slane %v1549_v54, 6 }
 0x26d   : > { %v1698_v16 = vpop.permute.xlu1 %1697  ;;  %v1702_v55 = vpop.permute.xlu0 %1701 }
 0x26e   : > { %2099 = vrot.lane.b32.xlu1 %v8239_v24, %s8646_s6  ;;  %v1731_v14 = vsel %vm510_vm4, %v1729_v34, %v1698_v16 }
 0x26f   : > { %2103 = vrot.lane.b32.xlu0 %v8240_v18, %s8647_s8  ;;  %v1733_v46 = vsel %vm513_vm5, %v1731_v14, %v1702_v55  ;;  %v1360_v18 = vsel %vm531_vm11, %v1358_v20, %v9334_v61  ;;  %s8656_s8 = smov 2  }
 0x270   : > { %v2168_v40 = vsel %vm2148_vm12, %v1360_v18, %v2139_v28 }
 0x271   : > { %v1706_v48 = vpop.permute.xlu1 %1705  ;;  %v1710_v52 = vpop.permute.xlu0 %1709 }
 0x272   : > { %2189 = vperm.xlu1 %8486, %v2183_v30   ;;  %v1735_v0 = vsel %vm516_vm6, %v1733_v46, %v1706_v48  ;;  %v8491_v46 = vld [vmem:[#allocation3 + $0x8] sm:$0xff]  }
 0x273   : > { %2194 = vperm.xlu0 %8487, %v2184_v15   ;;  %v1737_v5 = vsel %vm519_vm7, %v1735_v0, %v1710_v52 }
 0x275   : > { %v1714_v60 = vpop.permute.xlu1 %1713  ;;  %v1718_v47 = vpop.permute.xlu0 %1717 }
 0x276   : > { %2199 = vperm.xlu1 %8486, %v2185_v33   ;;  %v1739_v59 = vsel %vm522_vm8, %v1737_v5, %v1714_v60 }
 0x277   : > { %v1741_v49 = vsel %vm525_vm10, %v1739_v59, %v1718_v47 }
 0x279   : > { %v1722_v50 = vpop.permute.xlu1 %1721  ;;  %v1726_v44 = vpop.permute.xlu0 %1725 }
 0x27a   : > { %2204 = vperm.xlu1 %8486, %v2186_v8   ;;  %v1743_v11 = vsel %vm528_vm9, %v1718_v47, %v1722_v50 }
 0x27b   : > { %v1745_v36 = vsel %vm531_vm11, %v1743_v11, %v1726_v44  ;;  %v8490_v44 = vld [vmem:[#allocation3] sm:$0xff]  }
 0x27c   : > { %v2143_v62 = vrot.slane %v1745_v36, 4 }
 0x27e   : > { %v2172_v38 = vsel %vm2153_vm13, %v2168_v40, %v2143_v62 }
 0x2c0   : > { %v1883_v43 = vpop.permute.xlu1 %1882 }
 0x2c1   : > { %v1887_v56 = vpop.permute.xlu0 %1886  ;;  %v1918_v23 = vsel %vm506_vm3, %v1852_v37, %v1883_v43  ;;  %v2142_v37 = vrot.slane %v1741_v49, 4 }
 0x2c2   : > { %v1920_v35 = vsel %vm510_vm4, %v1918_v23, %v1887_v56 }
 0x2c3   : > { %v2170_v24 = vsel %vm2153_vm13, %v2166_v57, %v2142_v37 }
 0x2c4   : > { %v1891_v63 = vpop.permute.xlu1 %1890 }
 0x2c5   : > { %v1895_v26 = vpop.permute.xlu0 %1894  ;;  %v1922_v9 = vsel %vm513_vm5, %v1920_v35, %v1891_v63 }
 0x2c6   : > { %v1924_v39 = vsel %vm516_vm6, %v1922_v9, %v1895_v26 }
 0x2c8   : > { %v1899_v53 = vpop.permute.xlu1 %1898 }
 0x2c9   : > { %v1907_v2 = vpop.permute.xlu0 %1906  ;;  %v1926_v45 = vsel %vm519_vm7, %v1924_v39, %v1899_v53 }
 0x2cc   : > { %v1911_v1 = vpop.permute.xlu1 %1910 }
 0x2cd   : > { %v1903_v32 = vpop.permute.xlu0 %1902  ;;  %v1932_v31 = vsel %vm528_vm9, %v1907_v2, %v1911_v1 }
 0x2ce   : > { %v1928_v58 = vsel %vm522_vm8, %v1926_v45, %v1903_v32 }
 0x2cf   : > { %v1930_v25 = vsel %vm525_vm10, %v1928_v58, %v1907_v2 }
 0x2d0   : > { %v2146_v27 = vrot.slane %v1930_v25, 2  ;;  %v1915_v51 = vpop.permute.xlu1 %1914 }
 0x2d1   : > { %v2072_v19 = vpop.permute.xlu0 %2071  ;;  %v1934_v30 = vsel %vm531_vm11, %v1932_v31, %v1915_v51 }
 0x2d2   : > { %v2174_v15 = vsel %vm2158_vm14, %v2170_v24, %v2146_v27  ;;  %v2147_v33 = vrot.slane %v1934_v30, 2  ;;  %v2107_v8 = vsel %vm506_vm3, %v2041_v22, %v2072_v19  ;;  %vm3233_vm3 = vcmp.ge.s32.totalorder %v8841_v7, 1 }
 0x2d4   : > { %v2076_v12 = vpop.permute.xlu1 %2075  ;;  %v2177_v57 = vsel %vm2158_vm14, %v2172_v38, %v2147_v33 }
 0x2d5   : > { %v2080_v17 = vpop.permute.xlu0 %2079  ;;  %v2109_v61 = vsel %vm510_vm4, %v2107_v8, %v2076_v12  ;;  %2229 = vmatprep.subr.bf16.mxu0 %v2177_v57 }
 0x2d6   : > { %2230 = vmatpush1.bf16.msra.mxu0 %v2174_v15  ;;  %v2111_v41 = vsel %vm513_vm5, %v2109_v61, %v2080_v17 }
 0x2d8   : > { %v2084_v16 = vpop.permute.xlu1 %2083 }
 0x2d9   : > { %v2088_v55 = vpop.permute.xlu0 %2087  ;;  %v2113_v48 = vsel %vm516_vm6, %v2111_v41, %v2084_v16  ;;  %v3229_v41 = vand.u32 127, %v363_v4 }
 0x2da   : > { %v2115_v52 = vsel %vm519_vm7, %v2113_v48, %v2088_v55 }
 0x2db   : > { %vm3231_vm5 = vcmp.le.s32.totalorder %v3229_v41, 16 }
 0x2dc   : > { %v2092_v42 = vpop.permute.xlu1 %2091 }
 0x2dd   : > { %v2096_v3 = vpop.permute.xlu0 %2095  ;;  %v2117_v29 = vsel %vm522_vm8, %v2115_v52, %v2092_v42  ;;  %v3237_v42 = vstv %s3236_s29 }
 0x2de   : > { %v2119_v47 = vsel %vm525_vm10, %v2117_v29, %v2096_v3  ;;  %vm9734_vm6 = vcmp.eq.s32.totalorder %v3237_v42, 1 }
 0x2df   : > { %v2223_v50 = vsel %vm2148_vm12, %v2119_v47, 0 }
 0x2e0   : > { %v2100_v22 = vpop.permute.xlu1 %2099 }
 0x2e1   : > { %v2104_v60 = vpop.permute.xlu0 %2103  ;;  %v2121_v34 = vsel %vm528_vm9, %v2096_v3, %v2100_v22 }
 0x2e2   : > { %v2123_v14 = vsel %vm531_vm11, %v2121_v34, %v2104_v60  ;;  %vm3239_vm11 = vmor %vm3233_vm3, %vm9734_vm6  ;;  %vm3727_vm3 = vcmask 785408  }
 0x2e3   : > { %8243 = vmatprep.subr.msk.bf16.mxu0 %vm2148_vm12, %v2123_v14 }
 0x2e4   : > { %2232 = vmatpush1.bf16.msra.mxu0 %v2223_v50 }
 0x2e7   : > { %8244 = vmatmul.mubr.msk.bf16.vlgmr.msra.gmra.mrb[0].mxu0 %vm510_vm4, %v8490_v44 }
 0x2e8   : > { %2269 = vmatprep.mubr.bf16.mxu0 %v8644_v10 }
 0x2ef   : > { %8245 = vmatmul.mubr.msk.bf16.gmra.mrb[4].mxu0 %vm510_vm4, %v8491_v46  ;;  %vm3230_vm4 = vcmp.ge.s32.totalorder %v3229_v41, 1 }
 0x2f0   : > { %vm9769_vm10 = vmand %vm3230_vm4, %vm3231_vm5  ;;  %vm3732_vm4 = vcmask 916480  }
 0x2f1   : > { %v2190_v0 = vpop.permute.xlu1 %2189  ;;  %vm9796_vm12 = vmand %vm9769_vm10, %vm3239_vm11 }
 0x2f2   : > { %v2195_v23 = vpop.permute.xlu0 %2194 }
 0x2f5   : > { %v2200_v37 = vpop.permute.xlu1 %2199 }
 0x2f9   : > { %v2205_v1 = vpop.permute.xlu1 %2204 }
 0x3ba   : > { %v2261_v43 = vpop.f32.mrb[0].mxu0 }
 0x3bb   : > { %v2262_v56 = vadd.f32 %v2261_v43, %v2190_v0  ;;  %v2263_v5 = vpop.f32.mrb[1].mxu0  ;;  %v3247_v43 = vstv %s9726_s12 }
 0x3bc   : > { %v2264_v63 = vadd.f32 %v2263_v5, %v2190_v0  ;;  %v2265_v26 = vpop.f32.mrb[2].mxu0  ;;  %v9741_v0 = vadd.s32 8, %v8841_v7  ;;  %vm9752_vm8 = vcmp.eq.s32.totalorder %v3247_v43, 1 }
 0x3bd   : > { %v9637_v59 = vmax.f32 %v2262_v56, 0.0  ;;  %v2267_v35 = vpop.f32.mrb[3].mxu0  ;;  %v2266_v53 = vadd.f32 %v2265_v26, %v2195_v23 }
 0x3be   : > { %v2281_v9 = vmax.f32 %v2264_v63, 0.0  ;;  %v2268_v54 = vadd.f32 %v2267_v35, %v2195_v23  ;;  %vm3244_vm7 = vcmp.le.s32.totalorder %v9741_v0, 8 }
 0x3bf   : > { %2292 = vrot.lane.b32.xlu0 %v9637_v59, %s8655_s27  ;;  %v9642_v10 = vmax.f32 %v2266_v53, 0.0  ;;  %vm3250_vm13 = vmor %vm3244_vm7, %vm9752_vm8 }
 0x3c0   : > { %2370 = vrot.lane.b32.xlu1 %v2281_v9, %s8656_s8  ;;  %v2283_v39 = vmax.f32 %v2268_v54, 0.0  ;;  %vm9858_vm14 = vmand %vm9769_vm10, %vm3250_vm13 }
 0x3c2   : > { %v2271_v2 = vpop.f32.mrb[4].mxu0 }
 0x3c3   : > { %v2273_v49 = vpop.f32.mrb[5].mxu0  ;;  %2304 = vrot.lane.b32.xlu0 %v9637_v59, %s8657_s9  ;;  %v2272_v36 = vadd.f32 %v2271_v2, %v2200_v37 }
 0x3c4   : > { %v2275_v11 = vpop.f32.mrb[6].mxu0  ;;  %2294 = vrot.lane.b32.xlu1 %v9642_v10, %s8655_s27  ;;  %v2274_v45 = vadd.f32 %v2273_v49, %v2200_v37 }
 0x3c5   : > { %v2277_v6 = vpop.f32.mrb[7].mxu0  ;;  %v9675_v32 = vmax.f32 %v2272_v36, 0.0  ;;  %v2276_v20 = vadd.f32 %v2275_v11, %v2205_v1 }
 0x3c6   : > { %v2285_v58 = vmax.f32 %v2274_v45, 0.0  ;;  %v2278_v25 = vadd.f32 %v2277_v6, %v2205_v1 }
 0x3c7   : > { %2316 = vrot.lane.b32.xlu0 %v9637_v59, %s8658_s26  ;;  %v9680_v28 = vmax.f32 %v2276_v20, 0.0 }
 0x3c8   : > { %2306 = vrot.lane.b32.xlu1 %v9642_v10, %s8657_s9  ;;  %v2287_v62 = vmax.f32 %v2278_v25, 0.0 }
 0x3cb   : > { %2328 = vrot.lane.b32.xlu0 %v9637_v59, %s8659_s13 }
 0x3cc   : > { %2318 = vrot.lane.b32.xlu1 %v9642_v10, %s8658_s26 }
 0x3cf   : > { %2340 = vrot.lane.b32.xlu0 %v9637_v59, %s8660_s10 }
 0x3d0   : > { %2330 = vrot.lane.b32.xlu1 %v9642_v10, %s8659_s13 }
 0x3d3   : > { %2352 = vrot.lane.b32.xlu0 %v9637_v59, %s8661_s14 }
 0x3d4   : > { %2342 = vrot.lane.b32.xlu1 %v9642_v10, %s8660_s10 }
 0x3d7   : > { %2368 = vrot.lane.b32.xlu0 %v9637_v59, %s8656_s8 }
 0x3d8   : > { %2354 = vrot.lane.b32.xlu1 %v9642_v10, %s8661_s14 }
 0x3db   : > { %2393 = vrot.lane.b32.xlu0 %v2281_v9, %s8662_s15 }
 0x3dc   : > { %2374 = vrot.lane.b32.xlu1 %v2283_v39, %s8656_s8 }
 0x3df   : > { %2405 = vrot.lane.b32.xlu0 %v2281_v9, %s8663_s25 }
 0x3e0   : > { %2395 = vrot.lane.b32.xlu1 %v2283_v39, %s8662_s15 }
 0x3e3   : > { %2372 = vrot.lane.b32.xlu0 %v9642_v10, %s8656_s8 }
 0x3e4   : > { %2407 = vrot.lane.b32.xlu1 %v2283_v39, %s8663_s25 }
 0x3e7   : > { %2296 = vrot.lane.b32.xlu0 %v9675_v32, %s8655_s27 }
 0x3e8   : > { %2378 = vrot.lane.b32.xlu1 %v2285_v58, %s8656_s8 }
 0x3eb   : > { %2308 = vrot.lane.b32.xlu0 %v9675_v32, %s8657_s9 }
 0x3ec   : > { %2298 = vrot.lane.b32.xlu1 %v9680_v28, %s8655_s27 }
 0x3ef   : > { %2320 = vrot.lane.b32.xlu0 %v9675_v32, %s8658_s26 }
 0x3f0   : > { %2310 = vrot.lane.b32.xlu1 %v9680_v28, %s8657_s9 }
 0x3f3   : > { %2332 = vrot.lane.b32.xlu0 %v9675_v32, %s8659_s13 }
 0x3f4   : > { %2322 = vrot.lane.b32.xlu1 %v9680_v28, %s8658_s26 }
 0x3f7   : > { %2344 = vrot.lane.b32.xlu0 %v9675_v32, %s8660_s10 }
 0x3f8   : > { %2334 = vrot.lane.b32.xlu1 %v9680_v28, %s8659_s13 }
 0x3fb   : > { %2356 = vrot.lane.b32.xlu0 %v9675_v32, %s8661_s14 }
 0x3fc   : > { %2346 = vrot.lane.b32.xlu1 %v9680_v28, %s8660_s10 }
 0x3ff   : > { %2376 = vrot.lane.b32.xlu0 %v9675_v32, %s8656_s8 }
 0x400   : > { %2358 = vrot.lane.b32.xlu1 %v9680_v28, %s8661_s14 }
 0x403   : > { %2397 = vrot.lane.b32.xlu0 %v2285_v58, %s8662_s15 }
 0x404   : > { %2382 = vrot.lane.b32.xlu1 %v2287_v62, %s8656_s8 }
 0x407   : > { %2409 = vrot.lane.b32.xlu0 %v2285_v58, %s8663_s25 }
 0x408   : > { %2399 = vrot.lane.b32.xlu1 %v2287_v62, %s8662_s15 }
 0x40b   : > { %2380 = vrot.lane.b32.xlu0 %v9680_v28, %s8656_s8 }
 0x40c   : > { %2411 = vrot.lane.b32.xlu1 %v2287_v62, %s8663_s25 }
 0x431   : > { %v2293_v27 = vpop.permute.xlu0 %2292 }
 0x432   : > { %v2371_v31 = vpop.permute.xlu1 %2370 }
 0x435   : > { %v2305_v51 = vpop.permute.xlu0 %2304 }
 0x436   : > { %v2295_v19 = vpop.permute.xlu1 %2294  ;;  %v2417_v38 = vcombine.low %v9637_v59, %v2305_v51  ;;  %v2418_v8 = vcombine.high %v9637_v59, %v2305_v51 }
 0x438   : > { %v2425_v55 = vrot.slane %v2417_v38, %v8847_v13  ;;  %v2432_v3 = vrot.slane %v2418_v8, %v8847_v13 }
 0x439   : > { %v2317_v24 = vpop.permute.xlu0 %2316 }
 0x43a   : > { %v2307_v18 = vpop.permute.xlu1 %2306  ;;  %v2433_v15 = vcombine.low %v2293_v27, %v2317_v24  ;;  %v2434_v40 = vcombine.high %v2293_v27, %v2317_v24  ;;  %v13552_v24 = vmov 0.0  }
 0x43b   : > { %v2619_v48 = vcombine.low %v9642_v10, %v2307_v18  ;;  %v2620_v29 = vcombine.high %v9642_v10, %v2307_v18 }
 0x43c   : > { %v2441_v17 = vrot.slane %v2433_v15, %v8847_v13  ;;  %v2448_v16 = vrot.slane %v2434_v40, %v8847_v13 }
 0x43d   : > { %v2329_v30 = vpop.permute.xlu0 %2328  ;;  %v2627_v44 = vrot.slane %v2619_v48, %v8847_v13  ;;  %v2634_v5 = vrot.slane %v2620_v29, %v8847_v13 }
 0x43e   : > { %v2319_v33 = vpop.permute.xlu1 %2318  ;;  %v2481_v4 = vcombine.low %v2425_v55, %v2441_v17  ;;  %v2482_v34 = vcombine.high %v2425_v55, %v2441_v17  ;;  %v2497_v14 = vcombine.low %v2432_v3, %v2448_v16  ;;  %v2498_v56 = vcombine.high %v2432_v3, %v2448_v16 }
 0x43f   : > { %v2635_v57 = vcombine.low %v2295_v19, %v2319_v33  ;;  %v2636_v52 = vcombine.high %v2295_v19, %v2319_v33 }
 0x440   : > { %v2489_v59 = vrot.slane %v2481_v4, %v8873_v21  ;;  %v2496_v2 = vrot.slane %v2482_v34, %v8873_v21  ;;  %v2505_v49 = vrot.slane %v2497_v14, %v8873_v21  ;;  %v2512_v27 = vrot.slane %v2498_v56, %v8873_v21 }
 0x441   : > { %v2341_v12 = vpop.permute.xlu0 %2340  ;;  %v2643_v60 = vrot.slane %v2635_v57, %v8847_v13  ;;  %v2650_v46 = vrot.slane %v2636_v52, %v8847_v13 }
 0x442   : > { %v9718_v61 = vpop.permute.xlu1 %2330 }
 0x443   : > { %v2683_v35 = vcombine.low %v2627_v44, %v2643_v60  ;;  %v2684_v9 = vcombine.high %v2627_v44, %v2643_v60  ;;  %v2699_v54 = vcombine.low %v2634_v5, %v2650_v46  ;;  %v2700_v39 = vcombine.high %v2634_v5, %v2650_v46 }
 0x445   : > { %v2353_v22 = vpop.permute.xlu0 %2352  ;;  %v9765_v51 = vrot.slane %v2684_v9, %v8873_v21  ;;  %v9779_v8 = vrot.slane %v2699_v54, %v8873_v21 }
 0x446   : > { %v9732_v47 = vpop.permute.xlu1 %2342  ;;  %v2449_v23 = vcombine.low %v2329_v30, %v2353_v22  ;;  %v2450_v63 = vcombine.high %v2329_v30, %v2353_v22 }
 0x448   : > { %v2457_v1 = vrot.slane %v2449_v23, %v8847_v13  ;;  %v2464_v58 = vrot.slane %v2450_v63, %v8847_v13 }
 0x449   : > { %v2369_v26 = vpop.permute.xlu0 %2368 }
 0x44a   : > { %v2385_v53 = vsel %vm2384_vm2, %v2369_v26, %v2371_v31  ;;  %v2355_v10 = vpop.permute.xlu1 %2354  ;;  %v9762_v31 = vrot.slane %v2683_v35, %v8873_v21 }
 0x44b   : > { %v2465_v11 = vcombine.low %v2341_v12, %v2385_v53  ;;  %v2466_v6 = vcombine.high %v2341_v12, %v2385_v53  ;;  %v2651_v37 = vcombine.low %v9718_v61, %v2355_v10  ;;  %v2652_v36 = vcombine.high %v9718_v61, %v2355_v10 }
 0x44c   : > { %v9782_v12 = vrot.slane %v2700_v39, %v8873_v21 }
 0x44d   : > { %v2473_v20 = vrot.slane %v2465_v11, %v8847_v13  ;;  %v2480_v25 = vrot.slane %v2466_v6, %v8847_v13  ;;  %v2394_v62 = vpop.permute.xlu0 %2393  ;;  %v9785_v17 = vrot.slane %v2651_v37, %v8847_v13  ;;  %v9788_v57 = vrot.slane %v2652_v36, %v8847_v13 }
 0x44e   : > { %v2553_v18 = vcombine.high %v2394_v62, %v13552_v24  ;;  %v2375_v30 = vpop.permute.xlu1 %2374  ;;  %v2560_v52 = vrot.slane %v2394_v62, %v8847_v13 }
 0x44f   : > { %v2513_v15 = vcombine.low %v2457_v1, %v2473_v20  ;;  %v2514_v33 = vcombine.high %v2457_v1, %v2473_v20  ;;  %v2529_v40 = vcombine.low %v2464_v58, %v2480_v25  ;;  %v2530_v38 = vcombine.high %v2464_v58, %v2480_v25 }
 0x450   : > { %v2567_v42 = vrot.slane %v2553_v18, %v8847_v13 }
 0x451   : > { %v2521_v61 = vrot.slane %v2513_v15, %v8873_v21  ;;  %v2528_v7 = vrot.slane %v2514_v33, %v8873_v21  ;;  %v2537_v41 = vrot.slane %v2529_v40, %v8873_v21  ;;  %v2544_v16 = vrot.slane %v2530_v38, %v8873_v21  ;;  %v2406_v55 = vpop.permute.xlu0 %2405 }
 0x452   : > { %v2568_v3 = vcombine.high %v2406_v55, %v13552_v24  ;;  %v2575_v29 = vrot.slane %v2406_v55, %v8847_v13  ;;  %v2396_v22 = vpop.permute.xlu1 %2395 }
 0x453   : > { %v2545_v4 = vcombine.low %v2489_v59, %v2521_v61  ;;  %v2546_v60 = vcombine.high %v2489_v59, %v2521_v61  ;;  %v2547_v34 = vcombine.low %v2496_v2, %v2528_v7  ;;  %v2548_v14 = vcombine.high %v2496_v2, %v2528_v7 }
 0x454   : > { %v2549_v50 = vcombine.low %v2505_v49, %v2537_v41  ;;  %v2550_v44 = vcombine.high %v2505_v49, %v2537_v41  ;;  %v2551_v46 = vcombine.low %v2512_v27, %v2544_v16  ;;  %v2552_v43 = vcombine.high %v2512_v27, %v2544_v16 }
 0x455   : > { %v9806_v56 = vsel %vm9796_vm12, %v2546_v60, 0.0  ;;  %v9810_v5 = vsel %vm9796_vm12, %v2548_v14, 0.0  ;;  %v3257_v23 = vsel %vm9796_vm12, %v2545_v4, 0.0  ;;  %v3261_v63 = vsel %vm9796_vm12, %v2547_v34, 0.0  ;;  %v2373_v26 = vpop.permute.xlu0 %2372 }
 0x456   : > { %13848 = vst [vmem:[#allocation12_spill] sm:$0xff] %v9806_v56  ;;  %13849 = vst [vmem:[#allocation13_spill] sm:$0xff] %v9810_v5  ;;  %v9818_v59 = vsel %vm9796_vm12, %v2549_v50, 0.0  ;;  %v9822_v35 = vsel %vm9796_vm12, %v2550_v44, 0.0  ;;  %v9826_v9 = vsel %vm9796_vm12, %v2551_v46, 0.0  ;;  %v9830_v53 = vsel %vm9796_vm12, %v2552_v43, 0.0  ;;  %v2408_v10 = vpop.permute.xlu1 %2407 }
 0x457   : > { %13850 = vst [vmem:[#allocation14_spill] sm:$0xff] %v9822_v35  ;;  %13851 = vst [vmem:[#allocation15_spill] sm:$0xff] %v9830_v53  ;;  %v8246_v11 = vpack.c.bf16 %v9818_v59, %v3257_v23  ;;  %v8247_v6 = vpack.c.bf16 %v9826_v9, %v3261_v63  ;;  %v2582_v54 = vrot.slane %v2568_v3, %v8847_v13 }
 0x458   : > { %v2583_v39 = vcombine.low %v2560_v52, %v2575_v29  ;;  %v2584_v37 = vcombine.high %v2560_v52, %v2575_v29  ;;  %v2755_v36 = vcombine.high %v2396_v22, %v13552_v24  ;;  %v9851_v45 = vrot.slane %v2396_v22, %v8847_v13 }
 0x459   : > { %v9845_v1 = vrot.slane %v8246_v11, %v8847_v13  ;;  %v9848_v58 = vrot.slane %v8247_v6, %v8847_v13  ;;  %v2386_v0 = vsel %vm2384_vm2, %v2373_v26, %v2375_v30  ;;  %v9854_v20 = vpop.permute.xlu0 %2296  ;;  %v2599_v18 = vcombine.low %v2567_v42, %v2582_v54 }
 0x45a   : > { %v2591_v62 = vrot.slane %v2583_v39, %v8873_v21  ;;  %v2598_v27 = vrot.slane %v2584_v37, %v8873_v21  ;;  %v2600_v15 = vcombine.high %v2567_v42, %v2582_v54  ;;  %v9864_v33 = vpop.permute.xlu1 %2378  ;;  %v9867_v40 = vrot.slane %v2755_v36, %v8847_v13 }
 0x45b   : > { %v2667_v30 = vcombine.low %v9732_v47, %v2386_v0  ;;  %v2668_v38 = vcombine.high %v9732_v47, %v2386_v0  ;;  %v2770_v19 = vcombine.high %v2408_v10, %v13552_v24  ;;  %v9873_v61 = vrot.slane %v2599_v18, %v8873_v21 }
 0x45c   : > { %v9876_v7 = vrot.slane %v2600_v15, %v8873_v21  ;;  %v2615_v41 = vcombine.high %v2591_v62, %v13552_v24  ;;  %v9880_v16 = vcombine.high %v2598_v27, %v13552_v24  ;;  %v3258_v55 = vsel %vm9858_vm14, %v2591_v62, 0.0 }
 0x45d   : > { %v3262_v52 = vsel %vm9858_vm14, %v2598_v27, 0.0  ;;  %v2675_v47 = vrot.slane %v2667_v30, %v8847_v13  ;;  %v2682_v42 = vrot.slane %v2668_v38, %v8847_v13  ;;  %v9888_v3 = vpop.permute.xlu0 %2308  ;;  %v9892_v29 = vcombine.high %v9873_v61, %v13552_v24 }
 0x45e   : > { %v9896_v22 = vcombine.high %v9876_v7, %v13552_v24  ;;  %v3260_v4 = vsel %vm9858_vm14, %v2615_v41, 0.0  ;;  %v3264_v60 = vsel %vm9858_vm14, %v9880_v16, 0.0  ;;  %v9903_v34 = vpop.permute.xlu1 %2298  ;;  %v3266_v14 = vsel %vm9858_vm14, %v9873_v61, 0.0 }
 0x45f   : > { %v3270_v50 = vsel %vm9858_vm14, %v9876_v7, 0.0  ;;  %v9911_v44 = vpack.c.bf16 %v3258_v55, %v3257_v23  ;;  %v9913_v46 = vpack.c.bf16 %v3262_v52, %v3261_v63  ;;  %v2715_v43 = vcombine.low %v9785_v17, %v2675_v47 }
 0x460   : > { %v2716_v26 = vcombine.high %v9785_v17, %v2675_v47  ;;  %v2731_v11 = vcombine.low %v9788_v57, %v2682_v42  ;;  %v2732_v6 = vcombine.high %v9788_v57, %v2682_v42  ;;  %v2777_v54 = vrot.slane %v2408_v10, %v8847_v13 }
 0x461   : > { %13854 = vst [vmem:[#allocation16_spill] sm:$0xff] %v9911_v44  ;;  %13855 = vst [vmem:[#allocation17_spill] sm:$0xff] %v9913_v46  ;;  %v2784_v39 = vrot.slane %v2770_v19, %v8847_v13  ;;  %3771 = vrot.lane.b32.xlu0 %v9911_v44, %s8645_s18  ;;  %v9924_v23 = vpack.c.bf16 %v3260_v4, %v9806_v56  ;;  %v2821_v63 = vcombine.low %v9675_v32, %v9888_v3  ;;  %v9928_v37 = vpop.permute.xlu0 %2320  ;;  %v13867_v56 = vmov 0.0  }
 0x462   : > { %v2723_v17 = vrot.slane %v2715_v43, %v8873_v21  ;;  %v2730_v36 = vrot.slane %v2716_v26, %v8873_v21  ;;  %v2739_v57 = vrot.slane %v2731_v11, %v8873_v21  ;;  %v2746_v10 = vrot.slane %v2732_v6, %v8873_v21  ;;  %v9934_v0 = vpop.permute.xlu1 %2310 }
 0x463   : > { %13856 = vst [vmem:[#allocation18_spill] sm:$0xff] %v9924_v23  ;;  %v2785_v62 = vcombine.low %v9851_v45, %v2777_v54  ;;  %v2786_v27 = vcombine.high %v9851_v45, %v2777_v54  ;;  %v2801_v18 = vcombine.low %v9867_v40, %v2784_v39  ;;  %v2802_v15 = vcombine.high %v9867_v40, %v2784_v39 }
 0x464   : > { %3773 = vrot.lane.b32.xlu1 %v9924_v23, %s8645_s18  ;;  %v2747_v30 = vcombine.low %v9762_v31, %v2723_v17  ;;  %v2748_v38 = vcombine.high %v9762_v31, %v2723_v17  ;;  %v2749_v19 = vcombine.low %v9765_v51, %v2730_v36  ;;  %v2750_v41 = vcombine.high %v9765_v51, %v2730_v36 }
 0x465   : > { %v2751_v55 = vcombine.low %v9779_v8, %v2739_v57  ;;  %v2752_v52 = vcombine.high %v9779_v8, %v2739_v57  ;;  %v2753_v45 = vcombine.low %v9782_v12, %v2746_v10  ;;  %v2754_v47 = vcombine.high %v9782_v12, %v2746_v10  ;;  %3775 = vrot.lane.b32.xlu0 %v9913_v46, %s8645_s18  ;;  %v9952_v40 = vpop.permute.xlu0 %2332 }
 0x466   : > { %v9956_v31 = vsel %vm9796_vm12, %v2748_v38, 0.0  ;;  %v9960_v51 = vsel %vm9796_vm12, %v2750_v41, 0.0  ;;  %v2793_v42 = vrot.slane %v2785_v62, %v8873_v21  ;;  %v2800_v8 = vrot.slane %v2786_v27, %v8873_v21  ;;  %v9964_v4 = vpop.permute.xlu1 %2322 }
 0x467   : > { %13857 = vst [vmem:[#allocation19_spill] sm:$0xff] %v9960_v51  ;;  %v9968_v12 = vsel %vm9796_vm12, %v2751_v55, 0.0  ;;  %v9972_v43 = vsel %vm9796_vm12, %v2752_v52, 0.0  ;;  %v9976_v26 = vsel %vm9796_vm12, %v2753_v45, 0.0  ;;  %v9980_v11 = vsel %vm9796_vm12, %v2754_v47, 0.0 }
 0x468   : > { %13858 = vst [vmem:[#allocation20_spill] sm:$0xff] %v9980_v11  ;;  %v9987_v39 = vrot.slane %v2801_v18, %v8873_v21  ;;  %v9990_v17 = vrot.slane %v2802_v15, %v8873_v21  ;;  %v9993_v36 = vcombine.high %v2793_v42, %v13552_v24  ;;  %v9996_v57 = vcombine.high %v2800_v8, %v13552_v24 }
 0x469   : > { %v3273_v10 = vsel %vm9796_vm12, %v2747_v30, 0.0  ;;  %v3274_v62 = vsel %vm9858_vm14, %v2793_v42, 0.0  ;;  %v10002_v27 = vpop.permute.xlu0 %2344  ;;  %v3277_v38 = vsel %vm9796_vm12, %v2749_v19, 0.0  ;;  %v3278_v41 = vsel %vm9858_vm14, %v2800_v8, 0.0 }
 0x46a   : > { %v10006_v18 = vcombine.high %v9987_v39, %v13552_v24  ;;  %v10010_v15 = vcombine.high %v9990_v17, %v13552_v24  ;;  %v10016_v30 = vpop.permute.xlu1 %2334  ;;  %v10030_v47 = vpack.c.bf16 %v3274_v62, %v3273_v10  ;;  %v10032_v42 = vpack.c.bf16 %v3278_v41, %v3277_v38 }
 0x46b   : > { %v8248_v8 = vpack.c.bf16 %v9968_v12, %v3273_v10  ;;  %v8249_v54 = vpack.c.bf16 %v9976_v26, %v3277_v38  ;;  %v2822_v6 = vcombine.high %v9675_v32, %v9888_v3  ;;  %v2829_v49 = vrot.slane %v2821_v63, %v8847_v13 }
 0x46c   : > { %13859 = vst [vmem:[#allocation21_spill] sm:$0xff] %v10030_v47  ;;  %13860 = vst [vmem:[#allocation22_spill] sm:$0xff] %v10032_v42  ;;  %v10044_v2 = vpack.c.bf16 %v3264_v60, %v9810_v5  ;;  %v2837_v62 = vcombine.low %v9854_v20, %v9928_v37  ;;  %v2838_v32 = vcombine.high %v9854_v20, %v9928_v37 }
 0x46d   : > { %v2357_v41 = vpop.permute.xlu0 %2356  ;;  %v10049_v10 = vrot.slane %v8248_v8, %v8847_v13  ;;  %v10052_v38 = vrot.slane %v8249_v54, %v8847_v13  ;;  %v3023_v3 = vcombine.low %v9680_v28, %v9934_v0  ;;  %v2836_v16 = vrot.slane %v2822_v6, %v8847_v13 }
 0x46e   : > { %13861 = vst [vmem:[#allocation23_spill] sm:$0xff] %v10044_v2  ;;  %v10058_v63 = vpop.permute.xlu1 %2346  ;;  %3777 = vrot.lane.b32.xlu1 %v10044_v2, %s8645_s18  ;;  %v2845_v60 = vrot.slane %v2837_v62, %v8847_v13  ;;  %v3024_v8 = vcombine.high %v9680_v28, %v9934_v0  ;;  %v10071_v20 = vpack.c.bf16 %v3266_v14, %v9818_v59  ;;  %v3268_v6 = vsel %vm9858_vm14, %v9892_v29, 0.0 }
 0x46f   : > { %13862 = vst [vmem:[#allocation24_spill] sm:$0xff] %v10049_v10  ;;  %v2852_v37 = vrot.slane %v2838_v32, %v8847_v13  ;;  %v3031_v54 = vrot.slane %v3023_v3, %v8847_v13  ;;  %v3039_v62 = vcombine.low %v9903_v34, %v9964_v4  ;;  %v10084_v59 = vpack.c.bf16 %v3268_v6, %v9822_v35 }
 0x470   : > { %13863 = vst [vmem:[#allocation25_spill] sm:$0xff] %v10071_v20  ;;  %v2885_v19 = vcombine.low %v2829_v49, %v2845_v60  ;;  %v2886_v28 = vcombine.high %v2829_v49, %v2845_v60  ;;  %v3038_v0 = vrot.slane %v3024_v8, %v8847_v13  ;;  %3779 = vrot.lane.b32.xlu0 %v10071_v20, %s8645_s18 }
 0x471   : > { %13864 = vst [vmem:[#allocation26_spill] sm:$0xff] %v10084_v59  ;;  %v2377_v61 = vpop.permute.xlu0 %2376  ;;  %v2901_v14 = vcombine.low %v2836_v16, %v2852_v37  ;;  %v2902_v32 = vcombine.high %v2836_v16, %v2852_v37  ;;  %v3040_v3 = vcombine.high %v9903_v34, %v9964_v4  ;;  %v3047_v29 = vrot.slane %v3039_v62, %v8847_v13 }
 0x472   : > { %v2359_v45 = vpop.permute.xlu1 %2358  ;;  %v10090_v52 = vrot.slane %v2885_v19, %v8873_v21  ;;  %v10093_v49 = vrot.slane %v2886_v28, %v8873_v21  ;;  %3781 = vrot.lane.b32.xlu1 %v10084_v59, %s8645_s18  ;;  %v10102_v16 = vpack.c.bf16 %v3270_v50, %v9826_v9  ;;  %v3272_v34 = vsel %vm9858_vm14, %v9896_v22, 0.0 }
 0x473   : > { %v10108_v4 = vrot.slane %v2901_v14, %v8873_v21  ;;  %v10111_v19 = vrot.slane %v2902_v32, %v8873_v21  ;;  %v3054_v60 = vrot.slane %v3040_v3, %v8847_v13  ;;  %v3087_v8 = vcombine.low %v3031_v54, %v3047_v29 }
 0x474   : > { %13865 = vst [vmem:[#allocation27_spill] sm:$0xff] %v10102_v16  ;;  %v3088_v37 = vcombine.high %v3031_v54, %v3047_v29  ;;  %3783 = vrot.lane.b32.xlu0 %v10102_v16, %s8645_s18  ;;  %v10117_v9 = vpack.c.bf16 %v3272_v34, %v9830_v53  ;;  %v2853_v7 = vcombine.low %v9952_v40, %v2357_v41 }
 0x475   : > { %v2854_v22 = vcombine.high %v9952_v40, %v2357_v41  ;;  %v2398_v50 = vpop.permute.xlu0 %2397  ;;  %v10122_v6 = vrot.slane %v3087_v8, %v8873_v21  ;;  %v3103_v62 = vcombine.low %v3038_v0, %v3054_v60  ;;  %v3104_v28 = vcombine.high %v3038_v0, %v3054_v60 }
 0x476   : > { %13866 = vst [vmem:[#allocation28_spill] sm:$0xff] %v10117_v9  ;;  %v2387_v14 = vsel %vm2384_vm2, %v2377_v61, %v9864_v33  ;;  %v10126_v54 = vpop.permute.xlu1 %2382  ;;  %v10129_v32 = vrot.slane %v3088_v37, %v8873_v21  ;;  %3785 = vrot.lane.b32.xlu1 %v10117_v9, %s8645_s18  ;;  %v2861_v3 = vrot.slane %v2853_v7, %v8847_v13 }
 0x477   : > { %v2868_v40 = vrot.slane %v2854_v22, %v8847_v13  ;;  %v2869_v41 = vcombine.low %v10002_v27, %v2387_v14  ;;  %v10137_v29 = vrot.slane %v3103_v62, %v8873_v21  ;;  %v10140_v0 = vrot.slane %v3104_v28, %v8873_v21 }
 0x478   : > { %v2870_v33 = vcombine.high %v10002_v27, %v2387_v14  ;;  %v3055_v61 = vcombine.low %v10016_v30, %v2359_v45  ;;  %4247 = vrot.lane.b32.xlu0 %v9911_v44, %s8654_s16  ;;  %v3056_v60 = vcombine.high %v10016_v30, %v2359_v45  ;;  %v2957_v8 = vcombine.high %v2398_v50, %v13552_v24 }
 0x479   : > { %v2877_v34 = vrot.slane %v2869_v41, %v8847_v13  ;;  %v2964_v37 = vrot.slane %v2398_v50, %v8847_v13  ;;  %v2410_v7 = vpop.permute.xlu0 %2409 }
 0x47a   : > { %v2884_v22 = vrot.slane %v2870_v33, %v8847_v13  ;;  %v10152_v62 = vrot.slane %v3055_v61, %v8847_v13  ;;  %v2972_v27 = vcombine.high %v2410_v7, %v13552_v24  ;;  %v2979_v28 = vrot.slane %v2410_v7, %v8847_v13  ;;  %v2400_v14 = vpop.permute.xlu1 %2399  ;;  %4249 = vrot.lane.b32.xlu1 %v9924_v23, %s8654_s16 }
 0x47b   : > { %v2917_v41 = vcombine.low %v2861_v3, %v2877_v34  ;;  %v2918_v30 = vcombine.high %v2861_v3, %v2877_v34  ;;  %v10159_v45 = vrot.slane %v3056_v60, %v8847_v13  ;;  %v2971_v50 = vrot.slane %v2957_v8, %v8847_v13 }
 0x47c   : > { %v2933_v55 = vcombine.low %v2868_v40, %v2884_v22  ;;  %v2934_v33 = vcombine.high %v2868_v40, %v2884_v22  ;;  %v2986_v61 = vrot.slane %v2972_v27, %v8847_v13  ;;  %v2987_v5 = vcombine.low %v2964_v37, %v2979_v28  ;;  %4251 = vrot.lane.b32.xlu0 %v9913_v46, %s8654_s16 }
 0x47d   : > { %v2925_v7 = vrot.slane %v2917_v41, %v8873_v21  ;;  %v2932_v24 = vrot.slane %v2918_v30, %v8873_v21  ;;  %v2988_v53 = vcombine.high %v2964_v37, %v2979_v28  ;;  %v3159_v3 = vcombine.high %v2400_v14, %v13867_v56 }
 0x47e   : > { %v2941_v34 = vrot.slane %v2933_v55, %v8873_v21  ;;  %v2948_v60 = vrot.slane %v2934_v33, %v8873_v21  ;;  %v2995_v8 = vrot.slane %v2987_v5, %v8873_v21  ;;  %v3003_v40 = vcombine.low %v2971_v50, %v2986_v61  ;;  %4253 = vrot.lane.b32.xlu1 %v10044_v2, %s8654_s16 }
 0x47f   : > { %v2949_v22 = vcombine.low %v10090_v52, %v2925_v7  ;;  %v2950_v27 = vcombine.high %v10090_v52, %v2925_v7  ;;  %v2951_v41 = vcombine.low %v10093_v49, %v2932_v24  ;;  %v2952_v37 = vcombine.high %v10093_v49, %v2932_v24 }
 0x480   : > { %v2953_v28 = vcombine.low %v10108_v4, %v2941_v34  ;;  %v2954_v55 = vcombine.high %v10108_v4, %v2941_v34  ;;  %v2955_v30 = vcombine.low %v10111_v19, %v2948_v60  ;;  %v2956_v5 = vcombine.high %v10111_v19, %v2948_v60  ;;  %4255 = vrot.lane.b32.xlu0 %v10071_v20, %s8654_s16  ;;  %v2412_v34 = vpop.permute.xlu1 %2411 }
 0x481   : > { %v10183_v33 = vsel %vm9796_vm12, %v2950_v27, 0.0  ;;  %v10187_v35 = vsel %vm9796_vm12, %v2952_v37, 0.0  ;;  %v3289_v24 = vsel %vm9796_vm12, %v2949_v22, 0.0  ;;  %v3293_v52 = vsel %vm9796_vm12, %v2951_v41, 0.0 }
 0x482   : > { %v10197_v49 = vsel %vm9796_vm12, %v2953_v28, 0.0  ;;  %v10201_v4 = vsel %vm9796_vm12, %v2954_v55, 0.0  ;;  %v10205_v19 = vsel %vm9796_vm12, %v2955_v30, 0.0  ;;  %v10209_v7 = vsel %vm9796_vm12, %v2956_v5, 0.0  ;;  %4257 = vrot.lane.b32.xlu1 %v10084_v59, %s8654_s16 }
 0x483   : > { %v8254_v22 = vpack.c.bf16 %v10197_v49, %v3289_v24  ;;  %v8255_v27 = vpack.c.bf16 %v10205_v19, %v3293_v52  ;;  %v3002_v41 = vrot.slane %v2988_v53, %v8873_v21  ;;  %v3004_v37 = vcombine.high %v2971_v50, %v2986_v61 }
 0x484   : > { %v10221_v28 = vrot.slane %v3003_v40, %v8873_v21  ;;  %v10224_v55 = vcombine.high %v2995_v8, %v13867_v56  ;;  %4259 = vrot.lane.b32.xlu0 %v10102_v16, %s8654_s16  ;;  %v3290_v60 = vsel %vm9858_vm14, %v2995_v8, 0.0  ;;  %v3166_v53 = vrot.slane %v2400_v14, %v8847_v13 }
 0x485   : > { %v10229_v30 = vrot.slane %v8254_v22, %v8847_v13  ;;  %v10232_v5 = vrot.slane %v8255_v27, %v8847_v13  ;;  %v10238_v50 = vrot.slane %v3004_v37, %v8873_v21  ;;  %v10241_v61 = vcombine.high %v3002_v41, %v13867_v56  ;;  %v2381_v27 = vpop.permute.xlu0 %2380 }
 0x486   : > { %v10245_v40 = vcombine.high %v10221_v28, %v13867_v56  ;;  %4261 = vrot.lane.b32.xlu1 %v10117_v9, %s8654_s16  ;;  %v3294_v14 = vsel %vm9858_vm14, %v3002_v41, 0.0  ;;  %v10257_v37 = vpack.c.bf16 %v3290_v60, %v3289_v24  ;;  %v2388_v60 = vsel %vm2384_vm2, %v2381_v27, %v10126_v54 }
 0x487   : > { %13868 = vst [vmem:[#allocation29_spill] sm:$0xff] %v10229_v30  ;;  %13869 = vst [vmem:[#allocation30_spill] sm:$0xff] %v10232_v5  ;;  %v3173_v30 = vrot.slane %v3159_v3, %v8847_v13  ;;  %v10262_v5 = vcombine.high %v10238_v50, %v13867_v56  ;;  %v10270_v10 = vpack.c.bf16 %v3294_v14, %v3293_v52  ;;  %v13872_v3 = vsel %vm9858_vm14, %v9993_v36, 0.0 }
 0x488   : > { %13870 = vst [vmem:[#allocation31_spill] sm:$0xff] %v10257_v37  ;;  %3787 = vrot.lane.b32.xlu0 %v10030_v47, %s8645_s18  ;;  %v10279_v24 = vpack.c.bf16 %v13872_v3, %v9956_v31  ;;  %v3174_v8 = vcombine.high %v2412_v34, %v13867_v56  ;;  %v3181_v22 = vrot.slane %v2412_v34, %v8847_v13  ;;  %v13874_v41 = vsel %vm9858_vm14, %v9996_v57, 0.0 }
 0x489   : > { %13871 = vst [vmem:[#allocation32_spill] sm:$0xff] %v10270_v10  ;;  %v3071_v52 = vcombine.low %v10058_v63, %v2388_v60  ;;  %v3072_v14 = vcombine.high %v10058_v63, %v2388_v60  ;;  %v10292_v10 = vpack.c.bf16 %v13874_v41, %v9960_v51  ;;  %v13876_v36 = vsel %vm9858_vm14, %v9987_v39, 0.0 }
 0x48a   : > { %13873 = vst [vmem:[#allocation33_spill] sm:$0xff] %v10279_v24  ;;  %v10299_v54 = vpack.c.bf16 %v13876_v36, %v9968_v12  ;;  %3789 = vrot.lane.b32.xlu1 %v10279_v24, %s8645_s18  ;;  %v3188_v34 = vrot.slane %v3174_v8, %v8847_v13  ;;  %v3189_v63 = vcombine.low %v3166_v53, %v3181_v22  ;;  %v3284_v57 = vsel %vm9858_vm14, %v10006_v18, 0.0 }
 0x48b   : > { %13875 = vst [vmem:[#allocation34_spill] sm:$0xff] %v10292_v10  ;;  %v3190_v27 = vcombine.high %v3166_v53, %v3181_v22  ;;  %v3079_v41 = vrot.slane %v3071_v52, %v8847_v13  ;;  %v3086_v3 = vrot.slane %v3072_v14, %v8847_v13  ;;  %v10310_v60 = vpack.c.bf16 %v3284_v57, %v9972_v43 }
 0x48c   : > { %13877 = vst [vmem:[#allocation35_spill] sm:$0xff] %v10299_v54  ;;  %v13879_v12 = vsel %vm9858_vm14, %v9990_v17, 0.0  ;;  %v3197_v53 = vrot.slane %v3189_v63, %v8873_v21  ;;  %v3205_v8 = vcombine.low %v3173_v30, %v3188_v34  ;;  %v3206_v18 = vcombine.high %v3173_v30, %v3188_v34  ;;  %3791 = vrot.lane.b32.xlu0 %v10032_v42, %s8645_s18 }
 0x48d   : > { %13878 = vst [vmem:[#allocation36_spill] sm:$0xff] %v10310_v60  ;;  %v10317_v39 = vpack.c.bf16 %v13879_v12, %v9976_v26  ;;  %v3204_v22 = vrot.slane %v3190_v27, %v8873_v21  ;;  %v3119_v52 = vcombine.low %v10152_v62, %v3079_v41  ;;  %v3120_v14 = vcombine.high %v10152_v62, %v3079_v41 }
 0x48e   : > { %v3135_v36 = vcombine.low %v10159_v45, %v3086_v3  ;;  %v3136_v57 = vcombine.high %v10159_v45, %v3086_v3  ;;  %v10328_v26 = vrot.slane %v3205_v8, %v8873_v21  ;;  %v10331_v17 = vrot.slane %v3206_v18, %v8873_v21  ;;  %3793 = vrot.lane.b32.xlu1 %v10292_v10, %s8645_s18 }
 0x48f   : > { %13880 = vst [vmem:[#allocation37_spill] sm:$0xff] %v10317_v39  ;;  %v10334_v63 = vcombine.high %v3197_v53, %v13867_v56  ;;  %v10337_v30 = vcombine.high %v3204_v22, %v13867_v56  ;;  %v3127_v62 = vrot.slane %v3119_v52, %v8873_v21  ;;  %v3134_v34 = vrot.slane %v3120_v14, %v8873_v21 }
 0x490   : > { %v3143_v45 = vrot.slane %v3135_v36, %v8873_v21  ;;  %v3150_v27 = vrot.slane %v3136_v57, %v8873_v21  ;;  %v10347_v41 = vcombine.high %v10328_v26, %v13867_v56  ;;  %v10351_v3 = vcombine.high %v10331_v17, %v13867_v56  ;;  %3795 = vrot.lane.b32.xlu0 %v10299_v54, %s8645_s18 }
 0x491   : > { %v3306_v12 = vsel %vm9858_vm14, %v3197_v53, 0.0  ;;  %v3151_v18 = vcombine.low %v10122_v6, %v3127_v62  ;;  %v3152_v52 = vcombine.high %v10122_v6, %v3127_v62  ;;  %v3153_v14 = vcombine.low %v10129_v32, %v3134_v34 }
 0x492   : > { %v3154_v36 = vcombine.high %v10129_v32, %v3134_v34  ;;  %v3155_v56 = vcombine.low %v10137_v29, %v3143_v45  ;;  %v3156_v57 = vcombine.high %v10137_v29, %v3143_v45  ;;  %v3157_v53 = vcombine.low %v10140_v0, %v3150_v27  ;;  %3797 = vrot.lane.b32.xlu1 %v10310_v60, %s8645_s18 }
 0x493   : > { %v3158_v37 = vcombine.high %v10140_v0, %v3150_v27  ;;  %v10372_v8 = vsel %vm9796_vm12, %v3152_v52, 0.0  ;;  %v3305_v32 = vsel %vm9796_vm12, %v3151_v18, 0.0  ;;  %v3309_v29 = vsel %vm9796_vm12, %v3153_v14, 0.0 }
 0x494   : > { %v10376_v6 = vsel %vm9796_vm12, %v3154_v36, 0.0  ;;  %v10384_v0 = vsel %vm9796_vm12, %v3155_v56, 0.0  ;;  %v10388_v62 = vsel %vm9796_vm12, %v3156_v57, 0.0  ;;  %v10392_v34 = vsel %vm9796_vm12, %v3157_v53, 0.0  ;;  %3799 = vrot.lane.b32.xlu0 %v10317_v39, %s8645_s18 }
 0x495   : > { %v10396_v45 = vsel %vm9796_vm12, %v3158_v37, 0.0  ;;  %v3310_v52 = vsel %vm9858_vm14, %v3204_v22, 0.0  ;;  %v10415_v36 = vpack.c.bf16 %v3306_v12, %v3305_v32  ;;  %v8256_v57 = vpack.c.bf16 %v10384_v0, %v3305_v32 }
 0x496   : > { %v10417_v56 = vpack.c.bf16 %v3310_v52, %v3309_v29  ;;  %v8257_v22 = vpack.c.bf16 %v10392_v34, %v3309_v29  ;;  %v3288_v53 = vsel %vm9858_vm14, %v10010_v15, 0.0  ;;  %v4724_v18 = vshrl.u32 %v9911_v44, 16 }
 0x497   : > { %13881 = vst [vmem:[#allocation38_spill] sm:$0xff] %v10415_v36  ;;  %v10426_v27 = vpack.c.bf16 %v3288_v53, %v9980_v11  ;;  %v4726_v12 = vshll.u32 %v9911_v44, 16  ;;  %v4731_v52 = vshrl.u32 %v9924_v23, 16  ;;  %v4733_v32 = vshll.u32 %v9924_v23, 16 }
 0x498   : > { %13882 = vst [vmem:[#allocation39_spill] sm:$0xff] %v10417_v56  ;;  %4263 = vrot.lane.b32.xlu0 %v10030_v47, %s8654_s16  ;;  %v10434_v29 = vrot.slane %v8256_v57, %v8847_v13  ;;  %v10437_v37 = vrot.slane %v8257_v22, %v8847_v13  ;;  %v4738_v15 = vshrl.u32 %v9913_v46, 16  ;;  %v4740_v53 = vshll.u32 %v9913_v46, 16 }
 0x499   : > { %13883 = vst [vmem:[#allocation40_spill] sm:$0xff] %v10426_v27  ;;  %3801 = vrot.lane.b32.xlu1 %v10426_v27, %s8645_s18  ;;  %v4728_v48 = vrot.slane %v4726_v12, 1  ;;  %v4735_v14 = vrot.slane %v4733_v32, 1  ;;  %v4745_v44 = vshrl.u32 %v10044_v2, 16  ;;  %v4747_v56 = vshll.u32 %v10044_v2, 16 }
 0x49a   : > { %13884 = vst [vmem:[#allocation41_spill] sm:$0xff] %v10434_v29  ;;  %13885 = vst [vmem:[#allocation42_spill] sm:$0xff] %v10437_v37  ;;  %v4742_v23 = vrot.slane %v4740_v53, 1  ;;  %v4752_v57 = vshrl.u32 %v10071_v20, 16  ;;  %v4754_v36 = vshll.u32 %v10071_v20, 16  ;;  %v4759_v22 = vshrl.u32 %v10084_v59, 16 }
 0x49b   : > { %v10450_v46 = vor.u32 %v4728_v48, %v4724_v18  ;;  %v10452_v29 = vor.u32 %v4735_v14, %v4731_v52  ;;  %v4749_v12 = vrot.slane %v4747_v56, 1  ;;  %v4761_v32 = vshll.u32 %v10084_v59, 16 }
 0x49c   : > { %4267 = vrot.lane.b32.xlu0 %v10032_v42, %s8654_s16  ;;  %v10455_v37 = vor.u32 %v4742_v23, %v4738_v15  ;;  %v4756_v2 = vrot.slane %v4754_v36, 1  ;;  %v4766_v53 = vshrl.u32 %v10102_v16, 16  ;;  %v4768_v51 = vshll.u32 %v10102_v16, 16 }
 0x49d   : > { %4265 = vrot.lane.b32.xlu1 %v10279_v24, %s8654_s16  ;;  %v10461_v20 = vor.u32 %v4749_v12, %v4745_v44  ;;  %v4763_v11 = vrot.slane %v4761_v32, 1  ;;  %v4773_v18 = vshrl.u32 %v10117_v9, 16  ;;  %v4775_v14 = vshll.u32 %v10117_v9, 16 }
 0x49e   : > { %v10465_v48 = vor.u32 %v4756_v2, %v4752_v57  ;;  %v4770_v56 = vrot.slane %v4768_v51, 1  ;;  %v13886_v23 = vsel %vm9858_vm14, %v10224_v55, 0.0  ;;  %v13887_v44 = vsel %vm9858_vm14, %v10241_v61, 0.0 }
 0x49f   : > { %v10472_v36 = vpack.c.bf16 %v13886_v23, %v10183_v33  ;;  %v10479_v52 = vpack.c.bf16 %v13887_v44, %v10187_v35  ;;  %v10483_v2 = vor.u32 %v4763_v11, %v4759_v22  ;;  %v4777_v51 = vrot.slane %v4775_v14, 1 }
 0x4a0   : > { %4271 = vrot.lane.b32.xlu0 %v10299_v54, %s8654_s16  ;;  %v13888_v55 = vsel %vm9858_vm14, %v10221_v28, 0.0  ;;  %v3300_v57 = vsel %vm9858_vm14, %v10245_v40, 0.0  ;;  %v4979_v61 = vcombine.low %v10450_v46, %v10465_v48  ;;  %v10497_v12 = vor.u32 %v4770_v56, %v4766_v53 }
 0x4a1   : > { %v10490_v15 = vpack.c.bf16 %v13888_v55, %v10197_v49  ;;  %v10500_v11 = vpack.c.bf16 %v3300_v57, %v10201_v4  ;;  %v13889_v22 = vsel %vm9858_vm14, %v10238_v50, 0.0  ;;  %4269 = vrot.lane.b32.xlu1 %v10292_v10, %s8654_s16  ;;  %v5047_v49 = vcombine.low %v10452_v29, %v10483_v2 }
 0x4a2   : > { %v10507_v28 = vpack.c.bf16 %v13889_v22, %v10205_v19  ;;  %v10513_v40 = vor.u32 %v4777_v51, %v4773_v18  ;;  %v3304_v32 = vsel %vm9858_vm14, %v10262_v5, 0.0  ;;  %v4780_v53 = vshrl.u32 %v10030_v47, 16 }
 0x4a3   : > { %v10520_v14 = vrot.slane %v4979_v61, %v8847_v13  ;;  %v4987_v19 = vcombine.low %v10455_v37, %v10497_v12  ;;  %v10525_v50 = vpack.c.bf16 %v3304_v32, %v10209_v7  ;;  %v4782_v56 = vshll.u32 %v10030_v47, 16 }
 0x4a4   : > { %4275 = vrot.lane.b32.xlu0 %v10317_v39, %s8654_s16  ;;  %v10531_v18 = vrot.slane %v5047_v49, %v8847_v13  ;;  %v5055_v5 = vcombine.low %v10461_v20, %v10513_v40  ;;  %v4787_v23 = vshrl.u32 %v10279_v24, 16  ;;  %v4789_v44 = vshll.u32 %v10279_v24, 16 }
 0x4a5   : > { %v10538_v51 = vrot.slane %v4987_v19, %v8847_v13  ;;  %v4784_v55 = vrot.slane %v4782_v56, 1  ;;  %v4794_v57 = vshrl.u32 %v10032_v42, 16  ;;  %v4796_v61 = vshll.u32 %v10032_v42, 16  ;;  %4273 = vrot.lane.b32.xlu1 %v10310_v60, %s8654_s16 }
 0x4a6   : > { %v10545_v22 = vrot.slane %v5055_v5, %v8847_v13  ;;  %v4791_v49 = vrot.slane %v4789_v44, 1  ;;  %v4801_v32 = vshrl.u32 %v10292_v10, 16  ;;  %v4803_v9 = vshll.u32 %v10292_v10, 16 }
 0x4a7   : > { %v10549_v24 = vor.u32 %v4784_v55, %v4780_v53  ;;  %v4798_v19 = vrot.slane %v4796_v61, 1  ;;  %v4808_v56 = vshrl.u32 %v10299_v54, 16  ;;  %v4810_v16 = vshll.u32 %v10299_v54, 16 }
 0x4a8   : > { %5359 = vrot.lane.b32.xlu0 %v10450_v46, %s8645_s18  ;;  %v10555_v42 = vor.u32 %v4791_v49, %v4787_v23  ;;  %v4805_v59 = vrot.slane %v4803_v9, 1  ;;  %v4815_v5 = vshrl.u32 %v10310_v60, 16  ;;  %v4817_v44 = vshll.u32 %v10310_v60, 16 }
 0x4a9   : > { %v10559_v47 = vor.u32 %v4798_v19, %v4794_v57  ;;  %v4812_v10 = vrot.slane %v4810_v16, 1  ;;  %v4822_v53 = vshrl.u32 %v10317_v39, 16  ;;  %v4824_v55 = vshll.u32 %v10317_v39, 16  ;;  %4277 = vrot.lane.b32.xlu1 %v10426_v27, %s8654_s16  ;;  %v13906_v39 = vld [vmem:[#allocation13_spill] sm:$0xff] }
 0x4aa   : > { %13890 = vst [vmem:[#allocation43_spill] sm:$0xff] %v10555_v42  ;;  %v10565_v61 = vor.u32 %v4805_v59, %v4801_v32  ;;  %v4819_v54 = vrot.slane %v4817_v44, 1  ;;  %v4829_v23 = vshrl.u32 %v10426_v27, 16  ;;  %v4831_v9 = vshll.u32 %v10426_v27, 16  ;;  %v13905_v27 = vld [vmem:[#allocation15_spill] sm:$0xff] }
 0x4ab   : > { %v10569_v49 = vor.u32 %v4812_v10, %v4808_v56  ;;  %v4826_v60 = vrot.slane %v4824_v55, 1  ;;  %v13893_v16 = vsel %vm9858_vm14, %v10334_v63, 0.0  ;;  %v13894_v59 = vsel %vm9858_vm14, %v10337_v30, 0.0 }
 0x4ac   : > { %13891 = vst [vmem:[#allocation44_spill] sm:$0xff] %v10565_v61  ;;  %v10576_v57 = vpack.c.bf16 %v13893_v16, %v10372_v8  ;;  %v10583_v32 = vpack.c.bf16 %v13894_v59, %v10376_v6  ;;  %5363 = vrot.lane.b32.xlu0 %v10455_v37, %s8645_s18  ;;  %v10587_v10 = vor.u32 %v4819_v54, %v4815_v5  ;;  %v4833_v19 = vrot.slane %v4831_v9, 1  ;;  %v13901_v16 = vld [vmem:[#allocation24_spill] sm:$0xff] }
 0x4ad   : > { %13892 = vst [vmem:[#allocation45_spill] sm:$0xff] %v10569_v49  ;;  %v13896_v63 = vsel %vm9858_vm14, %v10328_v26, 0.0  ;;  %v3316_v44 = vsel %vm9858_vm14, %v10347_v41, 0.0  ;;  %v4995_v30 = vcombine.low %v10549_v24, %v10569_v49  ;;  %v10601_v55 = vor.u32 %v4826_v60, %v4822_v53  ;;  %5361 = vrot.lane.b32.xlu1 %v10452_v29, %s8645_s18 }
 0x4ae   : > { %13895 = vst [vmem:[#allocation46_spill] sm:$0xff] %v10587_v10  ;;  %v10594_v56 = vpack.c.bf16 %v13896_v63, %v10384_v0  ;;  %v10604_v54 = vpack.c.bf16 %v3316_v44, %v10388_v62  ;;  %v13899_v5 = vsel %vm9858_vm14, %v10331_v17, 0.0  ;;  %v5063_v41 = vcombine.low %v10555_v42, %v10587_v10  ;;  %v13903_v63 = vld [vmem:[#allocation12_spill] sm:$0xff] }
 0x4af   : > { %13897 = vst [vmem:[#allocation47_spill] sm:$0xff] %v10601_v55  ;;  %v10611_v26 = vpack.c.bf16 %v13899_v5, %v10392_v34  ;;  %v10617_v0 = vor.u32 %v4833_v19, %v4829_v23  ;;  %v3320_v60 = vsel %vm9858_vm14, %v10351_v3, 0.0  ;;  %v3385_v53 = vcombine.low %v9845_v1, %v9848_v58  ;;  %v13902_v19 = vld [vmem:[#allocation14_spill] sm:$0xff] }
 0x4b0   : > { %13898 = vst [vmem:[#allocation48_spill] sm:$0xff] %v10604_v54  ;;  %v10625_v9 = vrot.slane %v4995_v30, %v8847_v13  ;;  %v5003_v17 = vcombine.low %v10559_v47, %v10601_v55  ;;  %v10630_v34 = vpack.c.bf16 %v3320_v60, %v10396_v45  ;;  %v3401_v23 = vcombine.low %v13901_v16, %v10052_v38 }
 0x4b1   : > { %13900 = vst [vmem:[#allocation49_spill] sm:$0xff] %v10617_v0  ;;  %5367 = vrot.lane.b32.xlu0 %v10465_v48, %s8645_s18  ;;  %v10637_v25 = vrot.slane %v5063_v41, %v8847_v13  ;;  %v5071_v3 = vcombine.low %v10565_v61, %v10617_v0  ;;  %v3393_v59 = vrot.slane %v3385_v53, %v8873_v21  ;;  %v4843_v55 = vshrl.u32 %v10472_v36, 16 }
 0x4b2   : > { %v13904_v44 = vpack.c.bf16 %v13902_v19, %v13903_v63  ;;  %v10647_v5 = vrot.slane %v5003_v17, %v8847_v13  ;;  %v3409_v60 = vrot.slane %v3401_v23, %v8873_v21  ;;  %v13907_v41 = vpack.c.bf16 %v13905_v27, %v13906_v39  ;;  %5365 = vrot.lane.b32.xlu1 %v10461_v20, %s8645_s18  ;;  %v13909_v17 = vld [vmem:[#allocation20_spill] sm:$0xff]  ;;  %v13910_v63 = vld [vmem:[#allocation19_spill] sm:$0xff] }
 0x4b3   : > { %v13908_v0 = vpack.c.bf16 %v9972_v43, %v9956_v31  ;;  %v10661_v19 = vrot.slane %v5071_v3, %v8847_v13  ;;  %v13911_v23 = vpack.c.bf16 %v13909_v17, %v13910_v63  ;;  %v4845_v39 = vshll.u32 %v10472_v36, 16 }
 0x4b4   : > { %v3428_v30 = vrot.slane %v13904_v44, %v8847_v13  ;;  %v3436_v10 = vrot.slane %v13907_v41, %v8847_v13  ;;  %v10669_v27 = vcombine.high %v3393_v59, %v3409_v60  ;;  %v3386_v31 = vcombine.high %v9845_v1, %v9848_v58 }
 0x4b5   : > { %v3444_v53 = vrot.slane %v13908_v0, %v8847_v13  ;;  %v3452_v44 = vrot.slane %v13911_v23, %v8847_v13  ;;  %v3402_v43 = vcombine.high %v13901_v16, %v10052_v38  ;;  %5371 = vrot.lane.b32.xlu0 %v10497_v12, %s8645_s18  ;;  %v4847_v3 = vrot.slane %v4845_v39, 1 }
 0x4b6   : > { %13912 = vst [vmem:[#allocation24_spill] sm:$0xff] %v10669_v27  ;;  %v3453_v41 = vcombine.low %v3428_v30, %v3436_v10  ;;  %v3454_v17 = vcombine.high %v3428_v30, %v3436_v10  ;;  %v3400_v61 = vrot.slane %v3386_v31, %v8873_v21  ;;  %v4857_v42 = vshrl.u32 %v10479_v52, 16  ;;  %5369 = vrot.lane.b32.xlu1 %v10483_v2, %s8645_s18 }
 0x4b7   : > { %v3469_v0 = vcombine.low %v3444_v53, %v3452_v44  ;;  %v3470_v63 = vcombine.high %v3444_v53, %v3452_v44  ;;  %v3416_v49 = vrot.slane %v3402_v43, %v8873_v21  ;;  %v10684_v58 = vor.u32 %v4847_v3, %v4843_v55 }
 0x4b8   : > { %v3461_v23 = vrot.slane %v3453_v41, %v8873_v21  ;;  %v3468_v38 = vrot.slane %v3454_v17, %v8873_v21  ;;  %v4859_v30 = vshll.u32 %v10479_v52, 16  ;;  %v4871_v44 = vshrl.u32 %v10500_v11, 16 }
 0x4b9   : > { %v3477_v1 = vrot.slane %v3469_v0, %v8873_v21  ;;  %13913 = vst [vmem:[#allocation14_spill] sm:$0xff] %v10684_v58  ;;  %v3484_v10 = vrot.slane %v3470_v63, %v8873_v21  ;;  %v10688_v16 = vcombine.low %v3400_v61, %v3416_v49  ;;  %v10691_v53 = vcombine.high %v3400_v61, %v3416_v49 }
 0x4ba   : > { %5835 = vrot.lane.b32.xlu0 %v10450_v46, %s8654_s16  ;;  %v4873_v31 = vshll.u32 %v10500_v11, 16  ;;  %v4861_v43 = vrot.slane %v4859_v30, 1  ;;  %v10703_v0 = vcombine.low %v3393_v59, %v3409_v60  ;;  %v4885_v61 = vshrl.u32 %v10525_v50, 16  ;;  %5373 = vrot.lane.b32.xlu1 %v10513_v40, %s8645_s18  ;;  %v13925_v46 = vld [vmem:[#allocation31_spill] sm:$0xff] }
 0x4bb   : > { %13914 = vst [vmem:[#allocation12_spill] sm:$0xff] %v10688_v16  ;;  %13915 = vst [vmem:[#allocation15_spill] sm:$0xff] %v10691_v53  ;;  %v10696_v39 = vcombine.high %v3461_v23, %v3477_v1  ;;  %v10698_v41 = vcombine.low %v3468_v38, %v3484_v10  ;;  %v10700_v55 = vcombine.high %v3468_v38, %v3484_v10  ;;  %v3634_v10 = vshrl.u32 %v10669_v27, 16 }
 0x4bc   : > { %13919 = vst [vmem:[#allocation50_spill] sm:$0xff] %v10703_v0  ;;  %v10705_v3 = vcombine.low %v3461_v23, %v3477_v1  ;;  %v4875_v63 = vrot.slane %v4873_v31, 1  ;;  %v10716_v38 = vor.u32 %v4861_v43, %v4857_v42  ;;  %v3628_v59 = vshrl.u32 %v10703_v0, 16 }
 0x4bd   : > { %13916 = vst [vmem:[#allocation13_spill] sm:$0xff] %v10696_v39  ;;  %13917 = vst [vmem:[#allocation20_spill] sm:$0xff] %v10698_v41  ;;  %v4887_v23 = vshll.u32 %v10525_v50, 16  ;;  %v3635_v30 = vshrl.u32 %v10696_v39, 16  ;;  %v3640_v17 = vshrl.u32 %v10688_v16, 16  ;;  %v3641_v43 = vshrl.u32 %v10698_v41, 16 }
 0x4be   : > { %13918 = vst [vmem:[#allocation19_spill] sm:$0xff] %v10700_v55  ;;  %13920 = vst [vmem:[#allocation51_spill] sm:$0xff] %v10705_v3  ;;  %v3629_v60 = vshrl.u32 %v10705_v3, 16  ;;  %5839 = vrot.lane.b32.xlu0 %v10455_v37, %s8654_s16  ;;  %v10723_v1 = vor.u32 %v4875_v63, %v4871_v44  ;;  %v3646_v49 = vshrl.u32 %v10691_v53, 16  ;;  %5837 = vrot.lane.b32.xlu1 %v10452_v29, %s8654_s16  ;;  %v3647_v63 = vshrl.u32 %v10700_v55, 16 }
 0x4bf   : > { %13921 = vst [vmem:[#allocation52_spill] sm:$0xff] %v10716_v38  ;;  %v4889_v42 = vrot.slane %v4887_v23, 1  ;;  %v10736_v44 = vpack.i.b16 %v3635_v30, %v3634_v10  ;;  %v4836_v27 = vshrl.u32 %v13925_v46, 16  ;;  %v13928_v23 = vld [vmem:[#allocation32_spill] sm:$0xff]  ;;  %v4927_v55 = vshrl.u32 %v10604_v54, 16 }
 0x4c0   : > { %13922 = vst [vmem:[#allocation53_spill] sm:$0xff] %v10723_v1  ;;  %v10728_v31 = vpack.i.b16 %v3629_v60, %v3628_v59  ;;  %v5183_v37 = vcombine.low %v10684_v58, %v10723_v1  ;;  %v10742_v59 = vpack.i.b16 %v3641_v43, %v3640_v17  ;;  %v4838_v60 = vshll.u32 %v13925_v46, 16  ;;  %v13938_v58 = vld [vmem:[#allocation41_spill] sm:$0xff] }
 0x4c1   : > { %13924 = vst [vmem:[#allocation55_spill] sm:$0xff] %v10736_v44  ;;  %v10740_v16 = vor.u32 %v4889_v42, %v4885_v61  ;;  %v10751_v10 = vpack.i.b16 %v3647_v63, %v3646_v49  ;;  %v4852_v30 = vshll.u32 %v13928_v23, 16  ;;  %v4899_v44 = vshrl.u32 %v10576_v57, 16 }
 0x4c2   : > { %13923 = vst [vmem:[#allocation54_spill] sm:$0xff] %v10728_v31  ;;  %13927 = vst [vmem:[#allocation56_spill] sm:$0xff] %v10742_v59  ;;  %v4850_v31 = vshrl.u32 %v13928_v23, 16  ;;  %5843 = vrot.lane.b32.xlu0 %v10465_v48, %s8654_s16  ;;  %v10749_v29 = vrot.slane %v5183_v37, %v8847_v13  ;;  %v4840_v17 = vrot.slane %v4838_v60, 1  ;;  %v4901_v42 = vshll.u32 %v10576_v57, 16  ;;  %5841 = vrot.lane.b32.xlu1 %v10461_v20, %s8654_s16 }
 0x4c3   : > { %13926 = vst [vmem:[#allocation31_spill] sm:$0xff] %v10740_v16  ;;  %13929 = vst [vmem:[#allocation32_spill] sm:$0xff] %v10751_v10  ;;  %v5191_v61 = vcombine.low %v10716_v38, %v10740_v16  ;;  %v4864_v43 = vshrl.u32 %v10490_v15, 16  ;;  %v4854_v48 = vrot.slane %v4852_v30, 1  ;;  %v4866_v37 = vshll.u32 %v10490_v15, 16 }
 0x4c4   : > { %v4913_v49 = vshrl.u32 %v10583_v32, 16  ;;  %v4915_v63 = vshll.u32 %v10583_v32, 16  ;;  %v10767_v59 = vor.u32 %v4840_v17, %v4836_v27  ;;  %v4903_v60 = vrot.slane %v4901_v42, 1 }
 0x4c5   : > { %v10765_v10 = vrot.slane %v5191_v61, %v8847_v13  ;;  %v4878_v16 = vshrl.u32 %v10507_v28, 16  ;;  %v10772_v1 = vor.u32 %v4854_v48, %v4850_v31  ;;  %v4868_v20 = vrot.slane %v4866_v37, 1  ;;  %v13935_v37 = vld [vmem:[#allocation30_spill] sm:$0xff] }
 0x4c6   : > { %13930 = vst [vmem:[#allocation57_spill] sm:$0xff] %v10767_v59  ;;  %5847 = vrot.lane.b32.xlu0 %v10497_v12, %s8654_s16  ;;  %v4917_v30 = vrot.slane %v4915_v63, 1  ;;  %v4880_v38 = vshll.u32 %v10507_v28, 16  ;;  %v10775_v53 = vor.u32 %v4903_v60, %v4899_v44  ;;  %v4929_v61 = vshll.u32 %v10604_v54, 16  ;;  %5845 = vrot.lane.b32.xlu1 %v10483_v2, %s8654_s16  ;;  %v13936_v44 = vld [vmem:[#allocation29_spill] sm:$0xff]  ;;  %v13937_v60 = vld [vmem:[#allocation42_spill] sm:$0xff] }
 0x4c7   : > { %13931 = vst [vmem:[#allocation58_spill] sm:$0xff] %v10772_v1  ;;  %v4941_v27 = vshrl.u32 %v10630_v34, 16  ;;  %v10782_v17 = vor.u32 %v4868_v20, %v4864_v43  ;;  %v4943_v42 = vshll.u32 %v10630_v34, 16  ;;  %v3521_v63 = vcombine.low %v13936_v44, %v13935_v37 }
 0x4c8   : > { %13932 = vst [vmem:[#allocation59_spill] sm:$0xff] %v10775_v53  ;;  %v10784_v12 = vor.u32 %v4917_v30, %v4913_v49  ;;  %v4882_v31 = vrot.slane %v4880_v38, 1  ;;  %v4931_v48 = vrot.slane %v4929_v61, 1  ;;  %v3537_v41 = vcombine.low %v13938_v58, %v13937_v60 }
 0x4c9   : > { %13933 = vst [vmem:[#allocation60_spill] sm:$0xff] %v10782_v17  ;;  %v13939_v39 = vpack.c.bf16 %v10201_v4, %v10183_v33  ;;  %v5115_v2 = vcombine.low %v10767_v59, %v10782_v17  ;;  %v4945_v43 = vrot.slane %v4943_v42, 1  ;;  %v13941_v49 = vpack.c.bf16 %v10209_v7, %v10187_v35 }
 0x4ca   : > { %13934 = vst [vmem:[#allocation61_spill] sm:$0xff] %v10784_v12  ;;  %3803 = vrot.lane.b32.xlu0 %v13925_v46, %s8645_s18  ;;  %v10799_v38 = vor.u32 %v4882_v31, %v4878_v16  ;;  %v10805_v30 = vor.u32 %v4931_v48, %v4927_v55  ;;  %v3529_v61 = vrot.slane %v3521_v63, %v8873_v21  ;;  %v11277_v59 = vrot.slane %v10500_v11, 1 }
 0x4cb   : > { %v3564_v54 = vrot.slane %v13939_v39, %v8847_v13  ;;  %v3572_v20 = vrot.slane %v13941_v49, %v8847_v13  ;;  %v3545_v33 = vrot.slane %v3537_v41, %v8873_v21  ;;  %v13943_v4 = vpack.c.bf16 %v10388_v62, %v10372_v8  ;;  %5849 = vrot.lane.b32.xlu1 %v10513_v40, %s8654_s16 }
 0x4cc   : > { %13940 = vst [vmem:[#allocation30_spill] sm:$0xff] %v10799_v38  ;;  %13942 = vst [vmem:[#allocation29_spill] sm:$0xff] %v10805_v30  ;;  %v10816_v16 = vrot.slane %v5115_v2, %v8847_v13  ;;  %v5123_v35 = vcombine.low %v10772_v1, %v10799_v38  ;;  %v10820_v7 = vor.u32 %v4945_v43, %v4941_v27  ;;  %v11263_v38 = vrot.slane %v10630_v34, 1 }
 0x4cd   : > { %v3580_v39 = vrot.slane %v13943_v4, %v8847_v13  ;;  %v13945_v41 = vpack.c.bf16 %v10396_v45, %v10376_v6  ;;  %v5199_v8 = vcombine.low %v10775_v53, %v10805_v30  ;;  %v10828_v62 = vcombine.high %v3529_v61, %v3545_v33  ;;  %14044 = vst [vmem:[#allocation109_spill] sm:$0xff] %v11277_v59 }
 0x4ce   : > { %13944 = vst [vmem:[#allocation42_spill] sm:$0xff] %v10820_v7  ;;  %v3589_v31 = vcombine.low %v3564_v54, %v3572_v20  ;;  %v3522_v40 = vcombine.high %v13936_v44, %v13935_v37  ;;  %3807 = vrot.lane.b32.xlu0 %v13928_v23, %s8645_s18  ;;  %v10835_v27 = vrot.slane %v5123_v35, %v8847_v13  ;;  %14042 = vst [vmem:[#allocation107_spill] sm:$0xff] %v11263_v38  ;;  %vm3722_vm2 = vcmask 654336  }
 0x4cf   : > { %v3588_v55 = vrot.slane %v13945_v41, %v8847_v13  ;;  %13946 = vst [vmem:[#allocation41_spill] sm:$0xff] %v10828_v62  ;;  %v5207_v42 = vcombine.low %v10784_v12, %v10820_v7  ;;  %v3538_v45 = vcombine.high %v13938_v58, %v13937_v60  ;;  %v10842_v48 = vrot.slane %v5199_v8, %v8847_v13  ;;  %v13947_v60 = vld [vmem:[#allocation38_spill] sm:$0xff]  ;;  %v13948_v8 = vld [vmem:[#allocation39_spill] sm:$0xff] }
 0x4d0   : > { %v3597_v63 = vrot.slane %v3589_v31, %v8873_v21  ;;  %v3536_v37 = vrot.slane %v3522_v40, %v8873_v21  ;;  %v3590_v44 = vcombine.high %v3564_v54, %v3572_v20  ;;  %3805 = vrot.lane.b32.xlu1 %v10472_v36, %s8645_s18  ;;  %v4892_v35 = vshrl.u32 %v13947_v60, 16 }
 0x4d1   : > { %v3605_v6 = vcombine.low %v3580_v39, %v3588_v55  ;;  %v10849_v2 = vrot.slane %v5207_v42, %v8847_v13  ;;  %v3552_v49 = vrot.slane %v3538_v45, %v8873_v21  ;;  %v3606_v4 = vcombine.high %v3580_v39, %v3588_v55 }
 0x4d2   : > { %v3604_v58 = vrot.slane %v3590_v44, %v8873_v21  ;;  %v4894_v41 = vshll.u32 %v13947_v60, 16  ;;  %v4906_v31 = vshrl.u32 %v13948_v8, 16  ;;  %3811 = vrot.lane.b32.xlu0 %v10490_v15, %s8645_s18  ;;  %v4908_v55 = vshll.u32 %v13948_v8, 16 }
 0x4d3   : > { %v3613_v43 = vrot.slane %v3605_v6, %v8873_v21  ;;  %v10861_v20 = vcombine.low %v3536_v37, %v3552_v49  ;;  %v3620_v40 = vrot.slane %v3606_v4, %v8873_v21  ;;  %v10864_v42 = vcombine.high %v3536_v37, %v3552_v49  ;;  %v10900_v44 = vpop.permute.xlu0 %3771 }
 0x4d4   : > { %v4896_v39 = vrot.slane %v4894_v41, 1  ;;  %v10867_v6 = vcombine.low %v3529_v61, %v3545_v33  ;;  %3809 = vrot.lane.b32.xlu1 %v10479_v52, %s8645_s18  ;;  %v4920_v37 = vshrl.u32 %v10594_v56, 16  ;;  %v4910_v4 = vrot.slane %v4908_v55, 1 }
 0x4d5   : > { %v10859_v54 = vcombine.high %v3597_v63, %v3613_v43  ;;  %13950 = vst [vmem:[#allocation39_spill] sm:$0xff] %v10861_v20  ;;  %13951 = vst [vmem:[#allocation62_spill] sm:$0xff] %v10864_v42  ;;  %v10869_v45 = vcombine.low %v3597_v63, %v3613_v43  ;;  %v10875_v7 = vcombine.low %v3604_v58, %v3620_v40  ;;  %v3658_v41 = vshrl.u32 %v10828_v62, 16 }
 0x4d6   : > { %13952 = vst [vmem:[#allocation63_spill] sm:$0xff] %v10867_v6  ;;  %v10877_v30 = vcombine.high %v3604_v58, %v3620_v40  ;;  %v10880_v49 = vor.u32 %v4896_v39, %v4892_v35  ;;  %v3652_v61 = vshrl.u32 %v10867_v6, 16  ;;  %3815 = vrot.lane.b32.xlu0 %v10507_v28, %s8645_s18  ;;  %v4922_v58 = vshll.u32 %v10594_v56, 16  ;;  %v14014_v6 = vld [vmem:[#allocation33_spill] sm:$0xff] }
 0x4d7   : > { %13949 = vst [vmem:[#allocation38_spill] sm:$0xff] %v10859_v54  ;;  %13953 = vst [vmem:[#allocation64_spill] sm:$0xff] %v10869_v45  ;;  %v3653_v33 = vshrl.u32 %v10869_v45, 16  ;;  %v10892_v35 = vor.u32 %v4910_v4, %v4906_v31  ;;  %v3659_v39 = vshrl.u32 %v10859_v54, 16  ;;  %v4934_v55 = vshrl.u32 %v10611_v26, 16  ;;  %v14016_v45 = vld [vmem:[#allocation36_spill] sm:$0xff] }
 0x4d8   : > { %13954 = vst [vmem:[#allocation65_spill] sm:$0xff] %v10875_v7  ;;  %13955 = vst [vmem:[#allocation66_spill] sm:$0xff] %v10877_v30  ;;  %3813 = vrot.lane.b32.xlu1 %v10500_v11, %s8645_s18  ;;  %v4924_v63 = vrot.slane %v4922_v58, 1  ;;  %v4936_v43 = vshll.u32 %v10611_v26, 16  ;;  %v3664_v12 = vshrl.u32 %v10861_v20, 16  ;;  %v3665_v62 = vshrl.u32 %v10875_v7, 16 }
 0x4d9   : > { %13956 = vst [vmem:[#allocation67_spill] sm:$0xff] %v10880_v49  ;;  %13957 = vst [vmem:[#allocation68_spill] sm:$0xff] %v10892_v35  ;;  %v10894_v40 = vpack.i.b16 %v3653_v33, %v3652_v61  ;;  %v10905_v31 = vpack.i.b16 %v3659_v39, %v3658_v41  ;;  %v3670_v4 = vshrl.u32 %v10864_v42, 16  ;;  %v3671_v61 = vshrl.u32 %v10877_v30, 16 }
 0x4da   : > { %v5011_v33 = vcombine.low %v10520_v14, %v10538_v51  ;;  %4279 = vrot.lane.b32.xlu0 %v13925_v46, %s8654_s16  ;;  %v4938_v58 = vrot.slane %v4936_v43, 1  ;;  %v10915_v54 = vpack.i.b16 %v3665_v62, %v3664_v12  ;;  %v5027_v20 = vcombine.low %v10625_v9, %v10647_v5 }
 0x4db   : > { %13958 = vst [vmem:[#allocation69_spill] sm:$0xff] %v10894_v40  ;;  %13959 = vst [vmem:[#allocation70_spill] sm:$0xff] %v10905_v31  ;;  %v10913_v40 = vor.u32 %v4924_v63, %v4920_v37  ;;  %v10919_v41 = vpack.i.b16 %v3671_v61, %v3670_v4  ;;  %v5079_v31 = vcombine.low %v10531_v18, %v10545_v22  ;;  %v10928_v37 = vpop.permute.xlu1 %3773 }
 0x4dc   : > { %13961 = vst [vmem:[#allocation72_spill] sm:$0xff] %v10915_v54  ;;  %v5019_v39 = vrot.slane %v5011_v33, %v8873_v21  ;;  %v5095_v42 = vcombine.low %v10637_v25, %v10661_v19  ;;  %3817 = vrot.lane.b32.xlu1 %v10525_v50, %s8645_s18  ;;  %v10932_v62 = vor.u32 %v4938_v58, %v4934_v55  ;;  %v10945_v55 = vpop.permute.xlu0 %3775 }
 0x4dd   : > { %13960 = vst [vmem:[#allocation71_spill] sm:$0xff] %v10913_v40  ;;  %13962 = vst [vmem:[#allocation73_spill] sm:$0xff] %v10919_v41  ;;  %v5131_v12 = vcombine.low %v10880_v49, %v10913_v40  ;;  %v5035_v63 = vrot.slane %v5027_v20, %v8873_v21  ;;  %v5012_v43 = vcombine.high %v10520_v14, %v10538_v51 }
 0x4de   : > { %13963 = vst [vmem:[#allocation74_spill] sm:$0xff] %v10932_v62  ;;  %v5087_v4 = vrot.slane %v5079_v31, %v8873_v21  ;;  %v5103_v61 = vrot.slane %v5095_v42, %v8873_v21  ;;  %v5028_v33 = vcombine.high %v10625_v9, %v10647_v5  ;;  %v5080_v41 = vcombine.high %v10531_v18, %v10545_v22 }
 0x4df   : > { %4283 = vrot.lane.b32.xlu0 %v13928_v23, %s8654_s16  ;;  %v5138_v20 = vrot.slane %v5131_v12, %v8847_v13  ;;  %v5139_v14 = vcombine.low %v10892_v35, %v10932_v62  ;;  %v10950_v51 = vcombine.high %v5019_v39, %v5035_v63  ;;  %v5026_v42 = vrot.slane %v5012_v43, %v8873_v21 }
 0x4e0   : > { %v10953_v31 = vcombine.high %v5087_v4, %v5103_v61  ;;  %v5042_v9 = vrot.slane %v5028_v33, %v8873_v21  ;;  %v5094_v18 = vrot.slane %v5080_v41, %v8873_v21  ;;  %v5096_v22 = vcombine.high %v10637_v25, %v10661_v19  ;;  %4281 = vrot.lane.b32.xlu1 %v10472_v36, %s8654_s16  ;;  %v10975_v54 = vpop.permute.xlu1 %3777 }
 0x4e1   : > { %13964 = vst [vmem:[#allocation75_spill] sm:$0xff] %v10950_v51  ;;  %v5146_v5 = vrot.slane %v5139_v14, %v8847_v13  ;;  %v5147_v58 = vcombine.low %v10816_v16, %v10835_v27  ;;  %v5215_v12 = vcombine.low %v10749_v29, %v10765_v10  ;;  %v5231_v43 = vcombine.low %v10842_v48, %v10849_v2 }
 0x4e2   : > { %13965 = vst [vmem:[#allocation76_spill] sm:$0xff] %v10953_v31  ;;  %v10970_v33 = vcombine.low %v5026_v42, %v5042_v9  ;;  %v5110_v25 = vrot.slane %v5096_v22, %v8873_v21  ;;  %v10973_v19 = vcombine.high %v5026_v42, %v5042_v9  ;;  %v10986_v7 = vcombine.low %v5019_v39, %v5035_v63  ;;  %v10992_v9 = vpop.permute.xlu0 %3779 }
 0x4e3   : > { %4287 = vrot.lane.b32.xlu0 %v10490_v15, %s8654_s16  ;;  %v5155_v14 = vrot.slane %v5147_v58, %v8873_v21  ;;  %v5163_v62 = vcombine.low %v5138_v20, %v5146_v5  ;;  %v5223_v40 = vrot.slane %v5215_v12, %v8873_v21  ;;  %v5239_v30 = vrot.slane %v5231_v43, %v8873_v21 }
 0x4e4   : > { %13966 = vst [vmem:[#allocation77_spill] sm:$0xff] %v10970_v33  ;;  %13967 = vst [vmem:[#allocation78_spill] sm:$0xff] %v10973_v19  ;;  %v10982_v35 = vcombine.low %v5094_v18, %v5110_v25  ;;  %v10984_v41 = vcombine.high %v5094_v18, %v5110_v25  ;;  %v10988_v42 = vcombine.low %v5087_v4, %v5103_v61  ;;  %4285 = vrot.lane.b32.xlu1 %v10479_v52, %s8654_s16  ;;  %v11004_v4 = vpop.permute.xlu1 %3781 }
 0x4e5   : > { %13970 = vst [vmem:[#allocation81_spill] sm:$0xff] %v10986_v7  ;;  %v5171_v22 = vrot.slane %v5163_v62, %v8873_v21  ;;  %v10995_v58 = vcombine.high %v5223_v40, %v5239_v30  ;;  %v5148_v12 = vcombine.high %v10816_v16, %v10835_v27  ;;  %v5164_v43 = vcombine.high %v5138_v20, %v5146_v5 }
 0x4e6   : > { %13968 = vst [vmem:[#allocation79_spill] sm:$0xff] %v10982_v35  ;;  %13969 = vst [vmem:[#allocation80_spill] sm:$0xff] %v10984_v41  ;;  %v5254_v63 = vshrl.u32 %v10986_v7, 16  ;;  %v5255_v61 = vshrl.u32 %v10988_v42, 16  ;;  %v5216_v20 = vcombine.high %v10749_v29, %v10765_v10  ;;  %v5232_v5 = vcombine.high %v10842_v48, %v10849_v2  ;;  %v11019_v25 = vpop.permute.xlu0 %3783  ;;  %v14006_v7 = vld [vmem:[#allocation27_spill] sm:$0xff] }
 0x4e7   : > { %13971 = vst [vmem:[#allocation82_spill] sm:$0xff] %v10988_v42  ;;  %13972 = vst [vmem:[#allocation83_spill] sm:$0xff] %v10995_v58  ;;  %4291 = vrot.lane.b32.xlu0 %v10507_v28, %s8654_s16  ;;  %v11008_v62 = vcombine.high %v5155_v14, %v5171_v22  ;;  %v5178_v16 = vrot.slane %v5164_v43, %v8873_v21  ;;  %v5162_v27 = vrot.slane %v5148_v12, %v8873_v21  ;;  %v14012_v42 = vld [vmem:[#allocation17_spill] sm:$0xff] }
 0x4e8   : > { %4289 = vrot.lane.b32.xlu1 %v10500_v11, %s8654_s16  ;;  %v11023_v18 = vpack.i.b16 %v5255_v61, %v5254_v63  ;;  %v5260_v43 = vshrl.u32 %v10950_v51, 16  ;;  %v5230_v12 = vrot.slane %v5216_v20, %v8873_v21  ;;  %v5246_v29 = vrot.slane %v5232_v5, %v8873_v21  ;;  %v11030_v10 = vpop.permute.xlu1 %3785 }
 0x4e9   : > { %13973 = vst [vmem:[#allocation84_spill] sm:$0xff] %v11008_v62  ;;  %v11026_v49 = vcombine.low %v5162_v27, %v5178_v16  ;;  %v5261_v48 = vshrl.u32 %v10953_v31, 16  ;;  %v11035_v2 = vcombine.high %v5162_v27, %v5178_v16  ;;  %v5266_v63 = vshrl.u32 %v10970_v33, 16 }
 0x4ea   : > { %13974 = vst [vmem:[#allocation85_spill] sm:$0xff] %v11023_v18  ;;  %v5267_v61 = vshrl.u32 %v10982_v35, 16  ;;  %v11039_v39 = vcombine.low %v5230_v12, %v5246_v29  ;;  %v11041_v18 = vcombine.high %v5230_v12, %v5246_v29  ;;  %v11045_v20 = vpop.permute.xlu0 %4247  ;;  %v11051_v31 = vcombine.low %v5155_v14, %v5171_v22 }
 0x4eb   : > { %13975 = vst [vmem:[#allocation86_spill] sm:$0xff] %v11026_v49  ;;  %5375 = vrot.lane.b32.xlu0 %v10549_v24, %s8645_s18  ;;  %13976 = vst [vmem:[#allocation87_spill] sm:$0xff] %v11035_v2  ;;  %v11047_v5 = vpack.i.b16 %v5261_v48, %v5260_v43  ;;  %v11053_v16 = vcombine.low %v5223_v40, %v5239_v30  ;;  %v5272_v14 = vshrl.u32 %v10973_v19, 16  ;;  %v13983_v30 = vld [vmem:[#allocation43_spill] sm:$0xff]  ;;  %v5273_v48 = vshrl.u32 %v10984_v41, 16 }
 0x4ec   : > { %13977 = vst [vmem:[#allocation88_spill] sm:$0xff] %v11039_v39  ;;  %13978 = vst [vmem:[#allocation89_spill] sm:$0xff] %v11041_v18  ;;  %4293 = vrot.lane.b32.xlu1 %v10525_v50, %s8654_s16  ;;  %v11049_v51 = vpack.i.b16 %v5267_v61, %v5266_v63  ;;  %v11057_v33 = vpop.permute.xlu1 %4249  ;;  %v5278_v43 = vshrl.u32 %v11051_v31, 16  ;;  %v5284_v63 = vshrl.u32 %v11008_v62, 16  ;;  %v5285_v61 = vshrl.u32 %v10995_v58, 16  ;;  %v13989_v62 = vld [vmem:[#allocation44_spill] sm:$0xff] }
 0x4ed   : > { %13979 = vst [vmem:[#allocation90_spill] sm:$0xff] %v11047_v5  ;;  %13981 = vst [vmem:[#allocation92_spill] sm:$0xff] %v11051_v31  ;;  %v5279_v29 = vshrl.u32 %v11053_v16, 16  ;;  %v5290_v12 = vshrl.u32 %v11026_v49, 16  ;;  %v5291_v27 = vshrl.u32 %v11039_v39, 16  ;;  %v13985_v5 = vld [vmem:[#allocation45_spill] sm:$0xff]  ;;  %v11081_v19 = vpack.i.b16 %v5273_v48, %v5272_v14 }
 0x4ee   : > { %13980 = vst [vmem:[#allocation91_spill] sm:$0xff] %v11049_v51  ;;  %13982 = vst [vmem:[#allocation93_spill] sm:$0xff] %v11053_v16  ;;  %v11068_v40 = vpop.permute.xlu0 %4251  ;;  %v11083_v35 = vpack.i.b16 %v5285_v61, %v5284_v63  ;;  %v13991_v48 = vld [vmem:[#allocation47_spill] sm:$0xff]  ;;  %v13992_v63 = vld [vmem:[#allocation46_spill] sm:$0xff] }
 0x4ef   : > { %5379 = vrot.lane.b32.xlu0 %v10559_v47, %s8645_s18  ;;  %v11070_v22 = vpack.i.b16 %v5279_v29, %v5278_v43  ;;  %13986 = vst [vmem:[#allocation45_spill] sm:$0xff] %v11081_v19  ;;  %v5296_v43 = vshrl.u32 %v11035_v2, 16  ;;  %v5297_v29 = vshrl.u32 %v11041_v18, 16  ;;  %v13993_v61 = vld [vmem:[#allocation49_spill] sm:$0xff]  ;;  %v14020_v19 = vld [vmem:[#allocation22_spill] sm:$0xff] }
 0x4f0   : > { %5377 = vrot.lane.b32.xlu1 %v13983_v30, %s8645_s18  ;;  %v11077_v51 = vpop.permute.xlu1 %4253  ;;  %13987 = vst [vmem:[#allocation94_spill] sm:$0xff] %v11083_v35  ;;  %v14018_v35 = vld [vmem:[#allocation23_spill] sm:$0xff]  ;;  %v11190_v2 = vrot.slane %v14020_v19, 1  ;;  %v11228_v19 = vrot.slane %v13925_v46, 1  ;;  %v11247_v46 = vrot.slane %v13948_v8, 1 }
 0x4f1   : > { %13984 = vst [vmem:[#allocation43_spill] sm:$0xff] %v11070_v22  ;;  %v11087_v22 = vpack.i.b16 %v5291_v27, %v5290_v12  ;;  %v11093_v39 = vpack.i.b16 %v5297_v29, %v5296_v43 }
 0x4f2   : > { %v11091_v49 = vpop.permute.xlu0 %4255  ;;  %14021 = vst [vmem:[#allocation23_spill] sm:$0xff] %v11190_v2  ;;  %14031 = vst [vmem:[#allocation98_spill] sm:$0xff] %v11228_v19 }
 0x4f3   : > { %5383 = vrot.lane.b32.xlu0 %v13985_v5, %s8645_s18  ;;  %13988 = vst [vmem:[#allocation95_spill] sm:$0xff] %v11087_v22  ;;  %13990 = vst [vmem:[#allocation44_spill] sm:$0xff] %v11093_v39  ;;  %v13997_v39 = vld [vmem:[#allocation35_spill] sm:$0xff] }
 0x4f4   : > { %5381 = vrot.lane.b32.xlu1 %v13989_v62, %s8645_s18  ;;  %v11097_v14 = vpop.permute.xlu1 %4257  ;;  %v11146_v0 = vrot.slane %v13997_v39, 1  ;;  %v14004_v39 = vld [vmem:[#allocation26_spill] sm:$0xff]  ;;  %14036 = vst [vmem:[#allocation103_spill] sm:$0xff] %v11247_v46 }
 0x4f5   : > { %v11164_v16 = vrot.slane %v14004_v39, 1  ;;  %v11181_v39 = vrot.slane %v14014_v6, 1  ;;  %v14027_v6 = vld [vmem:[#allocation34_spill] sm:$0xff] }
 0x4f6   : > { %v11103_v27 = vpop.permute.xlu0 %4259  ;;  %13998 = vst [vmem:[#allocation49_spill] sm:$0xff] %v11146_v0 }
 0x4f7   : > { %5387 = vrot.lane.b32.xlu0 %v13991_v48, %s8645_s18  ;;  %14015 = vst [vmem:[#allocation17_spill] sm:$0xff] %v11181_v39 }
 0x4f8   : > { %5385 = vrot.lane.b32.xlu1 %v13992_v63, %s8645_s18  ;;  %v11105_v12 = vpop.permute.xlu1 %4261 }
 0x4fa   : > { %v11111_v43 = vpop.permute.xlu0 %3787 }
 0x4fb   : > { %5851 = vrot.lane.b32.xlu0 %v10549_v24, %s8654_s16  ;;  %v3867_v24 = vcombine.low %v10900_v44, %v10992_v9  ;;  %v13995_v9 = vld [vmem:[#allocation21_spill] sm:$0xff] }
 0x4fc   : > { %5389 = vrot.lane.b32.xlu1 %v13993_v61, %s8645_s18  ;;  %v11113_v29 = vpop.permute.xlu1 %3789  ;;  %v11143_v3 = vrot.slane %v13995_v9, 1  ;;  %v14002_v9 = vld [vmem:[#allocation25_spill] sm:$0xff] }
 0x4fd   : > { %v11140_v44 = vrot.slane %v3867_v24, %v8847_v13  ;;  %v11161_v31 = vrot.slane %v14002_v9, 1  ;;  %14005 = vst [vmem:[#allocation25_spill] sm:$0xff] %v11164_v16  ;;  %v11178_v9 = vrot.slane %v14012_v42, 1 }
 0x4fe   : > { %v11119_v58 = vpop.permute.xlu0 %3791  ;;  %13996 = vst [vmem:[#allocation46_spill] sm:$0xff] %v11143_v3 }
 0x4ff   : > { %5855 = vrot.lane.b32.xlu0 %v10559_v47, %s8654_s16  ;;  %v3875_v47 = vcombine.low %v10945_v55, %v11019_v25  ;;  %13994 = vst [vmem:[#allocation47_spill] sm:$0xff] %v11140_v44  ;;  %v3935_v55 = vcombine.low %v10928_v37, %v11004_v4  ;;  %v11167_v37 = vrot.slane %v14006_v7, 1  ;;  %v14008_v4 = vld [vmem:[#allocation28_spill] sm:$0xff]  ;;  %v11184_v7 = vrot.slane %v14016_v45, 1 }
 0x500   : > { %5853 = vrot.lane.b32.xlu1 %v13983_v30, %s8654_s16  ;;  %v11131_v22 = vpop.permute.xlu1 %3793 }
 0x501   : > { %v11151_v25 = vrot.slane %v3875_v47, %v8847_v13  ;;  %14007 = vst [vmem:[#allocation26_spill] sm:$0xff] %v11167_v37  ;;  %v11170_v47 = vrot.slane %v14008_v4, 1  ;;  %14017 = vst [vmem:[#allocation33_spill] sm:$0xff] %v11184_v7  ;;  %v11187_v4 = vrot.slane %v14018_v35, 1  ;;  %v11198_v42 = vrot.slane %v3935_v55, %v8847_v13 }
 0x502   : > { %v11137_v30 = vpop.permute.xlu0 %3795  ;;  %v11236_v55 = vrot.slane %v10472_v36, 1 }
 0x503   : > { %5859 = vrot.lane.b32.xlu0 %v13985_v5, %s8654_s16  ;;  %13999 = vst [vmem:[#allocation21_spill] sm:$0xff] %v11151_v25  ;;  %v14000_v5 = vld [vmem:[#allocation16_spill] sm:$0xff]  ;;  %14009 = vst [vmem:[#allocation27_spill] sm:$0xff] %v11170_v47 }
 0x504   : > { %5857 = vrot.lane.b32.xlu1 %v13989_v62, %s8654_s16  ;;  %v3943_v62 = vcombine.low %v10975_v54, %v11030_v10  ;;  %v11158_v24 = vrot.slane %v14000_v5, 1  ;;  %14003 = vst [vmem:[#allocation16_spill] sm:$0xff] %v11161_v31  ;;  %v3798_v54 = vpop.permute.xlu1 %3797  ;;  %14019 = vst [vmem:[#allocation36_spill] sm:$0xff] %v11187_v4 }
 0x505   : > { %14033 = vst [vmem:[#allocation100_spill] sm:$0xff] %v11236_v55  ;;  %v3951_v53 = vcombine.low %v11113_v29, %v3798_v54  ;;  %v11283_v29 = vrot.slane %v10490_v15, 1  ;;  %v3883_v54 = vcombine.low %v11111_v43, %v11137_v30 }
 0x506   : > { %14001 = vst [vmem:[#allocation35_spill] sm:$0xff] %v11158_v24  ;;  %v3800_v10 = vpop.permute.xlu0 %3799  ;;  %v11203_v45 = vrot.slane %v3943_v62, %v8847_v13  ;;  %v6375_v35 = vcombine.low %v11158_v24, %v11161_v31  ;;  %v14029_v31 = vld [vmem:[#allocation40_spill] sm:$0xff] }
 0x507   : > { %5863 = vrot.lane.b32.xlu0 %v13991_v48, %s8654_s16  ;;  %v14010_v48 = vld [vmem:[#allocation18_spill] sm:$0xff]  ;;  %v11225_v24 = vrot.slane %v14029_v31, 1  ;;  %v11244_v31 = vrot.slane %v10576_v57, 1  ;;  %v3891_v17 = vcombine.low %v11119_v58, %v3800_v10  ;;  %14046 = vst [vmem:[#allocation111_spill] sm:$0xff] %v11283_v29  ;;  %v11286_v58 = vrot.slane %v10507_v28, 1 }
 0x508   : > { %5861 = vrot.lane.b32.xlu1 %v13992_v63, %s8654_s16  ;;  %v11175_v5 = vrot.slane %v14010_v48, 1  ;;  %14013 = vst [vmem:[#allocation18_spill] sm:$0xff] %v11178_v9  ;;  %v6391_v63 = vcombine.low %v11143_v3, %v11146_v0  ;;  %v14022_v48 = vld [vmem:[#allocation37_spill] sm:$0xff]  ;;  %14025 = vst [vmem:[#allocation96_spill] sm:$0xff] %v11203_v45  ;;  %v11220_v0 = vrot.slane %v14027_v6, 1  ;;  %v6459_v3 = vcombine.low %v11181_v39, %v11184_v7  ;;  %v14040_v39 = vld [vmem:[#allocation48_spill] sm:$0xff] }
 0x509   : > { %v11195_v18 = vrot.slane %v14022_v48, 1  ;;  %14024 = vst [vmem:[#allocation37_spill] sm:$0xff] %v11198_v42  ;;  %14030 = vst [vmem:[#allocation40_spill] sm:$0xff] %v11225_v24  ;;  %v11239_v6 = vrot.slane %v13947_v60, 1  ;;  %v11253_v7 = vrot.slane %v10611_v26, 1  ;;  %v11302_v28 = vrot.slane %v13928_v23, 1 }
 0x50a   : > { %14011 = vst [vmem:[#allocation28_spill] sm:$0xff] %v11175_v5  ;;  %v11217_v62 = vpop.permute.xlu0 %4263  ;;  %14028 = vst [vmem:[#allocation34_spill] sm:$0xff] %v11220_v0  ;;  %v11231_v48 = vrot.slane %v6391_v63, %v8847_v13  ;;  %v11250_v63 = vrot.slane %v10594_v56, 1 }
 0x50b   : > { %14023 = vst [vmem:[#allocation22_spill] sm:$0xff] %v11195_v18  ;;  %3819 = vrot.lane.b32.xlu0 %v13947_v60, %s8645_s18  ;;  %14026 = vst [vmem:[#allocation97_spill] sm:$0xff] %v11217_v62  ;;  %v3802_v41 = vpop.permute.xlu1 %3801  ;;  %v11280_v62 = vrot.slane %v10525_v50, 1  ;;  %v6535_v15 = vcombine.low %v11247_v46, %v11253_v7  ;;  %v11305_v50 = vrot.slane %v10479_v52, 1 }
 0x50c   : > { %5865 = vrot.lane.b32.xlu1 %v13993_v61, %s8654_s16  ;;  %14032 = vst [vmem:[#allocation99_spill] sm:$0xff] %v11231_v48  ;;  %v6399_v61 = vcombine.low %v11190_v2, %v11195_v18  ;;  %14034 = vst [vmem:[#allocation101_spill] sm:$0xff] %v11239_v6  ;;  %v3959_v36 = vcombine.low %v11131_v22, %v3802_v41  ;;  %v11257_v18 = vrot.slane %v10583_v32, 1  ;;  %v11260_v2 = vrot.slane %v14040_v39, 1 }
 0x50d   : > { %14035 = vst [vmem:[#allocation102_spill] sm:$0xff] %v11244_v31  ;;  %14037 = vst [vmem:[#allocation104_spill] sm:$0xff] %v11250_v63  ;;  %v11272_v41 = vrot.slane %v6459_v3, %v8847_v13  ;;  %v6467_v22 = vcombine.low %v11220_v0, %v11225_v24  ;;  %v6527_v11 = vcombine.low %v11239_v6, %v11250_v63 }
 0x50e   : > { %14038 = vst [vmem:[#allocation105_spill] sm:$0xff] %v11253_v7  ;;  %14039 = vst [vmem:[#allocation106_spill] sm:$0xff] %v11257_v18  ;;  %v11269_v1 = vpop.permute.xlu0 %4267  ;;  %v11291_v3 = vrot.slane %v3959_v36, %v8847_v13  ;;  %v6595_v43 = vcombine.low %v11244_v31, %v11260_v2  ;;  %v6603_v30 = vcombine.low %v11257_v18, %v11263_v38 }
 0x50f   : > { %3823 = vrot.lane.b32.xlu0 %v13948_v8, %s8645_s18  ;;  %14041 = vst [vmem:[#allocation48_spill] sm:$0xff] %v11260_v2  ;;  %14043 = vst [vmem:[#allocation108_spill] sm:$0xff] %v11272_v41  ;;  %v11293_v10 = vpop.permute.xlu1 %4265  ;;  %v11312_v36 = vrot.slane %v3951_v53, %v8847_v13  ;;  %v11315_v63 = vrot.slane %v3891_v17, %v8847_v13  ;;  %v11322_v52 = vrot.slane %v6399_v61, %v8847_v13 }
 0x510   : > { %3821 = vrot.lane.b32.xlu1 %v10576_v57, %s8645_s18  ;;  %14045 = vst [vmem:[#allocation110_spill] sm:$0xff] %v11280_v62  ;;  %14047 = vst [vmem:[#allocation112_spill] sm:$0xff] %v11286_v58  ;;  %v11325_v7 = vrot.slane %v6467_v22, %v8847_v13  ;;  %v6579_v38 = vcombine.low %v11236_v55, %v11277_v59  ;;  %v6587_v53 = vcombine.low %v11305_v50, %v11280_v62 }
 0x511   : > { %14048 = vst [vmem:[#allocation113_spill] sm:$0xff] %v11291_v3  ;;  %14049 = vst [vmem:[#allocation114_spill] sm:$0xff] %v11302_v28  ;;  %v6511_v17 = vcombine.low %v11228_v19, %v11283_v29  ;;  %v6519_v2 = vcombine.low %v11302_v28, %v11286_v58  ;;  %v11336_v18 = vrot.slane %v3883_v54, %v8847_v13 }
 0x512   : > { %14050 = vst [vmem:[#allocation115_spill] sm:$0xff] %v11305_v50  ;;  %14051 = vst [vmem:[#allocation116_spill] sm:$0xff] %v11312_v36  ;;  %v11319_v23 = vpop.permute.xlu0 %4271  ;;  %v3983_v61 = vcombine.low %v11312_v36, %v11291_v3  ;;  %v11343_v31 = vrot.slane %v6527_v11, %v8847_v13  ;;  %v11346_v46 = vrot.slane %v6535_v15, %v8847_v13  ;;  %v14147_v36 = vld [vmem:[#allocation69_spill] sm:$0xff]  ;;  %v14149_v3 = vld [vmem:[#allocation70_spill] sm:$0xff] }
 0x513   : > { %3827 = vrot.lane.b32.xlu0 %v10594_v56, %s8645_s18  ;;  %14052 = vst [vmem:[#allocation117_spill] sm:$0xff] %v11315_v63  ;;  %14053 = vst [vmem:[#allocation118_spill] sm:$0xff] %v11322_v52  ;;  %v4270_v22 = vpop.permute.xlu1 %4269  ;;  %v3967_v6 = vcombine.low %v11198_v42, %v11203_v45  ;;  %v11351_v58 = vrot.slane %v6375_v35, %v8847_v13  ;;  %v11354_v54 = vrot.slane %v6595_v43, %v8847_v13  ;;  %v14146_v45 = vld [vmem:[#allocation71_spill] sm:$0xff] }
 0x514   : > { %3825 = vrot.lane.b32.xlu1 %v10583_v32, %s8645_s18  ;;  %14054 = vst [vmem:[#allocation119_spill] sm:$0xff] %v11325_v7  ;;  %14055 = vst [vmem:[#allocation120_spill] sm:$0xff] %v11336_v18  ;;  %v11357_v29 = vrot.slane %v6603_v30, %v8847_v13  ;;  %v3915_v62 = vcombine.low %v11336_v18, %v11315_v63  ;;  %v14061_v15 = vcombine.low %v11175_v5, %v11164_v16  ;;  %v14143_v63 = vld [vmem:[#allocation66_spill] sm:$0xff]  ;;  %v14152_v16 = vld [vmem:[#allocation75_spill] sm:$0xff] }
 0x515   : > { %14056 = vst [vmem:[#allocation121_spill] sm:$0xff] %v11343_v31  ;;  %14057 = vst [vmem:[#allocation122_spill] sm:$0xff] %v11346_v46  ;;  %v14063_v35 = vcombine.low %v11178_v9, %v11167_v37  ;;  %v14065_v30 = vcombine.low %v11187_v4, %v11170_v47  ;;  %v11382_v55 = vrot.slane %v6579_v38, %v8847_v13  ;;  %v14151_v47 = vld [vmem:[#allocation76_spill] sm:$0xff]  ;;  %v14156_v9 = vld [vmem:[#allocation77_spill] sm:$0xff] }
 0x516   : > { %14058 = vst [vmem:[#allocation123_spill] sm:$0xff] %v11351_v58  ;;  %14059 = vst [vmem:[#allocation124_spill] sm:$0xff] %v11354_v54  ;;  %v4276_v11 = vpop.permute.xlu0 %4275  ;;  %v11367_v59 = vrot.slane %v14061_v15, %v8847_v13  ;;  %v11385_v28 = vrot.slane %v6587_v53, %v8847_v13  ;;  %v11388_v15 = vrot.slane %v6511_v17, %v8847_v13 }
 0x517   : > { %3831 = vrot.lane.b32.xlu0 %v10611_v26, %s8645_s18  ;;  %14060 = vst [vmem:[#allocation125_spill] sm:$0xff] %v11357_v29  ;;  %v11373_v43 = vrot.slane %v14063_v35, %v8847_v13  ;;  %v11379_v50 = vrot.slane %v14065_v30, %v8847_v13  ;;  %14067 = vst [vmem:[#allocation129_spill] sm:$0xff] %v11382_v55  ;;  %v11391_v24 = vrot.slane %v6519_v2, %v8847_v13  ;;  %v4274_v19 = vpop.permute.xlu1 %4273 }
 0x518   : > { %3829 = vrot.lane.b32.xlu1 %v14040_v39, %s8645_s18  ;;  %14062 = vst [vmem:[#allocation126_spill] sm:$0xff] %v11367_v59  ;;  %14068 = vst [vmem:[#allocation130_spill] sm:$0xff] %v11385_v28  ;;  %v11394_v35 = vrot.slane %v3983_v61, %v8873_v21  ;;  %v6423_v38 = vcombine.low %v11231_v48, %v11322_v52  ;;  %v6491_v53 = vcombine.low %v11272_v41, %v11325_v7 }
 0x519   : > { %14064 = vst [vmem:[#allocation127_spill] sm:$0xff] %v11373_v43  ;;  %14066 = vst [vmem:[#allocation128_spill] sm:$0xff] %v11379_v50  ;;  %v6559_v17 = vcombine.low %v11343_v31, %v11346_v46  ;;  %v14072_v2 = vcombine.low %v11140_v44, %v11151_v25  ;;  %v11411_v61 = vrot.slane %v3967_v6, %v8873_v21  ;;  %v14140_v44 = vld [vmem:[#allocation39_spill] sm:$0xff] }
 0x51a   : > { %14069 = vst [vmem:[#allocation131_spill] sm:$0xff] %v11388_v15  ;;  %14070 = vst [vmem:[#allocation132_spill] sm:$0xff] %v11391_v24  ;;  %v4343_v48 = vcombine.low %v11045_v20, %v11091_v49  ;;  %v11418_v41 = vrot.slane %v3915_v62, %v8873_v21  ;;  %v11422_v31 = vpop.permute.xlu0 %5359  ;;  %v6475_v6 = vcombine.low %v11367_v59, %v11379_v50  ;;  %v14112_v50 = vld [vmem:[#allocation19_spill] sm:$0xff] }
 0x51b   : > { %14071 = vst [vmem:[#allocation133_spill] sm:$0xff] %v11394_v35  ;;  %4295 = vrot.lane.b32.xlu0 %v13947_v60, %s8654_s16  ;;  %v11408_v30 = vrot.slane %v14072_v2, %v8873_v21  ;;  %14074 = vst [vmem:[#allocation135_spill] sm:$0xff] %v11411_v61  ;;  %v6627_v60 = vcombine.low %v11354_v54, %v11357_v29  ;;  %v6407_v2 = vcombine.low %v11351_v58, %v11373_v43  ;;  %v4278_v46 = vpop.permute.xlu1 %4277  ;;  %v14113_v58 = vld [vmem:[#allocation15_spill] sm:$0xff] }
 0x51c   : > { %14075 = vst [vmem:[#allocation136_spill] sm:$0xff] %v11418_v41  ;;  %3833 = vrot.lane.b32.xlu1 %v10630_v34, %s8645_s18  ;;  %v4411_v54 = vcombine.low %v11057_v33, %v11097_v14  ;;  %v4419_v49 = vcombine.low %v11077_v51, %v11105_v12  ;;  %v6543_v20 = vcombine.low %v11388_v15, %v11391_v24 }
 0x51d   : > { %14073 = vst [vmem:[#allocation134_spill] sm:$0xff] %v11408_v30  ;;  %v6611_v62 = vcombine.low %v11382_v55, %v11385_v28  ;;  %v11438_v29 = vcombine.low %v11411_v61, %v11394_v35  ;;  %v11443_v59 = vrot.slane %v6423_v38, %v8873_v21  ;;  %v11446_v33 = vrot.slane %v6491_v53, %v8873_v21  ;;  %v14138_v35 = vld [vmem:[#allocation67_spill] sm:$0xff] }
 0x51e   : > { %v11449_v51 = vrot.slane %v6559_v17, %v8873_v21  ;;  %v4427_v14 = vcombine.low %v11293_v10, %v4274_v19  ;;  %v4367_v12 = vcombine.low %v11269_v1, %v4276_v11  ;;  %v4435_v55 = vcombine.low %v4270_v22, %v4278_v46  ;;  %v11464_v53 = vpop.permute.xlu0 %5363  ;;  %v14084_v46 = vld [vmem:[#allocation97_spill] sm:$0xff] }
 0x51f   : > { %14076 = vst [vmem:[#allocation137_spill] sm:$0xff] %v11438_v29  ;;  %4299 = vrot.lane.b32.xlu0 %v13948_v8, %s8654_s16  ;;  %14077 = vst [vmem:[#allocation138_spill] sm:$0xff] %v11443_v59  ;;  %v11454_v28 = vrot.slane %v6627_v60, %v8873_v21  ;;  %v4351_v8 = vcombine.low %v11068_v40, %v11103_v27  ;;  %v11460_v38 = vcombine.low %v11408_v30, %v11418_v41  ;;  %v11486_v11 = vpop.permute.xlu1 %5361  ;;  %v14126_v29 = vld [vmem:[#allocation59_spill] sm:$0xff] }
 0x520   : > { %14078 = vst [vmem:[#allocation139_spill] sm:$0xff] %v11446_v33  ;;  %14079 = vst [vmem:[#allocation140_spill] sm:$0xff] %v11449_v51  ;;  %4297 = vrot.lane.b32.xlu1 %v10576_v57, %s8654_s16  ;;  %v11467_v19 = vrot.slane %v6407_v2, %v8873_v21  ;;  %v11470_v1 = vrot.slane %v6475_v6, %v8873_v21  ;;  %v4359_v10 = vcombine.low %v14084_v46, %v11319_v23 }
 0x521   : > { %14080 = vst [vmem:[#allocation141_spill] sm:$0xff] %v11454_v28  ;;  %14081 = vst [vmem:[#allocation142_spill] sm:$0xff] %v11460_v38  ;;  %v11475_v40 = vrot.slane %v4435_v55, %v8847_v13  ;;  %v11478_v27 = vrot.slane %v6543_v20, %v8873_v21  ;;  %v11481_v22 = vrot.slane %v6611_v62, %v8873_v21  ;;  %v14125_v38 = vld [vmem:[#allocation60_spill] sm:$0xff] }
 0x522   : > { %14082 = vst [vmem:[#allocation143_spill] sm:$0xff] %v11467_v19  ;;  %14083 = vst [vmem:[#allocation144_spill] sm:$0xff] %v11470_v1  ;;  %v11484_v57 = vrot.slane %v4419_v49, %v8847_v13  ;;  %v11494_v55 = vcombine.low %v11467_v19, %v11443_v59  ;;  %v11498_v17 = vcombine.low %v11470_v1, %v11446_v33  ;;  %v14116_v1 = vld [vmem:[#allocation54_spill] sm:$0xff] }
 0x523   : > { %14085 = vst [vmem:[#allocation97_spill] sm:$0xff] %v11475_v40  ;;  %14086 = vst [vmem:[#allocation145_spill] sm:$0xff] %v11478_v27  ;;  %4303 = vrot.lane.b32.xlu0 %v10594_v56, %s8654_s16  ;;  %v11501_v60 = vrot.slane %v4427_v14, %v8847_v13  ;;  %v11504_v2 = vrot.slane %v4367_v12, %v8847_v13  ;;  %v11508_v56 = vcombine.low %v11478_v27, %v11449_v51  ;;  %v11516_v49 = vpop.permute.xlu0 %5367 }
 0x524   : > { %14087 = vst [vmem:[#allocation146_spill] sm:$0xff] %v11481_v22  ;;  %14088 = vst [vmem:[#allocation147_spill] sm:$0xff] %v11484_v57  ;;  %v11512_v6 = vcombine.low %v11481_v22, %v11454_v28  ;;  %4301 = vrot.lane.b32.xlu1 %v10583_v32, %s8654_s16  ;;  %v11519_v20 = vrot.slane %v4411_v54, %v8847_v13  ;;  %v11522_v62 = vrot.slane %v4351_v8, %v8847_v13  ;;  %v11532_v23 = vpop.permute.xlu1 %5365  ;;  %v14100_v22 = vld [vmem:[#allocation13_spill] sm:$0xff]  ;;  %v14101_v8 = vld [vmem:[#allocation24_spill] sm:$0xff] }
 0x525   : > { %14089 = vst [vmem:[#allocation148_spill] sm:$0xff] %v11494_v55  ;;  %14090 = vst [vmem:[#allocation149_spill] sm:$0xff] %v11498_v17  ;;  %v11525_v14 = vrot.slane %v4359_v10, %v8847_v13  ;;  %v4459_v12 = vcombine.low %v11501_v60, %v11475_v40  ;;  %v11530_v46 = vrot.slane %v4343_v48, %v8847_v13  ;;  %v14136_v40 = vld [vmem:[#allocation41_spill] sm:$0xff] }
 0x526   : > { %14091 = vst [vmem:[#allocation150_spill] sm:$0xff] %v11501_v60  ;;  %14092 = vst [vmem:[#allocation151_spill] sm:$0xff] %v11504_v2  ;;  %v4443_v32 = vcombine.low %v11519_v20, %v11484_v57  ;;  %v14102_v28 = vpack.i.b16 %v14100_v22, %v14101_v8  ;;  %v14111_v8 = vld [vmem:[#allocation14_spill] sm:$0xff]  ;;  %v14153_v37 = vpack.i.b16 %v14151_v47, %v14152_v16 }
 0x527   : > { %14093 = vst [vmem:[#allocation152_spill] sm:$0xff] %v11508_v56  ;;  %14094 = vst [vmem:[#allocation153_spill] sm:$0xff] %v11512_v6  ;;  %4307 = vrot.lane.b32.xlu0 %v10611_v26, %s8654_s16  ;;  %v4391_v54 = vcombine.low %v11525_v14, %v11504_v2  ;;  %v11546_v48 = vpop.permute.xlu0 %5371  ;;  %v4375_v26 = vcombine.low %v11530_v46, %v11522_v62  ;;  %v11551_v15 = vrot.slane %v4459_v12, %v8873_v21  ;;  %v14117_v6 = vld [vmem:[#allocation53_spill] sm:$0xff]  ;;  %v14134_v2 = vld [vmem:[#allocation42_spill] sm:$0xff] }
 0x528   : > { %14095 = vst [vmem:[#allocation154_spill] sm:$0xff] %v11519_v20  ;;  %14096 = vst [vmem:[#allocation155_spill] sm:$0xff] %v11522_v62  ;;  %4305 = vrot.lane.b32.xlu1 %v14040_v39, %s8654_s16  ;;  %v11553_v24 = vpop.permute.xlu1 %5369  ;;  %v11560_v10 = vrot.slane %v4443_v32, %v8873_v21  ;;  %v14108_v32 = vld [vmem:[#allocation12_spill] sm:$0xff]  ;;  %v14159_v16 = vld [vmem:[#allocation78_spill] sm:$0xff] }
 0x529   : > { %14097 = vst [vmem:[#allocation156_spill] sm:$0xff] %v11525_v14  ;;  %14098 = vst [vmem:[#allocation157_spill] sm:$0xff] %v11530_v46  ;;  %v11563_v39 = vrot.slane %v4391_v54, %v8873_v21  ;;  %v11570_v12 = vrot.slane %v4375_v26, %v8873_v21  ;;  %v14132_v46 = vld [vmem:[#allocation29_spill] sm:$0xff] }
 0x52a   : > { %14099 = vst [vmem:[#allocation158_spill] sm:$0xff] %v11551_v15  ;;  %14103 = vst [vmem:[#allocation13_spill] sm:$0xff] %v11560_v10  ;;  %v11574_v51 = vcombine.low %v11560_v10, %v11551_v15  ;;  %v14130_v10 = vld [vmem:[#allocation61_spill] sm:$0xff] }
 0x52b   : > { %3677 = vrot.lane.b32.xlu0 %v14102_v28, %s8665_s7  ;;  %14104 = vst [vmem:[#allocation24_spill] sm:$0xff] %v11563_v39  ;;  %14105 = vst [vmem:[#allocation159_spill] sm:$0xff] %v11570_v12  ;;  %v14107_v28 = vld [vmem:[#allocation20_spill] sm:$0xff] }
 0x52c   : > { %4309 = vrot.lane.b32.xlu1 %v10630_v34, %s8654_s16  ;;  %v11567_v27 = vpop.permute.xlu0 %5835  ;;  %14106 = vst [vmem:[#allocation160_spill] sm:$0xff] %v11574_v51  ;;  %v11576_v22 = vpop.permute.xlu1 %5373  ;;  %v14109_v54 = vpack.i.b16 %v14107_v28, %v14108_v32  ;;  %v11584_v34 = vcombine.low %v11570_v12, %v11563_v39  ;;  %v14114_v28 = vpack.i.b16 %v14112_v50, %v14113_v58  ;;  %v14115_v32 = vld [vmem:[#allocation52_spill] sm:$0xff]  ;;  %v14118_v58 = vld [vmem:[#allocation55_spill] sm:$0xff]  ;;  %v14123_v51 = vld [vmem:[#allocation58_spill] sm:$0xff] }
 0x52d   : > { %v14119_v50 = vld [vmem:[#allocation31_spill] sm:$0xff]  ;;  %v14129_v39 = vld [vmem:[#allocation30_spill] sm:$0xff] }
 0x52e   : > { %14110 = vst [vmem:[#allocation20_spill] sm:$0xff] %v11584_v34  ;;  %v14122_v34 = vld [vmem:[#allocation57_spill] sm:$0xff] }
 0x52f   : > { %3685 = vrot.lane.b32.xlu0 %v14109_v54, %s8666_s28 }
 0x530   : > { %5393 = vrot.lane.b32.xlu1 %v14111_v8, %s8645_s18  ;;  %v11588_v26 = vpop.permute.xlu0 %5839  ;;  %v11592_v56 = vpop.permute.xlu1 %5837 }
 0x533   : > { %3693 = vrot.lane.b32.xlu0 %v14114_v28, %s8667_s17 }
 0x534   : > { %5397 = vrot.lane.b32.xlu1 %v14115_v32, %s8645_s18  ;;  %v11600_v54 = vpop.permute.xlu0 %5843  ;;  %v11602_v43 = vpop.permute.xlu1 %5841 }
 0x537   : > { %3673 = vrot.lane.b32.xlu0 %v14116_v1, %s8646_s6  ;;  %v14120_v1 = vld [vmem:[#allocation56_spill] sm:$0xff] }
 0x538   : > { %5401 = vrot.lane.b32.xlu1 %v14117_v6, %s8645_s18  ;;  %v11608_v33 = vpop.permute.xlu0 %5847  ;;  %v11610_v19 = vpop.permute.xlu1 %5845 }
 0x53b   : > { %3681 = vrot.lane.b32.xlu0 %v14118_v58, %s8668_s30  ;;  %v14121_v58 = vld [vmem:[#allocation32_spill] sm:$0xff] }
 0x53c   : > { %5405 = vrot.lane.b32.xlu1 %v14119_v50, %s8645_s18  ;;  %v11616_v28 = vpop.permute.xlu0 %3803 }
 0x53d   : > { %v11618_v59 = vpop.permute.xlu1 %5849 }
 0x53f   : > { %3689 = vrot.lane.b32.xlu0 %v14120_v1, %s8669_s11 }
 0x540   : > { %5869 = vrot.lane.b32.xlu1 %v14111_v8, %s8654_s16  ;;  %v11624_v7 = vpop.permute.xlu0 %3807 }
 0x542   : > { %v11626_v52 = vpop.permute.xlu1 %3805 }
 0x543   : > { %3697 = vrot.lane.b32.xlu0 %v14121_v58, %s8662_s15 }
 0x544   : > { %5873 = vrot.lane.b32.xlu1 %v14115_v32, %s8654_s16  ;;  %v11632_v17 = vpop.permute.xlu0 %3811 }
 0x546   : > { %v11634_v55 = vpop.permute.xlu1 %3809 }
 0x547   : > { %5391 = vrot.lane.b32.xlu0 %v14122_v34, %s8645_s18 }
 0x548   : > { %5877 = vrot.lane.b32.xlu1 %v14117_v6, %s8654_s16  ;;  %v11640_v8 = vpop.permute.xlu0 %3815 }
 0x54a   : > { %v11642_v1 = vpop.permute.xlu1 %3813 }
 0x54b   : > { %5395 = vrot.lane.b32.xlu0 %v14123_v51, %s8645_s18 }
 0x54c   : > { %5881 = vrot.lane.b32.xlu1 %v14119_v50, %s8654_s16  ;;  %v11648_v32 = vpop.permute.xlu0 %4279 }
 0x54d   : > { %14124 = vst [vmem:[#allocation12_spill] sm:$0xff] %v11648_v32 }
 0x54e   : > { %v11650_v58 = vpop.permute.xlu1 %3817 }
 0x54f   : > { %5399 = vrot.lane.b32.xlu0 %v14125_v38, %s8645_s18 }
 0x550   : > { %5409 = vrot.lane.b32.xlu1 %v14126_v29, %s8645_s18 }
 0x551   : > { %v11656_v6 = vpop.permute.xlu0 %4283 }
 0x552   : > { %14127 = vst [vmem:[#allocation14_spill] sm:$0xff] %v11656_v6  ;;  %v11658_v12 = vpop.permute.xlu1 %4281 }
 0x553   : > { %14128 = vst [vmem:[#allocation19_spill] sm:$0xff] %v11658_v12  ;;  %5403 = vrot.lane.b32.xlu0 %v14129_v39, %s8645_s18  ;;  %v14165_v12 = vld [vmem:[#allocation90_spill] sm:$0xff] }
 0x554   : > { %5413 = vrot.lane.b32.xlu1 %v14130_v10, %s8645_s18 }
 0x555   : > { %v11664_v50 = vpop.permute.xlu0 %4287 }
 0x556   : > { %14131 = vst [vmem:[#allocation15_spill] sm:$0xff] %v11664_v50  ;;  %v11666_v15 = vpop.permute.xlu1 %4285  ;;  %v14158_v50 = vld [vmem:[#allocation80_spill] sm:$0xff] }
 0x557   : > { %5867 = vrot.lane.b32.xlu0 %v14122_v34, %s8654_s16 }
 0x558   : > { %5417 = vrot.lane.b32.xlu1 %v14132_v46, %s8645_s18 }
 0x559   : > { %v11672_v62 = vpop.permute.xlu0 %4291 }
 0x55a   : > { %14133 = vst [vmem:[#allocation52_spill] sm:$0xff] %v11672_v62  ;;  %v11674_v14 = vpop.permute.xlu1 %4289  ;;  %v5531_v62 = vcombine.low %v11532_v23, %v11576_v22  ;;  %v14168_v23 = vld [vmem:[#allocation86_spill] sm:$0xff] }
 0x55b   : > { %5871 = vrot.lane.b32.xlu0 %v14123_v51, %s8654_s16  ;;  %v14135_v51 = vld [vmem:[#allocation38_spill] sm:$0xff] }
 0x55c   : > { %5421 = vrot.lane.b32.xlu1 %v14134_v2, %s8645_s18  ;;  %v14137_v30 = vpack.i.b16 %v14135_v51, %v14136_v40  ;;  %v14144_v40 = vld [vmem:[#allocation62_spill] sm:$0xff] }
 0x55d   : > { %v11680_v20 = vpop.permute.xlu0 %5375 }
 0x55e   : > { %v11682_v57 = vpop.permute.xlu1 %4293 }
 0x55f   : > { %5875 = vrot.lane.b32.xlu0 %v14125_v38, %s8654_s16  ;;  %v14139_v38 = vld [vmem:[#allocation65_spill] sm:$0xff] }
 0x560   : > { %5885 = vrot.lane.b32.xlu1 %v14126_v29, %s8654_s16  ;;  %v14141_v29 = vpack.i.b16 %v14139_v38, %v14140_v44 }
 0x561   : > { %v5380_v34 = vpop.permute.xlu0 %5379 }
 0x562   : > { %v5378_v60 = vpop.permute.xlu1 %5377 }
 0x563   : > { %5879 = vrot.lane.b32.xlu0 %v14129_v39, %s8654_s16  ;;  %v14142_v39 = vld [vmem:[#allocation68_spill] sm:$0xff] }
 0x564   : > { %3679 = vrot.lane.b32.xlu1 %v14137_v30, %s8665_s7  ;;  %v14145_v30 = vpack.i.b16 %v14143_v63, %v14144_v40 }
 0x565   : > { %v11694_v41 = vpop.permute.xlu0 %5383 }
 0x566   : > { %v5382_v61 = vpop.permute.xlu1 %5381 }
 0x567   : > { %5407 = vrot.lane.b32.xlu0 %v14138_v35, %s8645_s18 }
 0x568   : > { %3687 = vrot.lane.b32.xlu1 %v14141_v29, %s8666_s28  ;;  %v14148_v29 = vld [vmem:[#allocation74_spill] sm:$0xff] }
 0x569   : > { %v5388_v25 = vpop.permute.xlu0 %5387 }
 0x56a   : > { %v5386_v18 = vpop.permute.xlu1 %5385 }
 0x56b   : > { %5411 = vrot.lane.b32.xlu0 %v14142_v39, %s8645_s18 }
 0x56c   : > { %3695 = vrot.lane.b32.xlu1 %v14145_v30, %s8667_s17  ;;  %v14150_v30 = vld [vmem:[#allocation72_spill] sm:$0xff] }
 0x56d   : > { %v11708_v51 = vpop.permute.xlu0 %5851 }
 0x56e   : > { %v5390_v42 = vpop.permute.xlu1 %5389 }
 0x56f   : > { %5415 = vrot.lane.b32.xlu0 %v14146_v45, %s8645_s18 }
 0x570   : > { %3675 = vrot.lane.b32.xlu1 %v14147_v36, %s8646_s6 }
 0x571   : > { %v11714_v44 = vpop.permute.xlu0 %5855 }
 0x572   : > { %v11716_v38 = vpop.permute.xlu1 %5853 }
 0x573   : > { %5419 = vrot.lane.b32.xlu0 %v14148_v29, %s8645_s18  ;;  %v14161_v29 = vld [vmem:[#allocation85_spill] sm:$0xff] }
 0x574   : > { %3683 = vrot.lane.b32.xlu1 %v14149_v3, %s8668_s30  ;;  %v14154_v3 = vld [vmem:[#allocation73_spill] sm:$0xff] }
 0x575   : > { %v11722_v63 = vpop.permute.xlu0 %5859 }
 0x576   : > { %v11724_v40 = vpop.permute.xlu1 %5857 }
 0x577   : > { %5883 = vrot.lane.b32.xlu0 %v14138_v35, %s8654_s16  ;;  %v14155_v35 = vld [vmem:[#allocation79_spill] sm:$0xff] }
 0x578   : > { %3691 = vrot.lane.b32.xlu1 %v14150_v30, %s8669_s11  ;;  %v14157_v2 = vpack.i.b16 %v14155_v35, %v14156_v9  ;;  %v5547_v9 = vcombine.low %v5382_v61, %v5390_v42  ;;  %v14163_v35 = vld [vmem:[#allocation84_spill] sm:$0xff]  ;;  %v5523_v42 = vcombine.low %v11486_v11, %v11553_v24  ;;  %v5471_v61 = vcombine.low %v11680_v20, %v11694_v41 }
 0x579   : > { %v11730_v36 = vpop.permute.xlu0 %5863  ;;  %v11784_v24 = vrot.slane %v5531_v62, %v8847_v13  ;;  %v4011_v20 = vcombine.low %v11624_v7, %v11640_v8  ;;  %v14174_v62 = vld [vmem:[#allocation91_spill] sm:$0xff]  ;;  %v4003_v7 = vcombine.low %v11616_v28, %v11632_v17 }
 0x57a   : > { %v11732_v0 = vpop.permute.xlu1 %5861 }
 0x57b   : > { %5303 = vrot.lane.b32.xlu0 %v14153_v37, %s8665_s7  ;;  %v14160_v37 = vpack.i.b16 %v14158_v50, %v14159_v16  ;;  %v5539_v50 = vcombine.low %v5378_v60, %v5386_v18  ;;  %v5479_v16 = vcombine.low %v5380_v34, %v5388_v25  ;;  %v5455_v18 = vcombine.low %v11422_v31, %v11516_v49 }
 0x57c   : > { %3699 = vrot.lane.b32.xlu1 %v14154_v3, %s8662_s15  ;;  %v4079_v25 = vcombine.low %v11634_v55, %v11650_v58  ;;  %14170 = vst [vmem:[#allocation53_spill] sm:$0xff] %v11784_v24  ;;  %v4071_v49 = vcombine.low %v11626_v52, %v11642_v1  ;;  %v11805_v34 = vrot.slane %v5471_v61, %v8847_v13  ;;  %v14178_v1 = vld [vmem:[#allocation89_spill] sm:$0xff] }
 0x57d   : > { %v3820_v4 = vpop.permute.xlu0 %3819  ;;  %v11787_v41 = vrot.slane %v5539_v50, %v8847_v13  ;;  %v11790_v11 = vrot.slane %v5479_v16, %v8847_v13  ;;  %v11810_v52 = vrot.slane %v5455_v18, %v8847_v13  ;;  %v11840_v50 = vrot.slane %v4011_v20, %v8847_v13 }
 0x57e   : > { %v11740_v5 = vpop.permute.xlu1 %5865  ;;  %14176 = vst [vmem:[#allocation57_spill] sm:$0xff] %v11805_v34 }
 0x57f   : > { %5311 = vrot.lane.b32.xlu0 %v14157_v2, %s8666_s28  ;;  %v14162_v2 = vld [vmem:[#allocation83_spill] sm:$0xff]  ;;  %14171 = vst [vmem:[#allocation55_spill] sm:$0xff] %v11787_v41  ;;  %14172 = vst [vmem:[#allocation31_spill] sm:$0xff] %v11790_v11 }
 0x580   : > { %5889 = vrot.lane.b32.xlu1 %v14130_v10, %s8654_s16  ;;  %v14164_v10 = vpack.i.b16 %v14162_v2, %v14163_v35  ;;  %14177 = vst [vmem:[#allocation58_spill] sm:$0xff] %v11810_v52  ;;  %v5503_v35 = vcombine.low %v11805_v34, %v11790_v11  ;;  %v14243_v34 = vld [vmem:[#allocation116_spill] sm:$0xff] }
 0x581   : > { %v3824_v30 = vpop.permute.xlu0 %3823 }
 0x582   : > { %v3822_v32 = vpop.permute.xlu1 %3821 }
 0x583   : > { %5319 = vrot.lane.b32.xlu0 %v14160_v37, %s8667_s17 }
 0x584   : > { %5893 = vrot.lane.b32.xlu1 %v14132_v46, %s8654_s16  ;;  %v5463_v46 = vcombine.low %v11464_v53, %v11546_v48  ;;  %v14167_v53 = vld [vmem:[#allocation88_spill] sm:$0xff] }
 0x585   : > { %v3828_v47 = vpop.permute.xlu0 %3827  ;;  %v14169_v60 = vpack.i.b16 %v14167_v53, %v14168_v23 }
 0x586   : > { %v3826_v3 = vpop.permute.xlu1 %3825  ;;  %v11793_v55 = vrot.slane %v5463_v46, %v8847_v13  ;;  %v4019_v22 = vcombine.low %v3820_v4, %v3828_v47  ;;  %v11815_v4 = vrot.slane %v4079_v25, %v8847_v13  ;;  %v14179_v47 = vld [vmem:[#allocation87_spill] sm:$0xff]  ;;  %v11857_v25 = vrot.slane %v4003_v7, %v8847_v13 }
 0x587   : > { %5299 = vrot.lane.b32.xlu0 %v14161_v29, %s8646_s6  ;;  %v11771_v29 = vrot.slane %v5547_v9, %v8847_v13  ;;  %v14180_v9 = vpack.i.b16 %v14178_v1, %v14179_v47  ;;  %v5939_v7 = vcombine.low %v11588_v26, %v11608_v33  ;;  %v5955_v33 = vcombine.low %v11714_v44, %v11730_v36 }
 0x588   : > { %5305 = vrot.lane.b32.xlu1 %v14164_v10, %s8665_s7  ;;  %14173 = vst [vmem:[#allocation56_spill] sm:$0xff] %v11793_v55  ;;  %v11837_v10 = vrot.slane %v4071_v49, %v8847_v13  ;;  %v11843_v16 = vrot.slane %v4019_v22, %v8847_v13  ;;  %v11869_v49 = vrot.slane %v5503_v35, %v8873_v21 }
 0x589   : > { %v3832_v6 = vpop.permute.xlu0 %3831  ;;  %14166 = vst [vmem:[#allocation54_spill] sm:$0xff] %v11771_v29  ;;  %v4035_v20 = vcombine.low %v11857_v25, %v11840_v50  ;;  %v5931_v26 = vcombine.low %v11567_v27, %v11600_v54  ;;  %v11928_v54 = vrot.slane %v5939_v7, %v8847_v13 }
 0x58a   : > { %v3830_v37 = vpop.permute.xlu1 %3829  ;;  %v4027_v48 = vcombine.low %v3824_v30, %v3832_v6  ;;  %v11802_v6 = vrot.slane %v5523_v42, %v8847_v13  ;;  %v5487_v42 = vcombine.low %v11810_v52, %v11793_v55  ;;  %v4103_v53 = vcombine.low %v11837_v10, %v11815_v4  ;;  %14185 = vst [vmem:[#allocation30_spill] sm:$0xff] %v11869_v49  ;;  %v14238_v52 = vld [vmem:[#allocation49_spill] sm:$0xff]  ;;  %v14239_v55 = vld [vmem:[#allocation34_spill] sm:$0xff] }
 0x58b   : > { %5307 = vrot.lane.b32.xlu0 %v14165_v12, %s8668_s30  ;;  %v4087_v31 = vcombine.low %v3822_v32, %v3830_v37  ;;  %v5571_v32 = vcombine.low %v11787_v41, %v11771_v29  ;;  %v14181_v37 = vld [vmem:[#allocation45_spill] sm:$0xff]  ;;  %14192 = vst [vmem:[#allocation65_spill] sm:$0xff] %v11928_v54  ;;  %v14248_v29 = vld [vmem:[#allocation120_spill] sm:$0xff] }
 0x58c   : > { %5313 = vrot.lane.b32.xlu1 %v14169_v60, %s8666_s28  ;;  %14175 = vst [vmem:[#allocation32_spill] sm:$0xff] %v11802_v6  ;;  %v11818_v8 = vrot.slane %v4027_v48, %v8847_v13  ;;  %v14183_v60 = vld [vmem:[#allocation43_spill] sm:$0xff]  ;;  %v11890_v1 = vrot.slane %v4103_v53, %v8873_v21  ;;  %v14200_v53 = vld [vmem:[#allocation52_spill] sm:$0xff]  ;;  %v14247_v41 = vld [vmem:[#allocation117_spill] sm:$0xff] }
 0x58d   : > { %v11781_v12 = vpop.permute.xlu0 %4295  ;;  %v11831_v17 = vrot.slane %v4087_v31, %v8847_v13  ;;  %v11852_v61 = vrot.slane %v5571_v32, %v8873_v21 }
 0x58e   : > { %v3834_v58 = vpop.permute.xlu1 %3833  ;;  %v4051_v23 = vcombine.low %v11843_v16, %v11818_v8 }
 0x58f   : > { %5315 = vrot.lane.b32.xlu0 %v14174_v62, %s8669_s11  ;;  %v4095_v30 = vcombine.low %v3826_v3, %v3834_v58  ;;  %v5555_v3 = vcombine.low %v11802_v6, %v11784_v24  ;;  %14182 = vst [vmem:[#allocation60_spill] sm:$0xff] %v11852_v61  ;;  %v11879_v62 = vrot.slane %v5487_v42, %v8873_v21  ;;  %v14244_v6 = vld [vmem:[#allocation33_spill] sm:$0xff] }
 0x590   : > { %5321 = vrot.lane.b32.xlu1 %v14180_v9, %s8667_s17  ;;  %v11893_v47 = vrot.slane %v4051_v23, %v8873_v21  ;;  %v11948_v42 = vrot.slane %v5955_v33, %v8847_v13  ;;  %v14201_v23 = vld [vmem:[#allocation14_spill] sm:$0xff] }
 0x591   : > { %v11824_v2 = vpop.permute.xlu0 %4299  ;;  %v11834_v28 = vrot.slane %v4095_v30, %v8847_v13  ;;  %v11866_v31 = vrot.slane %v5555_v3, %v8873_v21  ;;  %14186 = vst [vmem:[#allocation61_spill] sm:$0xff] %v11879_v62  ;;  %v6023_v30 = vcombine.low %v11724_v40, %v11740_v5  ;;  %v6007_v3 = vcombine.low %v11602_v43, %v11618_v59 }
 0x592   : > { %v11845_v46 = vpop.permute.xlu1 %4297  ;;  %v11901_v35 = vcombine.low %v11879_v62, %v11869_v49  ;;  %v6015_v5 = vcombine.low %v11716_v38, %v11732_v0  ;;  %v11910_v40 = vrot.slane %v4035_v20, %v8873_v21  ;;  %v5999_v0 = vcombine.low %v11592_v56, %v11610_v19  ;;  %v14194_v19 = vld [vmem:[#allocation95_spill] sm:$0xff]  ;;  %14198 = vst [vmem:[#allocation71_spill] sm:$0xff] %v11948_v42  ;;  %v14241_v49 = vld [vmem:[#allocation22_spill] sm:$0xff] }
 0x593   : > { %5323 = vrot.lane.b32.xlu0 %v14181_v37, %s8662_s15  ;;  %v4119_v18 = vcombine.low %v11831_v17, %v11834_v28  ;;  %14184 = vst [vmem:[#allocation59_spill] sm:$0xff] %v11866_v31  ;;  %v11883_v32 = vcombine.low %v11866_v31, %v11852_v61  ;;  %v5947_v43 = vcombine.low %v11708_v51, %v11722_v63  ;;  %v14245_v31 = vld [vmem:[#allocation96_spill] sm:$0xff]  ;;  %v14246_v61 = vld [vmem:[#allocation37_spill] sm:$0xff] }
 0x594   : > { %5301 = vrot.lane.b32.xlu1 %v14183_v60, %s8646_s6  ;;  %14189 = vst [vmem:[#allocation38_spill] sm:$0xff] %v11901_v35  ;;  %v11923_v44 = vrot.slane %v6023_v30, %v8847_v13  ;;  %v4555_v38 = vcombine.low %v11666_v15, %v11682_v57  ;;  %v11942_v63 = vrot.slane %v6007_v3, %v8847_v13  ;;  %v14199_v57 = vld [vmem:[#allocation19_spill] sm:$0xff]  ;;  %v14202_v30 = vld [vmem:[#allocation74_spill] sm:$0xff]  ;;  %v14242_v35 = vld [vmem:[#allocation113_spill] sm:$0xff] }
 0x595   : > { %v4304_v48 = vpop.permute.xlu0 %4303  ;;  %v11874_v22 = vrot.slane %v4119_v18, %v8873_v21  ;;  %14187 = vst [vmem:[#allocation29_spill] sm:$0xff] %v11883_v32  ;;  %v11945_v36 = vrot.slane %v6015_v5, %v8847_v13  ;;  %v4547_v18 = vcombine.low %v14199_v57, %v11674_v14  ;;  %v4487_v60 = vcombine.low %v14201_v23, %v14200_v53 }
 0x596   : > { %v4302_v58 = vpop.permute.xlu1 %4301  ;;  %14191 = vst [vmem:[#allocation67_spill] sm:$0xff] %v11923_v44  ;;  %14196 = vst [vmem:[#allocation66_spill] sm:$0xff] %v11942_v63  ;;  %v11969_v3 = vrot.slane %v5931_v26, %v8847_v13  ;;  %v11974_v33 = vrot.slane %v4555_v38, %v8847_v13  ;;  %v3984_v11 = vcombine.high %v14243_v34, %v14242_v35  ;;  %v14252_v35 = vld [vmem:[#allocation40_spill] sm:$0xff] }
 0x597   : > { %5887 = vrot.lane.b32.xlu0 %v14142_v39, %s8654_s16  ;;  %v14188_v39 = vld [vmem:[#allocation94_spill] sm:$0xff]  ;;  %v11914_v37 = vcombine.low %v11890_v1, %v11874_v22  ;;  %14197 = vst [vmem:[#allocation62_spill] sm:$0xff] %v11945_v36  ;;  %v6047_v14 = vcombine.low %v11945_v36, %v11923_v44  ;;  %v11997_v57 = vrot.slane %v4487_v60, %v8847_v13 }
 0x598   : > { %5309 = vrot.lane.b32.xlu1 %v14188_v39, %s8668_s30  ;;  %v11961_v39 = vrot.slane %v5999_v0, %v8847_v13  ;;  %14205 = vst [vmem:[#allocation72_spill] sm:$0xff] %v11969_v3  ;;  %v14208_v0 = vld [vmem:[#allocation44_spill] sm:$0xff]  ;;  %v14231_v44 = vld [vmem:[#allocation46_spill] sm:$0xff]  ;;  %v3968_v32 = vcombine.high %v14246_v61, %v14245_v31  ;;  %v3998_v34 = vrot.slane %v3984_v11, %v8873_v21  ;;  %v14254_v61 = vld [vmem:[#allocation135_spill] sm:$0xff] }
 0x599   : > { %v4308_v9 = vpop.permute.xlu0 %4307  ;;  %14190 = vst [vmem:[#allocation41_spill] sm:$0xff] %v11914_v37  ;;  %v14257_v11 = vld [vmem:[#allocation134_spill] sm:$0xff] }
 0x59a   : > { %v4306_v59 = vpop.permute.xlu1 %4305  ;;  %v4503_v56 = vcombine.low %v11824_v2, %v4308_v9  ;;  %v4495_v2 = vcombine.low %v11781_v12, %v4304_v48  ;;  %14203 = vst [vmem:[#allocation69_spill] sm:$0xff] %v11961_v39  ;;  %v14206_v12 = vld [vmem:[#allocation15_spill] sm:$0xff]  ;;  %v14207_v48 = vld [vmem:[#allocation12_spill] sm:$0xff] }
 0x59b   : > { %5891 = vrot.lane.b32.xlu0 %v14146_v45, %s8654_s16  ;;  %v11934_v45 = vcombine.low %v11910_v40, %v11893_v47  ;;  %v4563_v15 = vcombine.low %v11845_v46, %v4306_v59  ;;  %v11964_v46 = vrot.slane %v5947_v43, %v8847_v13  ;;  %v4479_v5 = vcombine.low %v14207_v48, %v14206_v12  ;;  %v14212_v12 = vld [vmem:[#allocation42_spill] sm:$0xff] }
 0x59c   : > { %5317 = vrot.lane.b32.xlu1 %v14194_v19, %s8669_s11  ;;  %v11977_v59 = vrot.slane %v4503_v56, %v8847_v13  ;;  %v11994_v56 = vrot.slane %v4547_v18, %v8847_v13  ;;  %v12000_v53 = vrot.slane %v4495_v2, %v8847_v13 }
 0x59d   : > { %14193 = vst [vmem:[#allocation39_spill] sm:$0xff] %v11934_v45  ;;  %v11939_v51 = vpop.permute.xlu0 %3677  ;;  %14204 = vst [vmem:[#allocation70_spill] sm:$0xff] %v11964_v46  ;;  %v5979_v26 = vcombine.low %v11964_v46, %v11948_v42  ;;  %v11988_v19 = vrot.slane %v4563_v15, %v8847_v13  ;;  %v5963_v15 = vcombine.low %v11969_v3, %v11928_v54  ;;  %v14225_v42 = vld [vmem:[#allocation36_spill] sm:$0xff] }
 0x59e   : > { %14195 = vst [vmem:[#allocation68_spill] sm:$0xff] %v11939_v51  ;;  %v4310_v20 = vpop.permute.xlu1 %4309  ;;  %v12014_v60 = vrot.slane %v4479_v5, %v8847_v13  ;;  %v4579_v2 = vcombine.low %v11994_v56, %v11974_v33 }
 0x59f   : > { %5895 = vrot.lane.b32.xlu0 %v14202_v30, %s8654_s16  ;;  %v4571_v9 = vcombine.low %v4302_v58, %v4310_v20  ;;  %v6031_v58 = vcombine.low %v11961_v39, %v11942_v63  ;;  %v14210_v20 = vld [vmem:[#allocation35_spill] sm:$0xff]  ;;  %v12009_v30 = vrot.slane %v6047_v14, %v8873_v21  ;;  %v14227_v63 = vld [vmem:[#allocation26_spill] sm:$0xff] }
 0x5a0   : > { %5325 = vrot.lane.b32.xlu1 %v14208_v0, %s8662_s15  ;;  %v12028_v0 = vrot.slane %v5979_v26, %v8873_v21  ;;  %v4511_v5 = vcombine.low %v12014_v60, %v11997_v57  ;;  %v12047_v26 = vrot.slane %v4579_v2, %v8873_v21 }
 0x5a1   : > { %v11981_v43 = vpop.permute.xlu0 %3685  ;;  %v11991_v38 = vrot.slane %v4571_v9, %v8847_v13  ;;  %14211 = vst [vmem:[#allocation75_spill] sm:$0xff] %v12009_v30  ;;  %v4527_v9 = vcombine.low %v12000_v53, %v11977_v59  ;;  %v12025_v14 = vrot.slane %v6031_v58, %v8873_v21 }
 0x5a2   : > { %14209 = vst [vmem:[#allocation76_spill] sm:$0xff] %v11981_v43  ;;  %v12002_v23 = vpop.permute.xlu1 %5393  ;;  %14215 = vst [vmem:[#allocation77_spill] sm:$0xff] %v12028_v0  ;;  %v14216_v43 = vld [vmem:[#allocation18_spill] sm:$0xff] }
 0x5a3   : > { %6755 = vrot.lane.b32.xlu0 %v14210_v20, %s8645_s18  ;;  %v4595_v18 = vcombine.low %v11988_v19, %v11991_v38  ;;  %14214 = vst [vmem:[#allocation79_spill] sm:$0xff] %v12025_v14  ;;  %v12044_v58 = vcombine.low %v12025_v14, %v12009_v30 }
 0x5a4   : > { %5897 = vrot.lane.b32.xlu1 %v14212_v12, %s8654_s16  ;;  %v12040_v12 = vrot.slane %v5963_v15, %v8873_v21  ;;  %v12061_v15 = vrot.slane %v4511_v5, %v8873_v21 }
 0x5a5   : > { %v12022_v48 = vpop.permute.xlu0 %3693  ;;  %v12033_v7 = vrot.slane %v4595_v18, %v8873_v21  ;;  %14218 = vst [vmem:[#allocation78_spill] sm:$0xff] %v12044_v58  ;;  %v14219_v18 = vld [vmem:[#allocation28_spill] sm:$0xff] }
 0x5a6   : > { %14213 = vst [vmem:[#allocation73_spill] sm:$0xff] %v12022_v48  ;;  %v12035_v27 = vpop.permute.xlu1 %5397  ;;  %14217 = vst [vmem:[#allocation80_spill] sm:$0xff] %v12040_v12  ;;  %v12050_v48 = vrot.slane %v4527_v9, %v8873_v21  ;;  %v12058_v3 = vcombine.low %v12040_v12, %v12028_v0  ;;  %v14223_v9 = vld [vmem:[#allocation16_spill] sm:$0xff]  ;;  %v14228_v0 = vld [vmem:[#allocation25_spill] sm:$0xff] }
 0x5a7   : > { %6759 = vrot.lane.b32.xlu0 %v14216_v43, %s8645_s18  ;;  %v12065_v54 = vcombine.low %v12047_v26, %v12033_v7  ;;  %v14236_v12 = vld [vmem:[#allocation17_spill] sm:$0xff]  ;;  %v4120_v43 = vcombine.high %v11831_v17, %v11834_v28 }
 0x5a8   : > { %6757 = vrot.lane.b32.xlu1 %v14219_v18, %s8645_s18  ;;  %14221 = vst [vmem:[#allocation83_spill] sm:$0xff] %v12058_v3  ;;  %v14235_v3 = vld [vmem:[#allocation23_spill] sm:$0xff] }
 0x5a9   : > { %v12054_v51 = vpop.permute.xlu0 %3673  ;;  %14222 = vst [vmem:[#allocation84_spill] sm:$0xff] %v12065_v54 }
 0x5aa   : > { %14220 = vst [vmem:[#allocation85_spill] sm:$0xff] %v12054_v51  ;;  %v12067_v2 = vpop.permute.xlu1 %5401  ;;  %v12075_v51 = vcombine.low %v12061_v15, %v12050_v48 }
 0x5ab   : > { %6763 = vrot.lane.b32.xlu0 %v14223_v9, %s8645_s18  ;;  %v14266_v9 = vld [vmem:[#allocation151_spill] sm:$0xff] }
 0x5ac   : > { %14224 = vst [vmem:[#allocation90_spill] sm:$0xff] %v12075_v51  ;;  %6761 = vrot.lane.b32.xlu1 %v14225_v42, %s8645_s18 }
 0x5ad   : > { %v12079_v5 = vpop.permute.xlu0 %3681 }
 0x5ae   : > { %14226 = vst [vmem:[#allocation88_spill] sm:$0xff] %v12079_v5  ;;  %v12081_v39 = vpop.permute.xlu1 %5405  ;;  %v14232_v5 = vld [vmem:[#allocation27_spill] sm:$0xff] }
 0x5af   : > { %6767 = vrot.lane.b32.xlu0 %v14227_v63, %s8645_s18  ;;  %v14265_v63 = vld [vmem:[#allocation154_spill] sm:$0xff] }
 0x5b0   : > { %6765 = vrot.lane.b32.xlu1 %v14228_v0, %s8645_s18  ;;  %v14264_v0 = vld [vmem:[#allocation147_spill] sm:$0xff] }
 0x5b1   : > { %v12089_v46 = vpop.permute.xlu0 %3689  ;;  %v4444_v42 = vcombine.high %v14265_v63, %v14264_v0  ;;  %v4104_v63 = vcombine.high %v11837_v10, %v11815_v4  ;;  %v4052_v0 = vcombine.high %v11843_v16, %v11818_v8  ;;  %v4036_v4 = vcombine.high %v11857_v25, %v11840_v50 }
 0x5b2   : > { %14229 = vst [vmem:[#allocation86_spill] sm:$0xff] %v12089_v46  ;;  %v12091_v36 = vpop.permute.xlu1 %5869  ;;  %v4134_v8 = vrot.slane %v4120_v43, %v8873_v21  ;;  %v12216_v16 = vcombine.high %v11890_v1, %v11874_v22  ;;  %v14276_v43 = vld [vmem:[#allocation110_spill] sm:$0xff] }
 0x5b3   : > { %14230 = vst [vmem:[#allocation91_spill] sm:$0xff] %v12091_v36  ;;  %6771 = vrot.lane.b32.xlu0 %v14231_v44, %s8645_s18  ;;  %v14249_v36 = vld [vmem:[#allocation98_spill] sm:$0xff]  ;;  %v4118_v50 = vrot.slane %v4104_v63, %v8873_v21  ;;  %v4066_v25 = vrot.slane %v4052_v0, %v8873_v21 }
 0x5b4   : > { %6769 = vrot.lane.b32.xlu1 %v14232_v5, %s8645_s18 }
 0x5b5   : > { %v12097_v14 = vpop.permute.xlu0 %3697  ;;  %v12243_v0 = vcombine.low %v4118_v50, %v4134_v8 }
 0x5b6   : > { %14233 = vst [vmem:[#allocation89_spill] sm:$0xff] %v12097_v14  ;;  %v12099_v30 = vpop.permute.xlu1 %5873 }
 0x5b7   : > { %14234 = vst [vmem:[#allocation87_spill] sm:$0xff] %v12099_v30  ;;  %6775 = vrot.lane.b32.xlu0 %v14235_v3, %s8645_s18  ;;  %v14253_v30 = vld [vmem:[#allocation133_spill] sm:$0xff]  ;;  %v14258_v3 = vld [vmem:[#allocation100_spill] sm:$0xff] }
 0x5b8   : > { %6773 = vrot.lane.b32.xlu1 %v14236_v12, %s8645_s18  ;;  %v12142_v31 = vcombine.high %v14254_v61, %v14253_v30 }
 0x5b9   : > { %v12105_v58 = vpop.permute.xlu0 %5391 }
 0x5ba   : > { %v12107_v46 = vpop.permute.xlu1 %5877 }
 0x5bb   : > { %14237 = vst [vmem:[#allocation45_spill] sm:$0xff] %v12107_v46  ;;  %6779 = vrot.lane.b32.xlu0 %v14238_v52, %s8645_s18  ;;  %v14251_v46 = vld [vmem:[#allocation47_spill] sm:$0xff] }
 0x5bc   : > { %6777 = vrot.lane.b32.xlu1 %v14239_v55, %s8645_s18  ;;  %v3916_v55 = vcombine.high %v14248_v29, %v14247_v41  ;;  %v3982_v29 = vrot.slane %v3968_v32, %v8873_v21 }
 0x5bd   : > { %v12113_v62 = vpop.permute.xlu0 %5395 }
 0x5be   : > { %v12115_v14 = vpop.permute.xlu1 %5881  ;;  %v3930_v41 = vrot.slane %v3916_v55, %v8873_v21  ;;  %v12161_v55 = vcombine.low %v3982_v29, %v3998_v34  ;;  %v12176_v44 = vcombine.high %v3982_v29, %v3998_v34  ;;  %v14273_v29 = vld [vmem:[#allocation13_spill] sm:$0xff] }
 0x5bf   : > { %14240 = vst [vmem:[#allocation43_spill] sm:$0xff] %v12115_v14  ;;  %6783 = vrot.lane.b32.xlu0 %v14241_v49, %s8645_s18  ;;  %v14250_v49 = vld [vmem:[#allocation21_spill] sm:$0xff] }
 0x5c0   : > { %6781 = vrot.lane.b32.xlu1 %v14244_v6, %s8645_s18  ;;  %v3900_v12 = vcombine.high %v14251_v46, %v14250_v49  ;;  %v14256_v49 = vld [vmem:[#allocation136_spill] sm:$0xff] }
 0x5c1   : > { %v12123_v24 = vpop.permute.xlu0 %5399  ;;  %v12152_v46 = vcombine.high %v14257_v11, %v14256_v49  ;;  %v14260_v49 = vld [vmem:[#allocation97_spill] sm:$0xff]  ;;  %v14261_v11 = vld [vmem:[#allocation150_spill] sm:$0xff] }
 0x5c2   : > { %v12129_v52 = vpop.permute.xlu1 %5409  ;;  %v4460_v5 = vcombine.high %v14261_v11, %v14260_v49 }
 0x5c3   : > { %6787 = vrot.lane.b32.xlu0 %v14249_v36, %s8645_s18  ;;  %v14255_v36 = vld [vmem:[#allocation114_spill] sm:$0xff]  ;;  %v4147_v32 = vpack.i.b16 %v12142_v31, %v12152_v46 }
 0x5c4   : > { %6785 = vrot.lane.b32.xlu1 %v14252_v35, %s8645_s18  ;;  %v3914_v35 = vrot.slane %v3900_v12, %v8873_v21  ;;  %v14262_v12 = vld [vmem:[#allocation115_spill] sm:$0xff]  ;;  %v4474_v34 = vrot.slane %v4460_v5, %v8873_v21 }
 0x5c5   : > { %v12138_v6 = vpop.permute.xlu0 %5403 }
 0x5c6   : > { %v12146_v14 = vpop.permute.xlu1 %5413  ;;  %v12187_v11 = vcombine.high %v3914_v35, %v3930_v41 }
 0x5c7   : > { %6791 = vrot.lane.b32.xlu0 %v14255_v36, %s8645_s18  ;;  %v12166_v36 = vcombine.low %v3914_v35, %v3930_v41  ;;  %v14272_v35 = vld [vmem:[#allocation158_spill] sm:$0xff] }
 0x5c8   : > { %6789 = vrot.lane.b32.xlu1 %v14258_v3, %s8645_s18  ;;  %v4159_v28 = vpack.i.b16 %v12176_v44, %v12187_v11  ;;  %v12204_v41 = vcombine.high %v14273_v29, %v14272_v35 }
 0x5c9   : > { %v12157_v30 = vpop.permute.xlu0 %5867 }
 0x5ca   : > { %14259 = vst [vmem:[#allocation94_spill] sm:$0xff] %v12157_v30  ;;  %v12163_v61 = vpop.permute.xlu1 %5417  ;;  %v4153_v30 = vpack.i.b16 %v12161_v55, %v12166_v36 }
 0x5cb   : > { %4191 = vrot.lane.b32.xlu0 %v4147_v32, %s8665_s7  ;;  %v14267_v32 = vld [vmem:[#allocation156_spill] sm:$0xff] }
 0x5cc   : > { %6793 = vrot.lane.b32.xlu1 %v14262_v12, %s8645_s18  ;;  %v4392_v18 = vcombine.high %v14267_v32, %v14266_v9  ;;  %v14268_v12 = vld [vmem:[#allocation155_spill] sm:$0xff]  ;;  %v14270_v9 = vld [vmem:[#allocation109_spill] sm:$0xff] }
 0x5cd   : > { %v12172_v3 = vpop.permute.xlu0 %5871 }
 0x5ce   : > { %14263 = vst [vmem:[#allocation95_spill] sm:$0xff] %v12172_v3  ;;  %v12184_v49 = vpop.permute.xlu1 %5421  ;;  %v14269_v3 = vld [vmem:[#allocation157_spill] sm:$0xff]  ;;  %v4406_v5 = vrot.slane %v4392_v18, %v8873_v21 }
 0x5cf   : > { %4199 = vrot.lane.b32.xlu0 %v4153_v30, %s8666_s28  ;;  %v4376_v20 = vcombine.high %v14269_v3, %v14268_v12  ;;  %v4458_v3 = vrot.slane %v4444_v42, %v8873_v21  ;;  %v14274_v30 = vld [vmem:[#allocation24_spill] sm:$0xff]  ;;  %v14275_v12 = vld [vmem:[#allocation159_spill] sm:$0xff] }
 0x5d0   : > { %6797 = vrot.lane.b32.xlu1 %v14270_v9, %s8645_s18  ;;  %v12220_v32 = vcombine.high %v14275_v12, %v14274_v30  ;;  %v4596_v12 = vcombine.high %v11988_v19, %v11991_v38  ;;  %v14279_v9 = vld [vmem:[#allocation137_spill] sm:$0xff] }
 0x5d1   : > { %v12198_v17 = vpop.permute.xlu0 %5875  ;;  %v4390_v42 = vrot.slane %v4376_v20, %v8873_v21  ;;  %v12223_v18 = vcombine.low %v4458_v3, %v4474_v34  ;;  %v4050_v20 = vrot.slane %v4036_v4, %v8873_v21  ;;  %v12254_v30 = vcombine.high %v4458_v3, %v4474_v34 }
 0x5d2   : > { %14271 = vst [vmem:[#allocation19_spill] sm:$0xff] %v12198_v17  ;;  %v12211_v10 = vpop.permute.xlu1 %5885  ;;  %v4623_v1 = vpack.i.b16 %v12204_v41, %v12220_v32  ;;  %v4143_v17 = vshrl.u32 %v14279_v9, 16  ;;  %v4580_v34 = vcombine.high %v11994_v56, %v11974_v33  ;;  %v4528_v3 = vcombine.high %v12000_v53, %v11977_v59  ;;  %v14325_v9 = vld [vmem:[#allocation45_spill] sm:$0xff] }
 0x5d3   : > { %4207 = vrot.lane.b32.xlu0 %v4159_v28, %s8667_s17  ;;  %v12231_v28 = vcombine.high %v11910_v40, %v11893_v47  ;;  %v12245_v29 = vcombine.low %v4390_v42, %v4406_v5  ;;  %v12248_v47 = vcombine.low %v4050_v20, %v4066_v25  ;;  %v12273_v19 = vcombine.high %v4050_v20, %v4066_v25 }
 0x5d4   : > { %6801 = vrot.lane.b32.xlu1 %v14276_v43, %s8645_s18  ;;  %v12265_v43 = vcombine.high %v4390_v42, %v4406_v5  ;;  %v4512_v42 = vcombine.high %v12014_v60, %v11997_v57  ;;  %v12290_v56 = vcombine.high %v12047_v26, %v12033_v7  ;;  %v4149_v53 = vshrl.u32 %v12142_v31, 16 }
 0x5d5   : > { %v12233_v22 = vpop.permute.xlu0 %5879  ;;  %v4171_v63 = vpack.i.b16 %v12216_v16, %v12231_v28  ;;  %v4629_v4 = vpack.i.b16 %v12223_v18, %v12245_v29  ;;  %v4594_v25 = vrot.slane %v4580_v34, %v8873_v21  ;;  %v4542_v20 = vrot.slane %v4528_v3, %v8873_v21 }
 0x5d6   : > { %v12238_v35 = vpop.permute.xlu1 %3679  ;;  %v12298_v57 = vcombine.high %v12061_v15, %v12050_v48  ;;  %v4148_v31 = vshrl.u32 %v12152_v46, 16  ;;  %v4155_v34 = vshrl.u32 %v12161_v55, 16  ;;  %v4154_v46 = vshrl.u32 %v12166_v36, 16 }
 0x5d7   : > { %14277 = vst [vmem:[#allocation52_spill] sm:$0xff] %v12238_v35  ;;  %4667 = vrot.lane.b32.xlu0 %v4623_v1, %s8665_s7  ;;  %v4177_v1 = vpack.i.b16 %v12243_v0, %v12248_v47  ;;  %v4161_v55 = vshrl.u32 %v12176_v44, 16  ;;  %v4160_v36 = vshrl.u32 %v12187_v11, 16  ;;  %v4172_v11 = vshrl.u32 %v12231_v28, 16 }
 0x5d8   : > { %4193 = vrot.lane.b32.xlu1 %v4171_v63, %s8665_s7  ;;  %v12263_v63 = vcombine.high %v4118_v50, %v4134_v8  ;;  %v4635_v8 = vpack.i.b16 %v12254_v30, %v12265_v43  ;;  %v14280_v50 = vld [vmem:[#allocation142_spill] sm:$0xff]  ;;  %v4647_v7 = vpack.i.b16 %v12290_v56, %v12298_v57 }
 0x5d9   : > { %v12250_v40 = vpop.permute.xlu0 %5407  ;;  %v4142_v5 = vshrl.u32 %v14280_v50, 16  ;;  %v14324_v50 = vld [vmem:[#allocation17_spill] sm:$0xff] }
 0x5da   : > { %v12258_v35 = vpop.permute.xlu1 %3687  ;;  %v4183_v59 = vpack.i.b16 %v12263_v63, %v12273_v19 }
 0x5db   : > { %14278 = vst [vmem:[#allocation14_spill] sm:$0xff] %v12258_v35  ;;  %4675 = vrot.lane.b32.xlu0 %v4629_v4, %s8666_s28  ;;  %v4610_v4 = vrot.slane %v4596_v12, %v8873_v21  ;;  %v4144_v12 = vpack.i.b16 %v4143_v17, %v4142_v5  ;;  %v4150_v17 = vpack.i.b16 %v4149_v53, %v4148_v31 }
 0x5dc   : > { %4201 = vrot.lane.b32.xlu1 %v4177_v1, %s8666_s28  ;;  %v4526_v1 = vrot.slane %v4512_v42, %v8873_v21  ;;  %v4156_v53 = vpack.i.b16 %v4155_v34, %v4154_v46  ;;  %v4173_v46 = vshrl.u32 %v12216_v16, 16  ;;  %v4624_v16 = vshrl.u32 %v12220_v32, 16 }
 0x5dd   : > { %v12275_v38 = vpop.permute.xlu0 %5411  ;;  %v12308_v26 = vcombine.low %v4594_v25, %v4610_v4  ;;  %v12322_v42 = vcombine.high %v4594_v25, %v4610_v4  ;;  %v4167_v4 = vshrl.u32 %v11914_v37, 16  ;;  %v4166_v25 = vshrl.u32 %v11934_v45, 16 }
 0x5de   : > { %v12283_v33 = vpop.permute.xlu1 %3695  ;;  %v12312_v48 = vcombine.low %v4526_v1, %v4542_v20  ;;  %v4184_v32 = vshrl.u32 %v12273_v19, 16 }
 0x5df   : > { %14281 = vst [vmem:[#allocation74_spill] sm:$0xff] %v12283_v33  ;;  %4683 = vrot.lane.b32.xlu0 %v4635_v8, %s8667_s17 }
 0x5e0   : > { %4209 = vrot.lane.b32.xlu1 %v4183_v59, %s8667_s17  ;;  %v4653_v5 = vpack.i.b16 %v12308_v26, %v12312_v48  ;;  %v12326_v59 = vcombine.high %v4526_v1, %v4542_v20  ;;  %v4162_v1 = vpack.i.b16 %v4161_v55, %v4160_v36  ;;  %v4625_v55 = vshrl.u32 %v12204_v41, 16 }
 0x5e1   : > { %v12300_v60 = vpop.permute.xlu0 %5415 }
 0x5e2   : > { %v12303_v8 = vpop.permute.xlu1 %3675  ;;  %v4659_v31 = vpack.i.b16 %v12322_v42, %v12326_v59  ;;  %v4626_v28 = vpack.i.b16 %v4625_v55, %v4624_v16 }
 0x5e3   : > { %14282 = vst [vmem:[#allocation15_spill] sm:$0xff] %v12303_v8  ;;  %4187 = vrot.lane.b32.xlu0 %v4144_v12, %s8646_s6 }
 0x5e4   : > { %4669 = vrot.lane.b32.xlu1 %v4647_v7, %s8665_s7 }
 0x5e5   : > { %v12314_v15 = vpop.permute.xlu0 %5419 }
 0x5e6   : > { %v12317_v3 = vpop.permute.xlu1 %3683 }
 0x5e7   : > { %14283 = vst [vmem:[#allocation12_spill] sm:$0xff] %v12317_v3  ;;  %4195 = vrot.lane.b32.xlu0 %v4150_v17, %s8668_s30  ;;  %v14286_v17 = vld [vmem:[#allocation160_spill] sm:$0xff] }
 0x5e8   : > { %4677 = vrot.lane.b32.xlu1 %v4653_v5, %s8666_s28  ;;  %v4619_v44 = vshrl.u32 %v14286_v17, 16  ;;  %v4168_v5 = vpack.i.b16 %v4167_v4, %v4166_v25  ;;  %v4179_v4 = vshrl.u32 %v12243_v0, 16  ;;  %v4178_v25 = vshrl.u32 %v12248_v47, 16 }
 0x5e9   : > { %v12328_v12 = vpop.permute.xlu0 %5883  ;;  %v4630_v0 = vshrl.u32 %v12245_v29, 16  ;;  %v4642_v29 = vshrl.u32 %v12075_v51, 16 }
 0x5ea   : > { %v12331_v7 = vpop.permute.xlu1 %3691  ;;  %v4180_v41 = vpack.i.b16 %v4179_v4, %v4178_v25  ;;  %v5615_v25 = vcombine.low %v12275_v38, %v12314_v15  ;;  %v14297_v15 = vld [vmem:[#allocation111_spill] sm:$0xff] }
 0x5eb   : > { %14284 = vst [vmem:[#allocation44_spill] sm:$0xff] %v12331_v7  ;;  %4203 = vrot.lane.b32.xlu0 %v4156_v53, %s8669_s11  ;;  %v14288_v53 = vld [vmem:[#allocation20_spill] sm:$0xff]  ;;  %v14337_v7 = vld [vmem:[#allocation98_spill] sm:$0xff] }
 0x5ec   : > { %4685 = vrot.lane.b32.xlu1 %v4659_v31, %s8667_s17  ;;  %v4618_v37 = vshrl.u32 %v14288_v53, 16 }
 0x5ed   : > { %v12340_v20 = vpop.permute.xlu0 %5303 }
 0x5ee   : > { %14285 = vst [vmem:[#allocation42_spill] sm:$0xff] %v12340_v20  ;;  %v12343_v34 = vpop.permute.xlu1 %3699  ;;  %v4620_v45 = vpack.i.b16 %v4619_v44, %v4618_v37  ;;  %v4174_v20 = vpack.i.b16 %v4173_v46, %v4172_v11  ;;  %v4631_v37 = vshrl.u32 %v12223_v18, 16  ;;  %v4643_v11 = vshrl.u32 %v12065_v54, 16  ;;  %v14323_v54 = vld [vmem:[#allocation87_spill] sm:$0xff] }
 0x5ef   : > { %14287 = vst [vmem:[#allocation113_spill] sm:$0xff] %v12343_v34  ;;  %4211 = vrot.lane.b32.xlu0 %v4162_v1, %s8662_s15  ;;  %v14327_v34 = vld [vmem:[#allocation95_spill] sm:$0xff] }
 0x5f0   : > { %4189 = vrot.lane.b32.xlu1 %v4168_v5, %s8646_s6  ;;  %v4632_v47 = vpack.i.b16 %v4631_v37, %v4630_v0  ;;  %v4637_v5 = vshrl.u32 %v12254_v30, 16  ;;  %v4644_v16 = vpack.i.b16 %v4643_v11, %v4642_v29  ;;  %v4649_v30 = vshrl.u32 %v12290_v56, 16  ;;  %v14302_v29 = vld [vmem:[#allocation101_spill] sm:$0xff] }
 0x5f1   : > { %v12350_v31 = vpop.permute.xlu0 %5311  ;;  %v4655_v37 = vshrl.u32 %v12308_v26, 16  ;;  %v5607_v56 = vcombine.low %v12250_v40, %v12300_v60  ;;  %v5667_v26 = vcombine.low %v12035_v27, %v12081_v39  ;;  %v5659_v40 = vcombine.low %v12002_v23, %v12067_v2 }
 0x5f2   : > { %14289 = vst [vmem:[#allocation116_spill] sm:$0xff] %v12350_v31  ;;  %v12353_v36 = vpop.permute.xlu1 %5889  ;;  %v4661_v60 = vshrl.u32 %v12322_v42, 16  ;;  %v6075_v33 = vcombine.low %v14327_v34, %v12233_v22 }
 0x5f3   : > { %4663 = vrot.lane.b32.xlu0 %v4620_v45, %s8646_s6  ;;  %v4185_v45 = vshrl.u32 %v12263_v63, 16  ;;  %v4636_v63 = vshrl.u32 %v12265_v43, 16  ;;  %v4648_v43 = vshrl.u32 %v12298_v57, 16  ;;  %v4654_v57 = vshrl.u32 %v12312_v48, 16 }
 0x5f4   : > { %4197 = vrot.lane.b32.xlu1 %v4174_v20, %s8668_s30  ;;  %v4660_v48 = vshrl.u32 %v12326_v59, 16  ;;  %v12434_v23 = vrot.slane %v5667_v26, %v8847_v13 }
 0x5f5   : > { %v12360_v1 = vpop.permute.xlu0 %5319  ;;  %v4186_v18 = vpack.i.b16 %v4185_v45, %v4184_v32  ;;  %v4638_v19 = vpack.i.b16 %v4637_v5, %v4636_v63  ;;  %v5683_v45 = vcombine.low %v12146_v14, %v12184_v49  ;;  %v4650_v38 = vpack.i.b16 %v4649_v30, %v4648_v43 }
 0x5f6   : > { %14290 = vst [vmem:[#allocation96_spill] sm:$0xff] %v12360_v1  ;;  %v12363_v44 = vpop.permute.xlu1 %5893  ;;  %v12411_v14 = vrot.slane %v5615_v25, %v8847_v13  ;;  %v12448_v5 = vrot.slane %v5659_v40, %v8847_v13  ;;  %v4662_v63 = vpack.i.b16 %v4661_v60, %v4660_v48  ;;  %v14308_v40 = vld [vmem:[#allocation106_spill] sm:$0xff]  ;;  %v14315_v1 = vld [vmem:[#allocation16_spill] sm:$0xff] }
 0x5f7   : > { %4671 = vrot.lane.b32.xlu0 %v4626_v28, %s8668_s30  ;;  %v6151_v17 = vcombine.low %v12211_v10, %v12363_v44  ;;  %v14328_v10 = vld [vmem:[#allocation49_spill] sm:$0xff]  ;;  %v14329_v44 = vld [vmem:[#allocation19_spill] sm:$0xff] }
 0x5f8   : > { %4205 = vrot.lane.b32.xlu1 %v4180_v41, %s8669_s11  ;;  %v5599_v41 = vcombine.low %v12113_v62, %v12138_v6  ;;  %v5591_v6 = vcombine.low %v12105_v58, %v12123_v24  ;;  %v5675_v62 = vcombine.low %v12129_v52, %v12163_v61  ;;  %v12423_v24 = vrot.slane %v5683_v45, %v8847_v13  ;;  %v14300_v61 = vld [vmem:[#allocation112_spill] sm:$0xff] }
 0x5f9   : > { %v12370_v20 = vpop.permute.xlu0 %5299  ;;  %v12426_v52 = vrot.slane %v5607_v56, %v8847_v13  ;;  %v4656_v58 = vpack.i.b16 %v4655_v37, %v4654_v57 }
 0x5fa   : > { %14291 = vst [vmem:[#allocation37_spill] sm:$0xff] %v12370_v20  ;;  %v12373_v46 = vpop.permute.xlu1 %5305  ;;  %v12420_v27 = vrot.slane %v5599_v41, %v8847_v13  ;;  %v12437_v2 = vrot.slane %v5591_v6, %v8847_v13  ;;  %v12440_v42 = vrot.slane %v5675_v62, %v8847_v13  ;;  %v14304_v41 = vld [vmem:[#allocation103_spill] sm:$0xff]  ;;  %v14307_v62 = vld [vmem:[#allocation104_spill] sm:$0xff] }
 0x5fb   : > { %14292 = vst [vmem:[#allocation117_spill] sm:$0xff] %v12373_v46  ;;  %4679 = vrot.lane.b32.xlu0 %v4632_v47, %s8669_s11  ;;  %v5639_v32 = vcombine.low %v12426_v52, %v12411_v14 }
 0x5fc   : > { %4213 = vrot.lane.b32.xlu1 %v4186_v18, %s8662_s15  ;;  %v5623_v59 = vcombine.low %v12437_v2, %v12420_v27  ;;  %v5707_v18 = vcombine.low %v12440_v42, %v12423_v24 }
 0x5fd   : > { %v12380_v55 = vpop.permute.xlu0 %5307 }
 0x5fe   : > { %14293 = vst [vmem:[#allocation120_spill] sm:$0xff] %v12380_v55  ;;  %v12382_v4 = vpop.permute.xlu1 %5313  ;;  %v12465_v25 = vrot.slane %v5623_v59, %v8873_v21  ;;  %v12468_v43 = vrot.slane %v5707_v18, %v8873_v21  ;;  %v14310_v59 = vld [vmem:[#allocation48_spill] sm:$0xff]  ;;  %v14319_v55 = vld [vmem:[#allocation46_spill] sm:$0xff] }
 0x5ff   : > { %14294 = vst [vmem:[#allocation21_spill] sm:$0xff] %v12382_v4  ;;  %4687 = vrot.lane.b32.xlu0 %v4638_v19, %s8662_s15  ;;  %v5691_v19 = vcombine.low %v12448_v5, %v12434_v23  ;;  %v14314_v4 = vld [vmem:[#allocation28_spill] sm:$0xff] }
 0x600   : > { %4665 = vrot.lane.b32.xlu1 %v4644_v16, %s8646_s6  ;;  %v12461_v16 = vrot.slane %v5639_v32, %v8873_v21  ;;  %v14309_v32 = vld [vmem:[#allocation105_spill] sm:$0xff] }
 0x601   : > { %v12390_v28 = vpop.permute.xlu0 %5315  ;;  %v12475_v45 = vrot.slane %v5691_v19, %v8873_v21  ;;  %v14311_v19 = vld [vmem:[#allocation35_spill] sm:$0xff] }
 0x602   : > { %14295 = vst [vmem:[#allocation47_spill] sm:$0xff] %v12390_v28  ;;  %v12399_v0 = vpop.permute.xlu1 %5321  ;;  %v12479_v56 = vcombine.low %v12465_v25, %v12461_v16  ;;  %v14317_v28 = vld [vmem:[#allocation26_spill] sm:$0xff] }
 0x603   : > { %14296 = vst [vmem:[#allocation133_spill] sm:$0xff] %v12399_v0  ;;  %6795 = vrot.lane.b32.xlu0 %v14297_v15, %s8645_s18  ;;  %v12485_v26 = vcombine.low %v12475_v45, %v12468_v43 }
 0x604   : > { %4673 = vrot.lane.b32.xlu1 %v4650_v38, %s8668_s30  ;;  %v14305_v38 = vld [vmem:[#allocation102_spill] sm:$0xff] }
 0x605   : > { %v12414_v49 = vpop.permute.xlu0 %5323 }
 0x606   : > { %14298 = vst [vmem:[#allocation135_spill] sm:$0xff] %v12414_v49  ;;  %v12428_v39 = vpop.permute.xlu1 %5301 }
 0x607   : > { %14299 = vst [vmem:[#allocation136_spill] sm:$0xff] %v12428_v39  ;;  %6799 = vrot.lane.b32.xlu0 %v14300_v61, %s8645_s18 }
 0x608   : > { %4681 = vrot.lane.b32.xlu1 %v4656_v58, %s8669_s11 }
 0x609   : > { %v12445_v47 = vpop.permute.xlu0 %5887 }
 0x60a   : > { %v12454_v11 = vpop.permute.xlu1 %5309 }
 0x60b   : > { %14301 = vst [vmem:[#allocation134_spill] sm:$0xff] %v12454_v11  ;;  %6803 = vrot.lane.b32.xlu0 %v14302_v29, %s8645_s18 }
 0x60c   : > { %4689 = vrot.lane.b32.xlu1 %v4662_v63, %s8662_s15 }
 0x60d   : > { %v5892_v30 = vpop.permute.xlu0 %5891 }
 0x60e   : > { %v12470_v37 = vpop.permute.xlu1 %5317 }
 0x60f   : > { %14303 = vst [vmem:[#allocation97_spill] sm:$0xff] %v12470_v37  ;;  %6807 = vrot.lane.b32.xlu0 %v14304_v41, %s8645_s18  ;;  %v14313_v37 = vld [vmem:[#allocation18_spill] sm:$0xff] }
 0x610   : > { %6805 = vrot.lane.b32.xlu1 %v14305_v38, %s8645_s18 }
 0x611   : > { %v5896_v57 = vpop.permute.xlu0 %5895 }
 0x612   : > { %v12487_v6 = vpop.permute.xlu1 %5325 }
 0x613   : > { %14306 = vst [vmem:[#allocation150_spill] sm:$0xff] %v12487_v6  ;;  %6811 = vrot.lane.b32.xlu0 %v14307_v62, %s8645_s18  ;;  %v14312_v6 = vld [vmem:[#allocation107_spill] sm:$0xff] }
 0x614   : > { %6809 = vrot.lane.b32.xlu1 %v14308_v40, %s8645_s18 }
 0x615   : > { %v12493_v60 = vpop.permute.xlu0 %6755 }
 0x616   : > { %v5898_v48 = vpop.permute.xlu1 %5897 }
 0x617   : > { %6815 = vrot.lane.b32.xlu0 %v14309_v32, %s8645_s18  ;;  %v6159_v20 = vcombine.low %v12353_v36, %v5898_v48  ;;  %v14326_v36 = vld [vmem:[#allocation91_spill] sm:$0xff] }
 0x618   : > { %6813 = vrot.lane.b32.xlu1 %v14310_v59, %s8645_s18  ;;  %v6135_v48 = vcombine.low %v14326_v36, %v14325_v9  ;;  %v12575_v9 = vrot.slane %v6151_v17, %v8847_v13 }
 0x619   : > { %v12501_v18 = vpop.permute.xlu0 %6759 }
 0x61a   : > { %v12503_v63 = vpop.permute.xlu1 %6757 }
 0x61b   : > { %7231 = vrot.lane.b32.xlu0 %v14311_v19, %s8654_s16  ;;  %v14316_v19 = vld [vmem:[#allocation36_spill] sm:$0xff] }
 0x61c   : > { %6817 = vrot.lane.b32.xlu1 %v14312_v6, %s8645_s18 }
 0x61d   : > { %v12509_v0 = vpop.permute.xlu0 %6763 }
 0x61e   : > { %v12511_v58 = vpop.permute.xlu1 %6761 }
 0x61f   : > { %7235 = vrot.lane.b32.xlu0 %v14313_v37, %s8654_s16  ;;  %v14318_v37 = vld [vmem:[#allocation25_spill] sm:$0xff] }
 0x620   : > { %7233 = vrot.lane.b32.xlu1 %v14314_v4, %s8654_s16 }
 0x621   : > { %v12517_v49 = vpop.permute.xlu0 %6767 }
 0x622   : > { %v12519_v11 = vpop.permute.xlu1 %6765 }
 0x623   : > { %7239 = vrot.lane.b32.xlu0 %v14315_v1, %s8654_s16  ;;  %v14320_v1 = vld [vmem:[#allocation27_spill] sm:$0xff] }
 0x624   : > { %7237 = vrot.lane.b32.xlu1 %v14316_v19, %s8654_s16 }
 0x625   : > { %v12525_v46 = vpop.permute.xlu0 %6771 }
 0x626   : > { %v12527_v39 = vpop.permute.xlu1 %6769 }
 0x627   : > { %7243 = vrot.lane.b32.xlu0 %v14317_v28, %s8654_s16  ;;  %v14321_v28 = vld [vmem:[#allocation23_spill] sm:$0xff] }
 0x628   : > { %7241 = vrot.lane.b32.xlu1 %v14318_v37, %s8654_s16  ;;  %v14322_v37 = vld [vmem:[#allocation43_spill] sm:$0xff] }
 0x629   : > { %v12533_v4 = vpop.permute.xlu0 %6775  ;;  %v6143_v53 = vcombine.low %v14323_v54, %v14322_v37  ;;  %v12563_v54 = vrot.slane %v6159_v20, %v8847_v13  ;;  %v12585_v20 = vrot.slane %v6135_v48, %v8847_v13  ;;  %v14334_v48 = vld [vmem:[#allocation33_spill] sm:$0xff] }
 0x62a   : > { %v12535_v31 = vpop.permute.xlu1 %6773 }
 0x62b   : > { %7247 = vrot.lane.b32.xlu0 %v14319_v55, %s8654_s16  ;;  %v6091_v55 = vcombine.low %v12445_v47, %v5896_v57  ;;  %v14330_v47 = vld [vmem:[#allocation94_spill] sm:$0xff]  ;;  %v6183_v17 = vcombine.low %v12575_v9, %v12563_v54 }
 0x62c   : > { %7245 = vrot.lane.b32.xlu1 %v14320_v1, %s8654_s16  ;;  %v6067_v57 = vcombine.low %v14330_v47, %v14329_v44 }
 0x62d   : > { %v12541_v19 = vpop.permute.xlu0 %6779  ;;  %v12578_v22 = vrot.slane %v6091_v55, %v8847_v13  ;;  %v14333_v55 = vld [vmem:[#allocation22_spill] sm:$0xff] }
 0x62e   : > { %v12544_v51 = vpop.permute.xlu1 %6777  ;;  %v12600_v44 = vrot.slane %v6067_v57, %v8847_v13 }
 0x62f   : > { %7251 = vrot.lane.b32.xlu0 %v14321_v28, %s8654_s16  ;;  %v6083_v28 = vcombine.low %v12328_v12, %v5892_v30  ;;  %v14331_v12 = vld [vmem:[#allocation34_spill] sm:$0xff] }
 0x630   : > { %7249 = vrot.lane.b32.xlu1 %v14324_v50, %s8654_s16  ;;  %v12570_v50 = vrot.slane %v6143_v53, %v8847_v13  ;;  %v12588_v53 = vrot.slane %v6075_v33, %v8847_v13 }
 0x631   : > { %v12555_v1 = vpop.permute.xlu0 %6783  ;;  %v12591_v30 = vrot.slane %v6083_v28, %v8847_v13 }
 0x632   : > { %v12565_v37 = vpop.permute.xlu1 %6781  ;;  %v6099_v47 = vcombine.low %v12600_v44, %v12588_v53 }
 0x633   : > { %7255 = vrot.lane.b32.xlu0 %v14328_v10, %s8654_s16  ;;  %v6167_v10 = vcombine.low %v12585_v20, %v12570_v50  ;;  %v6115_v33 = vcombine.low %v12591_v30, %v12578_v22 }
 0x634   : > { %7253 = vrot.lane.b32.xlu1 %v14331_v12, %s8654_s16  ;;  %v12611_v12 = vrot.slane %v6183_v17, %v8873_v21  ;;  %v12628_v8 = vrot.slane %v6099_v47, %v8873_v21 }
 0x635   : > { %v12582_v34 = vpop.permute.xlu0 %6787  ;;  %v12618_v57 = vrot.slane %v6167_v10, %v8873_v21  ;;  %v12621_v35 = vrot.slane %v6115_v33, %v8873_v21  ;;  %v14343_v33 = vld [vmem:[#allocation100_spill] sm:$0xff] }
 0x636   : > { %14332 = vst [vmem:[#allocation147_spill] sm:$0xff] %v12582_v34  ;;  %v6786_v36 = vpop.permute.xlu1 %6785 }
 0x637   : > { %7259 = vrot.lane.b32.xlu0 %v14333_v55, %s8654_s16  ;;  %v12632_v17 = vcombine.low %v12618_v57, %v12611_v12  ;;  %v12640_v10 = vcombine.low %v12628_v8, %v12621_v35 }
 0x638   : > { %7257 = vrot.lane.b32.xlu1 %v14334_v48, %s8654_s16  ;;  %v14338_v48 = vld [vmem:[#allocation40_spill] sm:$0xff] }
 0x639   : > { %v12606_v28 = vpop.permute.xlu0 %6791  ;;  %14340 = vst [vmem:[#allocation155_spill] sm:$0xff] %v12632_v17  ;;  %14342 = vst [vmem:[#allocation157_spill] sm:$0xff] %v12640_v10 }
 0x63a   : > { %14335 = vst [vmem:[#allocation154_spill] sm:$0xff] %v12606_v28  ;;  %v12613_v55 = vpop.permute.xlu1 %6789  ;;  %v14346_v28 = vld [vmem:[#allocation115_spill] sm:$0xff] }
 0x63b   : > { %14336 = vst [vmem:[#allocation151_spill] sm:$0xff] %v12613_v55  ;;  %7263 = vrot.lane.b32.xlu0 %v14337_v7, %s8654_s16  ;;  %v14341_v7 = vld [vmem:[#allocation114_spill] sm:$0xff] }
 0x63c   : > { %7261 = vrot.lane.b32.xlu1 %v14338_v48, %s8654_s16 }
 0x63d   : > { %v12625_v3 = vpop.permute.xlu0 %4191 }
 0x63e   : > { %14339 = vst [vmem:[#allocation156_spill] sm:$0xff] %v12625_v3  ;;  %v12634_v34 = vpop.permute.xlu1 %6793 }
 0x63f   : > { %7267 = vrot.lane.b32.xlu0 %v14341_v7, %s8654_s16 }
 0x640   : > { %7265 = vrot.lane.b32.xlu1 %v14343_v33, %s8654_s16  ;;  %v14348_v33 = vld [vmem:[#allocation109_spill] sm:$0xff] }
 0x641   : > { %v12644_v48 = vpop.permute.xlu0 %4199 }
 0x642   : > { %14344 = vst [vmem:[#allocation158_spill] sm:$0xff] %v12644_v48  ;;  %v12646_v47 = vpop.permute.xlu1 %6797 }
 0x643   : > { %14345 = vst [vmem:[#allocation13_spill] sm:$0xff] %v12646_v47  ;;  %7271 = vrot.lane.b32.xlu0 %v14297_v15, %s8654_s16  ;;  %v14351_v15 = vld [vmem:[#allocation110_spill] sm:$0xff] }
 0x644   : > { %7269 = vrot.lane.b32.xlu1 %v14346_v28, %s8654_s16 }
 0x645   : > { %v12654_v7 = vpop.permute.xlu0 %4207 }
 0x646   : > { %14347 = vst [vmem:[#allocation24_spill] sm:$0xff] %v12654_v7  ;;  %v12656_v55 = vpop.permute.xlu1 %6801 }
 0x647   : > { %7275 = vrot.lane.b32.xlu0 %v14300_v61, %s8654_s16 }
 0x648   : > { %7273 = vrot.lane.b32.xlu1 %v14348_v33, %s8654_s16  ;;  %v6943_v33 = vcombine.low %v12544_v51, %v6786_v36  ;;  %v14359_v36 = vld [vmem:[#allocation29_spill] sm:$0xff] }
 0x649   : > { %v12662_v48 = vpop.permute.xlu0 %4667 }
 0x64a   : > { %14349 = vst [vmem:[#allocation159_spill] sm:$0xff] %v12662_v48  ;;  %v12664_v47 = vpop.permute.xlu1 %4193 }
 0x64b   : > { %14350 = vst [vmem:[#allocation111_spill] sm:$0xff] %v12664_v47  ;;  %7279 = vrot.lane.b32.xlu0 %v14302_v29, %s8654_s16  ;;  %v6927_v29 = vcombine.low %v12511_v58, %v12527_v39  ;;  %v6919_v39 = vcombine.low %v12503_v63, %v12519_v11  ;;  %v6867_v58 = vcombine.low %v12525_v46, %v12541_v19  ;;  %v14367_v11 = vld [vmem:[#allocation38_spill] sm:$0xff] }
 0x64c   : > { %7277 = vrot.lane.b32.xlu1 %v14351_v15, %s8654_s16  ;;  %v6935_v15 = vcombine.low %v12535_v31, %v12565_v37  ;;  %v6859_v31 = vcombine.low %v12501_v18, %v12517_v49  ;;  %v5730_v63 = vshrl.u32 %v14367_v11, 16  ;;  %v14368_v49 = vld [vmem:[#allocation30_spill] sm:$0xff]  ;;  %v14369_v18 = vld [vmem:[#allocation61_spill] sm:$0xff]  ;;  %v6851_v46 = vcombine.low %v12493_v60, %v12509_v0 }
 0x64d   : > { %v12670_v28 = vpop.permute.xlu0 %4675  ;;  %v12723_v19 = vrot.slane %v6927_v29, %v8847_v13  ;;  %v12739_v29 = vrot.slane %v6919_v39, %v8847_v13 }
 0x64e   : > { %14352 = vst [vmem:[#allocation112_spill] sm:$0xff] %v12670_v28  ;;  %v12672_v3 = vpop.permute.xlu1 %4201  ;;  %v14356_v28 = vld [vmem:[#allocation54_spill] sm:$0xff]  ;;  %v12755_v39 = vrot.slane %v6851_v46, %v8847_v13 }
 0x64f   : > { %14353 = vst [vmem:[#allocation101_spill] sm:$0xff] %v12672_v3  ;;  %7283 = vrot.lane.b32.xlu0 %v14304_v41, %s8654_s16  ;;  %v6875_v41 = vcombine.low %v12533_v4, %v12555_v1  ;;  %v12707_v4 = vrot.slane %v6943_v33, %v8847_v13  ;;  %v14363_v1 = vld [vmem:[#allocation32_spill] sm:$0xff]  ;;  %v12726_v33 = vrot.slane %v6935_v15, %v8847_v13 }
 0x650   : > { %7281 = vrot.lane.b32.xlu1 %v14305_v38, %s8654_s16  ;;  %v14357_v38 = vld [vmem:[#allocation55_spill] sm:$0xff]  ;;  %v12742_v15 = vrot.slane %v6859_v31, %v8847_v13  ;;  %v6951_v31 = vcombine.low %v12739_v29, %v12723_v19 }
 0x651   : > { %v12678_v61 = vpop.permute.xlu0 %4683  ;;  %v5572_v3 = vcombine.high %v14357_v38, %v14356_v28  ;;  %v14364_v28 = vld [vmem:[#allocation31_spill] sm:$0xff]  ;;  %v14365_v38 = vld [vmem:[#allocation57_spill] sm:$0xff] }
 0x652   : > { %14354 = vst [vmem:[#allocation103_spill] sm:$0xff] %v12678_v61  ;;  %v12681_v48 = vpop.permute.xlu1 %4209  ;;  %v5731_v61 = vshrl.u32 %v14359_v36, 16  ;;  %v5504_v7 = vcombine.high %v14365_v38, %v14364_v28 }
 0x653   : > { %14355 = vst [vmem:[#allocation102_spill] sm:$0xff] %v12681_v48  ;;  %7287 = vrot.lane.b32.xlu0 %v14307_v62, %s8654_s16  ;;  %v14360_v62 = vld [vmem:[#allocation60_spill] sm:$0xff]  ;;  %v14361_v48 = vld [vmem:[#allocation59_spill] sm:$0xff]  ;;  %v5586_v28 = vrot.slane %v5572_v3, %v8873_v21 }
 0x654   : > { %7285 = vrot.lane.b32.xlu1 %v14308_v40, %s8654_s16  ;;  %v5588_v47 = vcombine.high %v14361_v48, %v14360_v62  ;;  %v14362_v40 = vld [vmem:[#allocation53_spill] sm:$0xff]  ;;  %v5520_v48 = vcombine.high %v14369_v18, %v14368_v49  ;;  %v12729_v62 = vrot.slane %v6875_v41, %v8847_v13  ;;  %v5732_v0 = vpack.i.b16 %v5731_v61, %v5730_v63 }
 0x655   : > { %v12695_v51 = vpop.permute.xlu0 %4187  ;;  %v5556_v37 = vcombine.high %v14363_v1, %v14362_v40  ;;  %v14370_v40 = vld [vmem:[#allocation56_spill] sm:$0xff]  ;;  %v14371_v1 = vld [vmem:[#allocation58_spill] sm:$0xff]  ;;  %v12745_v41 = vrot.slane %v6867_v58, %v8847_v13  ;;  %v6967_v49 = vcombine.low %v12726_v33, %v12707_v4  ;;  %v5518_v61 = vrot.slane %v5504_v7, %v8873_v21 }
 0x656   : > { %14358 = vst [vmem:[#allocation104_spill] sm:$0xff] %v12695_v51  ;;  %v12713_v51 = vpop.permute.xlu1 %4669  ;;  %v5737_v60 = vshrl.u32 %v5588_v47, 16  ;;  %v6883_v7 = vcombine.low %v12755_v39, %v12742_v15 }
 0x657   : > { %14366 = vst [vmem:[#allocation106_spill] sm:$0xff] %v12713_v51  ;;  %7291 = vrot.lane.b32.xlu0 %v14309_v32, %s8654_s16  ;;  %v5488_v32 = vcombine.high %v14371_v1, %v14370_v40  ;;  %v5570_v3 = vrot.slane %v5556_v37, %v8873_v21  ;;  %v6899_v58 = vcombine.low %v12745_v41, %v12729_v62  ;;  %v5754_v40 = vshrl.u32 %v12479_v56, 16 }
 0x658   : > { %7289 = vrot.lane.b32.xlu1 %v14310_v59, %s8654_s16  ;;  %v5736_v59 = vshrl.u32 %v5520_v48, 16  ;;  %v12770_v46 = vrot.slane %v6967_v49, %v8873_v21  ;;  %v5735_v51 = vpack.i.b16 %v5588_v47, %v5520_v48  ;;  %v5656_v47 = vcombine.high %v12465_v25, %v12461_v16 }
 0x659   : > { %v12736_v38 = vpop.permute.xlu0 %4195  ;;  %v5502_v1 = vrot.slane %v5488_v32, %v8873_v21  ;;  %v12790_v48 = vrot.slane %v6883_v7, %v8873_v21  ;;  %v5724_v16 = vcombine.high %v12475_v45, %v12468_v43  ;;  %v5692_v7 = vcombine.high %v12448_v5, %v12434_v23 }
 0x65a   : > { %14372 = vst [vmem:[#allocation105_spill] sm:$0xff] %v12736_v38  ;;  %v12750_v18 = vpop.permute.xlu1 %4677  ;;  %v5738_v63 = vpack.i.b16 %v5737_v60, %v5736_v59  ;;  %v12777_v60 = vrot.slane %v6951_v31, %v8873_v21  ;;  %v12780_v59 = vrot.slane %v6899_v58, %v8873_v21  ;;  %v14424_v38 = vld [vmem:[#allocation121_spill] sm:$0xff] }
 0x65b   : > { %14373 = vst [vmem:[#allocation48_spill] sm:$0xff] %v12750_v18  ;;  %5775 = vrot.lane.b32.xlu0 %v5732_v0, %s8646_s6  ;;  %v5589_v0 = vcombine.low %v5570_v3, %v5586_v28  ;;  %v5521_v32 = vcombine.low %v5502_v1, %v5518_v61  ;;  %v5761_v23 = vshrl.u32 %v5724_v16, 16  ;;  %v5706_v5 = vrot.slane %v5692_v7, %v8873_v21  ;;  %v14383_v7 = vld [vmem:[#allocation78_spill] sm:$0xff] }
 0x65c   : > { %7293 = vrot.lane.b32.xlu1 %v14312_v6, %s8654_s16  ;;  %v5755_v6 = vshrl.u32 %v12485_v26, 16  ;;  %v12794_v31 = vcombine.low %v12777_v60, %v12770_v46  ;;  %v12807_v25 = vcombine.low %v12790_v48, %v12780_v59 }
 0x65d   : > { %v12763_v37 = vpop.permute.xlu0 %4203  ;;  %v5741_v58 = vpack.i.b16 %v5589_v0, %v5521_v32 }
 0x65e   : > { %14374 = vst [vmem:[#allocation35_spill] sm:$0xff] %v12763_v37  ;;  %v12772_v18 = vpop.permute.xlu1 %4685  ;;  %v5640_v37 = vcombine.high %v12426_v52, %v12411_v14  ;;  %v5708_v14 = vcombine.high %v12440_v42, %v12423_v24  ;;  %v5760_v42 = vshrl.u32 %v5656_v47, 16 }
 0x65f   : > { %14375 = vst [vmem:[#allocation107_spill] sm:$0xff] %v12772_v18  ;;  %5783 = vrot.lane.b32.xlu0 %v5738_v63, %s8668_s30  ;;  %v5756_v18 = vpack.i.b16 %v5755_v6, %v5754_v40  ;;  %v5624_v63 = vcombine.high %v12437_v2, %v12420_v27  ;;  %v5742_v40 = vshrl.u32 %v5521_v32, 16  ;;  %v5759_v2 = vpack.i.b16 %v5724_v16, %v5656_v47 }
 0x660   : > { %5779 = vrot.lane.b32.xlu1 %v5735_v51, %s8665_s7  ;;  %v5743_v51 = vshrl.u32 %v5589_v0, 16  ;;  %v5654_v27 = vrot.slane %v5640_v37, %v8873_v21  ;;  %v5722_v0 = vrot.slane %v5708_v14, %v8873_v21  ;;  %v5522_v37 = vcombine.high %v5502_v1, %v5518_v61 }
 0x661   : > { %v12785_v49 = vpop.permute.xlu0 %4211  ;;  %v5638_v45 = vrot.slane %v5624_v63, %v8873_v21 }
 0x662   : > { %14376 = vst [vmem:[#allocation18_spill] sm:$0xff] %v12785_v49  ;;  %v12800_v52 = vpop.permute.xlu1 %4189  ;;  %v5744_v32 = vpack.i.b16 %v5743_v51, %v5742_v40  ;;  %v5725_v43 = vcombine.low %v5706_v5, %v5722_v0  ;;  %v5748_v51 = vshrl.u32 %v5522_v37, 16 }
 0x663   : > { %14377 = vst [vmem:[#allocation28_spill] sm:$0xff] %v12800_v52  ;;  %5777 = vrot.lane.b32.xlu0 %v5756_v18, %s8646_s6  ;;  %v5590_v18 = vcombine.high %v5570_v3, %v5586_v28  ;;  %v5762_v28 = vpack.i.b16 %v5761_v23, %v5760_v42  ;;  %v5657_v3 = vcombine.low %v5638_v45, %v5654_v27 }
 0x664   : > { %5787 = vrot.lane.b32.xlu1 %v5741_v58, %s8666_s28 }
 0x665   : > { %v12813_v24 = vpop.permute.xlu0 %4663  ;;  %v5747_v63 = vpack.i.b16 %v5590_v18, %v5522_v37  ;;  %v5749_v14 = vshrl.u32 %v5590_v18, 16  ;;  %v5765_v40 = vpack.i.b16 %v5725_v43, %v5657_v3  ;;  %v5766_v42 = vshrl.u32 %v5657_v3, 16  ;;  %v14387_v37 = vld [vmem:[#allocation75_spill] sm:$0xff] }
 0x666   : > { %14378 = vst [vmem:[#allocation16_spill] sm:$0xff] %v12813_v24  ;;  %v12819_v6 = vpop.permute.xlu1 %4197  ;;  %v5767_v18 = vshrl.u32 %v5725_v43, 16  ;;  %v14389_v24 = vld [vmem:[#allocation67_spill] sm:$0xff]  ;;  %v5658_v3 = vcombine.high %v5638_v45, %v5654_v27  ;;  %v14395_v43 = vld [vmem:[#allocation69_spill] sm:$0xff] }
 0x667   : > { %14379 = vst [vmem:[#allocation36_spill] sm:$0xff] %v12819_v6  ;;  %5781 = vrot.lane.b32.xlu0 %v5759_v2, %s8665_s7  ;;  %v6207_v2 = vshrl.u32 %v14383_v7, 16  ;;  %v5750_v1 = vpack.i.b16 %v5749_v14, %v5748_v51  ;;  %v14392_v51 = vld [vmem:[#allocation77_spill] sm:$0xff] }
 0x668   : > { %5791 = vrot.lane.b32.xlu1 %v5744_v32, %s8669_s11  ;;  %v14385_v32 = vld [vmem:[#allocation83_spill] sm:$0xff]  ;;  %v5768_v14 = vpack.i.b16 %v5767_v18, %v5766_v42  ;;  %v14398_v42 = vld [vmem:[#allocation65_spill] sm:$0xff]  ;;  %v14399_v18 = vld [vmem:[#allocation72_spill] sm:$0xff] }
 0x669   : > { %v12824_v47 = vpop.permute.xlu0 %4671  ;;  %v6206_v23 = vshrl.u32 %v14385_v32, 16 }
 0x66a   : > { %14380 = vst [vmem:[#allocation26_spill] sm:$0xff] %v12824_v47  ;;  %v12826_v58 = vpop.permute.xlu1 %4205  ;;  %v14388_v47 = vld [vmem:[#allocation79_spill] sm:$0xff] }
 0x66b   : > { %14381 = vst [vmem:[#allocation25_spill] sm:$0xff] %v12826_v58  ;;  %5785 = vrot.lane.b32.xlu0 %v5762_v28, %s8668_s30  ;;  %v14390_v58 = vld [vmem:[#allocation62_spill] sm:$0xff] }
 0x66c   : > { %5795 = vrot.lane.b32.xlu1 %v5747_v63, %s8667_s17  ;;  %v6208_v63 = vpack.i.b16 %v6207_v2, %v6206_v23  ;;  %v6048_v6 = vcombine.high %v14390_v58, %v14389_v24  ;;  %v14397_v2 = vld [vmem:[#allocation70_spill] sm:$0xff] }
 0x66d   : > { %v12830_v16 = vpop.permute.xlu0 %4679 }
 0x66e   : > { %14382 = vst [vmem:[#allocation46_spill] sm:$0xff] %v12830_v16  ;;  %v12833_v61 = vpop.permute.xlu1 %4213  ;;  %v6064_v16 = vcombine.high %v14388_v47, %v14387_v37  ;;  %v5726_v47 = vcombine.high %v5706_v5, %v5722_v0  ;;  %v6062_v27 = vrot.slane %v6048_v6, %v8873_v21 }
 0x66f   : > { %14384 = vst [vmem:[#allocation27_spill] sm:$0xff] %v12833_v61  ;;  %5789 = vrot.lane.b32.xlu0 %v5765_v40, %s8666_s28  ;;  %v14393_v40 = vld [vmem:[#allocation80_spill] sm:$0xff] }
 0x670   : > { %5799 = vrot.lane.b32.xlu1 %v5750_v1, %s8662_s15  ;;  %v5996_v61 = vcombine.high %v14393_v40, %v14392_v51  ;;  %v14394_v1 = vld [vmem:[#allocation66_spill] sm:$0xff]  ;;  %v6213_v58 = vshrl.u32 %v6064_v16, 16  ;;  %v5771_v51 = vpack.i.b16 %v5726_v47, %v5658_v3  ;;  %v5772_v40 = vshrl.u32 %v5658_v3, 16 }
 0x671   : > { %v12838_v28 = vpop.permute.xlu0 %4687  ;;  %v6032_v52 = vcombine.high %v14395_v43, %v14394_v1  ;;  %v5773_v5 = vshrl.u32 %v5726_v47, 16  ;;  %v6231_v43 = vshrl.u32 %v12632_v17, 16  ;;  %v6184_v3 = vcombine.high %v12575_v9, %v12563_v54 }
 0x672   : > { %14386 = vst [vmem:[#allocation23_spill] sm:$0xff] %v12838_v28  ;;  %v12844_v49 = vpop.permute.xlu1 %4665  ;;  %v14396_v28 = vld [vmem:[#allocation71_spill] sm:$0xff]  ;;  %v6211_v24 = vpack.i.b16 %v6064_v16, %v5996_v61  ;;  %v6212_v1 = vshrl.u32 %v5996_v61, 16  ;;  %v6132_v9 = vcombine.high %v12628_v8, %v12621_v35 }
 0x673   : > { %14391 = vst [vmem:[#allocation43_spill] sm:$0xff] %v12844_v49  ;;  %6251 = vrot.lane.b32.xlu0 %v6208_v63, %s8646_s6  ;;  %v5980_v23 = vcombine.high %v14397_v2, %v14396_v28  ;;  %v5964_v63 = vcombine.high %v14399_v18, %v14398_v42  ;;  %v6046_v28 = vrot.slane %v6032_v52, %v8873_v21  ;;  %v6230_v52 = vshrl.u32 %v12640_v10, 16  ;;  %v14411_v49 = vld [vmem:[#allocation139_spill] sm:$0xff] }
 0x674   : > { %5793 = vrot.lane.b32.xlu1 %v5768_v14, %s8669_s11  ;;  %v6214_v14 = vpack.i.b16 %v6213_v58, %v6212_v1  ;;  %v6200_v58 = vcombine.high %v12618_v57, %v12611_v12  ;;  %v6198_v12 = vrot.slane %v6184_v3, %v8873_v21  ;;  %v6236_v8 = vshrl.u32 %v6132_v9, 16 }
 0x675   : > { %v12854_v37 = vpop.permute.xlu0 %6795  ;;  %v5994_v0 = vrot.slane %v5980_v23, %v8873_v21  ;;  %v5978_v6 = vrot.slane %v5964_v63, %v8873_v21  ;;  %v6065_v2 = vcombine.low %v6046_v28, %v6062_v27  ;;  %v6232_v47 = vpack.i.b16 %v6231_v43, %v6230_v52 }
 0x676   : > { %v12859_v45 = vpop.permute.xlu1 %4673  ;;  %v6168_v63 = vcombine.high %v12585_v20, %v12570_v50  ;;  %v6235_v20 = vpack.i.b16 %v6200_v58, %v6132_v9 }
 0x677   : > { %14400 = vst [vmem:[#allocation87_spill] sm:$0xff] %v12859_v45  ;;  %6255 = vrot.lane.b32.xlu0 %v6211_v24, %s8665_s7  ;;  %v5774_v24 = vpack.i.b16 %v5773_v5, %v5772_v40  ;;  %v5997_v61 = vcombine.low %v5978_v6, %v5994_v0  ;;  %v6219_v54 = vshrl.u32 %v6065_v2, 16  ;;  %v6100_v5 = vcombine.high %v12600_v44, %v12588_v53 }
 0x678   : > { %5797 = vrot.lane.b32.xlu1 %v5771_v51, %s8667_s17  ;;  %v6116_v51 = vcombine.high %v12591_v30, %v12578_v22  ;;  %v6237_v22 = vshrl.u32 %v6200_v58, 16  ;;  %v6066_v30 = vcombine.high %v6046_v28, %v6062_v27  ;;  %v6182_v57 = vrot.slane %v6168_v63, %v8873_v21  ;;  %v14403_v63 = vld [vmem:[#allocation148_spill] sm:$0xff] }
 0x679   : > { %v12865_v16 = vpop.permute.xlu0 %6799  ;;  %v6217_v18 = vpack.i.b16 %v6065_v2, %v5997_v61  ;;  %v6218_v1 = vshrl.u32 %v5997_v61, 16  ;;  %v6114_v53 = vrot.slane %v6100_v5, %v8873_v21  ;;  %v5998_v44 = vcombine.high %v5978_v6, %v5994_v0  ;;  %v14404_v0 = vld [vmem:[#allocation149_spill] sm:$0xff]  ;;  %v14405_v5 = vld [vmem:[#allocation118_spill] sm:$0xff] }
 0x67a   : > { %v12869_v42 = vpop.permute.xlu1 %4681  ;;  %v6201_v52 = vcombine.low %v6182_v57, %v6198_v12  ;;  %v6225_v61 = vshrl.u32 %v6066_v30, 16  ;;  %v6651_v6 = vshrl.u32 %v14404_v0, 16  ;;  %v14415_v0 = vld [vmem:[#allocation128_spill] sm:$0xff] }
 0x67b   : > { %14401 = vst [vmem:[#allocation17_spill] sm:$0xff] %v12869_v42  ;;  %6259 = vrot.lane.b32.xlu0 %v6214_v14, %s8668_s30  ;;  %v6130_v14 = vrot.slane %v6116_v51, %v8873_v21  ;;  %v6220_v35 = vpack.i.b16 %v6219_v54, %v6218_v1  ;;  %v6223_v28 = vpack.i.b16 %v6066_v30, %v5998_v44  ;;  %v6650_v51 = vshrl.u32 %v14403_v63, 16  ;;  %v14407_v30 = vld [vmem:[#allocation119_spill] sm:$0xff] }
 0x67c   : > { %5801 = vrot.lane.b32.xlu1 %v5774_v24, %s8662_s15  ;;  %v6238_v24 = vpack.i.b16 %v6237_v22, %v6236_v8  ;;  %v6243_v1 = vshrl.u32 %v6201_v52, 16  ;;  %v14410_v42 = vld [vmem:[#allocation143_spill] sm:$0xff] }
 0x67d   : > { %v12876_v23 = vpop.permute.xlu0 %6803  ;;  %v6133_v3 = vcombine.low %v6114_v53, %v6130_v14 }
 0x67e   : > { %v12884_v40 = vpop.permute.xlu1 %4689 }
 0x67f   : > { %14402 = vst [vmem:[#allocation45_spill] sm:$0xff] %v12884_v40  ;;  %6253 = vrot.lane.b32.xlu0 %v6232_v47, %s8646_s6  ;;  %v6224_v47 = vshrl.u32 %v5998_v44, 16  ;;  %v6242_v44 = vshrl.u32 %v6133_v3, 16  ;;  %v14409_v40 = vld [vmem:[#allocation138_spill] sm:$0xff] }
 0x680   : > { %6263 = vrot.lane.b32.xlu1 %v6217_v18, %s8666_s28  ;;  %v6241_v18 = vpack.i.b16 %v6201_v52, %v6133_v3  ;;  %v6440_v45 = vcombine.high %v14410_v42, %v14409_v40  ;;  %v14414_v52 = vld [vmem:[#allocation123_spill] sm:$0xff]  ;;  %v6202_v3 = vcombine.high %v6182_v57, %v6198_v12  ;;  %v6134_v42 = vcombine.high %v6114_v53, %v6130_v14 }
 0x681   : > { %v12893_v50 = vpop.permute.xlu0 %6807  ;;  %v6226_v9 = vpack.i.b16 %v6225_v61, %v6224_v47  ;;  %v14412_v61 = vld [vmem:[#allocation144_spill] sm:$0xff] }
 0x682   : > { %v12897_v43 = vpop.permute.xlu1 %6805  ;;  %v6508_v47 = vcombine.high %v14412_v61, %v14411_v49  ;;  %v6249_v12 = vshrl.u32 %v6202_v3, 16  ;;  %v6248_v14 = vshrl.u32 %v6134_v42, 16 }
 0x683   : > { %6257 = vrot.lane.b32.xlu0 %v6235_v20, %s8665_s7  ;;  %v14406_v20 = vld [vmem:[#allocation99_spill] sm:$0xff] }
 0x684   : > { %6267 = vrot.lane.b32.xlu1 %v6220_v35, %s8669_s11  ;;  %v6424_v22 = vcombine.high %v14406_v20, %v14405_v5  ;;  %v14408_v35 = vld [vmem:[#allocation108_spill] sm:$0xff]  ;;  %v14416_v5 = vld [vmem:[#allocation126_spill] sm:$0xff]  ;;  %v6655_v49 = vpack.i.b16 %v6508_v47, %v6440_v45 }
 0x685   : > { %v12902_v2 = vpop.permute.xlu0 %6811  ;;  %v6492_v8 = vcombine.high %v14408_v35, %v14407_v30  ;;  %v6476_v20 = vcombine.high %v14416_v5, %v14415_v0  ;;  %v6244_v30 = vpack.i.b16 %v6243_v1, %v6242_v44  ;;  %v6657_v35 = vshrl.u32 %v6508_v47, 16  ;;  %v14418_v47 = vld [vmem:[#allocation153_spill] sm:$0xff]  ;;  %v14419_v5 = vld [vmem:[#allocation140_spill] sm:$0xff] }
 0x686   : > { %v12904_v27 = vpop.permute.xlu1 %6809  ;;  %v6247_v44 = vpack.i.b16 %v6202_v3, %v6134_v42  ;;  %v14421_v3 = vld [vmem:[#allocation141_spill] sm:$0xff] }
 0x687   : > { %6261 = vrot.lane.b32.xlu0 %v6238_v24, %s8668_s30  ;;  %v6490_v0 = vrot.slane %v6476_v20, %v8873_v21  ;;  %v14420_v20 = vld [vmem:[#allocation145_spill] sm:$0xff] }
 0x688   : > { %6271 = vrot.lane.b32.xlu1 %v6223_v28, %s8667_s17  ;;  %v6652_v28 = vpack.i.b16 %v6651_v6, %v6650_v51  ;;  %v6506_v51 = vrot.slane %v6492_v8, %v8873_v21  ;;  %v6656_v6 = vshrl.u32 %v6440_v45, 16  ;;  %v14417_v45 = vld [vmem:[#allocation152_spill] sm:$0xff] }
 0x689   : > { %v12908_v58 = vpop.permute.xlu0 %6815 }
 0x68a   : > { %v12912_v54 = vpop.permute.xlu1 %6813  ;;  %v6658_v8 = vpack.i.b16 %v6657_v35, %v6656_v6 }
 0x68b   : > { %6265 = vrot.lane.b32.xlu0 %v6241_v18, %s8666_s28  ;;  %v14413_v18 = vld [vmem:[#allocation127_spill] sm:$0xff] }
 0x68c   : > { %6275 = vrot.lane.b32.xlu1 %v6226_v9, %s8662_s15  ;;  %v6408_v63 = vcombine.high %v14414_v52, %v14413_v18  ;;  %v6438_v9 = vrot.slane %v6424_v22, %v8873_v21  ;;  %v6509_v22 = vcombine.low %v6490_v0, %v6506_v51  ;;  %v6250_v52 = vpack.i.b16 %v6249_v12, %v6248_v14  ;;  %v14425_v14 = vld [vmem:[#allocation125_spill] sm:$0xff] }
 0x68d   : > { %v12920_v24 = vpop.permute.xlu0 %7231 }
 0x68e   : > { %v6818_v10 = vpop.permute.xlu1 %6817  ;;  %v6422_v61 = vrot.slane %v6408_v63, %v8873_v21  ;;  %v6675_v63 = vshrl.u32 %v14418_v47, 16  ;;  %v14423_v47 = vld [vmem:[#allocation122_spill] sm:$0xff] }
 0x68f   : > { %6695 = vrot.lane.b32.xlu0 %v6652_v28, %s8646_s6  ;;  %v6674_v28 = vshrl.u32 %v14417_v45, 16  ;;  %v7079_v42 = vcombine.low %v12904_v27, %v6818_v10  ;;  %v6560_v12 = vcombine.high %v14424_v38, %v14423_v47  ;;  %v7011_v10 = vcombine.low %v12893_v50, %v12908_v58  ;;  %v14427_v38 = vld [vmem:[#allocation132_spill] sm:$0xff]  ;;  %v14428_v47 = vld [vmem:[#allocation131_spill] sm:$0xff] }
 0x690   : > { %6269 = vrot.lane.b32.xlu1 %v6244_v30, %s8669_s11  ;;  %v6441_v57 = vcombine.low %v6422_v61, %v6438_v9  ;;  %v6576_v30 = vcombine.high %v14420_v20, %v14419_v5  ;;  %v7063_v5 = vcombine.low %v12634_v34, %v12656_v55  ;;  %v7071_v20 = vcombine.low %v12897_v43, %v12912_v54  ;;  %v14431_v34 = vld [vmem:[#allocation13_spill] sm:$0xff]  ;;  %v14432_v55 = vld [vmem:[#allocation151_spill] sm:$0xff]  ;;  %v14433_v43 = vld [vmem:[#allocation154_spill] sm:$0xff] }
 0x691   : > { %v12934_v40 = vpop.permute.xlu0 %7235  ;;  %v6676_v35 = vpack.i.b16 %v6675_v63, %v6674_v28  ;;  %v6663_v27 = vshrl.u32 %v6509_v22, 16  ;;  %v6442_v28 = vcombine.high %v6422_v61, %v6438_v9  ;;  %v6544_v63 = vcombine.high %v14428_v47, %v14427_v38 }
 0x692   : > { %v12938_v1 = vpop.permute.xlu1 %7233  ;;  %v6662_v45 = vshrl.u32 %v6441_v57, 16  ;;  %v6995_v54 = vcombine.low %v14433_v43, %v12865_v16  ;;  %v7003_v50 = vcombine.low %v12876_v23, %v12902_v2  ;;  %v12981_v58 = vrot.slane %v7079_v42, %v8847_v13  ;;  %v14434_v16 = vld [vmem:[#allocation147_spill] sm:$0xff] }
 0x693   : > { %6699 = vrot.lane.b32.xlu0 %v6655_v49, %s8665_s7  ;;  %v14422_v49 = vld [vmem:[#allocation146_spill] sm:$0xff]  ;;  %v6680_v61 = vshrl.u32 %v6576_v30, 16  ;;  %v12989_v47 = vrot.slane %v7063_v5, %v8847_v13  ;;  %v12994_v23 = vrot.slane %v7071_v20, %v8847_v13  ;;  %v12997_v2 = vrot.slane %v7011_v10, %v8847_v13 }
 0x694   : > { %6273 = vrot.lane.b32.xlu1 %v6247_v44, %s8667_s17  ;;  %v6644_v17 = vcombine.high %v14422_v49, %v14421_v3  ;;  %v6661_v44 = vpack.i.b16 %v6509_v22, %v6441_v57  ;;  %v14429_v3 = vld [vmem:[#allocation130_spill] sm:$0xff]  ;;  %v14430_v49 = vld [vmem:[#allocation129_spill] sm:$0xff]  ;;  %v13011_v5 = vrot.slane %v7003_v50, %v8847_v13 }
 0x695   : > { %v12942_v53 = vpop.permute.xlu0 %7239  ;;  %v7103_v20 = vcombine.low %v12994_v23, %v12981_v58 }
 0x696   : > { %v12946_v18 = vpop.permute.xlu1 %7237  ;;  %v6679_v57 = vpack.i.b16 %v6644_v17, %v6576_v30  ;;  %v6681_v22 = vshrl.u32 %v6644_v17, 16  ;;  %v6664_v30 = vpack.i.b16 %v6663_v27, %v6662_v45  ;;  %v6510_v17 = vcombine.high %v6490_v0, %v6506_v51 }
 0x697   : > { %6703 = vrot.lane.b32.xlu0 %v6658_v8, %s8668_s30  ;;  %v14426_v8 = vld [vmem:[#allocation124_spill] sm:$0xff]  ;;  %v13031_v43 = vrot.slane %v7103_v20, %v8873_v21 }
 0x698   : > { %6277 = vrot.lane.b32.xlu1 %v6250_v52, %s8662_s15  ;;  %v6628_v32 = vcombine.high %v14426_v8, %v14425_v14  ;;  %v6612_v14 = vcombine.high %v14430_v49, %v14429_v3  ;;  %v7055_v8 = vcombine.low %v14432_v55, %v14431_v34  ;;  %v6987_v3 = vcombine.low %v14434_v16, %v12854_v37 }
 0x699   : > { %v12955_v6 = vpop.permute.xlu0 %7243  ;;  %v13008_v37 = vrot.slane %v6995_v54, %v8847_v13  ;;  %v6682_v51 = vpack.i.b16 %v6681_v22, %v6680_v61  ;;  %v6668_v34 = vshrl.u32 %v6442_v28, 16  ;;  %v6669_v55 = vshrl.u32 %v6510_v17, 16 }
 0x69a   : > { %v12967_v52 = vpop.permute.xlu1 %7241  ;;  %v6642_v38 = vrot.slane %v6628_v32, %v8873_v21  ;;  %v6558_v32 = vrot.slane %v6544_v63, %v8873_v21  ;;  %v7035_v63 = vcombine.low %v13011_v5, %v12997_v2  ;;  %v7127_v61 = vshrl.u32 %v12794_v31, 16 }
 0x69b   : > { %6697 = vrot.lane.b32.xlu0 %v6676_v35, %s8646_s6  ;;  %v6574_v35 = vrot.slane %v6560_v12, %v8873_v21  ;;  %v13005_v12 = vrot.slane %v7055_v8, %v8847_v13 }
 0x69c   : > { %6707 = vrot.lane.b32.xlu1 %v6661_v44, %s8666_s28  ;;  %v6626_v44 = vrot.slane %v6612_v14, %v8873_v21  ;;  %v6667_v14 = vpack.i.b16 %v6510_v17, %v6442_v28  ;;  %v13041_v16 = vrot.slane %v7035_v63, %v8873_v21  ;;  %v6670_v17 = vpack.i.b16 %v6669_v55, %v6668_v34 }
 0x69d   : > { %v12984_v9 = vpop.permute.xlu0 %7247  ;;  %v6577_v0 = vcombine.low %v6558_v32, %v6574_v35  ;;  %v7087_v27 = vcombine.low %v13005_v12, %v12989_v47  ;;  %v6578_v28 = vcombine.high %v6558_v32, %v6574_v35  ;;  %v6968_v32 = vcombine.high %v12726_v33, %v12707_v4 }
 0x69e   : > { %v12999_v42 = vpop.permute.xlu1 %7245  ;;  %v6645_v10 = vcombine.low %v6626_v44, %v6642_v38 }
 0x69f   : > { %6701 = vrot.lane.b32.xlu0 %v6679_v57, %s8665_s7  ;;  %v13021_v57 = vrot.slane %v6987_v3, %v8847_v13  ;;  %v13038_v22 = vrot.slane %v7087_v27, %v8873_v21  ;;  %v6646_v3 = vcombine.high %v6626_v44, %v6642_v38  ;;  %v6686_v20 = vshrl.u32 %v6577_v0, 16 }
 0x6a0   : > { %6711 = vrot.lane.b32.xlu1 %v6664_v30, %s8669_s11  ;;  %v6685_v50 = vpack.i.b16 %v6645_v10, %v6577_v0  ;;  %v6984_v38 = vcombine.high %v12777_v60, %v12770_v46  ;;  %v6692_v0 = vshrl.u32 %v6578_v28, 16  ;;  %v6900_v46 = vcombine.high %v12745_v41, %v12729_v62 }
 0x6a1   : > { %v13016_v45 = vpop.permute.xlu0 %7251  ;;  %v7019_v8 = vcombine.low %v13021_v57, %v13008_v37  ;;  %v13050_v27 = vcombine.low %v13038_v22, %v13031_v43 }
 0x6a2   : > { %v13025_v49 = vpop.permute.xlu1 %7249 }
 0x6a3   : > { %6705 = vrot.lane.b32.xlu0 %v6682_v51, %s8668_s30  ;;  %v6687_v51 = vshrl.u32 %v6645_v10, 16  ;;  %v13046_v7 = vrot.slane %v7019_v8, %v8873_v21  ;;  %v6693_v10 = vshrl.u32 %v6646_v3, 16  ;;  %v6916_v8 = vcombine.high %v12790_v48, %v12780_v59 }
 0x6a4   : > { %6715 = vrot.lane.b32.xlu1 %v6667_v14, %s8667_s17  ;;  %v7126_v14 = vshrl.u32 %v12807_v25, 16  ;;  %v6982_v59 = vrot.slane %v6968_v32, %v8873_v21  ;;  %v6691_v48 = vpack.i.b16 %v6646_v3, %v6578_v28  ;;  %v7395_v28 = vcombine.low %v12938_v1, %v12967_v52 }
 0x6a5   : > { %v13034_v54 = vpop.permute.xlu0 %7255  ;;  %v13059_v44 = vcombine.low %v13046_v7, %v13041_v16  ;;  %v6688_v55 = vpack.i.b16 %v6687_v51, %v6686_v20  ;;  %v7131_v60 = vpack.i.b16 %v6984_v38, %v6916_v8  ;;  %v6694_v20 = vpack.i.b16 %v6693_v10, %v6692_v0 }
 0x6a6   : > { %v7254_v30 = vpop.permute.xlu1 %7253  ;;  %v7128_v35 = vpack.i.b16 %v7127_v61, %v7126_v14  ;;  %v7133_v61 = vshrl.u32 %v6984_v38, 16  ;;  %v7132_v51 = vshrl.u32 %v6916_v8, 16  ;;  %v7120_v32 = vcombine.high %v13038_v22, %v13031_v43 }
 0x6a7   : > { %6709 = vrot.lane.b32.xlu0 %v6685_v50, %s8666_s28  ;;  %v6952_v50 = vcombine.high %v12739_v29, %v12723_v19  ;;  %v7149_v4 = vpack.i.b16 %v13050_v27, %v13059_v44  ;;  %v7403_v19 = vcombine.low %v12946_v18, %v12999_v42  ;;  %v7343_v18 = vcombine.low %v12984_v9, %v13034_v54 }
 0x6a8   : > { %6719 = vrot.lane.b32.xlu1 %v6670_v17, %s8662_s15  ;;  %v6884_v17 = vcombine.high %v12755_v39, %v12742_v15  ;;  %v7335_v15 = vcombine.low %v12934_v40, %v12955_v6  ;;  %v7150_v6 = vshrl.u32 %v13059_v44, 16  ;;  %v13120_v0 = vrot.slane %v7395_v28, %v8847_v13 }
 0x6a9   : > { %v7260_v63 = vpop.permute.xlu0 %7259  ;;  %v6966_v14 = vrot.slane %v6952_v50, %v8873_v21  ;;  %v13098_v1 = vrot.slane %v7403_v19, %v8847_v13  ;;  %v13123_v10 = vrot.slane %v7343_v18, %v8847_v13  ;;  %v7036_v43 = vcombine.high %v13011_v5, %v12997_v2 }
 0x6aa   : > { %v7258_v34 = vpop.permute.xlu1 %7257  ;;  %v7351_v29 = vcombine.low %v13016_v45, %v7260_v63  ;;  %v7134_v45 = vpack.i.b16 %v7133_v61, %v7132_v51  ;;  %v6898_v3 = vrot.slane %v6884_v17, %v8873_v21  ;;  %v7327_v63 = vcombine.low %v12920_v24, %v12942_v53 }
 0x6ab   : > { %7171 = vrot.lane.b32.xlu0 %v7128_v35, %s8646_s6  ;;  %v7411_v62 = vcombine.low %v13025_v49, %v7258_v34  ;;  %v6914_v35 = vrot.slane %v6900_v46, %v8873_v21  ;;  %v7151_v49 = vshrl.u32 %v13050_v27, 16  ;;  %v6985_v40 = vcombine.low %v6966_v14, %v6982_v59  ;;  %v14524_v27 = vld [vmem:[#allocation134_spill] sm:$0xff] }
 0x6ac   : > { %6713 = vrot.lane.b32.xlu1 %v6688_v55, %s8669_s11  ;;  %v13104_v9 = vrot.slane %v7351_v29, %v8847_v13  ;;  %v7104_v24 = vcombine.high %v12994_v23, %v12981_v58  ;;  %v13115_v53 = vrot.slane %v7335_v15, %v8847_v13  ;;  %v7088_v23 = vcombine.high %v13005_v12, %v12989_v47 }
 0x6ad   : > { %v13071_v33 = vpop.permute.xlu0 %7263  ;;  %v13101_v52 = vrot.slane %v7411_v62, %v8847_v13  ;;  %v6917_v38 = vcombine.low %v6898_v3, %v6914_v35  ;;  %v7152_v58 = vpack.i.b16 %v7151_v49, %v7150_v6  ;;  %v7139_v8 = vshrl.u32 %v6985_v40, 16 }
 0x6ae   : > { %v7262_v41 = vpop.permute.xlu1 %7261  ;;  %v13135_v50 = vrot.slane %v7327_v63, %v8847_v13  ;;  %v7427_v46 = vcombine.low %v13120_v0, %v13098_v1  ;;  %v7052_v47 = vcombine.high %v13046_v7, %v13041_v16  ;;  %v7020_v2 = vcombine.high %v13021_v57, %v13008_v37 }
 0x6af   : > { %7175 = vrot.lane.b32.xlu0 %v7131_v60, %s8665_s7  ;;  %v7419_v39 = vcombine.low %v7254_v30, %v7262_v41  ;;  %v7137_v22 = vpack.i.b16 %v6985_v40, %v6917_v38  ;;  %v7375_v60 = vcombine.low %v13123_v10, %v13104_v9  ;;  %v7118_v12 = vrot.slane %v7104_v24, %v8873_v21 }
 0x6b0   : > { %6717 = vrot.lane.b32.xlu1 %v6691_v48, %s8667_s17  ;;  %v7138_v5 = vshrl.u32 %v6917_v38, 16  ;;  %v7359_v17 = vcombine.low %v13135_v50, %v13115_v53  ;;  %v7155_v19 = vpack.i.b16 %v7120_v32, %v7052_v47  ;;  %v7157_v62 = vshrl.u32 %v7120_v32, 16 }
 0x6b1   : > { %v13090_v42 = vpop.permute.xlu0 %7267  ;;  %v13107_v54 = vrot.slane %v7419_v39, %v8847_v13  ;;  %v7102_v29 = vrot.slane %v7088_v23, %v8873_v21  ;;  %v6986_v16 = vcombine.high %v6966_v14, %v6982_v59  ;;  %v7050_v37 = vrot.slane %v7036_v43, %v8873_v21 }
 0x6b2   : > { %v13109_v30 = vpop.permute.xlu1 %7265  ;;  %v7140_v7 = vpack.i.b16 %v7139_v8, %v7138_v5  ;;  %v7435_v57 = vrot.slane %v7427_v46, %v8873_v21  ;;  %v7383_v41 = vrot.slane %v7375_v60, %v8873_v21  ;;  %v7156_v15 = vshrl.u32 %v7052_v47, 16  ;;  %v8494_v46 = vld [vmem:[#allocation5 + $0x4] ss:$12 sps:$4 sm:$0xff]  }
 0x6b3   : > { %7179 = vrot.lane.b32.xlu0 %v7134_v45, %s8668_s30  ;;  %v7443_v34 = vcombine.low %v13101_v52, %v13107_v54  ;;  %v7034_v39 = vrot.slane %v7020_v2, %v8873_v21  ;;  %v6918_v28 = vcombine.high %v6898_v3, %v6914_v35  ;;  %v7367_v18 = vrot.slane %v7359_v17, %v8873_v21 }
 0x6b4   : > { %6721 = vrot.lane.b32.xlu1 %v6694_v20, %s8662_s15  ;;  %v7158_v14 = vpack.i.b16 %v7157_v62, %v7156_v15  ;;  %v7121_v49 = vcombine.low %v7102_v29, %v7118_v12  ;;  %v7145_v24 = vshrl.u32 %v6986_v16, 16  ;;  %7875 = vmatprep.mubr.bf16.mxu1 %v8494_v46 }
 0x6b5   : > { %v13128_v55 = vpop.permute.xlu0 %7271  ;;  %v7451_v48 = vrot.slane %v7443_v34, %v8873_v21  ;;  %v13167_v63 = vcombine.low %v7367_v18, %v7383_v41  ;;  %v7143_v6 = vpack.i.b16 %v6986_v16, %v6918_v28  ;;  %v7053_v38 = vcombine.low %v7034_v39, %v7050_v37 }
 0x6b6   : > { %v13141_v61 = vpop.permute.xlu1 %7269  ;;  %v7144_v35 = vshrl.u32 %v6918_v28, 16  ;;  %v7122_v34 = vcombine.high %v7102_v29, %v7118_v12  ;;  %v7054_v8 = vcombine.high %v7034_v39, %v7050_v37  ;;  %v7444_v12 = vcombine.high %v13101_v52, %v13107_v54 }
 0x6b7   : > { %7173 = vrot.lane.b32.xlu0 %v7152_v58, %s8646_s6  ;;  %v13164_v45 = vcombine.low %v7435_v57, %v7451_v48  ;;  %v7161_v32 = vpack.i.b16 %v7121_v49, %v7053_v38  ;;  %v7460_v60 = vcombine.high %v7435_v57, %v7451_v48  ;;  %v7162_v47 = vshrl.u32 %v7053_v38, 16 }
 0x6b8   : > { %7183 = vrot.lane.b32.xlu1 %v7137_v22, %s8666_s28  ;;  %v7146_v43 = vpack.i.b16 %v7145_v24, %v7144_v35  ;;  %v7163_v22 = vshrl.u32 %v7121_v49, 16  ;;  %v7167_v5 = vpack.i.b16 %v7122_v34, %v7054_v8  ;;  %v7602_v16 = vshrl.u32 %v13167_v63, 16 }
 0x6b9   : > { %v13153_v20 = vpop.permute.xlu0 %7275  ;;  %v7601_v58 = vpack.i.b16 %v13164_v45, %v13167_v63  ;;  %v7603_v17 = vshrl.u32 %v13164_v45, 16  ;;  %v7428_v48 = vcombine.high %v13120_v0, %v13098_v1  ;;  %v7376_v37 = vcombine.high %v13123_v10, %v13104_v9  ;;  %v8501_v45 = vld [vmem:[#allocation5 + $0x4c] ss:$12 sps:$4 sm:$0xff]  }
 0x6ba   : > { %v13159_v51 = vpop.permute.xlu1 %7273  ;;  %v7164_v29 = vpack.i.b16 %v7163_v22, %v7162_v47  ;;  %v7471_v57 = vcombine.low %v13090_v42, %v13153_v20  ;;  %v7168_v54 = vshrl.u32 %v7054_v8, 16  ;;  %v7609_v39 = vshrl.u32 %v7460_v60, 16 }
 0x6bb   : > { %7177 = vrot.lane.b32.xlu0 %v7155_v19, %s8665_s7  ;;  %v7392_v19 = vcombine.high %v7367_v18, %v7383_v41  ;;  %v7604_v15 = vpack.i.b16 %v7603_v17, %v7602_v16  ;;  %v7360_v28 = vcombine.high %v13135_v50, %v13115_v53  ;;  %v7458_v18 = vrot.slane %v7444_v12, %v8873_v21 }
 0x6bc   : > { %7187 = vrot.lane.b32.xlu1 %v7140_v7, %s8669_s11  ;;  %v7169_v7 = vshrl.u32 %v7122_v34, 16  ;;  %v7463_v1 = vcombine.low %v13071_v33, %v13128_v55  ;;  %v7478_v49 = vrot.slane %v7471_v57, %v8847_v13  ;;  %v7531_v50 = vcombine.low %v13109_v30, %v13159_v51  ;;  %v14436_v57 = vld [vmem:[#allocation51_spill] sm:$0xff] }
 0x6bd   : > { %v7280_v59 = vpop.permute.xlu0 %7279  ;;  %v7608_v20 = vshrl.u32 %v7392_v19, 16  ;;  %v7607_v34 = vpack.i.b16 %v7460_v60, %v7392_v19 }
 0x6be   : > { %v7278_v40 = vpop.permute.xlu1 %7277  ;;  %v7170_v42 = vpack.i.b16 %v7169_v7, %v7168_v54  ;;  %v7470_v24 = vrot.slane %v7463_v1, %v8847_v13  ;;  %v7538_v22 = vrot.slane %v7531_v50, %v8847_v13  ;;  %v14440_v50 = vld [vmem:[#allocation68_spill] sm:$0xff] }
 0x6bf   : > { %7181 = vrot.lane.b32.xlu0 %v7158_v14, %s8668_s30  ;;  %v7539_v9 = vcombine.low %v13141_v61, %v7278_v40  ;;  %v7390_v14 = vrot.slane %v7376_v37, %v8873_v21  ;;  %v7610_v61 = vpack.i.b16 %v7609_v39, %v7608_v20  ;;  %v7374_v40 = vrot.slane %v7360_v28, %v8873_v21  ;;  %v14435_v37 = vld [vmem:[#allocation85_spill] sm:$0xff] }
 0x6c0   : > { %7191 = vrot.lane.b32.xlu1 %v7143_v6, %s8667_s17  ;;  %v7495_v51 = vcombine.low %v7470_v24, %v7478_v49  ;;  %v14439_v20 = vpack.i.b16 %v14359_v36, %v14367_v11 }
 0x6c1   : > { %v7284_v3 = vpop.permute.xlu0 %7283  ;;  %v7546_v38 = vrot.slane %v7539_v9, %v8847_v13  ;;  %v7393_v30 = vcombine.low %v7374_v40, %v7390_v14 }
 0x6c2   : > { %v13173_v23 = vpop.permute.xlu1 %7281  ;;  %v7503_v12 = vrot.slane %v7495_v51, %v8873_v21 }
 0x6c3   : > { %7185 = vrot.lane.b32.xlu0 %v7161_v32, %s8666_s28  ;;  %v7614_v19 = vshrl.u32 %v7393_v30, 16 }
 0x6c4   : > { %7195 = vrot.lane.b32.xlu1 %v7146_v43, %s8662_s15 }
 0x6c5   : > { %v7288_v2 = vpop.permute.xlu0 %7287 }
 0x6c6   : > { %v7286_v62 = vpop.permute.xlu1 %7285  ;;  %v7479_v52 = vcombine.low %v7280_v59, %v7288_v2  ;;  %v7442_v59 = vrot.slane %v7428_v48, %v8873_v21  ;;  %v7563_v2 = vcombine.low %v7538_v22, %v7546_v38 }
 0x6c7   : > { %7193 = vrot.lane.b32.xlu0 %v7167_v5, %s8667_s17 }
 0x6c8   : > { %7189 = vrot.lane.b32.xlu1 %v7164_v29, %s8669_s11  ;;  %v7486_v33 = vrot.slane %v7479_v52, %v8847_v13  ;;  %v7461_v6 = vcombine.low %v7442_v59, %v7458_v18  ;;  %v14437_v52 = vld [vmem:[#allocation50_spill] sm:$0xff]  ;;  %v7571_v28 = vrot.slane %v7563_v2, %v8873_v21 }
 0x6c9   : > { %v7292_v41 = vpop.permute.xlu0 %7291  ;;  %v14438_v54 = vpack.i.b16 %v14436_v57, %v14437_v52 }
 0x6ca   : > { %v7487_v0 = vcombine.low %v7284_v3, %v7292_v41  ;;  %v7290_v10 = vpop.permute.xlu1 %7289  ;;  %v7613_v46 = vpack.i.b16 %v7461_v6, %v7393_v30  ;;  %v7615_v47 = vshrl.u32 %v7461_v6, 16  ;;  %v7462_v41 = vcombine.high %v7442_v59, %v7458_v18  ;;  %v14441_v6 = vld [vmem:[#allocation88_spill] sm:$0xff] }
 0x6cb   : > { %7647 = vrot.lane.b32.xlu0 %v7604_v15, %s8646_s6  ;;  %v7547_v35 = vcombine.low %v13173_v23, %v7290_v10  ;;  %v7496_v15 = vcombine.high %v7470_v24, %v7478_v49 }
 0x6cc   : > { %v7494_v53 = vrot.slane %v7487_v0, %v8847_v13  ;;  %7197 = vrot.lane.b32.xlu1 %v7170_v42, %s8662_s15  ;;  %v7616_v39 = vpack.i.b16 %v7615_v47, %v7614_v19  ;;  %v7394_v42 = vcombine.high %v7374_v40, %v7390_v14  ;;  %v7621_v11 = vshrl.u32 %v7462_v41, 16 }
 0x6cd   : > { %v5776_v55 = vpop.permute.xlu0 %5775  ;;  %v7554_v5 = vrot.slane %v7547_v35, %v8847_v13  ;;  %v7510_v40 = vrot.slane %v7496_v15, %v8873_v21 }
 0x6ce   : > { %v7511_v3 = vcombine.low %v7486_v33, %v7494_v53  ;;  %v7294_v32 = vpop.permute.xlu1 %7293  ;;  %v7512_v29 = vcombine.high %v7486_v33, %v7494_v53  ;;  %v5805_v53 = vsel %vm528_vm9, %v14439_v20, %v5776_v55  ;;  %v7619_v36 = vpack.i.b16 %v7462_v41, %v7394_v42 }
 0x6cf   : > { %7655 = vrot.lane.b32.xlu0 %v7610_v61, %s8668_s30  ;;  %v7555_v43 = vcombine.low %v7286_v62, %v7294_v32  ;;  %v7564_v62 = vcombine.high %v7538_v22, %v7546_v38  ;;  %v7620_v32 = vshrl.u32 %v7394_v42, 16  ;;  %v14442_v22 = vld [vmem:[#allocation76_spill] sm:$0xff]  ;;  %v14447_v42 = vld [vmem:[#allocation63_spill] sm:$0xff] }
 0x6d0   : > { %7651 = vrot.lane.b32.xlu1 %v7607_v34, %s8665_s7  ;;  %v7519_v23 = vrot.slane %v7511_v3, %v8873_v21  ;;  %v7526_v49 = vrot.slane %v7512_v29, %v8873_v21 }
 0x6d1   : > { %v5784_v8 = vpop.permute.xlu0 %5783  ;;  %v7562_v17 = vrot.slane %v7555_v43, %v8847_v13  ;;  %v3703_v13 = vsel %vm528_vm9, %v14438_v54, %v14435_v37  ;;  %v7578_v59 = vrot.slane %v7564_v62, %v8873_v21  ;;  %v14443_v62 = vld [vmem:[#allocation86_spill] sm:$0xff] }
 0x6d2   : > { %v5780_v60 = vpop.permute.xlu1 %5779  ;;  %v13224_v1 = vcombine.low %v7503_v12, %v7519_v23  ;;  %v3709_v18 = vsel %vm3707_vm15, %v3703_v13, %v14440_v50  ;;  %v7529_v34 = vcombine.low %v7510_v40, %v7526_v49  ;;  %v7528_v2 = vcombine.high %v7503_v12, %v7519_v23 }
 0x6d3   : > { %v7579_v7 = vcombine.low %v7554_v5, %v7562_v17  ;;  %v7580_v16 = vcombine.high %v7554_v5, %v7562_v17  ;;  %v3714_v14 = vsel %vm3712_vm0, %v3709_v18, %v14441_v6  ;;  %v5810_v24 = vsel %vm3707_vm15, %v5805_v53, %v5780_v60  ;;  %v14449_v18 = vld [vmem:[#allocation89_spill] sm:$0xff] }
 0x6d4   : > { %7659 = vrot.lane.b32.xlu1 %v7613_v46, %s8666_s28  ;;  %v7626_v35 = vshrl.u32 %v13224_v1, 16  ;;  %v3719_v46 = vsel %vm3717_vm1, %v3714_v14, %v14442_v22  ;;  %v5814_v47 = vsel %vm3712_vm0, %v5810_v24, %v5784_v8  ;;  %v7622_v60 = vpack.i.b16 %v7621_v11, %v7620_v32  ;;  %v8504_v14 = vld [vmem:[#allocation5 + $0x8] ss:$12 sps:$4 sm:$0xff]   ;;  %v14450_v11 = vld [vmem:[#allocation52_spill] sm:$0xff] }
 0x6d5   : > { %v13216_v48 = vpop.permute.xlu0 %5777  ;;  %v7587_v0 = vrot.slane %v7579_v7, %v8873_v21  ;;  %v7594_v9 = vrot.slane %v7580_v16, %v8873_v21  ;;  %v3724_v29 = vsel %vm3722_vm2, %v3719_v46, %v14443_v62  ;;  %v7530_v7 = vcombine.high %v7510_v40, %v7526_v49  ;;  %8369 = vmatprep.mubr.msk.bf16.mxu0 %vm3707_vm15, %v8504_v14 }
 0x6d6   : > { %v5788_v10 = vpop.permute.xlu1 %5787  ;;  %v7638_v57 = vshrl.u32 %v7529_v34, 16  ;;  %v7632_v41 = vshrl.u32 %v7528_v2, 16 }
 0x6d7   : > { %v13236_v33 = vcombine.low %v7571_v28, %v7587_v0  ;;  %v13242_v55 = vcombine.low %v7578_v59, %v7594_v9  ;;  %v7596_v30 = vcombine.high %v7571_v28, %v7587_v0  ;;  %v7598_v5 = vcombine.high %v7578_v59, %v7594_v9  ;;  %v14444_v28 = vld [vmem:[#allocation73_spill] sm:$0xff]  ;;  %v14445_v9 = vld [vmem:[#allocation15_spill] sm:$0xff] }
 0x6d8   : > { %7663 = vrot.lane.b32.xlu1 %v7616_v39, %s8669_s11  ;;  %v5818_v16 = vsel %vm3717_vm1, %v5814_v47, %v5788_v10  ;;  %v3729_v0 = vsel %vm3727_vm3, %v3724_v29, %v14444_v28  ;;  %v14446_v10 = vld [vmem:[#allocation64_spill] sm:$0xff]  ;;  %v7644_v49 = vshrl.u32 %v7530_v7, 16  ;;  %v7724_v47 = vld [vmem:[%s13544_s4 + $0x8] sm:$0xff] }
 0x6d9   : > { %v5782_v61 = vpop.permute.xlu0 %5781  ;;  %v7627_v3 = vshrl.u32 %v13236_v33, 16  ;;  %v7625_v21 = vpack.i.b16 %v13236_v33, %v13224_v1  ;;  %v7639_v19 = vshrl.u32 %v13242_v55, 16  ;;  %v7631_v37 = vpack.i.b16 %v7596_v30, %v7528_v2  ;;  %v8505_v1 = vld [vmem:[#allocation5 + $0x20] ss:$12 sps:$4 sm:$0xff]   ;;  %v8506_v33 = vld [vmem:[#allocation5 + $0x38] ss:$12 sps:$4 sm:$0xff]  }
 0x6da   : > { %v5792_v38 = vpop.permute.xlu1 %5791  ;;  %v7633_v23 = vshrl.u32 %v7596_v30, 16  ;;  %v7645_v15 = vshrl.u32 %v7598_v5, 16  ;;  %v14448_v20 = vpack.i.b16 %v14446_v10, %v14447_v42  ;;  %v3734_v59 = vsel %vm3732_vm4, %v3729_v0, %v14449_v18  ;;  %v7730_v0 = vld [vmem:[%s13544_s4 + $0x38] sm:$0xff]  ;;  %v14461_v10 = vld [vmem:[#allocation156_spill] sm:$0xff] }
 0x6db   : > { %v7628_v51 = vpack.i.b16 %v7627_v3, %v7626_v35  ;;  %v5822_v12 = vsel %vm3722_vm2, %v5818_v16, %v5792_v38  ;;  %v7640_v13 = vpack.i.b16 %v7639_v19, %v7638_v57  ;;  %v14451_v38 = vpack.i.b16 %v12485_v26, %v12479_v56  ;;  %v14452_v3 = vld [vmem:[#allocation12_spill] sm:$0xff]  ;;  %v7723_v16 = vld [vmem:[%s13544_s4] sm:$0xff] }
 0x6dc   : > { %7667 = vrot.lane.b32.xlu1 %v7619_v36, %s8667_s17  ;;  %v3706_v53 = vsel %vm528_vm9, %v14448_v20, %v14445_v9  ;;  %v7634_v50 = vpack.i.b16 %v7633_v23, %v7632_v41  ;;  %v7646_v36 = vpack.i.b16 %v7645_v15, %v7644_v49  ;;  %v7728_v23 = vld [vmem:[%s13544_s4 + $0x28] sm:$0xff]  ;;  %v14459_v41 = vld [vmem:[#allocation142_spill] sm:$0xff]  ;;  %v14465_v49 = vld [vmem:[#allocation105_spill] sm:$0xff] }
 0x6dd   : > { %v5786_v43 = vpop.permute.xlu0 %5785  ;;  %7649 = vrot.lane.b32.xlu0 %v7628_v51, %s8646_s6  ;;  %v3711_v24 = vsel %vm3707_vm15, %v3706_v53, %v14450_v11  ;;  %v5808_v35 = vsel %vm528_vm9, %v14451_v38, %v13216_v48  ;;  %v7637_v51 = vpack.i.b16 %v13242_v55, %v7529_v34  ;;  %v14453_v48 = vld [vmem:[#allocation14_spill] sm:$0xff]  ;;  %v7643_v55 = vpack.i.b16 %v7598_v5, %v7530_v7  ;;  %v14456_v7 = vld [vmem:[#allocation113_spill] sm:$0xff]  ;;  %v14463_v53 = vld [vmem:[#allocation83_spill] sm:$0xff] }
 0x6de   : > { %v5796_v17 = vpop.permute.xlu1 %5795  ;;  %v3716_v32 = vsel %vm3712_vm0, %v3711_v24, %v14452_v3  ;;  %v5812_v30 = vsel %vm3707_vm15, %v5808_v35, %v5782_v61  ;;  %v14454_v61 = vld [vmem:[#allocation44_spill] sm:$0xff]  ;;  %v14462_v20 = vld [vmem:[#allocation78_spill] sm:$0xff]  ;;  %v14467_v3 = vld [vmem:[#allocation35_spill] sm:$0xff] }
 0x6df   : > { %v5826_v52 = vsel %vm3727_vm3, %v5822_v12, %v5796_v17  ;;  %v5816_v46 = vsel %vm3712_vm0, %v5812_v30, %v5786_v43  ;;  %v3721_v2 = vsel %vm3717_vm1, %v3716_v32, %v14453_v48  ;;  %v14466_v38 = vld [vmem:[#allocation158_spill] sm:$0xff] }
 0x6e0   : > { %7671 = vrot.lane.b32.xlu1 %v7622_v60, %s8662_s15  ;;  %v3726_v17 = vsel %vm3722_vm2, %v3721_v2, %v14454_v61  ;;  %v7726_v60 = vld [vmem:[%s13544_s4 + $0x18] sm:$0xff]  ;;  %v14469_v2 = vld [vmem:[#allocation28_spill] sm:$0xff] }
 0x6e1   : > { %v5790_v8 = vpop.permute.xlu0 %5789  ;;  %7653 = vrot.lane.b32.xlu0 %v7631_v37, %s8665_s7  ;;  %v14455_v37 = vld [vmem:[#allocation74_spill] sm:$0xff]  ;;  %v14470_v61 = vld [vmem:[#allocation41_spill] sm:$0xff] }
 0x6e2   : > { %v5800_v54 = vpop.permute.xlu1 %5799  ;;  %v5820_v56 = vsel %vm3717_vm1, %v5816_v46, %v5790_v8  ;;  %v3731_v5 = vsel %vm3727_vm3, %v3726_v17, %v14455_v37  ;;  %v14471_v17 = vld [vmem:[#allocation39_spill] sm:$0xff] }
 0x6e3   : > { %v5830_v39 = vsel %vm3732_vm4, %v5826_v52, %v5800_v54  ;;  %v3737_v57 = vsel %vm3732_vm4, %v3731_v5, %v14456_v7  ;;  %v7725_v52 = vld [vmem:[%s13544_s4 + $0x10] sm:$0xff]  ;;  %v14475_v37 = vld [vmem:[#allocation155_spill] sm:$0xff]  ;;  %v14476_v5 = vld [vmem:[#allocation157_spill] sm:$0xff] }
 0x6e4   : > { %7665 = vrot.lane.b32.xlu1 %v7640_v13, %s8669_s11  ;;  %8319 = vmatprep.subr.bf16.mxu1 %v5830_v39  ;;  %v14457_v54 = vld [vmem:[#allocation104_spill] sm:$0xff]  ;;  %v14458_v13 = vld [vmem:[#allocation137_spill] sm:$0xff]  ;;  %v14477_v7 = vpack.i.b16 %v14475_v37, %v14476_v5 }
 0x6e5   : > { %v6252_v6 = vpop.permute.xlu0 %6251  ;;  %8320 = vmatpush3.bf16.msra.mxu1 %v3734_v59  ;;  %7657 = vrot.lane.b32.xlu0 %v7634_v50, %s8668_s30  ;;  %v14460_v15 = vpack.i.b16 %v14458_v13, %v14459_v41  ;;  %v14464_v50 = vpack.i.b16 %v14462_v20, %v14463_v53  ;;  %v7727_v59 = vld [vmem:[%s13544_s4 + $0x20] sm:$0xff]  ;;  %s8154_s30 = sshll.u32 %s14548_s21, 4 }
 0x6e6   : > { %v5794_v40 = vpop.permute.xlu1 %5793 }
 0x6e7   : > { %v5824_v43 = vsel %vm3722_vm2, %v5820_v56, %v5794_v40  ;;  %v4217_v39 = vsel %vm528_vm9, %v14460_v15, %v14457_v54  ;;  %v6281_v18 = vsel %vm528_vm9, %v14464_v50, %v6252_v6  ;;  %v7729_v6 = vld [vmem:[%s13544_s4 + $0x30] sm:$0xff]  ;;  %v14481_v50 = vld [vmem:[#allocation102_spill] sm:$0xff] }
 0x6e8   : > { %7673 = vrot.lane.b32.xlu1 %v7646_v36, %s8662_s15  ;;  %v4222_v42 = vsel %vm3707_vm15, %v4217_v39, %v14461_v10  ;;  %v14479_v39 = vld [vmem:[#allocation101_spill] sm:$0xff] }
 0x6e9   : > { %v6256_v22 = vpop.permute.xlu0 %6255  ;;  %7661 = vrot.lane.b32.xlu0 %v7637_v51, %s8666_s28  ;;  %v4226_v14 = vsel %vm3712_vm0, %v4222_v42, %v14465_v49 }
 0x6ea   : > { %v5798_v26 = vpop.permute.xlu1 %5797  ;;  %v6286_v40 = vsel %vm3707_vm15, %v6281_v18, %v6256_v22  ;;  %v4230_v35 = vsel %vm3717_vm1, %v4226_v14, %v14466_v38 }
 0x6eb   : > { %v5828_v19 = vsel %vm3727_vm3, %v5824_v43, %v5798_v26  ;;  %v4234_v32 = vsel %vm3722_vm2, %v4230_v35, %v14467_v3  ;;  %v14468_v26 = vld [vmem:[#allocation24_spill] sm:$0xff]  ;;  %v14473_v43 = vld [vmem:[#allocation18_spill] sm:$0xff] }
 0x6ec   : > { %7738 = vperm.xlu1 %8486, %v7724_v47   ;;  %v4238_v48 = vsel %vm3727_vm3, %v4234_v32, %v14468_v26  ;;  %v14487_v32 = vld [vmem:[#allocation159_spill] sm:$0xff] }
 0x6ed   : > { %v6260_v34 = vpop.permute.xlu0 %6259  ;;  %7669 = vrot.lane.b32.xlu0 %v7643_v55, %s8667_s17  ;;  %v14472_v55 = vpack.i.b16 %v14470_v61, %v14471_v17  ;;  %s8153_s17 = sshll.u32 %s14546_s20, 3 }
 0x6ee   : > { %v5802_v62 = vpop.permute.xlu1 %5801  ;;  %v6290_v11 = vsel %vm3712_vm0, %v6286_v40, %v6260_v34  ;;  %s348_s11 = sadd.s32 %s8154_s30, %s8153_s17 }
 0x6ef   : > { %v5833_v29 = vsel %vm3732_vm4, %v5828_v19, %v5802_v62  ;;  %v4220_v34 = vsel %vm528_vm9, %v14472_v55, %v14469_v2  ;;  %v14492_v55 = vld [vmem:[#allocation112_spill] sm:$0xff]  ;;  %s8155_s18 = sshll.u32 %s348_s11, 2 }
 0x6f0   : > { %7748 = vperm.xlu1 %8486, %v7726_v60   ;;  %8321 = vmatprep.subr.bf16.mxu1 %v5833_v29  ;;  %v4242_v60 = vsel %vm3732_vm4, %v4238_v48, %v14473_v43  ;;  %v14474_v29 = vld [vmem:[#allocation111_spill] sm:$0xff]  ;;  %v14493_v43 = vld [vmem:[#allocation46_spill] sm:$0xff]  ;;  %s350_s6 = scalar_lea.vmem %s13545_s5, %s8155_s18 }
 0x6f1   : > { %v6254_v8 = vpop.permute.xlu0 %6253  ;;  %8322 = vmatpush3.bf16.msra.mxu1 %v3737_v57  ;;  %7733 = vperm.xlu0 %8487, %v7723_v16   ;;  %v4224_v16 = vsel %vm3707_vm15, %v4220_v34, %v14474_v29 }
 0x6f2   : > { %v6264_v12 = vpop.permute.xlu1 %6263  ;;  %v6284_v57 = vsel %vm528_vm9, %v14477_v7, %v6254_v8  ;;  %v14494_v7 = vld [vmem:[#allocation103_spill] sm:$0xff] }
 0x6f3   : > { %v6294_v30 = vsel %vm3717_vm1, %v6290_v11, %v6264_v12  ;;  %v14484_v11 = vld [vmem:[#allocation160_spill] sm:$0xff] }
 0x6f4   : > { %7758 = vperm.xlu1 %8486, %v7728_v23   ;;  %v14478_v23 = vld [vmem:[#allocation36_spill] sm:$0xff] }
 0x6f5   : > { %v6258_v28 = vpop.permute.xlu0 %6257  ;;  %7743 = vperm.xlu0 %8487, %v7725_v52   ;;  %v4228_v12 = vsel %vm3712_vm0, %v4224_v16, %v14478_v23  ;;  %v14495_v23 = vld [vmem:[#allocation43_spill] sm:$0xff] }
 0x6f6   : > { %v6268_v9 = vpop.permute.xlu1 %6267  ;;  %v6288_v52 = vsel %vm3707_vm15, %v6284_v57, %v6258_v28 }
 0x6f7   : > { %v6298_v22 = vsel %vm3722_vm2, %v6294_v30, %v6268_v9  ;;  %v14480_v9 = vld [vmem:[#allocation25_spill] sm:$0xff] }
 0x6f8   : > { %7768 = vperm.xlu1 %8486, %v7730_v0   ;;  %v4232_v0 = vsel %vm3717_vm1, %v4228_v12, %v14479_v39  ;;  %v14496_v12 = vld [vmem:[#allocation84_spill] sm:$0xff] }
 0x6f9   : > { %v6262_v36 = vpop.permute.xlu0 %6261  ;;  %7753 = vperm.xlu0 %8487, %v7727_v59   ;;  %v4236_v10 = vsel %vm3722_vm2, %v4232_v0, %v14480_v9  ;;  %v14482_v59 = vld [vmem:[#allocation27_spill] sm:$0xff]  ;;  %v14500_v9 = vld [vmem:[#allocation106_spill] sm:$0xff] }
 0x6fa   : > { %v6272_v24 = vpop.permute.xlu1 %6271  ;;  %v6292_v13 = vsel %vm3712_vm0, %v6288_v52, %v6262_v36  ;;  %v4240_v18 = vsel %vm3727_vm3, %v4236_v10, %v14481_v50  ;;  %v14483_v36 = vld [vmem:[#allocation16_spill] sm:$0xff]  ;;  %v14497_v52 = vld [vmem:[#allocation90_spill] sm:$0xff] }
 0x6fb   : > { %v6302_v46 = vsel %vm3727_vm3, %v6298_v22, %v6272_v24  ;;  %v4245_v49 = vsel %vm3732_vm4, %v4240_v18, %v14482_v59  ;;  %v14485_v24 = vld [vmem:[#allocation20_spill] sm:$0xff] }
 0x6fc   : > { %v14486_v38 = vpack.i.b16 %v14484_v11, %v14485_v24  ;;  %v14489_v22 = vld [vmem:[#allocation148_spill] sm:$0xff] }
 0x6fd   : > { %v6266_v51 = vpop.permute.xlu0 %6265  ;;  %7763 = vperm.xlu0 %8487, %v7729_v6   ;;  %v14505_v11 = vld [vmem:[#allocation48_spill] sm:$0xff] }
 0x6fe   : > { %v6276_v47 = vpop.permute.xlu1 %6275  ;;  %v6296_v41 = vsel %vm3717_vm1, %v6292_v13, %v6266_v51  ;;  %v4693_v35 = vsel %vm528_vm9, %v14486_v38, %v14483_v36  ;;  %v14488_v51 = vld [vmem:[#allocation149_spill] sm:$0xff] }
 0x6ff   : > { %v6306_v56 = vsel %vm3732_vm4, %v6302_v46, %v6276_v47  ;;  %v4698_v30 = vsel %vm3707_vm15, %v4693_v35, %v14487_v32  ;;  %v14490_v46 = vpack.i.b16 %v14488_v51, %v14489_v22  ;;  %v14506_v38 = vld [vmem:[#allocation17_spill] sm:$0xff]  ;;  %v14507_v51 = vld [vmem:[#allocation107_spill] sm:$0xff] }
 0x700   : > { %8323 = vmatprep.subr.bf16.mxu1 %v6306_v56  ;;  %v14491_v56 = vld [vmem:[#allocation26_spill] sm:$0xff] }
 0x701   : > { %v6696_v19 = vpop.permute.xlu0 %6695  ;;  %8324 = vmatpush3.bf16.msra.mxu1 %v4242_v60  ;;  %v4702_v26 = vsel %vm3712_vm0, %v4698_v30, %v14491_v56 }
 0x702   : > { %v6270_v62 = vpop.permute.xlu1 %6269  ;;  %v6725_v47 = vsel %vm528_vm9, %v14490_v46, %v6696_v19  ;;  %v4706_v34 = vsel %vm3717_vm1, %v4702_v26, %v14492_v55  ;;  %v14508_v46 = vld [vmem:[#allocation45_spill] sm:$0xff] }
 0x703   : > { %v6300_v8 = vsel %vm3722_vm2, %v6296_v41, %v6270_v62  ;;  %v4710_v60 = vsel %vm3722_vm2, %v4706_v34, %v14493_v43  ;;  %v14499_v41 = vld [vmem:[#allocation23_spill] sm:$0xff] }
 0x704   : > { %v4714_v57 = vsel %vm3727_vm3, %v4710_v60, %v14494_v7  ;;  %v14513_v60 = vld [vmem:[#allocation42_spill] sm:$0xff] }
 0x705   : > { %v6700_v54 = vpop.permute.xlu0 %6699 }
 0x706   : > { %v6274_v15 = vpop.permute.xlu1 %6273  ;;  %v6730_v48 = vsel %vm3707_vm15, %v6725_v47, %v6700_v54  ;;  %v14498_v54 = vpack.i.b16 %v14496_v12, %v14497_v52  ;;  %v14516_v12 = vld [vmem:[#allocation116_spill] sm:$0xff] }
 0x707   : > { %v6304_v20 = vsel %vm3727_vm3, %v6300_v8, %v6274_v15  ;;  %v4718_v15 = vsel %vm3732_vm4, %v4714_v57, %v14499_v41  ;;  %v14502_v8 = vld [vmem:[#allocation152_spill] sm:$0xff] }
 0x708   : > { %v4696_v13 = vsel %vm528_vm9, %v14498_v54, %v14495_v23  ;;  %v14517_v54 = vld [vmem:[#allocation47_spill] sm:$0xff]  ;;  %v14518_v41 = vld [vmem:[#allocation136_spill] sm:$0xff] }
 0x709   : > { %v6704_v42 = vpop.permute.xlu0 %6703  ;;  %v4700_v10 = vsel %vm3707_vm15, %v4696_v13, %v14500_v9 }
 0x70a   : > { %v6278_v53 = vpop.permute.xlu1 %6277  ;;  %v6734_v61 = vsel %vm3712_vm0, %v6730_v48, %v6704_v42  ;;  %v14501_v42 = vld [vmem:[#allocation153_spill] sm:$0xff] }
 0x70b   : > { %v6309_v28 = vsel %vm3732_vm4, %v6304_v20, %v6278_v53  ;;  %v14503_v20 = vpack.i.b16 %v14501_v42, %v14502_v8  ;;  %v14509_v48 = vld [vmem:[#allocation37_spill] sm:$0xff] }
 0x70c   : > { %8325 = vmatprep.subr.bf16.mxu1 %v6309_v28  ;;  %v14504_v28 = vld [vmem:[#allocation87_spill] sm:$0xff] }
 0x70d   : > { %v6698_v14 = vpop.permute.xlu0 %6697  ;;  %8326 = vmatpush3.bf16.msra.mxu1 %v4245_v49  ;;  %v4704_v50 = vsel %vm3712_vm0, %v4700_v10, %v14504_v28  ;;  %v14522_v28 = vld [vmem:[#allocation117_spill] sm:$0xff] }
 0x70e   : > { %v6708_v40 = vpop.permute.xlu1 %6707  ;;  %v6728_v53 = vsel %vm528_vm9, %v14503_v20, %v6698_v14  ;;  %v4708_v24 = vsel %vm3717_vm1, %v4704_v50, %v14505_v11 }
 0x70f   : > { %v6738_v62 = vsel %vm3717_vm1, %v6734_v61, %v6708_v40  ;;  %v4712_v35 = vsel %vm3722_vm2, %v4708_v24, %v14506_v38  ;;  %v14511_v61 = vld [vmem:[#allocation81_spill] sm:$0xff] }
 0x710   : > { %v4716_v22 = vsel %vm3727_vm3, %v4712_v35, %v14507_v51  ;;  %v14526_v35 = vld [vmem:[#allocation21_spill] sm:$0xff] }
 0x711   : > { %v6702_v6 = vpop.permute.xlu0 %6701  ;;  %v4721_v47 = vsel %vm3732_vm4, %v4716_v22, %v14508_v46  ;;  %v14528_v46 = vld [vmem:[#allocation133_spill] sm:$0xff] }
 0x712   : > { %v6712_v3 = vpop.permute.xlu1 %6711  ;;  %v6732_v18 = vsel %vm3707_vm15, %v6728_v53, %v6702_v6 }
 0x713   : > { %v6742_v19 = vsel %vm3722_vm2, %v6738_v62, %v6712_v3 }
 0x715   : > { %v6706_v2 = vpop.permute.xlu0 %6705 }
 0x716   : > { %v6716_v17 = vpop.permute.xlu1 %6715  ;;  %v6736_v49 = vsel %vm3712_vm0, %v6732_v18, %v6706_v2  ;;  %v14510_v2 = vld [vmem:[#allocation82_spill] sm:$0xff] }
 0x717   : > { %v6746_v16 = vsel %vm3727_vm3, %v6742_v19, %v6716_v17  ;;  %v14512_v17 = vpack.i.b16 %v14510_v2, %v14511_v61  ;;  %v8495_v2 = vld [vmem:[#allocation5 + $0x1c] ss:$12 sps:$4 sm:$0xff]  }
 0x719   : > { %v6710_v29 = vpop.permute.xlu0 %6709  ;;  %v5329_v55 = vsel %vm528_vm9, %v14512_v17, %v14509_v48  ;;  %v8492_v48 = vld [vmem:[#allocation5] ss:$12 sps:$4 sm:$0xff]  }
 0x71a   : > { %v6720_v37 = vpop.permute.xlu1 %6719  ;;  %v6740_v40 = vsel %vm3717_vm1, %v6736_v49, %v6710_v29  ;;  %v5334_v62 = vsel %vm3707_vm15, %v5329_v55, %v14513_v60  ;;  %v14514_v29 = vpack.i.b16 %v12794_v31, %v12807_v25  ;;  %v14520_v31 = vld [vmem:[#allocation92_spill] sm:$0xff] }
 0x71b   : > { %v6750_v5 = vsel %vm3732_vm4, %v6746_v16, %v6720_v37  ;;  %v14515_v16 = vld [vmem:[#allocation120_spill] sm:$0xff] }
 0x71c   : > { %8327 = vmatprep.subr.bf16.mxu1 %v6750_v5  ;;  %v5338_v37 = vsel %vm3712_vm0, %v5334_v62, %v14515_v16  ;;  %v14523_v49 = vld [vmem:[#allocation96_spill] sm:$0xff] }
 0x71d   : > { %v7172_v39 = vpop.permute.xlu0 %7171  ;;  %8328 = vmatpush3.bf16.msra.mxu1 %v4718_v15  ;;  %v5342_v52 = vsel %vm3717_vm1, %v5338_v37, %v14516_v12  ;;  %v14519_v15 = vld [vmem:[#allocation93_spill] sm:$0xff]  ;;  %v8498_v60 = vld [vmem:[#allocation5 + $0x34] ss:$12 sps:$4 sm:$0xff]  }
 0x71e   : > { %v6714_v0 = vpop.permute.xlu1 %6713  ;;  %v7201_v19 = vsel %vm528_vm9, %v14514_v29, %v7172_v39  ;;  %v5346_v13 = vsel %vm3722_vm2, %v5342_v52, %v14517_v54  ;;  %v14521_v25 = vpack.i.b16 %v14519_v15, %v14520_v31 }
 0x71f   : > { %v6744_v14 = vsel %vm3722_vm2, %v6740_v40, %v6714_v0  ;;  %v5350_v40 = vsel %vm3727_vm3, %v5346_v13, %v14523_v49  ;;  %v8503_v13 = vld [vmem:[#allocation5 + $0x48] ss:$12 sps:$4 sm:$0xff]  }
 0x720   : > { %v5332_v39 = vsel %vm528_vm9, %v14521_v25, %v14518_v41 }
 0x721   : > { %v7176_v59 = vpop.permute.xlu0 %7175  ;;  %v5336_v50 = vsel %vm3707_vm15, %v5332_v39, %v14522_v28 }
 0x722   : > { %v6718_v36 = vpop.permute.xlu1 %6717  ;;  %v7206_v5 = vsel %vm3707_vm15, %v7201_v19, %v7176_v59  ;;  %v5340_v44 = vsel %vm3712_vm0, %v5336_v50, %v14524_v27 }
 0x723   : > { %v6748_v32 = vsel %vm3727_vm3, %v6744_v14, %v6718_v36  ;;  %v14525_v36 = vld [vmem:[#allocation135_spill] sm:$0xff] }
 0x724   : > { %v5354_v11 = vsel %vm3732_vm4, %v5350_v40, %v14525_v36 }
 0x725   : > { %v7180_v3 = vpop.permute.xlu0 %7179 }
 0x726   : > { %v6722_v30 = vpop.permute.xlu1 %6721  ;;  %v7210_v57 = vsel %vm3712_vm0, %v7206_v5, %v7180_v3  ;;  %v5344_v3 = vsel %vm3717_vm1, %v5340_v44, %v14526_v35 }
 0x727   : > { %v6753_v6 = vsel %vm3732_vm4, %v6748_v32, %v6722_v30  ;;  %v14527_v32 = vld [vmem:[#allocation97_spill] sm:$0xff] }
 0x728   : > { %8329 = vmatprep.subr.bf16.mxu1 %v6753_v6  ;;  %v5348_v30 = vsel %vm3722_vm2, %v5344_v3, %v14527_v32 }
 0x729   : > { %v7174_v56 = vpop.permute.xlu0 %7173  ;;  %8330 = vmatpush3.bf16.msra.mxu1 %v4721_v47  ;;  %v5352_v47 = vsel %vm3727_vm3, %v5348_v30, %v14528_v46 }
 0x72a   : > { %v7184_v26 = vpop.permute.xlu1 %7183  ;;  %v7204_v10 = vsel %vm528_vm9, %v7149_v4, %v7174_v56  ;;  %v14529_v56 = vld [vmem:[#allocation150_spill] sm:$0xff] }
 0x72b   : > { %v7214_v0 = vsel %vm3717_vm1, %v7210_v57, %v7184_v26  ;;  %v5357_v26 = vsel %vm3732_vm4, %v5352_v47, %v14529_v56  ;;  %v8500_v57 = vld [vmem:[#allocation5 + $0x30] ss:$12 sps:$4 sm:$0xff]  }
 0x72d   : > { %v7178_v34 = vpop.permute.xlu0 %7177 }
 0x72e   : > { %v7188_v43 = vpop.permute.xlu1 %7187  ;;  %v7208_v8 = vsel %vm3707_vm15, %v7204_v10, %v7178_v34 }
 0x72f   : > { %v7218_v42 = vsel %vm3722_vm2, %v7214_v0, %v7188_v43  ;;  %v8497_v43 = vld [vmem:[#allocation5 + $0x18] ss:$12 sps:$4 sm:$0xff]  }
 0x731   : > { %v7182_v7 = vpop.permute.xlu0 %7181 }
 0x732   : > { %v7192_v23 = vpop.permute.xlu1 %7191  ;;  %v7212_v18 = vsel %vm3712_vm0, %v7208_v8, %v7182_v7 }
 0x733   : > { %v7222_v20 = vsel %vm3727_vm3, %v7218_v42, %v7192_v23 }
 0x735   : > { %v7186_v9 = vpop.permute.xlu0 %7185 }
 0x736   : > { %v7196_v53 = vpop.permute.xlu1 %7195  ;;  %v7216_v4 = vsel %vm3717_vm1, %v7212_v18, %v7186_v9 }
 0x737   : > { %v7226_v59 = vsel %vm3732_vm4, %v7222_v20, %v7196_v53 }
 0x738   : > { %8331 = vmatprep.subr.bf16.mxu1 %v7226_v59 }
 0x739   : > { %8332 = vmatpush3.bf16.msra.mxu1 %v5354_v11  ;;  %v7194_v24 = vpop.permute.xlu0 %7193 }
 0x73a   : > { %v7190_v38 = vpop.permute.xlu1 %7189 }
 0x73b   : > { %v7220_v14 = vsel %vm3722_vm2, %v7216_v4, %v7190_v38 }
 0x73c   : > { %v7224_v6 = vsel %vm3727_vm3, %v7220_v14, %v7194_v24 }
 0x73d   : > { %v7648_v17 = vpop.permute.xlu0 %7647 }
 0x73e   : > { %v7198_v51 = vpop.permute.xlu1 %7197  ;;  %v7677_v34 = vsel %vm528_vm9, %v7601_v58, %v7648_v17 }
 0x73f   : > { %v7229_v22 = vsel %vm3732_vm4, %v7224_v6, %v7198_v51 }
 0x740   : > { %8333 = vmatprep.subr.bf16.mxu1 %v7229_v22 }
 0x741   : > { %8334 = vmatpush3.bf16.msra.mxu1 %v5357_v26  ;;  %v7656_v29 = vpop.permute.xlu0 %7655 }
 0x742   : > { %v7652_v61 = vpop.permute.xlu1 %7651 }
 0x743   : > { %v7682_v62 = vsel %vm3707_vm15, %v7677_v34, %v7652_v61 }
 0x744   : > { %7876 = vmatmul.mubr.bf16.vlgmr.msra.gmra.mrb[0].mxu1 %v8492_v48  ;;  %v7686_v16 = vsel %vm3712_vm0, %v7682_v62, %v7656_v29 }
 0x745   : > { %7883 = vmatprep.mubr.bf16.mxu1 %v8495_v2 }
 0x746   : > { %v7660_v55 = vpop.permute.xlu1 %7659 }
 0x747   : > { %v7690_v5 = vsel %vm3717_vm1, %v7686_v16, %v7660_v55 }
 0x74a   : > { %v7664_v19 = vpop.permute.xlu1 %7663 }
 0x74b   : > { %v7694_v23 = vsel %vm3722_vm2, %v7690_v5, %v7664_v19 }
 0x74c   : > { %7884 = vmatmul.mubr.bf16.gmra.mrb[4].mxu1 %v8497_v43 }
 0x74d   : > { %7891 = vmatprep.mubr.bf16.mxu1 %v8498_v60 }
 0x74e   : > { %v7668_v37 = vpop.permute.xlu1 %7667 }
 0x74f   : > { %v7650_v7 = vpop.permute.xlu0 %7649  ;;  %v7698_v63 = vsel %vm3727_vm3, %v7694_v23, %v7668_v37 }
 0x750   : > { %v7680_v41 = vsel %vm528_vm9, %v7625_v21, %v7650_v7  ;;  %v8507_v21 = vld [vmem:[#allocation5 + $0x50] ss:$12 sps:$4 sm:$0xff]  }
 0x752   : > { %v7672_v58 = vpop.permute.xlu1 %7671 }
 0x753   : > { %v7702_v12 = vsel %vm3732_vm4, %v7698_v63, %v7672_v58  ;;  %v7654_v52 = vpop.permute.xlu0 %7653 }
 0x754   : > { %7892 = vmatmul.mubr.bf16.gmra.mrb[8].mxu1 %v8500_v57  ;;  %8365 = vmatprep.subr.bf16.mxu0 %v7702_v12  ;;  %v7684_v15 = vsel %vm3707_vm15, %v7680_v41, %v7654_v52 }
 0x755   : > { %8366 = vmatpush3.bf16.msra.mxu0 %v7702_v12  ;;  %7899 = vmatprep.mubr.bf16.mxu1 %v8501_v45 }
 0x756   : > { %v7666_v31 = vpop.permute.xlu1 %7665 }
 0x757   : > { %v7658_v54 = vpop.permute.xlu0 %7657 }
 0x758   : > { %v7688_v25 = vsel %vm3712_vm0, %v7684_v15, %v7658_v54 }
 0x75a   : > { %v7674_v42 = vpop.permute.xlu1 %7673 }
 0x75b   : > { %v7662_v39 = vpop.permute.xlu0 %7661 }
 0x75c   : > { %7900 = vmatmul.mubr.bf16.gmra.mrb[12].mxu1 %v8503_v13  ;;  %v7692_v0 = vsel %vm3717_vm1, %v7688_v25, %v7662_v39 }
 0x75d   : > { %v7696_v9 = vsel %vm3722_vm2, %v7692_v0, %v7666_v31 }
 0x75f   : > { %v7670_v10 = vpop.permute.xlu0 %7669 }
 0x760   : > { %v7700_v8 = vsel %vm3727_vm3, %v7696_v9, %v7670_v10 }
 0x761   : > { %v7705_v20 = vsel %vm3732_vm4, %v7700_v8, %v7674_v42 }
 0x762   : > { %8367 = vmatprep.subr.bf16.mxu0 %v7705_v20 }
 0x763   : > { %8368 = vmatpush3.bf16.msra.mxu0 %v7705_v20 }
 0x766   : > { %8370 = vmatmul.mubr.msk.bf16.vlgmr.msra.gmra.mrb[8].mxu0 %vm3707_vm15, %v8505_v1 }
 0x767   : > { %8373 = vmatprep.mubr.msk.bf16.mxu0 %vm3707_vm15, %v8506_v33 }
 0x76b   : > { %v7739_v51 = vpop.permute.xlu1 %7738 }
 0x76e   : > { %8374 = vmatmul.mubr.msk.bf16.gmra.mrb[12].mxu0 %vm3707_vm15, %v8507_v21 }
 0x76f   : > { %v7749_v2 = vpop.permute.xlu1 %7748 }
 0x770   : > { %v7734_v30 = vpop.permute.xlu0 %7733 }
 0x773   : > { %v7759_v29 = vpop.permute.xlu1 %7758 }
 0x774   : > { %v7744_v48 = vpop.permute.xlu0 %7743 }
 0x777   : > { %v7769_v13 = vpop.permute.xlu1 %7768 }
 0x778   : > { %v7754_v17 = vpop.permute.xlu0 %7753 }
 0x77c   : > { %v7764_v63 = vpop.permute.xlu0 %7763 }
 0x817   : > { %v8335_v53 = vpop.f32.mrb[0].mxu1 }
 0x818   : > { %v8336_v28 = vpop.f32.mrb[1].mxu1 }
 0x819   : > { %v8337_v50 = vadd.f32 %v8336_v28, %v8335_v53  ;;  %v8338_v18 = vpop.f32.mrb[2].mxu1 }
 0x81a   : > { %v8339_v59 = vpop.f32.mrb[3].mxu1 }
 0x81b   : > { %v8340_v49 = vadd.f32 %v8339_v59, %v8338_v18  ;;  %v7878_v34 = vadd.f32 %v8337_v50, %v7734_v30 }
 0x81d   : > { %v7881_v37 = vadd.f32 %v8340_v49, %v7739_v51 }
 0x81f   : > { %v8341_v40 = vpop.f32.mrb[4].mxu1 }
 0x820   : > { %v8342_v27 = vpop.f32.mrb[5].mxu1 }
 0x821   : > { %v8343_v44 = vadd.f32 %v8342_v27, %v8341_v40  ;;  %v8344_v4 = vpop.f32.mrb[6].mxu1 }
 0x822   : > { %v8345_v36 = vpop.f32.mrb[7].mxu1 }
 0x823   : > { %v8346_v11 = vadd.f32 %v8345_v36, %v8344_v4  ;;  %v7886_v61 = vadd.f32 %v8343_v44, %v7744_v48 }
 0x825   : > { %v7889_v62 = vadd.f32 %v8346_v11, %v7749_v2 }
 0x827   : > { %v8347_v24 = vpop.f32.mrb[8].mxu1 }
 0x828   : > { %v8348_v38 = vpop.f32.mrb[9].mxu1 }
 0x829   : > { %v8349_v35 = vadd.f32 %v8348_v38, %v8347_v24  ;;  %v8350_v3 = vpop.f32.mrb[10].mxu1 }
 0x82a   : > { %v8351_v14 = vpop.f32.mrb[11].mxu1 }
 0x82b   : > { %v8352_v32 = vadd.f32 %v8351_v14, %v8350_v3  ;;  %v7894_v31 = vadd.f32 %v8349_v35, %v7754_v17 }
 0x82d   : > { %v7897_v42 = vadd.f32 %v8352_v32, %v7759_v29 }
 0x82f   : > { %v8353_v6 = vpop.f32.mrb[12].mxu1 }
 0x830   : > { %v8354_v22 = vpop.f32.mrb[13].mxu1 }
 0x831   : > { %v8355_v46 = vadd.f32 %v8354_v22, %v8353_v6  ;;  %v8356_v47 = vpop.f32.mrb[14].mxu1 }
 0x832   : > { %v8357_v56 = vpop.f32.mrb[15].mxu1 }
 0x833   : > { %v8358_v26 = vadd.f32 %v8357_v56, %v8356_v47  ;;  %v7902_v54 = vadd.f32 %v8355_v46, %v7764_v63 }
 0x835   : > { %v7905_v0 = vadd.f32 %v8358_v26, %v7769_v13 }
 0x839   : > { %v8371_v55 = vpop.f32.mrb[8].mxu0 }
 0x83a   : > { %v7951_v43 = vadd.f32 %v8371_v55, %v7886_v61  ;;  %v7942_v60 = vpop.f32.mrb[9].mxu0 }
 0x83b   : > { %v7943_v19 = vadd.f32 %v7942_v60, %v7878_v34  ;;  %v8372_v16 = vpop.f32.mrb[10].mxu0 }
 0x83c   : > { %v7954_v5 = vadd.f32 %v8372_v16, %v7889_v62  ;;  %v7945_v7 = vpop.f32.mrb[11].mxu0  ;;  %v7975_v23 = vmax.f32 %v7951_v43, 0.0 }
 0x83d   : > { %v7946_v57 = vadd.f32 %v7945_v7, %v7881_v37  ;;  %v7973_v58 = vmax.f32 %v7943_v19, 0.0 }
 0x83e   : > { %v7976_v45 = vmax.f32 %v7954_v5, 0.0 }
 0x83f   : > { %v7974_v12 = vmax.f32 %v7946_v57, 0.0 }
 0x840   : > { %v8304_v52 = vpack.c.bf16 %v7976_v45, %v7975_v23 }
 0x841   : > { %v8299_v41 = vpack.c.bf16 %v7974_v12, %v7973_v58  ;;  %v8375_v15 = vpop.f32.mrb[12].mxu0 }
 0x842   : > { %8316 = vst [vmem:[%s350_s6 + $0x8] sm:$0xff] %v8304_v52   ;;  %v7967_v25 = vadd.f32 %v8375_v15, %v7902_v54  ;;  %v7958_v39 = vpop.f32.mrb[13].mxu0 }
 0x843   : > { %8300 = vst [vmem:[%s350_s6] sm:$0xff] %v8299_v41   ;;  %v7959_v9 = vadd.f32 %v7958_v39, %v7894_v31  ;;  %v8376_v10 = vpop.f32.mrb[14].mxu0 }
 0x844   : > { %v7970_v8 = vadd.f32 %v8376_v10, %v7905_v0  ;;  %v7961_v20 = vpop.f32.mrb[15].mxu0  ;;  %v7979_v33 = vmax.f32 %v7967_v25, 0.0 }
 0x845   : > { %v7962_v1 = vadd.f32 %v7961_v20, %v7897_v42  ;;  %v7977_v53 = vmax.f32 %v7959_v9, 0.0 }
 0x846   : > { %v7980_v21 = vmax.f32 %v7970_v8, 0.0 }
 0x847   : > { %v7978_v28 = vmax.f32 %v7962_v1, 0.0 }
 0x848   : > { %v8314_v50 = vpack.c.bf16 %v7980_v21, %v7979_v33 }
 0x849   : > { %v8309_v18 = vpack.c.bf16 %v7978_v28, %v7977_v53 }
 0x84a   : > { %8318 = vst [vmem:[%s350_s6 + $0x18] sm:$0xff] %v8314_v50  }
 0x84b   : > { %8317 = vst [vmem:[%s350_s6 + $0x10] sm:$0xff] %v8309_v18  }
 0x84c PF: > { %s17_s24 = sadd.s32 1, %s8634_s24   ;;  %s14530_s16 = sld [smem:[#allocation11_spill]] }
 0x84d   : > { %p14_p1 = scmp.ge.s32.totalorder %s17_s24, 6   ;;  %s14531_s27 = sld [smem:[#allocation9_spill]] }
 0x84e   : > { %s14532_s8 = sld [smem:[#allocation10_spill]]  ;;  %s14533_s18 = smov %s8614_s19 }
 0x84f   : > { %s14535_s20 = smov %s8626_s22  ;;  %s14536_s21 = smov %s8630_s23 }
 0x850   :  { %16 = sbr.rel (!%p14_p1) target bundleno = 5 (0x5), region = 125 }
 0x852   : > { %s14534_s19 = smov %s14530_s16 }
 0x853   : > { %s14537_s22 = smov %s14531_s27 }
 0x854   : > { %s14538_s23 = smov %s14532_s8 }
 0x857   :  { %8050 = vsyncpa [#allocation4], 1 }
 0x858   :  { %8052 = vsyncpa [#allocation4 + $0x1], 1 }
 0x859   :  { %8053 = vsyncpa [#allocation6], 1 }

// kernel: forward_pallas.3
= control target key start
LH: loop header
LB: loop body
LE: loop exit
PB: predicated region body
PF: predicated region fallthrough
CT: control target
= control target key end

     0   :  { %s15792_s15 = smov 0   ;;  %s15794_s16 = smov 0   ;;  %s17178_s0 = inlined_call_operand.vmem [shape: bf16[2,16384], index: 0, kind: input, shape index: {}]   ;;  %s17179_s1 = inlined_call_operand.vmem [shape: bf16[2,16384,64], index: 1, kind: input, shape index: {}]   ;;  %s17180_s2 = inlined_call_operand.vmem [shape: f32[2,1,64], index: 2, kind: input, shape index: {}]   ;;  %s17181_s3 = inlined_call_operand.vmem [shape: f32[2,64,8], index: 3, kind: input, shape index: {}]   ;;  %s17182_s4 = inlined_call_operand.vmem [shape: f32[2,2,8], index: 4, kind: output, shape index: {}]  }
   0x1   :  { %s15796_s17 = smov 0  }
   0x2 LB: > { %s26_s18 = sadd.s32 1, %s15757_s16  ;;  %p12187_p0 = scmp.ge.s32.totalorder %s15761_s17, 1  ;;  %s15761_s17 = sphi %s15796_s17, %s14_s17   ;;  %s15757_s16 = sphi %s15794_s16, %s17184_s16   ;;  %s15753_s15 = sphi %s15792_s15, %s17183_s15  }
   0x3   : > { %p28_p1 = scmp.ge.s32.totalorder %s26_s18, 2  ;;  %p209_p2 = scmp.lt.s32.totalorder %s15761_s17, 3 }
   0x5   : > { %s17186_s18 = smov (%p28_p1, %s26_s18), 0  ;;  %p210_p3 = pnand %p12187_p0, %p209_p2 }
   0x6   : > { %p256_p4 = scmp.lt.s32.totalorder (!%p210_p3), %s15753_s15, 1  ;;  %v2369_v0 = vlaneseq (!%p210_p3)  ;;  %v15763_v1 = vmov (!%p210_p3), 1966171168   ;;  %v285_v5 = vld [vmem:[%s17178_s0] sm:$0xff] (!%p210_p3)  ;;  %vm282_vm0 = vcmask (!%p210_p3), 517120   ;;  %vm15766_vm1 = vmmov (!%p210_p3), 0  }
   0x7   : > { %213 = sbr.rel (%p210_p3) target bundleno = 1489 (0x5d1), region = 36  ;;  %v2367_v2 = vunpack.c.l.s4 (!%p210_p3), %v15763_v1  ;;  %v2365_v30 = vcombine.high (!%p210_p3), %v285_v5, %v285_v5  ;;  %vm12005_vm2 = vcmask (!%p210_p3), 523264   ;;  %vm12079_vm3 = vcmask (!%p210_p3), 58368  }
   0x8   : > { %v2370_v3 = vshrl.u32 (!%p210_p3), %v2369_v0, 7 }
   0x9   : > { %v2368_v4 = vunpack.c.0.s8 (!%p210_p3), %v2367_v2 }
   0xb   : > { %v15821_v6 = vsub.s32 (!%p210_p3), %v2368_v4, %v2370_v3  ;;  %v15890_v4 = vld [vmem:[%s17178_s0 + $0x8] sm:$0xff] (!%p210_p3) }
   0xd   : > { %v15826_v9 = vrot.slane (!%p210_p3), %v285_v5, %v15821_v6  ;;  %v15853_v35 = vrot.slane (!%p210_p3), %v2365_v30, %v15821_v6 }
   0xe   : > { %s17188_s15 = smov (!%p256_p4, %s15753_s15), 1 }
   0xf   : > { %s13221_s19 = sshll.u32 %s17188_s15, 13  ;;  %v2380_v12 = vcombine.high %v15826_v9, %v15826_v9  ;;  %v2381_v40 = vcombine.high %v15853_v35, %v15853_v35  ;;  %v2388_v43 = vrot.slane %v15826_v9, %v15821_v6  ;;  %s267_s13 = scalar_lea.vmem %s17180_s2, %s17188_s15 }
  0x10   : > { %s15819_s24 = scalar_lea.vmem %s17179_s1, %s13221_s19  ;;  %s12192_s14 = sshll.u32 %s17188_s15, 1 }
  0x11   : > { %v14699_v7 = vld [vmem:[%s15819_s24 + $0x40] sm:$0xff]   ;;  %v14703_v13 = vld [vmem:[%s15819_s24 + $0x48] sm:$0xff]   ;;  %v2402_v15 = vrot.slane %v2380_v12, %v15821_v6  ;;  %v14707_v19 = vld [vmem:[%s15819_s24 + $0x50] sm:$0xff]   ;;  %v2409_v46 = vrot.slane %v2381_v40, %v15821_v6  ;;  %v2410_v48 = vcombine.high %v2388_v43, %v2388_v43  ;;  %s276_s21 = scalar_lea.vmem %s17182_s4, %s12192_s14 }
  0x12   : > { %v14700_v8 = vld [vmem:[%s15819_s24 + $0xc0] sm:$0xff]   ;;  %13223 = vmatprep.subr.bf16.mxu0 %v14699_v7  ;;  %v14704_v14 = vld [vmem:[%s15819_s24 + $0xc8] sm:$0xff]   ;;  %v14708_v20 = vld [vmem:[%s15819_s24 + $0xd0] sm:$0xff]  }
  0x13   : > { %v14701_v10 = vld [vmem:[%s15819_s24] sm:$0xff]   ;;  %13245 = vmatprep.subr.bf16.mxu1 %v14700_v8  ;;  %v14705_v16 = vld [vmem:[%s15819_s24 + $0x8] sm:$0xff]   ;;  %9453 = vmatprep.mubr.bf16.mxu0 %v2402_v15  ;;  %v2412_v18 = vcombine.high %v2402_v15, %v2402_v15  ;;  %v14709_v21 = vld [vmem:[%s15819_s24 + $0x10] sm:$0xff]   ;;  %v2413_v52 = vcombine.high %v2409_v46, %v2409_v46 }
  0x14   : > { %v14702_v11 = vld [vmem:[%s15819_s24 + $0x80] sm:$0xff]   ;;  %13224 = vmatpush3.bf16.msra.mxu0 %v14701_v10  ;;  %v14706_v17 = vld [vmem:[%s15819_s24 + $0x88] sm:$0xff]   ;;  %v14710_v22 = vld [vmem:[%s15819_s24 + $0x90] sm:$0xff]  }
  0x15   : > { %13246 = vmatpush3.bf16.msra.mxu1 %v14702_v11  ;;  %13225 = vmatprep.subr.bf16.mxu0 %v14703_v13  ;;  %v14711_v23 = vld [vmem:[%s15819_s24 + $0x58] sm:$0xff]   ;;  %v14715_v27 = vld [vmem:[%s15819_s24 + $0x60] sm:$0xff]   ;;  %v14719_v32 = vld [vmem:[%s15819_s24 + $0x68] sm:$0xff]   ;;  %v15899_v11 = vrot.slane %v15890_v4, %v15821_v6 }
  0x16   : > { %13247 = vmatprep.subr.bf16.mxu1 %v14704_v14  ;;  %9493 = vmatprep.mubr.bf16.mxu1 %v2412_v18  ;;  %v14712_v24 = vld [vmem:[%s15819_s24 + $0xd8] sm:$0xff]   ;;  %v14716_v28 = vld [vmem:[%s15819_s24 + $0xe0] sm:$0xff]   ;;  %v14720_v33 = vld [vmem:[%s15819_s24 + $0xe8] sm:$0xff]  }
  0x17   : > { %v14713_v25 = vld [vmem:[%s15819_s24 + $0x18] sm:$0xff]   ;;  %v14717_v29 = vld [vmem:[%s15819_s24 + $0x20] sm:$0xff]   ;;  %v14721_v34 = vld [vmem:[%s15819_s24 + $0x28] sm:$0xff]  }
  0x18   : > { %13226 = vmatpush3.bf16.msra.mxu0 %v14705_v16  ;;  %v14714_v26 = vld [vmem:[%s15819_s24 + $0x98] sm:$0xff]   ;;  %v14718_v31 = vld [vmem:[%s15819_s24 + $0xa0] sm:$0xff]   ;;  %v14722_v36 = vld [vmem:[%s15819_s24 + $0xa8] sm:$0xff]   ;;  %v2429_v16 = vcombine.high %v15899_v11, %v15899_v11 }
  0x19   : > { %13248 = vmatpush3.bf16.msra.mxu1 %v14706_v17  ;;  %13227 = vmatprep.subr.bf16.mxu0 %v14707_v19  ;;  %v14723_v37 = vld [vmem:[%s15819_s24 + $0x70] sm:$0xff]   ;;  %v14727_v42 = vld [vmem:[%s15819_s24 + $0x78] sm:$0xff]   ;;  %v14732_v49 = vld [vmem:[%s15819_s24 + $0x140] sm:$0xff]   ;;  %v2395_v19 = vrot.slane %v15853_v35, %v15821_v6 }
  0x1a   : > { %13249 = vmatprep.subr.bf16.mxu1 %v14708_v20  ;;  %v14724_v38 = vld [vmem:[%s15819_s24 + $0xf0] sm:$0xff]   ;;  %v14728_v44 = vld [vmem:[%s15819_s24 + $0xf8] sm:$0xff]   ;;  %v14733_v50 = vld [vmem:[%s15819_s24 + $0x1c0] sm:$0xff]  }
  0x1b   : > { %v14725_v39 = vld [vmem:[%s15819_s24 + $0x30] sm:$0xff]   ;;  %v14729_v45 = vld [vmem:[%s15819_s24 + $0x38] sm:$0xff]   ;;  %v14734_v51 = vld [vmem:[%s15819_s24 + $0x100] sm:$0xff]  }
  0x1c   : > { %13228 = vmatpush3.bf16.msra.mxu0 %v14709_v21  ;;  %v14726_v41 = vld [vmem:[%s15819_s24 + $0xb0] sm:$0xff]   ;;  %v14730_v47 = vld [vmem:[%s15819_s24 + $0xb8] sm:$0xff]   ;;  %v14735_v53 = vld [vmem:[%s15819_s24 + $0x180] sm:$0xff]  }
  0x1d   : > { %13250 = vmatpush3.bf16.msra.mxu1 %v14710_v22  ;;  %13229 = vmatprep.subr.bf16.mxu0 %v14711_v23  ;;  %v14736_v54 = vld [vmem:[%s15819_s24 + $0x148] sm:$0xff]   ;;  %v14740_v58 = vld [vmem:[%s15819_s24 + $0x150] sm:$0xff]   ;;  %v14744_v62 = vld [vmem:[%s15819_s24 + $0x158] sm:$0xff]   ;;  %v2451_v22 = vrot.slane %v2429_v16, %v15821_v6 }
  0x1e   : > { %13251 = vmatprep.subr.bf16.mxu1 %v14712_v24  ;;  %v14737_v55 = vld [vmem:[%s15819_s24 + $0x1c8] sm:$0xff]   ;;  %v14741_v59 = vld [vmem:[%s15819_s24 + $0x1d0] sm:$0xff]   ;;  %v14745_v63 = vld [vmem:[%s15819_s24 + $0x1d8] sm:$0xff]   ;;  %v2411_v24 = vcombine.high %v2395_v19, %v2395_v19 }
  0x1f   : > { %v14738_v56 = vld [vmem:[%s15819_s24 + $0x108] sm:$0xff]   ;;  %v14742_v60 = vld [vmem:[%s15819_s24 + $0x110] sm:$0xff]   ;;  %v14746_v0 = vld [vmem:[%s15819_s24 + $0x118] sm:$0xff]  }
  0x20   : > { %13230 = vmatpush3.bf16.msra.mxu0 %v14713_v25  ;;  %v14739_v57 = vld [vmem:[%s15819_s24 + $0x188] sm:$0xff]   ;;  %v14743_v61 = vld [vmem:[%s15819_s24 + $0x190] sm:$0xff]   ;;  %v14747_v1 = vld [vmem:[%s15819_s24 + $0x198] sm:$0xff]  }
  0x21   : > { %13252 = vmatpush3.bf16.msra.mxu1 %v14714_v26  ;;  %13231 = vmatprep.subr.bf16.mxu0 %v14715_v27  ;;  %v14748_v2 = vld [vmem:[%s15819_s24 + $0x160] sm:$0xff]   ;;  %v14752_v8 = vld [vmem:[%s15819_s24 + $0x168] sm:$0xff]   ;;  %v14756_v13 = vld [vmem:[%s15819_s24 + $0x170] sm:$0xff]  }
  0x22   : > { %13253 = vmatprep.subr.bf16.mxu1 %v14716_v28  ;;  %v14749_v3 = vld [vmem:[%s15819_s24 + $0x1e0] sm:$0xff]   ;;  %v14753_v9 = vld [vmem:[%s15819_s24 + $0x1e8] sm:$0xff]   ;;  %v14757_v14 = vld [vmem:[%s15819_s24 + $0x1f0] sm:$0xff]   ;;  %v2461_v28 = vcombine.high %v2451_v22, %v2451_v22 }
  0x23   : > { %v14750_v5 = vld [vmem:[%s15819_s24 + $0x120] sm:$0xff]   ;;  %v14754_v10 = vld [vmem:[%s15819_s24 + $0x128] sm:$0xff]   ;;  %v14758_v15 = vld [vmem:[%s15819_s24 + $0x130] sm:$0xff]  }
  0x24   : > { %13232 = vmatpush3.bf16.msra.mxu0 %v14717_v29  ;;  %v14751_v7 = vld [vmem:[%s15819_s24 + $0x1a0] sm:$0xff]   ;;  %v14755_v12 = vld [vmem:[%s15819_s24 + $0x1a8] sm:$0xff]   ;;  %v14759_v17 = vld [vmem:[%s15819_s24 + $0x1b0] sm:$0xff]  }
  0x25   : > { %13254 = vmatpush3.bf16.msra.mxu1 %v14718_v31  ;;  %13233 = vmatprep.subr.bf16.mxu0 %v14719_v32  ;;  %v14760_v18 = vld [vmem:[%s15819_s24 + $0x178] sm:$0xff]   ;;  %v14764_v25 = vld [vmem:[%s15819_s24 + $0x240] sm:$0xff]   ;;  %v14768_v30 = vld [vmem:[%s15819_s24 + $0x248] sm:$0xff]  }
  0x26   : > { %13255 = vmatprep.subr.bf16.mxu1 %v14720_v33  ;;  %v14761_v20 = vld [vmem:[%s15819_s24 + $0x1f8] sm:$0xff]   ;;  %v14765_v26 = vld [vmem:[%s15819_s24 + $0x2c0] sm:$0xff]   ;;  %v14769_v31 = vld [vmem:[%s15819_s24 + $0x2c8] sm:$0xff]  }
  0x27   : > { %v14762_v21 = vld [vmem:[%s15819_s24 + $0x138] sm:$0xff]   ;;  %v14766_v27 = vld [vmem:[%s15819_s24 + $0x200] sm:$0xff]   ;;  %v14770_v32 = vld [vmem:[%s15819_s24 + $0x208] sm:$0xff]  }
  0x28   : > { %13234 = vmatpush3.bf16.msra.mxu0 %v14721_v34  ;;  %v14763_v23 = vld [vmem:[%s15819_s24 + $0x1b8] sm:$0xff]   ;;  %v14767_v29 = vld [vmem:[%s15819_s24 + $0x280] sm:$0xff]   ;;  %v14771_v33 = vld [vmem:[%s15819_s24 + $0x288] sm:$0xff]  }
  0x29   : > { %13256 = vmatpush3.bf16.msra.mxu1 %v14722_v36  ;;  %13235 = vmatprep.subr.bf16.mxu0 %v14723_v37  ;;  %v14772_v34 = vld [vmem:[%s15819_s24 + $0x250] sm:$0xff]   ;;  %v14778_v40 = vld [vmem:[%s15819_s24 + $0x218] sm:$0xff]  }
  0x2a   : > { %13257 = vmatprep.subr.bf16.mxu1 %v14724_v38  ;;  %v14773_v35 = vld [vmem:[%s15819_s24 + $0x2d0] sm:$0xff]   ;;  %v14776_v38 = vld [vmem:[%s15819_s24 + $0x258] sm:$0xff]  }
  0x2b   : > { %v14774_v36 = vld [vmem:[%s15819_s24 + $0x210] sm:$0xff]   ;;  %v14810_v16 = vld [vmem:[%s15819_s24 + $0x318] sm:$0xff]  }
  0x2c   : > { %13236 = vmatpush3.bf16.msra.mxu0 %v14725_v39  ;;  %v14775_v37 = vld [vmem:[%s15819_s24 + $0x290] sm:$0xff]   ;;  %v14777_v39 = vld [vmem:[%s15819_s24 + $0x2d8] sm:$0xff]  }
  0x2d   : > { %13258 = vmatpush3.bf16.msra.mxu1 %v14726_v41  ;;  %13237 = vmatprep.subr.bf16.mxu0 %v14727_v42  ;;  %v14779_v41 = vld [vmem:[%s15819_s24 + $0x298] sm:$0xff]   ;;  %v14780_v42 = vld [vmem:[%s15819_s24 + $0x260] sm:$0xff]  }
  0x2e   : > { %13259 = vmatprep.subr.bf16.mxu1 %v14728_v44  ;;  %v14782_v44 = vld [vmem:[%s15819_s24 + $0x220] sm:$0xff]  }
  0x30   : > { %13238 = vmatpush3.bf16.msra.mxu0 %v14729_v45  ;;  %v2414_v45 = vcombine.high %v15890_v4, %v15890_v4  ;;  %v14799_v4 = vld [vmem:[%s15819_s24 + $0x380] sm:$0xff]  }
  0x31   : > { %13260 = vmatpush3.bf16.msra.mxu1 %v14730_v47  ;;  %13267 = vmatprep.subr.bf16.mxu0 %v14732_v49  ;;  %v14784_v47 = vld [vmem:[%s15819_s24 + $0x268] sm:$0xff]  }
  0x32   : > { %13289 = vmatprep.subr.bf16.mxu1 %v14733_v50  ;;  %v14786_v49 = vld [vmem:[%s15819_s24 + $0x228] sm:$0xff]   ;;  %v15941_v50 = vrot.slane %v2414_v45, %v15821_v6  ;;  %v14838_v45 = vld [vmem:[%s15819_s24 + $0x4d0] sm:$0xff]  }
  0x33   : > { %9454 = vmatmul.mubr.bf16.vlgmr.msra.gmra.mrb[0].mxu0 %v2388_v43  ;;  %v14781_v43 = vld [vmem:[%s15819_s24 + $0x2e0] sm:$0xff]  }
  0x34   : > { %9494 = vmatmul.mubr.bf16.vlgmr.msra.gmra.mrb[0].mxu1 %v2410_v48  ;;  %13268 = vmatpush3.bf16.msra.mxu0 %v14734_v51  ;;  %v14785_v48 = vld [vmem:[%s15819_s24 + $0x2e8] sm:$0xff]  }
  0x35   : > { %13290 = vmatpush3.bf16.msra.mxu1 %v14735_v53  ;;  %9533 = vmatprep.mubr.bf16.mxu0 %v2409_v46  ;;  %v14783_v46 = vld [vmem:[%s15819_s24 + $0x2a0] sm:$0xff]   ;;  %v14787_v51 = vld [vmem:[%s15819_s24 + $0x2a8] sm:$0xff]   ;;  %v14789_v53 = vld [vmem:[%s15819_s24 + $0x2f0] sm:$0xff]  }
  0x36   : > { %13269 = vmatprep.subr.bf16.mxu0 %v14736_v54  ;;  %9573 = vmatprep.mubr.bf16.mxu1 %v2413_v52  ;;  %v14788_v52 = vld [vmem:[%s15819_s24 + $0x270] sm:$0xff]  }
  0x37   : > { %13291 = vmatprep.subr.bf16.mxu1 %v14737_v55  ;;  %v14790_v54 = vld [vmem:[%s15819_s24 + $0x230] sm:$0xff]   ;;  %v2430_v55 = vcombine.high %v15941_v50, %v15941_v50 }
  0x38   : > { %13270 = vmatpush3.bf16.msra.mxu0 %v14738_v56  ;;  %v14791_v56 = vld [vmem:[%s15819_s24 + $0x2b0] sm:$0xff]  }
  0x39   : > { %13292 = vmatpush3.bf16.msra.mxu1 %v14739_v57  ;;  %13271 = vmatprep.subr.bf16.mxu0 %v14740_v58  ;;  %v14792_v57 = vld [vmem:[%s15819_s24 + $0x278] sm:$0xff]   ;;  %v2437_v58 = vrot.slane %v15899_v11, %v15821_v6  ;;  %v14805_v11 = vld [vmem:[%s15819_s24 + $0x3d0] sm:$0xff]  }
  0x3a   : > { %13293 = vmatprep.subr.bf16.mxu1 %v14741_v59  ;;  %v14793_v59 = vld [vmem:[%s15819_s24 + $0x2f8] sm:$0xff]  }
  0x3c   : > { %13272 = vmatpush3.bf16.msra.mxu0 %v14742_v60  ;;  %v14794_v60 = vld [vmem:[%s15819_s24 + $0x238] sm:$0xff]  }
  0x3d   : > { %13294 = vmatpush3.bf16.msra.mxu1 %v14743_v61  ;;  %13273 = vmatprep.subr.bf16.mxu0 %v14744_v62  ;;  %v2458_v61 = vrot.slane %v2430_v55, %v15821_v6  ;;  %v14795_v62 = vld [vmem:[%s15819_s24 + $0x2b8] sm:$0xff]   ;;  %v14848_v55 = vld [vmem:[%s15819_s24 + $0x4a0] sm:$0xff]  }
  0x3e   : > { %13295 = vmatprep.subr.bf16.mxu1 %v14745_v63  ;;  %v2459_v63 = vcombine.high %v2437_v58, %v2437_v58 }
  0x40   : > { %13274 = vmatpush3.bf16.msra.mxu0 %v14746_v0  ;;  %v14796_v0 = vld [vmem:[%s15819_s24 + $0x340] sm:$0xff]  }
  0x41   : > { %13296 = vmatpush3.bf16.msra.mxu1 %v14747_v1  ;;  %13275 = vmatprep.subr.bf16.mxu0 %v14748_v2  ;;  %v14797_v1 = vld [vmem:[%s15819_s24 + $0x3c0] sm:$0xff]  }
  0x42   : > { %13297 = vmatprep.subr.bf16.mxu1 %v14749_v3  ;;  %v14798_v2 = vld [vmem:[%s15819_s24 + $0x300] sm:$0xff]   ;;  %v2462_v3 = vcombine.high %v2458_v61, %v2458_v61 }
  0x44   : > { %13276 = vmatpush3.bf16.msra.mxu0 %v14750_v5  ;;  %v14800_v5 = vld [vmem:[%s15819_s24 + $0x348] sm:$0xff]  }
  0x45   : > { %13298 = vmatpush3.bf16.msra.mxu1 %v14751_v7  ;;  %13277 = vmatprep.subr.bf16.mxu0 %v14752_v8  ;;  %v14801_v7 = vld [vmem:[%s15819_s24 + $0x3c8] sm:$0xff]  }
  0x46   : > { %13299 = vmatprep.subr.bf16.mxu1 %v14753_v9  ;;  %v14802_v8 = vld [vmem:[%s15819_s24 + $0x308] sm:$0xff]  }
  0x47   : > { %v14803_v9 = vld [vmem:[%s15819_s24 + $0x388] sm:$0xff]  }
  0x48   : > { %13278 = vmatpush3.bf16.msra.mxu0 %v14754_v10  ;;  %v14804_v10 = vld [vmem:[%s15819_s24 + $0x350] sm:$0xff]  }
  0x49   : > { %13300 = vmatpush3.bf16.msra.mxu1 %v14755_v12  ;;  %13279 = vmatprep.subr.bf16.mxu0 %v14756_v13  ;;  %v14806_v12 = vld [vmem:[%s15819_s24 + $0x310] sm:$0xff]  }
  0x4a   : > { %13301 = vmatprep.subr.bf16.mxu1 %v14757_v14  ;;  %v14807_v13 = vld [vmem:[%s15819_s24 + $0x390] sm:$0xff]   ;;  %v14808_v14 = vld [vmem:[%s15819_s24 + $0x358] sm:$0xff]  }
  0x4c   : > { %13280 = vmatpush3.bf16.msra.mxu0 %v14758_v15  ;;  %v14809_v15 = vld [vmem:[%s15819_s24 + $0x3d8] sm:$0xff]  }
  0x4d   : > { %13302 = vmatpush3.bf16.msra.mxu1 %v14759_v17  ;;  %13281 = vmatprep.subr.bf16.mxu0 %v14760_v18  ;;  %v14811_v17 = vld [vmem:[%s15819_s24 + $0x398] sm:$0xff]   ;;  %v14812_v18 = vld [vmem:[%s15819_s24 + $0x360] sm:$0xff]  }
  0x4e   : > { %13303 = vmatprep.subr.bf16.mxu1 %v14761_v20  ;;  %v14814_v20 = vld [vmem:[%s15819_s24 + $0x320] sm:$0xff]  }
  0x50   : > { %13282 = vmatpush3.bf16.msra.mxu0 %v14762_v21  ;;  %v14815_v21 = vld [vmem:[%s15819_s24 + $0x3a0] sm:$0xff]  }
  0x51   : > { %13304 = vmatpush3.bf16.msra.mxu1 %v14763_v23  ;;  %13311 = vmatprep.subr.bf16.mxu0 %v14764_v25  ;;  %v14817_v23 = vld [vmem:[%s15819_s24 + $0x3e8] sm:$0xff]  }
  0x52   : > { %13333 = vmatprep.subr.bf16.mxu1 %v14765_v26  ;;  %v14819_v25 = vld [vmem:[%s15819_s24 + $0x3a8] sm:$0xff]   ;;  %v14820_v26 = vld [vmem:[%s15819_s24 + $0x370] sm:$0xff]  }
  0x53   : > { %9534 = vmatmul.mubr.bf16.vlgmr.msra.gmra.mrb[4].mxu0 %v2395_v19  ;;  %v14813_v19 = vld [vmem:[%s15819_s24 + $0x3e0] sm:$0xff]  }
  0x54   : > { %9574 = vmatmul.mubr.bf16.vlgmr.msra.gmra.mrb[4].mxu1 %v2411_v24  ;;  %13312 = vmatpush3.bf16.msra.mxu0 %v14766_v27  ;;  %v14818_v24 = vld [vmem:[%s15819_s24 + $0x328] sm:$0xff]   ;;  %v14821_v27 = vld [vmem:[%s15819_s24 + $0x3f0] sm:$0xff]  }
  0x55   : > { %13334 = vmatpush3.bf16.msra.mxu1 %v14767_v29  ;;  %9613 = vmatprep.mubr.bf16.mxu0 %v2451_v22  ;;  %v14816_v22 = vld [vmem:[%s15819_s24 + $0x368] sm:$0xff]   ;;  %v14823_v29 = vld [vmem:[%s15819_s24 + $0x3b0] sm:$0xff]  }
  0x56   : > { %13313 = vmatprep.subr.bf16.mxu0 %v14768_v30  ;;  %9653 = vmatprep.mubr.bf16.mxu1 %v2461_v28  ;;  %v14822_v28 = vld [vmem:[%s15819_s24 + $0x330] sm:$0xff]   ;;  %v14824_v30 = vld [vmem:[%s15819_s24 + $0x378] sm:$0xff]  }
  0x57   : > { %13335 = vmatprep.subr.bf16.mxu1 %v14769_v31  ;;  %v2444_v31 = vrot.slane %v15941_v50, %v15821_v6  ;;  %v14843_v50 = vld [vmem:[%s15819_s24 + $0x418] sm:$0xff]  }
  0x58   : > { %13314 = vmatpush3.bf16.msra.mxu0 %v14770_v32  ;;  %v14825_v32 = vld [vmem:[%s15819_s24 + $0x3f8] sm:$0xff]  }
  0x59   : > { %13336 = vmatpush3.bf16.msra.mxu1 %v14771_v33  ;;  %13315 = vmatprep.subr.bf16.mxu0 %v14772_v34  ;;  %v14826_v33 = vld [vmem:[%s15819_s24 + $0x338] sm:$0xff]  }
  0x5a   : > { %13337 = vmatprep.subr.bf16.mxu1 %v14773_v35  ;;  %v14827_v34 = vld [vmem:[%s15819_s24 + $0x3b8] sm:$0xff]   ;;  %v2460_v35 = vcombine.high %v2444_v31, %v2444_v31 }
  0x5c   : > { %13316 = vmatpush3.bf16.msra.mxu0 %v14774_v36  ;;  %v14829_v36 = vld [vmem:[%s15819_s24 + $0x440] sm:$0xff]  }
  0x5d   : > { %13338 = vmatpush3.bf16.msra.mxu1 %v14775_v37  ;;  %13317 = vmatprep.subr.bf16.mxu0 %v14776_v38  ;;  %v14830_v37 = vld [vmem:[%s15819_s24 + $0x4c0] sm:$0xff]  }
  0x5e   : > { %13339 = vmatprep.subr.bf16.mxu1 %v14777_v39  ;;  %v14831_v38 = vld [vmem:[%s15819_s24 + $0x400] sm:$0xff]  }
  0x5f   : > { %v14832_v39 = vld [vmem:[%s15819_s24 + $0x480] sm:$0xff]  }
  0x60   : > { %13318 = vmatpush3.bf16.msra.mxu0 %v14778_v40  ;;  %v14833_v40 = vld [vmem:[%s15819_s24 + $0x448] sm:$0xff]  }
  0x61   : > { %13340 = vmatpush3.bf16.msra.mxu1 %v14779_v41  ;;  %13319 = vmatprep.subr.bf16.mxu0 %v14780_v42  ;;  %v14834_v41 = vld [vmem:[%s15819_s24 + $0x4c8] sm:$0xff]  }
  0x62   : > { %13341 = vmatprep.subr.bf16.mxu1 %v14781_v43  ;;  %v14835_v42 = vld [vmem:[%s15819_s24 + $0x408] sm:$0xff]  }
  0x63   : > { %v14836_v43 = vld [vmem:[%s15819_s24 + $0x488] sm:$0xff]  }
  0x64   : > { %13320 = vmatpush3.bf16.msra.mxu0 %v14782_v44  ;;  %v14837_v44 = vld [vmem:[%s15819_s24 + $0x450] sm:$0xff]  }
  0x65   : > { %13342 = vmatpush3.bf16.msra.mxu1 %v14783_v46  ;;  %13321 = vmatprep.subr.bf16.mxu0 %v14784_v47  ;;  %v14839_v46 = vld [vmem:[%s15819_s24 + $0x410] sm:$0xff]  }
  0x66   : > { %13343 = vmatprep.subr.bf16.mxu1 %v14785_v48  ;;  %v14840_v47 = vld [vmem:[%s15819_s24 + $0x490] sm:$0xff]   ;;  %v14841_v48 = vld [vmem:[%s15819_s24 + $0x458] sm:$0xff]  }
  0x68   : > { %13322 = vmatpush3.bf16.msra.mxu0 %v14786_v49  ;;  %v14842_v49 = vld [vmem:[%s15819_s24 + $0x4d8] sm:$0xff]  }
  0x69   : > { %13344 = vmatpush3.bf16.msra.mxu1 %v14787_v51  ;;  %13323 = vmatprep.subr.bf16.mxu0 %v14788_v52  ;;  %v14844_v51 = vld [vmem:[%s15819_s24 + $0x498] sm:$0xff]   ;;  %v14845_v52 = vld [vmem:[%s15819_s24 + $0x460] sm:$0xff]  }
  0x6a   : > { %13345 = vmatprep.subr.bf16.mxu1 %v14789_v53  ;;  %v14846_v53 = vld [vmem:[%s15819_s24 + $0x4e0] sm:$0xff]  }
  0x6c   : > { %13324 = vmatpush3.bf16.msra.mxu0 %v14790_v54  ;;  %v14847_v54 = vld [vmem:[%s15819_s24 + $0x420] sm:$0xff]  }
  0x6d   : > { %13346 = vmatpush3.bf16.msra.mxu1 %v14791_v56  ;;  %13325 = vmatprep.subr.bf16.mxu0 %v14792_v57  ;;  %v14849_v56 = vld [vmem:[%s15819_s24 + $0x468] sm:$0xff]  }
  0x6e   : > { %13347 = vmatprep.subr.bf16.mxu1 %v14793_v59  ;;  %v14850_v57 = vld [vmem:[%s15819_s24 + $0x4e8] sm:$0xff]  }
  0x6f   : > { %v14852_v59 = vld [vmem:[%s15819_s24 + $0x4a8] sm:$0xff]  }
  0x70   : > { %13326 = vmatpush3.bf16.msra.mxu0 %v14794_v60  ;;  %v14853_v60 = vld [vmem:[%s15819_s24 + $0x470] sm:$0xff]  }
  0x71   : > { %13348 = vmatpush3.bf16.msra.mxu1 %v14795_v62  ;;  %13355 = vmatprep.subr.bf16.mxu0 %v14796_v0  ;;  %v14855_v62 = vld [vmem:[%s15819_s24 + $0x430] sm:$0xff]   ;;  %v14857_v0 = vld [vmem:[%s15819_s24 + $0x478] sm:$0xff]  }
  0x72   : > { %13377 = vmatprep.subr.bf16.mxu1 %v14797_v1  ;;  %v14858_v1 = vld [vmem:[%s15819_s24 + $0x4f8] sm:$0xff]  }
  0x73   : > { %9614 = vmatmul.mubr.bf16.vlgmr.msra.gmra.mrb[8].mxu0 %v2437_v58  ;;  %v14851_v58 = vld [vmem:[%s15819_s24 + $0x428] sm:$0xff]  }
  0x74   : > { %9654 = vmatmul.mubr.bf16.vlgmr.msra.gmra.mrb[8].mxu1 %v2459_v63  ;;  %13356 = vmatpush3.bf16.msra.mxu0 %v14798_v2  ;;  %v14856_v63 = vld [vmem:[%s15819_s24 + $0x4b0] sm:$0xff]   ;;  %v14859_v2 = vld [vmem:[%s15819_s24 + $0x438] sm:$0xff]  }
  0x75   : > { %13378 = vmatpush3.bf16.msra.mxu1 %v14799_v4  ;;  %9693 = vmatprep.mubr.bf16.mxu0 %v2458_v61  ;;  %v14854_v61 = vld [vmem:[%s15819_s24 + $0x4f0] sm:$0xff]  }
  0x76   : > { %13357 = vmatprep.subr.bf16.mxu0 %v14800_v5  ;;  %9733 = vmatprep.mubr.bf16.mxu1 %v2462_v3  ;;  %v14860_v3 = vld [vmem:[%s15819_s24 + $0x4b8] sm:$0xff]   ;;  %v287_v4 = vld [vmem:[%s17178_s0 + $0x10] sm:$0xff] }
  0x77   : > { %13379 = vmatprep.subr.bf16.mxu1 %v14801_v7  ;;  %v2470_v5 = vrot.slane %v287_v4, %v15821_v6  ;;  %v14861_v7 = vld [vmem:[%s15819_s24 + $0x540] sm:$0xff]  }
  0x78   : > { %13358 = vmatpush3.bf16.msra.mxu0 %v14802_v8  ;;  %v2463_v8 = vcombine.high %v287_v4, %v287_v4  ;;  %v14911_v4 = vld [vmem:[%s15819_s24 + $0x6e0] sm:$0xff]  }
  0x79   : > { %13380 = vmatpush3.bf16.msra.mxu1 %v14803_v9  ;;  %13359 = vmatprep.subr.bf16.mxu0 %v14804_v10  ;;  %v14862_v9 = vld [vmem:[%s15819_s24 + $0x5c0] sm:$0xff]   ;;  %v2478_v10 = vcombine.high %v2470_v5, %v2470_v5 }
  0x7a   : > { %13381 = vmatprep.subr.bf16.mxu1 %v14805_v11  ;;  %v2486_v11 = vrot.slane %v2470_v5, %v15821_v6  ;;  %v14912_v5 = vld [vmem:[%s15819_s24 + $0x620] sm:$0xff]  }
  0x7c   : > { %13360 = vmatpush3.bf16.msra.mxu0 %v14806_v12  ;;  %v16031_v12 = vrot.slane %v2463_v8, %v15821_v6  ;;  %v14914_v8 = vld [vmem:[%s15819_s24 + $0x668] sm:$0xff]  }
  0x7d   : > { %13382 = vmatpush3.bf16.msra.mxu1 %v14807_v13  ;;  %13361 = vmatprep.subr.bf16.mxu0 %v14808_v14  ;;  %v14863_v13 = vld [vmem:[%s15819_s24 + $0x500] sm:$0xff]   ;;  %v2500_v14 = vrot.slane %v2478_v10, %v15821_v6  ;;  %v14916_v10 = vld [vmem:[%s15819_s24 + $0x628] sm:$0xff]  }
  0x7e   : > { %13383 = vmatprep.subr.bf16.mxu1 %v14809_v15  ;;  %v14864_v15 = vld [vmem:[%s15819_s24 + $0x580] sm:$0xff]  }
  0x80   : > { %13362 = vmatpush3.bf16.msra.mxu0 %v14810_v16  ;;  %v2479_v16 = vcombine.high %v16031_v12, %v16031_v12 }
  0x81   : > { %13384 = vmatpush3.bf16.msra.mxu1 %v14811_v17  ;;  %13363 = vmatprep.subr.bf16.mxu0 %v14812_v18  ;;  %v2508_v17 = vcombine.high %v2486_v11, %v2486_v11  ;;  %v14865_v18 = vld [vmem:[%s15819_s24 + $0x548] sm:$0xff]  }
  0x82   : > { %13385 = vmatprep.subr.bf16.mxu1 %v14813_v19  ;;  %v2510_v19 = vcombine.high %v2500_v14, %v2500_v14 }
  0x84   : > { %13364 = vmatpush3.bf16.msra.mxu0 %v14814_v20  ;;  %v14866_v20 = vld [vmem:[%s15819_s24 + $0x5c8] sm:$0xff]  }
  0x85   : > { %13386 = vmatpush3.bf16.msra.mxu1 %v14815_v21  ;;  %13365 = vmatprep.subr.bf16.mxu0 %v14816_v22  ;;  %v2507_v21 = vrot.slane %v2479_v16, %v15821_v6  ;;  %v14867_v22 = vld [vmem:[%s15819_s24 + $0x508] sm:$0xff]   ;;  %v14922_v16 = vld [vmem:[%s15819_s24 + $0x678] sm:$0xff]  }
  0x86   : > { %13387 = vmatprep.subr.bf16.mxu1 %v14817_v23  ;;  %v14868_v23 = vld [vmem:[%s15819_s24 + $0x588] sm:$0xff]  }
  0x88   : > { %13366 = vmatpush3.bf16.msra.mxu0 %v14818_v24  ;;  %v2511_v24 = vcombine.high %v2507_v21, %v2507_v21 }
  0x89   : > { %13388 = vmatpush3.bf16.msra.mxu1 %v14819_v25  ;;  %13367 = vmatprep.subr.bf16.mxu0 %v14820_v26  ;;  %v14869_v25 = vld [vmem:[%s15819_s24 + $0x550] sm:$0xff]  }
  0x8a   : > { %13389 = vmatprep.subr.bf16.mxu1 %v14821_v27  ;;  %v14870_v26 = vld [vmem:[%s15819_s24 + $0x5d0] sm:$0xff]  }
  0x8b   : > { %v14871_v27 = vld [vmem:[%s15819_s24 + $0x510] sm:$0xff]  }
  0x8c   : > { %13368 = vmatpush3.bf16.msra.mxu0 %v14822_v28  ;;  %v14872_v28 = vld [vmem:[%s15819_s24 + $0x590] sm:$0xff]  }
  0x8d   : > { %13390 = vmatpush3.bf16.msra.mxu1 %v14823_v29  ;;  %13369 = vmatprep.subr.bf16.mxu0 %v14824_v30  ;;  %v14873_v29 = vld [vmem:[%s15819_s24 + $0x558] sm:$0xff]  }
  0x8e   : > { %13391 = vmatprep.subr.bf16.mxu1 %v14825_v32  ;;  %v14874_v30 = vld [vmem:[%s15819_s24 + $0x5d8] sm:$0xff]  }
  0x8f   : > { %v14876_v32 = vld [vmem:[%s15819_s24 + $0x598] sm:$0xff]  }
  0x90   : > { %13370 = vmatpush3.bf16.msra.mxu0 %v14826_v33  ;;  %v14877_v33 = vld [vmem:[%s15819_s24 + $0x560] sm:$0xff]  }
  0x91   : > { %13392 = vmatpush3.bf16.msra.mxu1 %v14827_v34  ;;  %13399 = vmatprep.subr.bf16.mxu0 %v14829_v36  ;;  %v14878_v34 = vld [vmem:[%s15819_s24 + $0x5e0] sm:$0xff]  }
  0x92   : > { %13421 = vmatprep.subr.bf16.mxu1 %v14830_v37  ;;  %v14880_v36 = vld [vmem:[%s15819_s24 + $0x5a0] sm:$0xff]   ;;  %v14881_v37 = vld [vmem:[%s15819_s24 + $0x568] sm:$0xff]  }
  0x93   : > { %9694 = vmatmul.mubr.bf16.vlgmr.msra.gmra.mrb[12].mxu0 %v2444_v31  ;;  %v14875_v31 = vld [vmem:[%s15819_s24 + $0x518] sm:$0xff]  }
  0x94   : > { %9734 = vmatmul.mubr.bf16.vlgmr.msra.gmra.mrb[12].mxu1 %v2460_v35  ;;  %13400 = vmatpush3.bf16.msra.mxu0 %v14831_v38  ;;  %v14879_v35 = vld [vmem:[%s15819_s24 + $0x520] sm:$0xff]   ;;  %v14882_v38 = vld [vmem:[%s15819_s24 + $0x5e8] sm:$0xff]  }
  0x95   : > { %13422 = vmatpush3.bf16.msra.mxu1 %v14832_v39  ;;  %13401 = vmatprep.subr.bf16.mxu0 %v14833_v40  ;;  %v14883_v39 = vld [vmem:[%s15819_s24 + $0x528] sm:$0xff]  }
  0x96   : > { %13423 = vmatprep.subr.bf16.mxu1 %v14834_v41  ;;  %9773 = vmatprep.mubr.bf16.mxu0 %v2500_v14  ;;  %v14884_v40 = vld [vmem:[%s15819_s24 + $0x5a8] sm:$0xff]   ;;  %v14885_v41 = vld [vmem:[%s15819_s24 + $0x570] sm:$0xff]  }
  0x97   : > { %9813 = vmatprep.mubr.bf16.mxu1 %v2510_v19  ;;  %v14920_v14 = vld [vmem:[%s15819_s24 + $0x630] sm:$0xff]   ;;  %v288_v19 = vld [vmem:[%s17178_s0 + $0x18] sm:$0xff] }
  0x98   : > { %13402 = vmatpush3.bf16.msra.mxu0 %v14835_v42  ;;  %v14886_v42 = vld [vmem:[%s15819_s24 + $0x5f0] sm:$0xff]  }
  0x99   : > { %13424 = vmatpush3.bf16.msra.mxu1 %v14836_v43  ;;  %13403 = vmatprep.subr.bf16.mxu0 %v14837_v44  ;;  %v14887_v43 = vld [vmem:[%s15819_s24 + $0x530] sm:$0xff]  }
  0x9a   : > { %13425 = vmatprep.subr.bf16.mxu1 %v14838_v45  ;;  %v14888_v44 = vld [vmem:[%s15819_s24 + $0x5b0] sm:$0xff]   ;;  %v14889_v45 = vld [vmem:[%s15819_s24 + $0x578] sm:$0xff]  }
  0x9c   : > { %13404 = vmatpush3.bf16.msra.mxu0 %v14839_v46  ;;  %v14890_v46 = vld [vmem:[%s15819_s24 + $0x5f8] sm:$0xff]  }
  0x9d   : > { %13426 = vmatpush3.bf16.msra.mxu1 %v14840_v47  ;;  %13405 = vmatprep.subr.bf16.mxu0 %v14841_v48  ;;  %v14891_v47 = vld [vmem:[%s15819_s24 + $0x538] sm:$0xff]  }
  0x9e   : > { %13427 = vmatprep.subr.bf16.mxu1 %v14842_v49  ;;  %v14892_v48 = vld [vmem:[%s15819_s24 + $0x5b8] sm:$0xff]   ;;  %v2493_v49 = vrot.slane %v16031_v12, %v15821_v6  ;;  %v14918_v12 = vld [vmem:[%s15819_s24 + $0x670] sm:$0xff]  }
  0xa0   : > { %13406 = vmatpush3.bf16.msra.mxu0 %v14843_v50  ;;  %v14894_v50 = vld [vmem:[%s15819_s24 + $0x640] sm:$0xff]  }
  0xa1   : > { %13428 = vmatpush3.bf16.msra.mxu1 %v14844_v51  ;;  %13407 = vmatprep.subr.bf16.mxu0 %v14845_v52  ;;  %v14895_v51 = vld [vmem:[%s15819_s24 + $0x6c0] sm:$0xff]  }
  0xa2   : > { %13429 = vmatprep.subr.bf16.mxu1 %v14846_v53  ;;  %v14896_v52 = vld [vmem:[%s15819_s24 + $0x600] sm:$0xff]  }
  0xa3   : > { %v14897_v53 = vld [vmem:[%s15819_s24 + $0x680] sm:$0xff]  }
  0xa4   : > { %13408 = vmatpush3.bf16.msra.mxu0 %v14847_v54  ;;  %v2509_v54 = vcombine.high %v2493_v49, %v2493_v49 }
  0xa5   : > { %13430 = vmatpush3.bf16.msra.mxu1 %v14848_v55  ;;  %13409 = vmatprep.subr.bf16.mxu0 %v14849_v56  ;;  %v14898_v55 = vld [vmem:[%s15819_s24 + $0x648] sm:$0xff]  }
  0xa6   : > { %13431 = vmatprep.subr.bf16.mxu1 %v14850_v57  ;;  %v14899_v56 = vld [vmem:[%s15819_s24 + $0x6c8] sm:$0xff]  }
  0xa7   : > { %v14900_v57 = vld [vmem:[%s15819_s24 + $0x608] sm:$0xff]  }
  0xa8   : > { %13410 = vmatpush3.bf16.msra.mxu0 %v14851_v58  ;;  %v14901_v58 = vld [vmem:[%s15819_s24 + $0x688] sm:$0xff]  }
  0xa9   : > { %13432 = vmatpush3.bf16.msra.mxu1 %v14852_v59  ;;  %13411 = vmatprep.subr.bf16.mxu0 %v14853_v60  ;;  %v14902_v59 = vld [vmem:[%s15819_s24 + $0x650] sm:$0xff]  }
  0xaa   : > { %13433 = vmatprep.subr.bf16.mxu1 %v14854_v61  ;;  %v14903_v60 = vld [vmem:[%s15819_s24 + $0x6d0] sm:$0xff]  }
  0xab   : > { %v14904_v61 = vld [vmem:[%s15819_s24 + $0x610] sm:$0xff]  }
  0xac   : > { %13412 = vmatpush3.bf16.msra.mxu0 %v14855_v62  ;;  %v14905_v62 = vld [vmem:[%s15819_s24 + $0x690] sm:$0xff]  }
  0xad   : > { %13434 = vmatpush3.bf16.msra.mxu1 %v14856_v63  ;;  %13413 = vmatprep.subr.bf16.mxu0 %v14857_v0  ;;  %v14906_v63 = vld [vmem:[%s15819_s24 + $0x658] sm:$0xff]  }
  0xae   : > { %13435 = vmatprep.subr.bf16.mxu1 %v14858_v1  ;;  %v14907_v0 = vld [vmem:[%s15819_s24 + $0x6d8] sm:$0xff]  }
  0xaf   : > { %v14908_v1 = vld [vmem:[%s15819_s24 + $0x618] sm:$0xff]  }
  0xb0   : > { %13414 = vmatpush3.bf16.msra.mxu0 %v14859_v2  ;;  %v14909_v2 = vld [vmem:[%s15819_s24 + $0x698] sm:$0xff]  }
  0xb1   : > { %13436 = vmatpush3.bf16.msra.mxu1 %v14860_v3  ;;  %13443 = vmatprep.subr.bf16.mxu0 %v14861_v7  ;;  %v14910_v3 = vld [vmem:[%s15819_s24 + $0x660] sm:$0xff]  }
  0xb2   : > { %13465 = vmatprep.subr.bf16.mxu1 %v14862_v9  ;;  %v14913_v7 = vld [vmem:[%s15819_s24 + $0x6a0] sm:$0xff]   ;;  %v14915_v9 = vld [vmem:[%s15819_s24 + $0x6e8] sm:$0xff]  }
  0xb3   : > { %9774 = vmatmul.mubr.bf16.vlgmr.msra.gmra.mrb[16].mxu0 %v2486_v11  ;;  %v14917_v11 = vld [vmem:[%s15819_s24 + $0x6a8] sm:$0xff]  }
  0xb4   : > { %13444 = vmatpush3.bf16.msra.mxu0 %v14863_v13  ;;  %9814 = vmatmul.mubr.bf16.vlgmr.msra.gmra.mrb[16].mxu1 %v2508_v17  ;;  %v14919_v13 = vld [vmem:[%s15819_s24 + $0x6f0] sm:$0xff]   ;;  %v14923_v17 = vld [vmem:[%s15819_s24 + $0x6f8] sm:$0xff]  }
  0xb5   : > { %13445 = vmatprep.subr.bf16.mxu0 %v14865_v18  ;;  %13466 = vmatpush3.bf16.msra.mxu1 %v14864_v15  ;;  %v14921_v15 = vld [vmem:[%s15819_s24 + $0x6b0] sm:$0xff]   ;;  %v14924_v18 = vld [vmem:[%s15819_s24 + $0x638] sm:$0xff]  }
  0xb6   : > { %9853 = vmatprep.mubr.bf16.mxu0 %v2507_v21  ;;  %13467 = vmatprep.subr.bf16.mxu1 %v14866_v20  ;;  %v14925_v20 = vld [vmem:[%s15819_s24 + $0x6b8] sm:$0xff]   ;;  %v2519_v21 = vrot.slane %v288_v19, %v15821_v6 }
  0xb7   : > { %9893 = vmatprep.mubr.bf16.mxu1 %v2511_v24 }
  0xb8   : > { %13446 = vmatpush3.bf16.msra.mxu0 %v14867_v22  ;;  %v2512_v22 = vcombine.high %v288_v19, %v288_v19  ;;  %v2527_v24 = vcombine.high %v2519_v21, %v2519_v21  ;;  %v14964_v19 = vld [vmem:[%s15819_s24 + $0x8c8] sm:$0xff]  }
  0xb9   : > { %13447 = vmatprep.subr.bf16.mxu0 %v14869_v25  ;;  %13468 = vmatpush3.bf16.msra.mxu1 %v14868_v23  ;;  %v14926_v23 = vld [vmem:[%s15819_s24 + $0x740] sm:$0xff]   ;;  %v2535_v25 = vrot.slane %v2519_v21, %v15821_v6  ;;  %v14967_v21 = vld [vmem:[%s15819_s24 + $0x850] sm:$0xff]  }
  0xba   : > { %13469 = vmatprep.subr.bf16.mxu1 %v14870_v26  ;;  %v14927_v26 = vld [vmem:[%s15819_s24 + $0x7c0] sm:$0xff]  }
  0xbc   : > { %13448 = vmatpush3.bf16.msra.mxu0 %v14871_v27  ;;  %v16109_v27 = vrot.slane %v2512_v22, %v15821_v6  ;;  %v14966_v22 = vld [vmem:[%s15819_s24 + $0x888] sm:$0xff]  }
  0xbd   : > { %13449 = vmatprep.subr.bf16.mxu0 %v14873_v29  ;;  %13470 = vmatpush3.bf16.msra.mxu1 %v14872_v28  ;;  %v14928_v28 = vld [vmem:[%s15819_s24 + $0x700] sm:$0xff]   ;;  %v2549_v29 = vrot.slane %v2527_v24, %v15821_v6  ;;  %v14969_v24 = vld [vmem:[%s15819_s24 + $0x810] sm:$0xff]  }
  0xbe   : > { %13471 = vmatprep.subr.bf16.mxu1 %v14874_v30  ;;  %v14929_v30 = vld [vmem:[%s15819_s24 + $0x780] sm:$0xff]  }
  0xc0   : > { %13450 = vmatpush3.bf16.msra.mxu0 %v14875_v31  ;;  %v2528_v31 = vcombine.high %v16109_v27, %v16109_v27 }
  0xc1   : > { %13451 = vmatprep.subr.bf16.mxu0 %v14877_v33  ;;  %13472 = vmatpush3.bf16.msra.mxu1 %v14876_v32  ;;  %v2557_v32 = vcombine.high %v2535_v25, %v2535_v25  ;;  %v14930_v33 = vld [vmem:[%s15819_s24 + $0x748] sm:$0xff]  }
  0xc2   : > { %13473 = vmatprep.subr.bf16.mxu1 %v14878_v34  ;;  %v2559_v34 = vcombine.high %v2549_v29, %v2549_v29 }
  0xc4   : > { %13452 = vmatpush3.bf16.msra.mxu0 %v14879_v35  ;;  %v14931_v35 = vld [vmem:[%s15819_s24 + $0x7c8] sm:$0xff]  }
  0xc5   : > { %13453 = vmatprep.subr.bf16.mxu0 %v14881_v37  ;;  %13474 = vmatpush3.bf16.msra.mxu1 %v14880_v36  ;;  %v2556_v36 = vrot.slane %v2528_v31, %v15821_v6  ;;  %v14932_v37 = vld [vmem:[%s15819_s24 + $0x708] sm:$0xff]   ;;  %v14976_v31 = vld [vmem:[%s15819_s24 + $0x8e0] sm:$0xff]  }
  0xc6   : > { %13475 = vmatprep.subr.bf16.mxu1 %v14882_v38  ;;  %v14933_v38 = vld [vmem:[%s15819_s24 + $0x788] sm:$0xff]  }
  0xc8   : > { %13454 = vmatpush3.bf16.msra.mxu0 %v14883_v39  ;;  %v2560_v39 = vcombine.high %v2556_v36, %v2556_v36 }
  0xc9   : > { %13455 = vmatprep.subr.bf16.mxu0 %v14885_v41  ;;  %13476 = vmatpush3.bf16.msra.mxu1 %v14884_v40  ;;  %v14934_v40 = vld [vmem:[%s15819_s24 + $0x750] sm:$0xff]  }
  0xca   : > { %13477 = vmatprep.subr.bf16.mxu1 %v14886_v42  ;;  %v14935_v41 = vld [vmem:[%s15819_s24 + $0x7d0] sm:$0xff]  }
  0xcb   : > { %v14936_v42 = vld [vmem:[%s15819_s24 + $0x710] sm:$0xff]  }
  0xcc   : > { %13456 = vmatpush3.bf16.msra.mxu0 %v14887_v43  ;;  %v14937_v43 = vld [vmem:[%s15819_s24 + $0x790] sm:$0xff]  }
  0xcd   : > { %13457 = vmatprep.subr.bf16.mxu0 %v14889_v45  ;;  %13478 = vmatpush3.bf16.msra.mxu1 %v14888_v44  ;;  %v14938_v44 = vld [vmem:[%s15819_s24 + $0x758] sm:$0xff]  }
  0xce   : > { %13479 = vmatprep.subr.bf16.mxu1 %v14890_v46  ;;  %v14939_v45 = vld [vmem:[%s15819_s24 + $0x7d8] sm:$0xff]  }
  0xcf   : > { %v14940_v46 = vld [vmem:[%s15819_s24 + $0x718] sm:$0xff]  }
  0xd0   : > { %13458 = vmatpush3.bf16.msra.mxu0 %v14891_v47  ;;  %v14941_v47 = vld [vmem:[%s15819_s24 + $0x798] sm:$0xff]  }
  0xd1   : > { %13487 = vmatprep.subr.bf16.mxu0 %v14894_v50  ;;  %13480 = vmatpush3.bf16.msra.mxu1 %v14892_v48  ;;  %v14942_v48 = vld [vmem:[%s15819_s24 + $0x760] sm:$0xff]  }
  0xd2   : > { %13509 = vmatprep.subr.bf16.mxu1 %v14895_v51  ;;  %v14944_v50 = vld [vmem:[%s15819_s24 + $0x720] sm:$0xff]  }
  0xd3   : > { %9854 = vmatmul.mubr.bf16.vlgmr.msra.gmra.mrb[20].mxu0 %v2493_v49  ;;  %v14943_v49 = vld [vmem:[%s15819_s24 + $0x7e0] sm:$0xff]  }
  0xd4   : > { %13488 = vmatpush3.bf16.msra.mxu0 %v14896_v52  ;;  %9894 = vmatmul.mubr.bf16.vlgmr.msra.gmra.mrb[20].mxu1 %v2509_v54  ;;  %v14945_v51 = vld [vmem:[%s15819_s24 + $0x7a0] sm:$0xff]  }
  0xd5   : > { %13489 = vmatprep.subr.bf16.mxu0 %v14898_v55  ;;  %13510 = vmatpush3.bf16.msra.mxu1 %v14897_v53  ;;  %v14946_v53 = vld [vmem:[%s15819_s24 + $0x768] sm:$0xff]  }
  0xd6   : > { %13511 = vmatprep.subr.bf16.mxu1 %v14899_v56  ;;  %9933 = vmatprep.mubr.bf16.mxu0 %v2549_v29  ;;  %v14947_v56 = vld [vmem:[%s15819_s24 + $0x7e8] sm:$0xff]   ;;  %v14975_v29 = vld [vmem:[%s15819_s24 + $0x860] sm:$0xff]  }
  0xd7   : > { %9973 = vmatprep.mubr.bf16.mxu1 %v2559_v34  ;;  %v14979_v34 = vld [vmem:[%s15819_s24 + $0x868] sm:$0xff]  }
  0xd8   : > { %13490 = vmatpush3.bf16.msra.mxu0 %v14900_v57  ;;  %v14948_v57 = vld [vmem:[%s15819_s24 + $0x728] sm:$0xff]  }
  0xd9   : > { %13491 = vmatprep.subr.bf16.mxu0 %v14902_v59  ;;  %13512 = vmatpush3.bf16.msra.mxu1 %v14901_v58 }
  0xda   : > { %13513 = vmatprep.subr.bf16.mxu1 %v14903_v60 }
  0xdc   : > { %13492 = vmatpush3.bf16.msra.mxu0 %v14904_v61 }
  0xdd   : > { %13493 = vmatprep.subr.bf16.mxu0 %v14906_v63  ;;  %13514 = vmatpush3.bf16.msra.mxu1 %v14905_v62 }
  0xde   : > { %13515 = vmatprep.subr.bf16.mxu1 %v14907_v0 }
  0xe0   : > { %13494 = vmatpush3.bf16.msra.mxu0 %v14908_v1  ;;  %v14950_v1 = vld [vmem:[%s15819_s24 + $0x770] sm:$0xff]  }
  0xe1   : > { %13495 = vmatprep.subr.bf16.mxu0 %v14910_v3  ;;  %13516 = vmatpush3.bf16.msra.mxu1 %v14909_v2  ;;  %v14949_v3 = vld [vmem:[%s15819_s24 + $0x7a8] sm:$0xff]  }
  0xe2   : > { %13517 = vmatprep.subr.bf16.mxu1 %v14911_v4  ;;  %v14951_v4 = vld [vmem:[%s15819_s24 + $0x7f0] sm:$0xff]  }
  0xe4   : > { %13496 = vmatpush3.bf16.msra.mxu0 %v14912_v5  ;;  %v14952_v5 = vld [vmem:[%s15819_s24 + $0x730] sm:$0xff]  }
  0xe5   : > { %13497 = vmatprep.subr.bf16.mxu0 %v14914_v8  ;;  %13518 = vmatpush3.bf16.msra.mxu1 %v14913_v7  ;;  %v14954_v7 = vld [vmem:[%s15819_s24 + $0x778] sm:$0xff]   ;;  %v14953_v8 = vld [vmem:[%s15819_s24 + $0x7b0] sm:$0xff]  }
  0xe6   : > { %13519 = vmatprep.subr.bf16.mxu1 %v14915_v9  ;;  %v14955_v9 = vld [vmem:[%s15819_s24 + $0x7f8] sm:$0xff]  }
  0xe8   : > { %13498 = vmatpush3.bf16.msra.mxu0 %v14916_v10  ;;  %v14956_v10 = vld [vmem:[%s15819_s24 + $0x738] sm:$0xff]  }
  0xe9   : > { %13499 = vmatprep.subr.bf16.mxu0 %v14918_v12  ;;  %13520 = vmatpush3.bf16.msra.mxu1 %v14917_v11  ;;  %v2542_v11 = vrot.slane %v16109_v27, %v15821_v6  ;;  %v14959_v12 = vld [vmem:[%s15819_s24 + $0x840] sm:$0xff]   ;;  %v14972_v27 = vld [vmem:[%s15819_s24 + $0x8d8] sm:$0xff]  }
  0xea   : > { %13521 = vmatprep.subr.bf16.mxu1 %v14919_v13  ;;  %v14957_v13 = vld [vmem:[%s15819_s24 + $0x7b8] sm:$0xff]  }
  0xec   : > { %13500 = vmatpush3.bf16.msra.mxu0 %v14920_v14  ;;  %v14960_v14 = vld [vmem:[%s15819_s24 + $0x8c0] sm:$0xff]  }
  0xed   : > { %13501 = vmatprep.subr.bf16.mxu0 %v14922_v16  ;;  %13522 = vmatpush3.bf16.msra.mxu1 %v14921_v15  ;;  %v14961_v15 = vld [vmem:[%s15819_s24 + $0x800] sm:$0xff]   ;;  %v2558_v16 = vcombine.high %v2542_v11, %v2542_v11 }
  0xee   : > { %13523 = vmatprep.subr.bf16.mxu1 %v14923_v17  ;;  %v14963_v17 = vld [vmem:[%s15819_s24 + $0x848] sm:$0xff]  }
  0xf0   : > { %13502 = vmatpush3.bf16.msra.mxu0 %v14924_v18  ;;  %v14962_v18 = vld [vmem:[%s15819_s24 + $0x880] sm:$0xff]  }
  0xf1   : > { %13531 = vmatprep.subr.bf16.mxu0 %v14926_v23  ;;  %13524 = vmatpush3.bf16.msra.mxu1 %v14925_v20  ;;  %v14965_v20 = vld [vmem:[%s15819_s24 + $0x808] sm:$0xff]   ;;  %v14968_v23 = vld [vmem:[%s15819_s24 + $0x8d0] sm:$0xff]  }
  0xf2   : > { %13553 = vmatprep.subr.bf16.mxu1 %v14927_v26  ;;  %v14970_v26 = vld [vmem:[%s15819_s24 + $0x890] sm:$0xff]  }
  0xf3   : > { %9934 = vmatmul.mubr.bf16.vlgmr.msra.gmra.mrb[24].mxu0 %v2535_v25  ;;  %v14971_v25 = vld [vmem:[%s15819_s24 + $0x858] sm:$0xff]  }
  0xf4   : > { %13532 = vmatpush3.bf16.msra.mxu0 %v14928_v28  ;;  %9974 = vmatmul.mubr.bf16.vlgmr.msra.gmra.mrb[24].mxu1 %v2557_v32  ;;  %v14973_v28 = vld [vmem:[%s15819_s24 + $0x818] sm:$0xff]   ;;  %v14977_v32 = vld [vmem:[%s15819_s24 + $0x820] sm:$0xff]  }
  0xf5   : > { %13533 = vmatprep.subr.bf16.mxu0 %v14930_v33  ;;  %13554 = vmatpush3.bf16.msra.mxu1 %v14929_v30  ;;  %v14974_v30 = vld [vmem:[%s15819_s24 + $0x898] sm:$0xff]  }
  0xf6   : > { %10013 = vmatprep.mubr.bf16.mxu0 %v2556_v36  ;;  %13555 = vmatprep.subr.bf16.mxu1 %v14931_v35  ;;  %v14978_v35 = vld [vmem:[%s15819_s24 + $0x8a0] sm:$0xff]  }
  0xf7   : > { %10053 = vmatprep.mubr.bf16.mxu1 %v2560_v39 }
  0xf8   : > { %13534 = vmatpush3.bf16.msra.mxu0 %v14932_v37 }
  0xf9   : > { %13535 = vmatprep.subr.bf16.mxu0 %v14934_v40  ;;  %13556 = vmatpush3.bf16.msra.mxu1 %v14933_v38  ;;  %v14980_v38 = vld [vmem:[%s15819_s24 + $0x8e8] sm:$0xff]  }
  0xfa   : > { %13557 = vmatprep.subr.bf16.mxu1 %v14935_v41 }
  0xfc   : > { %13536 = vmatpush3.bf16.msra.mxu0 %v14936_v42 }
  0xfd   : > { %13537 = vmatprep.subr.bf16.mxu0 %v14938_v44  ;;  %13558 = vmatpush3.bf16.msra.mxu1 %v14937_v43  ;;  %v14981_v44 = vld [vmem:[%s15819_s24 + $0x828] sm:$0xff]  }
  0xfe   : > { %13559 = vmatprep.subr.bf16.mxu1 %v14939_v45  ;;  %v14982_v45 = vld [vmem:[%s15819_s24 + $0x8a8] sm:$0xff]  }
 0x100   : > { %13538 = vmatpush3.bf16.msra.mxu0 %v14940_v46 }
 0x101   : > { %13539 = vmatprep.subr.bf16.mxu0 %v14942_v48  ;;  %13560 = vmatpush3.bf16.msra.mxu1 %v14941_v47 }
 0x102   : > { %13561 = vmatprep.subr.bf16.mxu1 %v14943_v49  ;;  %v14983_v49 = vld [vmem:[%s15819_s24 + $0x870] sm:$0xff]  }
 0x104   : > { %13540 = vmatpush3.bf16.msra.mxu0 %v14944_v50 }
 0x105   : > { %13541 = vmatprep.subr.bf16.mxu0 %v14946_v53  ;;  %13562 = vmatpush3.bf16.msra.mxu1 %v14945_v51  ;;  %v14984_v51 = vld [vmem:[%s15819_s24 + $0x8f0] sm:$0xff]   ;;  %v14987_v53 = vld [vmem:[%s15819_s24 + $0x878] sm:$0xff]  }
 0x106   : > { %v13239_v52 = vpop.f32.mrb[0].mxu0  ;;  %13563 = vmatprep.subr.bf16.mxu1 %v14947_v56  ;;  %v14989_v56 = vld [vmem:[%s15819_s24 + $0x838] sm:$0xff]  }
 0x107   : > { %v13261_v54 = vpop.f32.mrb[0].mxu1  ;;  %v13240_v55 = vpop.f32.mrb[1].mxu0 }
 0x108   : > { %v13241_v58 = vadd.f32 %v13240_v55, %v13239_v52  ;;  %v13262_v59 = vpop.f32.mrb[1].mxu1  ;;  %v13242_v60 = vpop.f32.mrb[2].mxu0  ;;  %13542 = vmatpush3.bf16.msra.mxu0 %v14948_v57  ;;  %v14985_v52 = vld [vmem:[%s15819_s24 + $0x830] sm:$0xff]   ;;  %v14988_v55 = vld [vmem:[%s15819_s24 + $0x8f8] sm:$0xff]   ;;  %v289_v57 = vld [vmem:[%s17178_s0 + $0x20] sm:$0xff] }
 0x109   : > { %v13263_v61 = vadd.f32 %v13262_v59, %v13261_v54  ;;  %v13264_v62 = vpop.f32.mrb[2].mxu1  ;;  %v13243_v63 = vpop.f32.mrb[3].mxu0  ;;  %13543 = vmatprep.subr.bf16.mxu0 %v14950_v1  ;;  %13564 = vmatpush3.bf16.msra.mxu1 %v14949_v3  ;;  %v14986_v54 = vld [vmem:[%s15819_s24 + $0x8b0] sm:$0xff]   ;;  %v14991_v59 = vld [vmem:[%s15819_s24 + $0x940] sm:$0xff]   ;;  %v2561_v60 = vcombine.high %v289_v57, %v289_v57 }
 0x10a   : > { %v13265_v0 = vpop.f32.mrb[3].mxu1  ;;  %13565 = vmatprep.subr.bf16.mxu1 %v14951_v4  ;;  %v14994_v4 = vld [vmem:[%s15819_s24 + $0x980] sm:$0xff]  }
 0x10b   : > { %v16137_v2 = vadd.f32 %v13263_v61, %v13241_v58  ;;  %v2568_v58 = vrot.slane %v289_v57, %v15821_v6  ;;  %v14990_v61 = vld [vmem:[%s15819_s24 + $0x8b8] sm:$0xff]   ;;  %v14992_v0 = vld [vmem:[%s15819_s24 + $0x9c0] sm:$0xff]   ;;  %v16192_v1 = vrot.slane %v2561_v60, %v15821_v6  ;;  %v15028_v57 = vld [vmem:[%s15819_s24 + $0xa48] sm:$0xff]  }
 0x10c   : > { %13544 = vmatpush3.bf16.msra.mxu0 %v14952_v5  ;;  %v15031_v60 = vld [vmem:[%s15819_s24 + $0xa88] sm:$0xff]  }
 0x10d   : > { %13545 = vmatprep.subr.bf16.mxu0 %v14954_v7  ;;  %13566 = vmatpush3.bf16.msra.mxu1 %v14953_v8  ;;  %v2576_v62 = vcombine.high %v2568_v58, %v2568_v58  ;;  %v2584_v63 = vrot.slane %v2568_v58, %v15821_v6  ;;  %v2577_v5 = vcombine.high %v16192_v1, %v16192_v1  ;;  %v14995_v8 = vld [vmem:[%s15819_s24 + $0x948] sm:$0xff]  }
 0x10e   : > { %13567 = vmatprep.subr.bf16.mxu1 %v14955_v9  ;;  %v15029_v58 = vld [vmem:[%s15819_s24 + $0xac8] sm:$0xff]  }
 0x10f   : > { %v2598_v3 = vrot.slane %v2576_v62, %v15821_v6  ;;  %v2606_v7 = vcombine.high %v2584_v63, %v2584_v63  ;;  %v15033_v62 = vld [vmem:[%s15819_s24 + $0xad0] sm:$0xff]  }
 0x110   : > { %13546 = vmatpush3.bf16.msra.mxu0 %v14956_v10  ;;  %v14996_v10 = vld [vmem:[%s15819_s24 + $0x9c8] sm:$0xff]  }
 0x111   : > { %13575 = vmatprep.subr.bf16.mxu0 %v14959_v12  ;;  %13568 = vmatpush3.bf16.msra.mxu1 %v14957_v13  ;;  %v2608_v9 = vcombine.high %v2598_v3, %v2598_v3  ;;  %v14997_v12 = vld [vmem:[%s15819_s24 + $0x908] sm:$0xff]  }
 0x112   : > { %13597 = vmatprep.subr.bf16.mxu1 %v14960_v14  ;;  %v14998_v13 = vld [vmem:[%s15819_s24 + $0x988] sm:$0xff]  }
 0x113   : > { %10014 = vmatmul.mubr.bf16.vlgmr.msra.gmra.mrb[28].mxu0 %v2542_v11  ;;  %v2605_v11 = vrot.slane %v2577_v5, %v15821_v6  ;;  %v15040_v5 = vld [vmem:[%s15819_s24 + $0xa60] sm:$0xff]  }
 0x114   : > { %13576 = vmatpush3.bf16.msra.mxu0 %v14961_v15  ;;  %10054 = vmatmul.mubr.bf16.vlgmr.msra.gmra.mrb[28].mxu1 %v2558_v16  ;;  %v14999_v15 = vld [vmem:[%s15819_s24 + $0x950] sm:$0xff]  }
 0x115   : > { %13577 = vmatprep.subr.bf16.mxu0 %v14963_v17  ;;  %13598 = vmatpush3.bf16.msra.mxu1 %v14962_v18  ;;  %v2609_v14 = vcombine.high %v2605_v11, %v2605_v11  ;;  %v15000_v16 = vld [vmem:[%s15819_s24 + $0x9d0] sm:$0xff]  }
 0x116   : > { %13599 = vmatprep.subr.bf16.mxu1 %v14964_v19  ;;  %10093 = vmatprep.mubr.bf16.mxu0 %v2598_v3  ;;  %v15001_v17 = vld [vmem:[%s15819_s24 + $0x910] sm:$0xff]   ;;  %v15003_v19 = vld [vmem:[%s15819_s24 + $0x958] sm:$0xff]  }
 0x117   : > { %10133 = vmatprep.mubr.bf16.mxu1 %v2608_v9  ;;  %v15002_v18 = vld [vmem:[%s15819_s24 + $0x990] sm:$0xff]   ;;  %v15038_v3 = vld [vmem:[%s15819_s24 + $0xa18] sm:$0xff]   ;;  %v15043_v9 = vld [vmem:[%s15819_s24 + $0xaa0] sm:$0xff]  }
 0x118   : > { %13578 = vmatpush3.bf16.msra.mxu0 %v14965_v20  ;;  %v15004_v20 = vld [vmem:[%s15819_s24 + $0x9d8] sm:$0xff]  }
 0x119   : > { %13579 = vmatprep.subr.bf16.mxu0 %v14967_v21  ;;  %13600 = vmatpush3.bf16.msra.mxu1 %v14966_v22  ;;  %v15005_v21 = vld [vmem:[%s15819_s24 + $0x918] sm:$0xff]  }
 0x11a   : > { %13601 = vmatprep.subr.bf16.mxu1 %v14968_v23  ;;  %v15006_v22 = vld [vmem:[%s15819_s24 + $0x998] sm:$0xff]   ;;  %v15007_v23 = vld [vmem:[%s15819_s24 + $0x960] sm:$0xff]  }
 0x11c   : > { %13580 = vmatpush3.bf16.msra.mxu0 %v14969_v24  ;;  %v15008_v24 = vld [vmem:[%s15819_s24 + $0x9e0] sm:$0xff]  }
 0x11d   : > { %13581 = vmatprep.subr.bf16.mxu0 %v14971_v25  ;;  %13602 = vmatpush3.bf16.msra.mxu1 %v14970_v26  ;;  %v15009_v25 = vld [vmem:[%s15819_s24 + $0x920] sm:$0xff]  }
 0x11e   : > { %13603 = vmatprep.subr.bf16.mxu1 %v14972_v27  ;;  %v15011_v27 = vld [vmem:[%s15819_s24 + $0x968] sm:$0xff]  }
 0x120   : > { %13582 = vmatpush3.bf16.msra.mxu0 %v14973_v28 }
 0x121   : > { %13583 = vmatprep.subr.bf16.mxu0 %v14975_v29  ;;  %13604 = vmatpush3.bf16.msra.mxu1 %v14974_v30  ;;  %v15010_v30 = vld [vmem:[%s15819_s24 + $0x9a0] sm:$0xff]  }
 0x122   : > { %13605 = vmatprep.subr.bf16.mxu1 %v14976_v31 }
 0x124   : > { %13584 = vmatpush3.bf16.msra.mxu0 %v14977_v32 }
 0x125   : > { %13585 = vmatprep.subr.bf16.mxu0 %v14979_v34  ;;  %13606 = vmatpush3.bf16.msra.mxu1 %v14978_v35 }
 0x126   : > { %v13283_v33 = vpop.f32.mrb[4].mxu0  ;;  %13607 = vmatprep.subr.bf16.mxu1 %v14980_v38 }
 0x127   : > { %v13305_v36 = vpop.f32.mrb[4].mxu1  ;;  %v13284_v37 = vpop.f32.mrb[5].mxu0 }
 0x128   : > { %v13285_v39 = vadd.f32 %v13284_v37, %v13283_v33  ;;  %v13306_v40 = vpop.f32.mrb[5].mxu1  ;;  %v13286_v41 = vpop.f32.mrb[6].mxu0  ;;  %13586 = vmatpush3.bf16.msra.mxu0 %v14981_v44  ;;  %v15012_v33 = vld [vmem:[%s15819_s24 + $0x9e8] sm:$0xff]   ;;  %v15016_v44 = vld [vmem:[%s15819_s24 + $0x9f0] sm:$0xff]  }
 0x129   : > { %v13307_v42 = vadd.f32 %v13306_v40, %v13305_v36  ;;  %v13308_v43 = vpop.f32.mrb[6].mxu1  ;;  %v13287_v46 = vpop.f32.mrb[7].mxu0  ;;  %13587 = vmatprep.subr.bf16.mxu0 %v14983_v49  ;;  %13608 = vmatpush3.bf16.msra.mxu1 %v14982_v45  ;;  %v15013_v37 = vld [vmem:[%s15819_s24 + $0x928] sm:$0xff]   ;;  %v15017_v45 = vld [vmem:[%s15819_s24 + $0x930] sm:$0xff]   ;;  %v15021_v49 = vld [vmem:[%s15819_s24 + $0x938] sm:$0xff]  }
 0x12a   : > { %v9536_v47 = vadd.f32 %v13285_v39, %v16137_v2  ;;  %v13309_v48 = vpop.f32.mrb[7].mxu1  ;;  %13609 = vmatprep.subr.bf16.mxu1 %v14984_v51  ;;  %v14993_v2 = vld [vmem:[%s15819_s24 + $0x900] sm:$0xff]   ;;  %v15014_v39 = vld [vmem:[%s15819_s24 + $0x9a8] sm:$0xff]   ;;  %v15018_v46 = vld [vmem:[%s15819_s24 + $0x9b0] sm:$0xff]   ;;  %v2591_v51 = vrot.slane %v16192_v1, %v15821_v6 }
 0x12b   : > { %v15020_v48 = vld [vmem:[%s15819_s24 + $0x9f8] sm:$0xff]  }
 0x12c   : > { %v16175_v50 = vadd.f32 %v13307_v42, %v9536_v47  ;;  %13588 = vmatpush3.bf16.msra.mxu0 %v14985_v52  ;;  %v15015_v42 = vld [vmem:[%s15819_s24 + $0x970] sm:$0xff]   ;;  %v15019_v47 = vld [vmem:[%s15819_s24 + $0x978] sm:$0xff]   ;;  %v15024_v52 = vld [vmem:[%s15819_s24 + $0xa40] sm:$0xff]  }
 0x12d   : > { %13589 = vmatprep.subr.bf16.mxu0 %v14987_v53  ;;  %13610 = vmatpush3.bf16.msra.mxu1 %v14986_v54  ;;  %v15025_v53 = vld [vmem:[%s15819_s24 + $0xac0] sm:$0xff]   ;;  %v15036_v1 = vld [vmem:[%s15819_s24 + $0xa58] sm:$0xff]  }
 0x12e   : > { %13611 = vmatprep.subr.bf16.mxu1 %v14988_v55  ;;  %v15026_v54 = vld [vmem:[%s15819_s24 + $0xa00] sm:$0xff]  }
 0x12f   : > { %v15027_v55 = vld [vmem:[%s15819_s24 + $0xa80] sm:$0xff]  }
 0x130   : > { %13590 = vmatpush3.bf16.msra.mxu0 %v14989_v56  ;;  %v2607_v56 = vcombine.high %v2591_v51, %v2591_v51 }
 0x131   : > { %13619 = vmatprep.subr.bf16.mxu0 %v14991_v59  ;;  %13612 = vmatpush3.bf16.msra.mxu1 %v14990_v61  ;;  %v15030_v59 = vld [vmem:[%s15819_s24 + $0xa08] sm:$0xff]   ;;  %v15032_v61 = vld [vmem:[%s15819_s24 + $0xa50] sm:$0xff]  }
 0x132   : > { %13641 = vmatprep.subr.bf16.mxu1 %v14992_v0  ;;  %v15035_v0 = vld [vmem:[%s15819_s24 + $0xa90] sm:$0xff]  }
 0x133   : > { %10094 = vmatmul.mubr.bf16.vlgmr.msra.gmra.mrb[32].mxu0 %v2584_v63  ;;  %v15034_v63 = vld [vmem:[%s15819_s24 + $0xa10] sm:$0xff]  }
 0x134   : > { %13620 = vmatpush3.bf16.msra.mxu0 %v14993_v2  ;;  %10134 = vmatmul.mubr.bf16.vlgmr.msra.gmra.mrb[32].mxu1 %v2606_v7  ;;  %v15037_v2 = vld [vmem:[%s15819_s24 + $0xad8] sm:$0xff]   ;;  %v15041_v7 = vld [vmem:[%s15819_s24 + $0xae0] sm:$0xff]  }
 0x135   : > { %13621 = vmatprep.subr.bf16.mxu0 %v14995_v8  ;;  %13642 = vmatpush3.bf16.msra.mxu1 %v14994_v4  ;;  %v15039_v4 = vld [vmem:[%s15819_s24 + $0xa98] sm:$0xff]   ;;  %v15042_v8 = vld [vmem:[%s15819_s24 + $0xa20] sm:$0xff]  }
 0x136   : > { %10173 = vmatprep.mubr.bf16.mxu0 %v2605_v11  ;;  %13643 = vmatprep.subr.bf16.mxu1 %v14996_v10 }
 0x137   : > { %10213 = vmatprep.mubr.bf16.mxu1 %v2609_v14  ;;  %v15045_v14 = vld [vmem:[%s15819_s24 + $0xae8] sm:$0xff]  }
 0x138   : > { %13622 = vmatpush3.bf16.msra.mxu0 %v14997_v12 }
 0x139   : > { %13623 = vmatprep.subr.bf16.mxu0 %v14999_v15  ;;  %13644 = vmatpush3.bf16.msra.mxu1 %v14998_v13  ;;  %v15044_v13 = vld [vmem:[%s15819_s24 + $0xa68] sm:$0xff]  }
 0x13a   : > { %13645 = vmatprep.subr.bf16.mxu1 %v15000_v16 }
 0x13c   : > { %13624 = vmatpush3.bf16.msra.mxu0 %v15001_v17 }
 0x13d   : > { %13625 = vmatprep.subr.bf16.mxu0 %v15003_v19  ;;  %13646 = vmatpush3.bf16.msra.mxu1 %v15002_v18 }
 0x13e   : > { %13647 = vmatprep.subr.bf16.mxu1 %v15004_v20  ;;  %v15046_v20 = vld [vmem:[%s15819_s24 + $0xa28] sm:$0xff]  }
 0x140   : > { %13626 = vmatpush3.bf16.msra.mxu0 %v15005_v21 }
 0x141   : > { %13627 = vmatprep.subr.bf16.mxu0 %v15007_v23  ;;  %13648 = vmatpush3.bf16.msra.mxu1 %v15006_v22  ;;  %v15047_v22 = vld [vmem:[%s15819_s24 + $0xaa8] sm:$0xff]  }
 0x142   : > { %13649 = vmatprep.subr.bf16.mxu1 %v15008_v24 }
 0x144   : > { %13628 = vmatpush3.bf16.msra.mxu0 %v15009_v25  ;;  %v15048_v25 = vld [vmem:[%s15819_s24 + $0xa70] sm:$0xff]  }
 0x145   : > { %13629 = vmatprep.subr.bf16.mxu0 %v15011_v27  ;;  %13650 = vmatpush3.bf16.msra.mxu1 %v15010_v30  ;;  %v15049_v27 = vld [vmem:[%s15819_s24 + $0xaf0] sm:$0xff]   ;;  %v15052_v30 = vld [vmem:[%s15819_s24 + $0xa78] sm:$0xff]  }
 0x146   : > { %v13327_v26 = vpop.f32.mrb[8].mxu0  ;;  %13651 = vmatprep.subr.bf16.mxu1 %v15012_v33  ;;  %v15055_v33 = vld [vmem:[%s15819_s24 + $0xab8] sm:$0xff]  }
 0x147   : > { %v13349_v28 = vpop.f32.mrb[8].mxu1  ;;  %v13328_v29 = vpop.f32.mrb[9].mxu0 }
 0x148   : > { %v13329_v31 = vadd.f32 %v13328_v29, %v13327_v26  ;;  %v13350_v32 = vpop.f32.mrb[9].mxu1  ;;  %v13330_v34 = vpop.f32.mrb[10].mxu0  ;;  %13630 = vmatpush3.bf16.msra.mxu0 %v15013_v37  ;;  %v15051_v29 = vld [vmem:[%s15819_s24 + $0xab0] sm:$0xff]  }
 0x149   : > { %v13351_v35 = vadd.f32 %v13350_v32, %v13349_v28  ;;  %v13352_v36 = vpop.f32.mrb[10].mxu1  ;;  %v13331_v40 = vpop.f32.mrb[11].mxu0  ;;  %13631 = vmatprep.subr.bf16.mxu0 %v15015_v42  ;;  %13652 = vmatpush3.bf16.msra.mxu1 %v15014_v39  ;;  %v15050_v28 = vld [vmem:[%s15819_s24 + $0xa30] sm:$0xff]   ;;  %v15054_v32 = vld [vmem:[%s15819_s24 + $0xa38] sm:$0xff]   ;;  %v290_v34 = vld [vmem:[%s17178_s0 + $0x28] sm:$0xff] }
 0x14a   : > { %v9616_v38 = vadd.f32 %v13329_v31, %v16175_v50  ;;  %v13353_v41 = vpop.f32.mrb[11].mxu1  ;;  %13653 = vmatprep.subr.bf16.mxu1 %v15016_v44  ;;  %v15022_v50 = vld [vmem:[%s15819_s24 + $0x9b8] sm:$0xff]   ;;  %v15056_v36 = vld [vmem:[%s15819_s24 + $0xb40] sm:$0xff]   ;;  %v2610_v37 = vcombine.high %v290_v34, %v290_v34 }
 0x14b   : > { %v15053_v31 = vld [vmem:[%s15819_s24 + $0xaf8] sm:$0xff]   ;;  %v15058_v42 = vld [vmem:[%s15819_s24 + $0xb00] sm:$0xff]  }
 0x14c   : > { %v16222_v43 = vadd.f32 %v13351_v35, %v9616_v38  ;;  %13632 = vmatpush3.bf16.msra.mxu0 %v15017_v45  ;;  %v2617_v35 = vrot.slane %v290_v34, %v15821_v6  ;;  %v15057_v38 = vld [vmem:[%s15819_s24 + $0xbc0] sm:$0xff]   ;;  %v16276_v41 = vrot.slane %v2610_v37, %v15821_v6  ;;  %v15094_v34 = vld [vmem:[%s15819_s24 + $0xcc8] sm:$0xff]   ;;  %v15097_v37 = vld [vmem:[%s15819_s24 + $0xc50] sm:$0xff]  }
 0x14d   : > { %13633 = vmatprep.subr.bf16.mxu0 %v15019_v47  ;;  %13654 = vmatpush3.bf16.msra.mxu1 %v15018_v46  ;;  %v15059_v44 = vld [vmem:[%s15819_s24 + $0xb80] sm:$0xff]   ;;  %v15060_v47 = vld [vmem:[%s15819_s24 + $0xb48] sm:$0xff]  }
 0x14e   : > { %13655 = vmatprep.subr.bf16.mxu1 %v15020_v48  ;;  %v2625_v39 = vcombine.high %v2617_v35, %v2617_v35  ;;  %v2633_v40 = vrot.slane %v2617_v35, %v15821_v6  ;;  %v2626_v45 = vcombine.high %v16276_v41, %v16276_v41  ;;  %v15095_v35 = vld [vmem:[%s15819_s24 + $0xc08] sm:$0xff]  }
 0x150   : > { %13634 = vmatpush3.bf16.msra.mxu0 %v15021_v49  ;;  %v2655_v46 = vcombine.high %v2633_v40, %v2633_v40  ;;  %v15061_v49 = vld [vmem:[%s15819_s24 + $0xbc8] sm:$0xff]  }
 0x151   : > { %13663 = vmatprep.subr.bf16.mxu0 %v15024_v52  ;;  %13656 = vmatpush3.bf16.msra.mxu1 %v15022_v50  ;;  %v2654_v50 = vrot.slane %v2626_v45, %v15821_v6  ;;  %v15063_v52 = vld [vmem:[%s15819_s24 + $0xb88] sm:$0xff]   ;;  %v15105_v45 = vld [vmem:[%s15819_s24 + $0xc60] sm:$0xff]  }
 0x152   : > { %13685 = vmatprep.subr.bf16.mxu1 %v15025_v53 }
 0x153   : > { %10174 = vmatmul.mubr.bf16.vlgmr.msra.gmra.mrb[36].mxu0 %v2591_v51  ;;  %v15062_v51 = vld [vmem:[%s15819_s24 + $0xb08] sm:$0xff]   ;;  %v2658_v53 = vcombine.high %v2654_v50, %v2654_v50 }
 0x154   : > { %13664 = vmatpush3.bf16.msra.mxu0 %v15026_v54  ;;  %10214 = vmatmul.mubr.bf16.vlgmr.msra.gmra.mrb[36].mxu1 %v2607_v56  ;;  %v15064_v54 = vld [vmem:[%s15819_s24 + $0xb50] sm:$0xff]  }
 0x155   : > { %13665 = vmatprep.subr.bf16.mxu0 %v15028_v57  ;;  %13686 = vmatpush3.bf16.msra.mxu1 %v15027_v55  ;;  %v15065_v55 = vld [vmem:[%s15819_s24 + $0xbd0] sm:$0xff]  }
 0x156   : > { %13687 = vmatprep.subr.bf16.mxu1 %v15029_v58  ;;  %v15066_v56 = vld [vmem:[%s15819_s24 + $0xb10] sm:$0xff]   ;;  %v15068_v58 = vld [vmem:[%s15819_s24 + $0xb58] sm:$0xff]  }
 0x157   : > { %v15067_v57 = vld [vmem:[%s15819_s24 + $0xb90] sm:$0xff]  }
 0x158   : > { %13666 = vmatpush3.bf16.msra.mxu0 %v15030_v59  ;;  %v15069_v59 = vld [vmem:[%s15819_s24 + $0xbd8] sm:$0xff]  }
 0x159   : > { %13667 = vmatprep.subr.bf16.mxu0 %v15032_v61  ;;  %13688 = vmatpush3.bf16.msra.mxu1 %v15031_v60  ;;  %v15070_v60 = vld [vmem:[%s15819_s24 + $0xb18] sm:$0xff]  }
 0x15a   : > { %13689 = vmatprep.subr.bf16.mxu1 %v15033_v62  ;;  %v15071_v61 = vld [vmem:[%s15819_s24 + $0xb98] sm:$0xff]   ;;  %v15072_v62 = vld [vmem:[%s15819_s24 + $0xb60] sm:$0xff]  }
 0x15c   : > { %13668 = vmatpush3.bf16.msra.mxu0 %v15034_v63  ;;  %v15073_v63 = vld [vmem:[%s15819_s24 + $0xbe0] sm:$0xff]  }
 0x15d   : > { %13669 = vmatprep.subr.bf16.mxu0 %v15036_v1  ;;  %13690 = vmatpush3.bf16.msra.mxu1 %v15035_v0  ;;  %v15074_v0 = vld [vmem:[%s15819_s24 + $0xb20] sm:$0xff]  }
 0x15e   : > { %13691 = vmatprep.subr.bf16.mxu1 %v15037_v2  ;;  %v15075_v1 = vld [vmem:[%s15819_s24 + $0xba0] sm:$0xff]   ;;  %v15076_v2 = vld [vmem:[%s15819_s24 + $0xb68] sm:$0xff]  }
 0x160   : > { %13670 = vmatpush3.bf16.msra.mxu0 %v15038_v3  ;;  %v15077_v3 = vld [vmem:[%s15819_s24 + $0xbe8] sm:$0xff]  }
 0x161   : > { %13671 = vmatprep.subr.bf16.mxu0 %v15040_v5  ;;  %13692 = vmatpush3.bf16.msra.mxu1 %v15039_v4  ;;  %v15078_v5 = vld [vmem:[%s15819_s24 + $0xb28] sm:$0xff]  }
 0x162   : > { %13693 = vmatprep.subr.bf16.mxu1 %v15041_v7 }
 0x164   : > { %13672 = vmatpush3.bf16.msra.mxu0 %v15042_v8  ;;  %v15079_v8 = vld [vmem:[%s15819_s24 + $0xba8] sm:$0xff]  }
 0x165   : > { %13673 = vmatprep.subr.bf16.mxu0 %v15044_v13  ;;  %13694 = vmatpush3.bf16.msra.mxu1 %v15043_v9  ;;  %v15081_v13 = vld [vmem:[%s15819_s24 + $0xbf0] sm:$0xff]  }
 0x166   : > { %v13371_v10 = vpop.f32.mrb[12].mxu0  ;;  %13695 = vmatprep.subr.bf16.mxu1 %v15045_v14 }
 0x167   : > { %v13393_v11 = vpop.f32.mrb[12].mxu1  ;;  %v13372_v12 = vpop.f32.mrb[13].mxu0 }
 0x168   : > { %v13373_v15 = vadd.f32 %v13372_v12, %v13371_v10  ;;  %v13394_v16 = vpop.f32.mrb[13].mxu1  ;;  %v13374_v17 = vpop.f32.mrb[14].mxu0  ;;  %13674 = vmatpush3.bf16.msra.mxu0 %v15046_v20  ;;  %v15080_v12 = vld [vmem:[%s15819_s24 + $0xb70] sm:$0xff]  }
 0x169   : > { %v13395_v18 = vadd.f32 %v13394_v16, %v13393_v11  ;;  %v13396_v19 = vpop.f32.mrb[14].mxu1  ;;  %v13375_v23 = vpop.f32.mrb[15].mxu0  ;;  %13675 = vmatprep.subr.bf16.mxu0 %v15048_v25  ;;  %13696 = vmatpush3.bf16.msra.mxu1 %v15047_v22  ;;  %v15086_v25 = vld [vmem:[%s15819_s24 + $0xb38] sm:$0xff]  }
 0x16a   : > { %v9696_v21 = vadd.f32 %v13373_v15, %v16222_v43  ;;  %v13397_v24 = vpop.f32.mrb[15].mxu1  ;;  %13697 = vmatprep.subr.bf16.mxu1 %v15049_v27  ;;  %v2647_v43 = vrot.slane %v2625_v39, %v15821_v6  ;;  %v15082_v19 = vld [vmem:[%s15819_s24 + $0xb30] sm:$0xff]   ;;  %v15084_v23 = vld [vmem:[%s15819_s24 + $0xb78] sm:$0xff]   ;;  %v2640_v27 = vrot.slane %v16276_v41, %v15821_v6 }
 0x16b   : > { %v15085_v24 = vld [vmem:[%s15819_s24 + $0xbf8] sm:$0xff]   ;;  %v15099_v39 = vld [vmem:[%s15819_s24 + $0xc10] sm:$0xff]  }
 0x16c   : > { %v16259_v26 = vadd.f32 %v13395_v18, %v9696_v21  ;;  %13676 = vmatpush3.bf16.msra.mxu0 %v15050_v28  ;;  %10253 = vmatprep.mubr.bf16.mxu0 %v2647_v43  ;;  %v2657_v48 = vcombine.high %v2647_v43, %v2647_v43  ;;  %v15083_v21 = vld [vmem:[%s15819_s24 + $0xbb0] sm:$0xff]   ;;  %v15089_v28 = vld [vmem:[%s15819_s24 + $0xc40] sm:$0xff]   ;;  %v15101_v41 = vld [vmem:[%s15819_s24 + $0xc58] sm:$0xff]  }
 0x16d   : > { %13677 = vmatprep.subr.bf16.mxu0 %v15052_v30  ;;  %13698 = vmatpush3.bf16.msra.mxu1 %v15051_v29  ;;  %v15090_v29 = vld [vmem:[%s15819_s24 + $0xcc0] sm:$0xff]   ;;  %v15103_v43 = vld [vmem:[%s15819_s24 + $0xc18] sm:$0xff]  }
 0x16e   : > { %13699 = vmatprep.subr.bf16.mxu1 %v15053_v31  ;;  %10293 = vmatprep.mubr.bf16.mxu1 %v2657_v48  ;;  %v15091_v30 = vld [vmem:[%s15819_s24 + $0xc00] sm:$0xff]  }
 0x16f   : > { %v15092_v31 = vld [vmem:[%s15819_s24 + $0xc80] sm:$0xff]  }
 0x170   : > { %13678 = vmatpush3.bf16.msra.mxu0 %v15054_v32  ;;  %v2656_v32 = vcombine.high %v2640_v27, %v2640_v27  ;;  %v15108_v48 = vld [vmem:[%s15819_s24 + $0xca0] sm:$0xff]  }
 0x171   : > { %13707 = vmatprep.subr.bf16.mxu0 %v15056_v36  ;;  %13700 = vmatpush3.bf16.msra.mxu1 %v15055_v33  ;;  %v15093_v33 = vld [vmem:[%s15819_s24 + $0xc48] sm:$0xff]  }
 0x172   : > { %13729 = vmatprep.subr.bf16.mxu1 %v15057_v38  ;;  %v15096_v36 = vld [vmem:[%s15819_s24 + $0xc88] sm:$0xff]   ;;  %v15098_v38 = vld [vmem:[%s15819_s24 + $0xcd0] sm:$0xff]  }
 0x173   : > { %10254 = vmatmul.mubr.bf16.vlgmr.msra.gmra.mrb[40].mxu0 %v2633_v40  ;;  %v15100_v40 = vld [vmem:[%s15819_s24 + $0xc90] sm:$0xff]  }
 0x174   : > { %13708 = vmatpush3.bf16.msra.mxu0 %v15058_v42  ;;  %10294 = vmatmul.mubr.bf16.vlgmr.msra.gmra.mrb[40].mxu1 %v2655_v46  ;;  %v15102_v42 = vld [vmem:[%s15819_s24 + $0xcd8] sm:$0xff]   ;;  %v15106_v46 = vld [vmem:[%s15819_s24 + $0xce0] sm:$0xff]  }
 0x175   : > { %13709 = vmatprep.subr.bf16.mxu0 %v15060_v47  ;;  %13730 = vmatpush3.bf16.msra.mxu1 %v15059_v44  ;;  %v15104_v44 = vld [vmem:[%s15819_s24 + $0xc98] sm:$0xff]   ;;  %v15107_v47 = vld [vmem:[%s15819_s24 + $0xc20] sm:$0xff]  }
 0x176   : > { %10333 = vmatprep.mubr.bf16.mxu0 %v2654_v50  ;;  %13731 = vmatprep.subr.bf16.mxu1 %v15061_v49  ;;  %v15109_v49 = vld [vmem:[%s15819_s24 + $0xc68] sm:$0xff]  }
 0x177   : > { %10373 = vmatprep.mubr.bf16.mxu1 %v2658_v53  ;;  %v15110_v50 = vld [vmem:[%s15819_s24 + $0xce8] sm:$0xff]  }
 0x178   : > { %13710 = vmatpush3.bf16.msra.mxu0 %v15062_v51 }
 0x179   : > { %13711 = vmatprep.subr.bf16.mxu0 %v15064_v54  ;;  %13732 = vmatpush3.bf16.msra.mxu1 %v15063_v52  ;;  %v15111_v52 = vld [vmem:[%s15819_s24 + $0xc28] sm:$0xff]  }
 0x17a   : > { %13733 = vmatprep.subr.bf16.mxu1 %v15065_v55  ;;  %v15112_v54 = vld [vmem:[%s15819_s24 + $0xca8] sm:$0xff]  }
 0x17c   : > { %13712 = vmatpush3.bf16.msra.mxu0 %v15066_v56 }
 0x17d   : > { %13713 = vmatprep.subr.bf16.mxu0 %v15068_v58  ;;  %13734 = vmatpush3.bf16.msra.mxu1 %v15067_v57  ;;  %v15113_v58 = vld [vmem:[%s15819_s24 + $0xc70] sm:$0xff]  }
 0x17e   : > { %13735 = vmatprep.subr.bf16.mxu1 %v15069_v59  ;;  %v15114_v59 = vld [vmem:[%s15819_s24 + $0xcf0] sm:$0xff]  }
 0x180   : > { %13714 = vmatpush3.bf16.msra.mxu0 %v15070_v60 }
 0x181   : > { %13715 = vmatprep.subr.bf16.mxu0 %v15072_v62  ;;  %13736 = vmatpush3.bf16.msra.mxu1 %v15071_v61 }
 0x182   : > { %13737 = vmatprep.subr.bf16.mxu1 %v15073_v63 }
 0x184   : > { %13716 = vmatpush3.bf16.msra.mxu0 %v15074_v0 }
 0x185   : > { %13717 = vmatprep.subr.bf16.mxu0 %v15076_v2  ;;  %13738 = vmatpush3.bf16.msra.mxu1 %v15075_v1  ;;  %v15115_v1 = vld [vmem:[%s15819_s24 + $0xc30] sm:$0xff]  }
 0x186   : > { %v13415_v4 = vpop.f32.mrb[16].mxu0  ;;  %13739 = vmatprep.subr.bf16.mxu1 %v15077_v3  ;;  %v15116_v3 = vld [vmem:[%s15819_s24 + $0xcb0] sm:$0xff]  }
 0x187   : > { %v13416_v7 = vpop.f32.mrb[17].mxu0  ;;  %v13437_v9 = vpop.f32.mrb[16].mxu1 }
 0x188   : > { %v13417_v10 = vadd.f32 %v13416_v7, %v13415_v4  ;;  %v13418_v11 = vpop.f32.mrb[18].mxu0  ;;  %v13438_v14 = vpop.f32.mrb[17].mxu1  ;;  %13718 = vmatpush3.bf16.msra.mxu0 %v15078_v5  ;;  %v15117_v5 = vld [vmem:[%s15819_s24 + $0xc78] sm:$0xff]  }
 0x189   : > { %v13419_v15 = vpop.f32.mrb[19].mxu0  ;;  %v13439_v17 = vadd.f32 %v13438_v14, %v13437_v9  ;;  %v13440_v18 = vpop.f32.mrb[18].mxu1  ;;  %13719 = vmatprep.subr.bf16.mxu0 %v15080_v12  ;;  %13740 = vmatpush3.bf16.msra.mxu1 %v15079_v8  ;;  %v15118_v7 = vld [vmem:[%s15819_s24 + $0xcf8] sm:$0xff]   ;;  %v291_v9 = vld [vmem:[%s17178_s0 + $0x30] sm:$0xff]  ;;  %v15121_v11 = vld [vmem:[%s15819_s24 + $0xd40] sm:$0xff]  }
 0x18a   : > { %v9776_v16 = vadd.f32 %v13417_v10, %v16259_v26  ;;  %v13441_v20 = vpop.f32.mrb[19].mxu1  ;;  %13741 = vmatprep.subr.bf16.mxu1 %v15081_v13  ;;  %v15087_v26 = vld [vmem:[%s15819_s24 + $0xbb8] sm:$0xff]   ;;  %v2666_v10 = vrot.slane %v291_v9, %v15821_v6  ;;  %v2659_v12 = vcombine.high %v291_v9, %v291_v9  ;;  %v15123_v18 = vld [vmem:[%s15819_s24 + $0xd00] sm:$0xff]   ;;  %v15158_v9 = vld [vmem:[%s15819_s24 + $0xe48] sm:$0xff]  }
 0x18b   : > { %v15119_v8 = vld [vmem:[%s15819_s24 + $0xc38] sm:$0xff]   ;;  %v15124_v20 = vld [vmem:[%s15819_s24 + $0xd80] sm:$0xff]  }
 0x18c   : > { %v16309_v22 = vadd.f32 %v13439_v17, %v9776_v16  ;;  %13720 = vmatpush3.bf16.msra.mxu0 %v15082_v19  ;;  %v15120_v13 = vld [vmem:[%s15819_s24 + $0xcb8] sm:$0xff]   ;;  %v2674_v14 = vcombine.high %v2666_v10, %v2666_v10  ;;  %v2682_v15 = vrot.slane %v2666_v10, %v15821_v6  ;;  %v15122_v16 = vld [vmem:[%s15819_s24 + $0xdc0] sm:$0xff]   ;;  %v16360_v17 = vrot.slane %v2659_v12, %v15821_v6  ;;  %v15159_v10 = vld [vmem:[%s15819_s24 + $0xec8] sm:$0xff]  }
 0x18d   : > { %13721 = vmatprep.subr.bf16.mxu0 %v15084_v23  ;;  %13742 = vmatpush3.bf16.msra.mxu1 %v15083_v21  ;;  %v15125_v23 = vld [vmem:[%s15819_s24 + $0xd48] sm:$0xff]  }
 0x18e   : > { %13743 = vmatprep.subr.bf16.mxu1 %v15085_v24  ;;  %v2696_v19 = vrot.slane %v2674_v14, %v15821_v6  ;;  %v2675_v21 = vcombine.high %v16360_v17, %v16360_v17  ;;  %v15161_v12 = vld [vmem:[%s15819_s24 + $0xe88] sm:$0xff]   ;;  %v15163_v14 = vld [vmem:[%s15819_s24 + $0xed0] sm:$0xff]  }
 0x190   : > { %13722 = vmatpush3.bf16.msra.mxu0 %v15086_v25  ;;  %v2706_v24 = vcombine.high %v2696_v19, %v2696_v19  ;;  %v15126_v25 = vld [vmem:[%s15819_s24 + $0xdc8] sm:$0xff]  }
 0x191   : > { %13751 = vmatprep.subr.bf16.mxu0 %v15089_v28  ;;  %13744 = vmatpush3.bf16.msra.mxu1 %v15087_v26  ;;  %v2703_v26 = vrot.slane %v2675_v21, %v15821_v6  ;;  %v15128_v28 = vld [vmem:[%s15819_s24 + $0xd88] sm:$0xff]   ;;  %v15170_v21 = vld [vmem:[%s15819_s24 + $0xe60] sm:$0xff]  }
 0x192   : > { %13773 = vmatprep.subr.bf16.mxu1 %v15090_v29 }
 0x193   : > { %10334 = vmatmul.mubr.bf16.vlgmr.msra.gmra.mrb[44].mxu0 %v2640_v27  ;;  %v15127_v27 = vld [vmem:[%s15819_s24 + $0xd08] sm:$0xff]   ;;  %v2707_v29 = vcombine.high %v2703_v26, %v2703_v26 }
 0x194   : > { %13752 = vmatpush3.bf16.msra.mxu0 %v15091_v30  ;;  %10374 = vmatmul.mubr.bf16.vlgmr.msra.gmra.mrb[44].mxu1 %v2656_v32  ;;  %v15129_v30 = vld [vmem:[%s15819_s24 + $0xd50] sm:$0xff]  }
 0x195   : > { %13753 = vmatprep.subr.bf16.mxu0 %v15093_v33  ;;  %13774 = vmatpush3.bf16.msra.mxu1 %v15092_v31  ;;  %v15130_v31 = vld [vmem:[%s15819_s24 + $0xdd0] sm:$0xff]  }
 0x196   : > { %13775 = vmatprep.subr.bf16.mxu1 %v15094_v34  ;;  %10413 = vmatprep.mubr.bf16.mxu0 %v2696_v19  ;;  %v15131_v32 = vld [vmem:[%s15819_s24 + $0xd10] sm:$0xff]   ;;  %v15133_v34 = vld [vmem:[%s15819_s24 + $0xd58] sm:$0xff]  }
 0x197   : > { %10453 = vmatprep.mubr.bf16.mxu1 %v2706_v24  ;;  %v15132_v33 = vld [vmem:[%s15819_s24 + $0xd90] sm:$0xff]   ;;  %v15168_v19 = vld [vmem:[%s15819_s24 + $0xe18] sm:$0xff]   ;;  %v15173_v24 = vld [vmem:[%s15819_s24 + $0xea0] sm:$0xff]  }
 0x198   : > { %13754 = vmatpush3.bf16.msra.mxu0 %v15095_v35  ;;  %v15134_v35 = vld [vmem:[%s15819_s24 + $0xdd8] sm:$0xff]  }
 0x199   : > { %13755 = vmatprep.subr.bf16.mxu0 %v15097_v37  ;;  %13776 = vmatpush3.bf16.msra.mxu1 %v15096_v36  ;;  %v15135_v36 = vld [vmem:[%s15819_s24 + $0xd18] sm:$0xff]  }
 0x19a   : > { %13777 = vmatprep.subr.bf16.mxu1 %v15098_v38  ;;  %v15136_v37 = vld [vmem:[%s15819_s24 + $0xd98] sm:$0xff]   ;;  %v15137_v38 = vld [vmem:[%s15819_s24 + $0xd60] sm:$0xff]  }
 0x19c   : > { %13756 = vmatpush3.bf16.msra.mxu0 %v15099_v39  ;;  %v15138_v39 = vld [vmem:[%s15819_s24 + $0xde0] sm:$0xff]  }
 0x19d   : > { %13757 = vmatprep.subr.bf16.mxu0 %v15101_v41  ;;  %13778 = vmatpush3.bf16.msra.mxu1 %v15100_v40  ;;  %v15139_v40 = vld [vmem:[%s15819_s24 + $0xd20] sm:$0xff]  }
 0x19e   : > { %13779 = vmatprep.subr.bf16.mxu1 %v15102_v42  ;;  %v15140_v41 = vld [vmem:[%s15819_s24 + $0xda0] sm:$0xff]   ;;  %v15141_v42 = vld [vmem:[%s15819_s24 + $0xd68] sm:$0xff]  }
 0x1a0   : > { %13758 = vmatpush3.bf16.msra.mxu0 %v15103_v43 }
 0x1a1   : > { %13759 = vmatprep.subr.bf16.mxu0 %v15105_v45  ;;  %13780 = vmatpush3.bf16.msra.mxu1 %v15104_v44  ;;  %v15142_v44 = vld [vmem:[%s15819_s24 + $0xde8] sm:$0xff]  }
 0x1a2   : > { %13781 = vmatprep.subr.bf16.mxu1 %v15106_v46  ;;  %v15143_v46 = vld [vmem:[%s15819_s24 + $0xd28] sm:$0xff]  }
 0x1a4   : > { %13760 = vmatpush3.bf16.msra.mxu0 %v15107_v47 }
 0x1a5   : > { %13761 = vmatprep.subr.bf16.mxu0 %v15109_v49  ;;  %13782 = vmatpush3.bf16.msra.mxu1 %v15108_v48 }
 0x1a6   : > { %v13459_v51 = vpop.f32.mrb[20].mxu0  ;;  %13783 = vmatprep.subr.bf16.mxu1 %v15110_v50  ;;  %v15144_v50 = vld [vmem:[%s15819_s24 + $0xda8] sm:$0xff]  }
 0x1a7   : > { %v13460_v53 = vpop.f32.mrb[21].mxu0  ;;  %v13481_v55 = vpop.f32.mrb[20].mxu1 }
 0x1a8   : > { %v13461_v56 = vadd.f32 %v13460_v53, %v13459_v51  ;;  %v13462_v57 = vpop.f32.mrb[22].mxu0  ;;  %v13482_v60 = vpop.f32.mrb[21].mxu1  ;;  %13762 = vmatpush3.bf16.msra.mxu0 %v15111_v52  ;;  %v15145_v51 = vld [vmem:[%s15819_s24 + $0xd70] sm:$0xff]  }
 0x1a9   : > { %v13463_v61 = vpop.f32.mrb[23].mxu0  ;;  %v13483_v63 = vadd.f32 %v13482_v60, %v13481_v55  ;;  %v13484_v0 = vpop.f32.mrb[22].mxu1  ;;  %13763 = vmatprep.subr.bf16.mxu0 %v15113_v58  ;;  %13784 = vmatpush3.bf16.msra.mxu1 %v15112_v54  ;;  %v15146_v57 = vld [vmem:[%s15819_s24 + $0xdf0] sm:$0xff]  }
 0x1aa   : > { %v9856_v62 = vadd.f32 %v13461_v56, %v16309_v22  ;;  %v13485_v2 = vpop.f32.mrb[23].mxu1  ;;  %13785 = vmatprep.subr.bf16.mxu1 %v15114_v59  ;;  %v2704_v22 = vcombine.high %v2682_v15, %v2682_v15  ;;  %v15147_v59 = vld [vmem:[%s15819_s24 + $0xd30] sm:$0xff]   ;;  %v15151_v0 = vld [vmem:[%s15819_s24 + $0xd38] sm:$0xff]  }
 0x1ab   : > { %v15148_v61 = vld [vmem:[%s15819_s24 + $0xdb0] sm:$0xff]   ;;  %v2689_v2 = vrot.slane %v16360_v17, %v15821_v6  ;;  %v15166_v17 = vld [vmem:[%s15819_s24 + $0xe58] sm:$0xff]  }
 0x1ac   : > { %v16346_v4 = vadd.f32 %v13483_v63, %v9856_v62  ;;  %13764 = vmatpush3.bf16.msra.mxu0 %v15115_v1  ;;  %v15149_v62 = vld [vmem:[%s15819_s24 + $0xd78] sm:$0xff]  }
 0x1ad   : > { %13765 = vmatprep.subr.bf16.mxu0 %v15117_v5  ;;  %13786 = vmatpush3.bf16.msra.mxu1 %v15116_v3  ;;  %v15150_v63 = vld [vmem:[%s15819_s24 + $0xdf8] sm:$0xff]   ;;  %v15154_v3 = vld [vmem:[%s15819_s24 + $0xe40] sm:$0xff]  }
 0x1ae   : > { %13787 = vmatprep.subr.bf16.mxu1 %v15118_v7  ;;  %v15152_v1 = vld [vmem:[%s15819_s24 + $0xdb8] sm:$0xff]   ;;  %v15156_v5 = vld [vmem:[%s15819_s24 + $0xe00] sm:$0xff]  }
 0x1af   : > { %v15157_v7 = vld [vmem:[%s15819_s24 + $0xe80] sm:$0xff]  }
 0x1b0   : > { %13766 = vmatpush3.bf16.msra.mxu0 %v15119_v8  ;;  %v2705_v8 = vcombine.high %v2689_v2, %v2689_v2 }
 0x1b1   : > { %13795 = vmatprep.subr.bf16.mxu0 %v15121_v11  ;;  %13788 = vmatpush3.bf16.msra.mxu1 %v15120_v13  ;;  %v15160_v11 = vld [vmem:[%s15819_s24 + $0xe08] sm:$0xff]   ;;  %v15162_v13 = vld [vmem:[%s15819_s24 + $0xe50] sm:$0xff]  }
 0x1b2   : > { %13817 = vmatprep.subr.bf16.mxu1 %v15122_v16  ;;  %v15165_v16 = vld [vmem:[%s15819_s24 + $0xe90] sm:$0xff]  }
 0x1b3   : > { %10414 = vmatmul.mubr.bf16.vlgmr.msra.gmra.mrb[48].mxu0 %v2682_v15  ;;  %v15164_v15 = vld [vmem:[%s15819_s24 + $0xe10] sm:$0xff]  }
 0x1b4   : > { %13796 = vmatpush3.bf16.msra.mxu0 %v15123_v18  ;;  %10454 = vmatmul.mubr.bf16.vlgmr.msra.gmra.mrb[48].mxu1 %v2704_v22  ;;  %v15167_v18 = vld [vmem:[%s15819_s24 + $0xed8] sm:$0xff]   ;;  %v15171_v22 = vld [vmem:[%s15819_s24 + $0xee0] sm:$0xff]  }
 0x1b5   : > { %13797 = vmatprep.subr.bf16.mxu0 %v15125_v23  ;;  %13818 = vmatpush3.bf16.msra.mxu1 %v15124_v20  ;;  %v15169_v20 = vld [vmem:[%s15819_s24 + $0xe98] sm:$0xff]   ;;  %v15172_v23 = vld [vmem:[%s15819_s24 + $0xe20] sm:$0xff]  }
 0x1b6   : > { %10493 = vmatprep.mubr.bf16.mxu0 %v2703_v26  ;;  %13819 = vmatprep.subr.bf16.mxu1 %v15126_v25  ;;  %v15174_v25 = vld [vmem:[%s15819_s24 + $0xe68] sm:$0xff]  }
 0x1b7   : > { %10533 = vmatprep.mubr.bf16.mxu1 %v2707_v29  ;;  %v15176_v29 = vld [vmem:[%s15819_s24 + $0xe28] sm:$0xff]  }
 0x1b8   : > { %13798 = vmatpush3.bf16.msra.mxu0 %v15127_v27  ;;  %v15175_v27 = vld [vmem:[%s15819_s24 + $0xee8] sm:$0xff]  }
 0x1b9   : > { %13799 = vmatprep.subr.bf16.mxu0 %v15129_v30  ;;  %13820 = vmatpush3.bf16.msra.mxu1 %v15128_v28 }
 0x1ba   : > { %13821 = vmatprep.subr.bf16.mxu1 %v15130_v31 }
 0x1bc   : > { %13800 = vmatpush3.bf16.msra.mxu0 %v15131_v32 }
 0x1bd   : > { %13801 = vmatprep.subr.bf16.mxu0 %v15133_v34  ;;  %13822 = vmatpush3.bf16.msra.mxu1 %v15132_v33  ;;  %v15177_v33 = vld [vmem:[%s15819_s24 + $0xea8] sm:$0xff]   ;;  %v15178_v34 = vld [vmem:[%s15819_s24 + $0xe70] sm:$0xff]  }
 0x1be   : > { %13823 = vmatprep.subr.bf16.mxu1 %v15134_v35 }
 0x1c0   : > { %13802 = vmatpush3.bf16.msra.mxu0 %v15135_v36 }
 0x1c1   : > { %13803 = vmatprep.subr.bf16.mxu0 %v15137_v38  ;;  %13824 = vmatpush3.bf16.msra.mxu1 %v15136_v37 }
 0x1c2   : > { %13825 = vmatprep.subr.bf16.mxu1 %v15138_v39 }
 0x1c4   : > { %13804 = vmatpush3.bf16.msra.mxu0 %v15139_v40  ;;  %v15179_v40 = vld [vmem:[%s15819_s24 + $0xef0] sm:$0xff]  }
 0x1c5   : > { %13805 = vmatprep.subr.bf16.mxu0 %v15141_v42  ;;  %13826 = vmatpush3.bf16.msra.mxu1 %v15140_v41  ;;  %v15180_v42 = vld [vmem:[%s15819_s24 + $0xe30] sm:$0xff]  }
 0x1c6   : > { %v13503_v43 = vpop.f32.mrb[24].mxu0  ;;  %13827 = vmatprep.subr.bf16.mxu1 %v15142_v44  ;;  %v15181_v44 = vld [vmem:[%s15819_s24 + $0xeb0] sm:$0xff]  }
 0x1c7   : > { %v13504_v45 = vpop.f32.mrb[25].mxu0  ;;  %v13525_v47 = vpop.f32.mrb[24].mxu1 }
 0x1c8   : > { %v13505_v48 = vadd.f32 %v13504_v45, %v13503_v43  ;;  %v13506_v49 = vpop.f32.mrb[26].mxu0  ;;  %v13526_v52 = vpop.f32.mrb[25].mxu1  ;;  %13806 = vmatpush3.bf16.msra.mxu0 %v15143_v46  ;;  %v15182_v45 = vld [vmem:[%s15819_s24 + $0xe78] sm:$0xff]  }
 0x1c9   : > { %v13507_v53 = vpop.f32.mrb[27].mxu0  ;;  %v13527_v55 = vadd.f32 %v13526_v52, %v13525_v47  ;;  %v13528_v56 = vpop.f32.mrb[26].mxu1  ;;  %13807 = vmatprep.subr.bf16.mxu0 %v15145_v51  ;;  %13828 = vmatpush3.bf16.msra.mxu1 %v15144_v50  ;;  %v15183_v46 = vld [vmem:[%s15819_s24 + $0xef8] sm:$0xff]   ;;  %v15186_v50 = vld [vmem:[%s15819_s24 + $0xf40] sm:$0xff]  }
 0x1ca   : > { %v9936_v54 = vadd.f32 %v13505_v48, %v16346_v4  ;;  %v13529_v58 = vpop.f32.mrb[27].mxu1  ;;  %13829 = vmatprep.subr.bf16.mxu1 %v15146_v57  ;;  %v15155_v4 = vld [vmem:[%s15819_s24 + $0xec0] sm:$0xff]   ;;  %v15184_v47 = vld [vmem:[%s15819_s24 + $0xe38] sm:$0xff]  }
 0x1cb   : > { %v292_v48 = vld [vmem:[%s17178_s0 + $0x38] sm:$0xff]  ;;  %v15188_v57 = vld [vmem:[%s15819_s24 + $0xf00] sm:$0xff]  }
 0x1cc   : > { %v16392_v60 = vadd.f32 %v13527_v55, %v9936_v54  ;;  %13808 = vmatpush3.bf16.msra.mxu0 %v15147_v59  ;;  %v2715_v49 = vrot.slane %v292_v48, %v15821_v6  ;;  %v2708_v51 = vcombine.high %v292_v48, %v292_v48  ;;  %v15185_v52 = vld [vmem:[%s15819_s24 + $0xeb8] sm:$0xff]   ;;  %v15187_v55 = vld [vmem:[%s15819_s24 + $0xfc0] sm:$0xff]   ;;  %v15223_v48 = vld [vmem:[%s15819_s24 + $0x1048] sm:$0xff]  }
 0x1cd   : > { %13809 = vmatprep.subr.bf16.mxu0 %v15149_v62  ;;  %13830 = vmatpush3.bf16.msra.mxu1 %v15148_v61  ;;  %v15189_v59 = vld [vmem:[%s15819_s24 + $0xf80] sm:$0xff]   ;;  %v15190_v62 = vld [vmem:[%s15819_s24 + $0xf48] sm:$0xff]  }
 0x1ce   : > { %13831 = vmatprep.subr.bf16.mxu1 %v15150_v63  ;;  %v2723_v53 = vcombine.high %v2715_v49, %v2715_v49  ;;  %v2731_v54 = vrot.slane %v2715_v49, %v15821_v6  ;;  %v16444_v56 = vrot.slane %v2708_v51, %v15821_v6  ;;  %v15224_v49 = vld [vmem:[%s15819_s24 + $0x10c8] sm:$0xff]  }
 0x1cf   : > { %v15226_v51 = vld [vmem:[%s15819_s24 + $0x1088] sm:$0xff]  }
 0x1d0   : > { %13810 = vmatpush3.bf16.msra.mxu0 %v15151_v0  ;;  %v2745_v58 = vrot.slane %v2723_v53, %v15821_v6  ;;  %v2753_v61 = vcombine.high %v2731_v54, %v2731_v54  ;;  %v15191_v0 = vld [vmem:[%s15819_s24 + $0xfc8] sm:$0xff]   ;;  %v15228_v53 = vld [vmem:[%s15819_s24 + $0x10d0] sm:$0xff]  }
 0x1d1   : > { %13839 = vmatprep.subr.bf16.mxu0 %v15154_v3  ;;  %13832 = vmatpush3.bf16.msra.mxu1 %v15152_v1  ;;  %v15193_v3 = vld [vmem:[%s15819_s24 + $0xf88] sm:$0xff]  }
 0x1d2   : > { %13861 = vmatprep.subr.bf16.mxu1 %v15155_v4  ;;  %v2755_v63 = vcombine.high %v2745_v58, %v2745_v58 }
 0x1d3   : > { %10494 = vmatmul.mubr.bf16.vlgmr.msra.gmra.mrb[52].mxu0 %v2689_v2  ;;  %v15192_v2 = vld [vmem:[%s15819_s24 + $0xf08] sm:$0xff]  }
 0x1d4   : > { %13840 = vmatpush3.bf16.msra.mxu0 %v15156_v5  ;;  %10534 = vmatmul.mubr.bf16.vlgmr.msra.gmra.mrb[52].mxu1 %v2705_v8  ;;  %v15194_v5 = vld [vmem:[%s15819_s24 + $0xf50] sm:$0xff]  }
 0x1d5   : > { %13841 = vmatprep.subr.bf16.mxu0 %v15158_v9  ;;  %13862 = vmatpush3.bf16.msra.mxu1 %v15157_v7  ;;  %v15195_v7 = vld [vmem:[%s15819_s24 + $0xfd0] sm:$0xff]  }
 0x1d6   : > { %13863 = vmatprep.subr.bf16.mxu1 %v15159_v10  ;;  %10573 = vmatprep.mubr.bf16.mxu0 %v2745_v58  ;;  %v15196_v8 = vld [vmem:[%s15819_s24 + $0xf10] sm:$0xff]   ;;  %v15198_v10 = vld [vmem:[%s15819_s24 + $0xf58] sm:$0xff]  }
 0x1d7   : > { %10613 = vmatprep.mubr.bf16.mxu1 %v2755_v63  ;;  %v15197_v9 = vld [vmem:[%s15819_s24 + $0xf90] sm:$0xff]   ;;  %v15233_v58 = vld [vmem:[%s15819_s24 + $0x1018] sm:$0xff]   ;;  %v15238_v63 = vld [vmem:[%s15819_s24 + $0x10a0] sm:$0xff]  }
 0x1d8   : > { %13842 = vmatpush3.bf16.msra.mxu0 %v15160_v11  ;;  %v15199_v11 = vld [vmem:[%s15819_s24 + $0xfd8] sm:$0xff]  }
 0x1d9   : > { %13843 = vmatprep.subr.bf16.mxu0 %v15162_v13  ;;  %13864 = vmatpush3.bf16.msra.mxu1 %v15161_v12  ;;  %v15200_v12 = vld [vmem:[%s15819_s24 + $0xf18] sm:$0xff]  }
 0x1da   : > { %13865 = vmatprep.subr.bf16.mxu1 %v15163_v14  ;;  %v15201_v13 = vld [vmem:[%s15819_s24 + $0xf98] sm:$0xff]   ;;  %v15202_v14 = vld [vmem:[%s15819_s24 + $0xf60] sm:$0xff]  }
 0x1dc   : > { %13844 = vmatpush3.bf16.msra.mxu0 %v15164_v15  ;;  %v15203_v15 = vld [vmem:[%s15819_s24 + $0xfe0] sm:$0xff]  }
 0x1dd   : > { %13845 = vmatprep.subr.bf16.mxu0 %v15166_v17  ;;  %13866 = vmatpush3.bf16.msra.mxu1 %v15165_v16  ;;  %v15204_v16 = vld [vmem:[%s15819_s24 + $0xf20] sm:$0xff]  }
 0x1de   : > { %13867 = vmatprep.subr.bf16.mxu1 %v15167_v18  ;;  %v15205_v17 = vld [vmem:[%s15819_s24 + $0xfa0] sm:$0xff]   ;;  %v15206_v18 = vld [vmem:[%s15819_s24 + $0xf68] sm:$0xff]  }
 0x1e0   : > { %13846 = vmatpush3.bf16.msra.mxu0 %v15168_v19 }
 0x1e1   : > { %13847 = vmatprep.subr.bf16.mxu0 %v15170_v21  ;;  %13868 = vmatpush3.bf16.msra.mxu1 %v15169_v20  ;;  %v15207_v20 = vld [vmem:[%s15819_s24 + $0xfe8] sm:$0xff]  }
 0x1e2   : > { %13869 = vmatprep.subr.bf16.mxu1 %v15171_v22  ;;  %v15208_v22 = vld [vmem:[%s15819_s24 + $0xf28] sm:$0xff]  }
 0x1e4   : > { %13848 = vmatpush3.bf16.msra.mxu0 %v15172_v23 }
 0x1e5   : > { %13849 = vmatprep.subr.bf16.mxu0 %v15174_v25  ;;  %13870 = vmatpush3.bf16.msra.mxu1 %v15173_v24 }
 0x1e6   : > { %v13547_v26 = vpop.f32.mrb[28].mxu0  ;;  %13871 = vmatprep.subr.bf16.mxu1 %v15175_v27  ;;  %v15210_v27 = vld [vmem:[%s15819_s24 + $0xf70] sm:$0xff]  }
 0x1e7   : > { %v13548_v28 = vpop.f32.mrb[29].mxu0  ;;  %v13569_v30 = vpop.f32.mrb[28].mxu1 }
 0x1e8   : > { %v13549_v31 = vadd.f32 %v13548_v28, %v13547_v26  ;;  %v13550_v32 = vpop.f32.mrb[30].mxu0  ;;  %v13570_v35 = vpop.f32.mrb[29].mxu1  ;;  %13850 = vmatpush3.bf16.msra.mxu0 %v15176_v29  ;;  %v15209_v26 = vld [vmem:[%s15819_s24 + $0xfa8] sm:$0xff]  }
 0x1e9   : > { %v13551_v36 = vpop.f32.mrb[31].mxu0  ;;  %v13571_v38 = vadd.f32 %v13570_v35, %v13569_v30  ;;  %v13572_v39 = vpop.f32.mrb[30].mxu1  ;;  %13851 = vmatprep.subr.bf16.mxu0 %v15178_v34  ;;  %13872 = vmatpush3.bf16.msra.mxu1 %v15177_v33  ;;  %v15211_v33 = vld [vmem:[%s15819_s24 + $0xff0] sm:$0xff]  }
 0x1ea   : > { %v10016_v37 = vadd.f32 %v13549_v31, %v16392_v60  ;;  %v13573_v41 = vpop.f32.mrb[31].mxu1  ;;  %13873 = vmatprep.subr.bf16.mxu1 %v15179_v40  ;;  %v2724_v60 = vcombine.high %v16444_v56, %v16444_v56  ;;  %v15212_v35 = vld [vmem:[%s15819_s24 + $0xf30] sm:$0xff]   ;;  %v15215_v39 = vld [vmem:[%s15819_s24 + $0xff8] sm:$0xff]  }
 0x1eb   : > { %v15216_v40 = vld [vmem:[%s15819_s24 + $0xf38] sm:$0xff]  }
 0x1ec   : > { %v16429_v43 = vadd.f32 %v13571_v38, %v10016_v37  ;;  %13852 = vmatpush3.bf16.msra.mxu0 %v15180_v42  ;;  %v2752_v1 = vrot.slane %v2724_v60, %v15821_v6  ;;  %v15213_v37 = vld [vmem:[%s15819_s24 + $0xfb0] sm:$0xff]   ;;  %v15214_v38 = vld [vmem:[%s15819_s24 + $0xf78] sm:$0xff]   ;;  %v2738_v42 = vrot.slane %v16444_v56, %v15821_v6  ;;  %v15235_v60 = vld [vmem:[%s15819_s24 + $0x1060] sm:$0xff]  }
 0x1ed   : > { %13853 = vmatprep.subr.bf16.mxu0 %v15182_v45  ;;  %13874 = vmatpush3.bf16.msra.mxu1 %v15181_v44  ;;  %v15217_v41 = vld [vmem:[%s15819_s24 + $0xfb8] sm:$0xff]   ;;  %v15220_v44 = vld [vmem:[%s15819_s24 + $0x10c0] sm:$0xff]  }
 0x1ee   : > { %13875 = vmatprep.subr.bf16.mxu1 %v15183_v46  ;;  %v2756_v4 = vcombine.high %v2752_v1, %v2752_v1  ;;  %v15221_v45 = vld [vmem:[%s15819_s24 + $0x1000] sm:$0xff]   ;;  %v15231_v56 = vld [vmem:[%s15819_s24 + $0x1058] sm:$0xff]  }
 0x1ef   : > { %v15222_v46 = vld [vmem:[%s15819_s24 + $0x1080] sm:$0xff]  }
 0x1f0   : > { %13854 = vmatpush3.bf16.msra.mxu0 %v15184_v47  ;;  %v2754_v47 = vcombine.high %v2738_v42, %v2738_v42 }
 0x1f1   : > { %13883 = vmatprep.subr.bf16.mxu0 %v15186_v50  ;;  %13876 = vmatpush3.bf16.msra.mxu1 %v15185_v52  ;;  %v15225_v50 = vld [vmem:[%s15819_s24 + $0x1008] sm:$0xff]   ;;  %v15227_v52 = vld [vmem:[%s15819_s24 + $0x1050] sm:$0xff]  }
 0x1f2   : > { %13905 = vmatprep.subr.bf16.mxu1 %v15187_v55  ;;  %v15230_v55 = vld [vmem:[%s15819_s24 + $0x1090] sm:$0xff]  }
 0x1f3   : > { %10574 = vmatmul.mubr.bf16.vlgmr.msra.gmra.mrb[56].mxu0 %v2731_v54  ;;  %v15229_v54 = vld [vmem:[%s15819_s24 + $0x1010] sm:$0xff]  }
 0x1f4   : > { %13884 = vmatpush3.bf16.msra.mxu0 %v15188_v57  ;;  %10614 = vmatmul.mubr.bf16.vlgmr.msra.gmra.mrb[56].mxu1 %v2753_v61  ;;  %v15232_v57 = vld [vmem:[%s15819_s24 + $0x10d8] sm:$0xff]   ;;  %v15236_v61 = vld [vmem:[%s15819_s24 + $0x10e0] sm:$0xff]  }
 0x1f5   : > { %13885 = vmatprep.subr.bf16.mxu0 %v15190_v62  ;;  %13906 = vmatpush3.bf16.msra.mxu1 %v15189_v59  ;;  %v15234_v59 = vld [vmem:[%s15819_s24 + $0x1098] sm:$0xff]   ;;  %v15237_v62 = vld [vmem:[%s15819_s24 + $0x1020] sm:$0xff]  }
 0x1f6   : > { %10653 = vmatprep.mubr.bf16.mxu0 %v2752_v1  ;;  %13907 = vmatprep.subr.bf16.mxu1 %v15191_v0  ;;  %v15239_v0 = vld [vmem:[%s15819_s24 + $0x1068] sm:$0xff]  }
 0x1f7   : > { %10693 = vmatprep.mubr.bf16.mxu1 %v2756_v4  ;;  %v15241_v4 = vld [vmem:[%s15819_s24 + $0x1028] sm:$0xff]  }
 0x1f8   : > { %13886 = vmatpush3.bf16.msra.mxu0 %v15192_v2  ;;  %v15240_v2 = vld [vmem:[%s15819_s24 + $0x10e8] sm:$0xff]  }
 0x1f9   : > { %13887 = vmatprep.subr.bf16.mxu0 %v15194_v5  ;;  %13908 = vmatpush3.bf16.msra.mxu1 %v15193_v3 }
 0x1fa   : > { %13909 = vmatprep.subr.bf16.mxu1 %v15195_v7 }
 0x1fc   : > { %13888 = vmatpush3.bf16.msra.mxu0 %v15196_v8 }
 0x1fd   : > { %13889 = vmatprep.subr.bf16.mxu0 %v15198_v10  ;;  %13910 = vmatpush3.bf16.msra.mxu1 %v15197_v9  ;;  %v15242_v9 = vld [vmem:[%s15819_s24 + $0x10a8] sm:$0xff]   ;;  %v15243_v10 = vld [vmem:[%s15819_s24 + $0x1070] sm:$0xff]  }
 0x1fe   : > { %13911 = vmatprep.subr.bf16.mxu1 %v15199_v11 }
 0x200   : > { %13890 = vmatpush3.bf16.msra.mxu0 %v15200_v12 }
 0x201   : > { %13891 = vmatprep.subr.bf16.mxu0 %v15202_v14  ;;  %13912 = vmatpush3.bf16.msra.mxu1 %v15201_v13 }
 0x202   : > { %13913 = vmatprep.subr.bf16.mxu1 %v15203_v15 }
 0x204   : > { %13892 = vmatpush3.bf16.msra.mxu0 %v15204_v16  ;;  %v15244_v16 = vld [vmem:[%s15819_s24 + $0x10f0] sm:$0xff]  }
 0x205   : > { %13893 = vmatprep.subr.bf16.mxu0 %v15206_v18  ;;  %13914 = vmatpush3.bf16.msra.mxu1 %v15205_v17  ;;  %v15245_v18 = vld [vmem:[%s15819_s24 + $0x1030] sm:$0xff]  }
 0x206   : > { %v13591_v19 = vpop.f32.mrb[32].mxu0  ;;  %13915 = vmatprep.subr.bf16.mxu1 %v15207_v20  ;;  %v15246_v20 = vld [vmem:[%s15819_s24 + $0x10b0] sm:$0xff]  }
 0x207   : > { %v13592_v21 = vpop.f32.mrb[33].mxu0  ;;  %v13613_v23 = vpop.f32.mrb[32].mxu1 }
 0x208   : > { %v13593_v24 = vadd.f32 %v13592_v21, %v13591_v19  ;;  %v13594_v25 = vpop.f32.mrb[34].mxu0  ;;  %v13614_v28 = vpop.f32.mrb[33].mxu1  ;;  %13894 = vmatpush3.bf16.msra.mxu0 %v15208_v22  ;;  %v15247_v21 = vld [vmem:[%s15819_s24 + $0x1078] sm:$0xff]  }
 0x209   : > { %v13595_v29 = vpop.f32.mrb[35].mxu0  ;;  %v13615_v31 = vadd.f32 %v13614_v28, %v13613_v23  ;;  %v13616_v32 = vpop.f32.mrb[34].mxu1  ;;  %13895 = vmatprep.subr.bf16.mxu0 %v15210_v27  ;;  %13916 = vmatpush3.bf16.msra.mxu1 %v15209_v26  ;;  %v15248_v22 = vld [vmem:[%s15819_s24 + $0x10f8] sm:$0xff]   ;;  %v15251_v26 = vld [vmem:[%s15819_s24 + $0x1140] sm:$0xff]  }
 0x20a   : > { %v10096_v30 = vadd.f32 %v13593_v24, %v16429_v43  ;;  %v13617_v34 = vpop.f32.mrb[35].mxu1  ;;  %13917 = vmatprep.subr.bf16.mxu1 %v15211_v33  ;;  %v15219_v43 = vld [vmem:[%s15819_s24 + $0x1040] sm:$0xff]   ;;  %v15249_v23 = vld [vmem:[%s15819_s24 + $0x1038] sm:$0xff]  }
 0x20b   : > { %v293_v24 = vld [vmem:[%s17178_s0 + $0x40] sm:$0xff]  ;;  %v15250_v28 = vld [vmem:[%s15819_s24 + $0x10b8] sm:$0xff]  }
 0x20c   : > { %v16476_v36 = vadd.f32 %v13615_v31, %v10096_v30  ;;  %13896 = vmatpush3.bf16.msra.mxu0 %v15212_v35  ;;  %v2764_v25 = vrot.slane %v293_v24, %v15821_v6  ;;  %v2757_v27 = vcombine.high %v293_v24, %v293_v24  ;;  %v15252_v31 = vld [vmem:[%s15819_s24 + $0x11c0] sm:$0xff]   ;;  %v15288_v24 = vld [vmem:[%s15819_s24 + $0x1248] sm:$0xff]  }
 0x20d   : > { %13897 = vmatprep.subr.bf16.mxu0 %v15214_v38  ;;  %13918 = vmatpush3.bf16.msra.mxu1 %v15213_v37  ;;  %v15253_v33 = vld [vmem:[%s15819_s24 + $0x1100] sm:$0xff]   ;;  %v15255_v38 = vld [vmem:[%s15819_s24 + $0x1148] sm:$0xff]  }
 0x20e   : > { %13919 = vmatprep.subr.bf16.mxu1 %v15215_v39  ;;  %v2772_v29 = vcombine.high %v2764_v25, %v2764_v25  ;;  %v2780_v30 = vrot.slane %v2764_v25, %v15821_v6  ;;  %v16528_v32 = vrot.slane %v2757_v27, %v15821_v6  ;;  %v15254_v35 = vld [vmem:[%s15819_s24 + $0x1180] sm:$0xff]   ;;  %v15289_v25 = vld [vmem:[%s15819_s24 + $0x12c8] sm:$0xff]  }
 0x20f   : > { %v15291_v27 = vld [vmem:[%s15819_s24 + $0x1288] sm:$0xff]  }
 0x210   : > { %13898 = vmatpush3.bf16.msra.mxu0 %v15216_v40  ;;  %v2794_v34 = vrot.slane %v2772_v29, %v15821_v6  ;;  %v2802_v37 = vcombine.high %v2780_v30, %v2780_v30  ;;  %v15256_v40 = vld [vmem:[%s15819_s24 + $0x11c8] sm:$0xff]   ;;  %v15293_v29 = vld [vmem:[%s15819_s24 + $0x12d0] sm:$0xff]  }
 0x211   : > { %13927 = vmatprep.subr.bf16.mxu0 %v15219_v43  ;;  %13920 = vmatpush3.bf16.msra.mxu1 %v15217_v41  ;;  %v15258_v43 = vld [vmem:[%s15819_s24 + $0x1188] sm:$0xff]  }
 0x212   : > { %13949 = vmatprep.subr.bf16.mxu1 %v15220_v44  ;;  %v2804_v39 = vcombine.high %v2794_v34, %v2794_v34 }
 0x213   : > { %10654 = vmatmul.mubr.bf16.vlgmr.msra.gmra.mrb[60].mxu0 %v2738_v42  ;;  %v15257_v42 = vld [vmem:[%s15819_s24 + $0x1108] sm:$0xff]  }
 0x214   : > { %13928 = vmatpush3.bf16.msra.mxu0 %v15221_v45  ;;  %10694 = vmatmul.mubr.bf16.vlgmr.msra.gmra.mrb[60].mxu1 %v2754_v47  ;;  %v15259_v45 = vld [vmem:[%s15819_s24 + $0x1150] sm:$0xff]  }
 0x215   : > { %13929 = vmatprep.subr.bf16.mxu0 %v15223_v48  ;;  %13950 = vmatpush3.bf16.msra.mxu1 %v15222_v46  ;;  %v15260_v46 = vld [vmem:[%s15819_s24 + $0x11d0] sm:$0xff]  }
 0x216   : > { %13951 = vmatprep.subr.bf16.mxu1 %v15224_v49  ;;  %10733 = vmatprep.mubr.bf16.mxu0 %v2794_v34  ;;  %v15261_v47 = vld [vmem:[%s15819_s24 + $0x1110] sm:$0xff]   ;;  %v15263_v49 = vld [vmem:[%s15819_s24 + $0x1158] sm:$0xff]  }
 0x217   : > { %10773 = vmatprep.mubr.bf16.mxu1 %v2804_v39  ;;  %v15262_v48 = vld [vmem:[%s15819_s24 + $0x1190] sm:$0xff]   ;;  %v15298_v34 = vld [vmem:[%s15819_s24 + $0x1218] sm:$0xff]   ;;  %v15303_v39 = vld [vmem:[%s15819_s24 + $0x12a0] sm:$0xff]  }
 0x218   : > { %13930 = vmatpush3.bf16.msra.mxu0 %v15225_v50  ;;  %v15264_v50 = vld [vmem:[%s15819_s24 + $0x11d8] sm:$0xff]  }
 0x219   : > { %13931 = vmatprep.subr.bf16.mxu0 %v15227_v52  ;;  %13952 = vmatpush3.bf16.msra.mxu1 %v15226_v51  ;;  %v15265_v51 = vld [vmem:[%s15819_s24 + $0x1118] sm:$0xff]  }
 0x21a   : > { %13953 = vmatprep.subr.bf16.mxu1 %v15228_v53  ;;  %v15266_v52 = vld [vmem:[%s15819_s24 + $0x1198] sm:$0xff]   ;;  %v15267_v53 = vld [vmem:[%s15819_s24 + $0x1160] sm:$0xff]  }
 0x21c   : > { %13932 = vmatpush3.bf16.msra.mxu0 %v15229_v54  ;;  %v15268_v54 = vld [vmem:[%s15819_s24 + $0x11e0] sm:$0xff]  }
 0x21d   : > { %13933 = vmatprep.subr.bf16.mxu0 %v15231_v56  ;;  %13954 = vmatpush3.bf16.msra.mxu1 %v15230_v55  ;;  %v15269_v55 = vld [vmem:[%s15819_s24 + $0x1120] sm:$0xff]  }
 0x21e   : > { %13955 = vmatprep.subr.bf16.mxu1 %v15232_v57  ;;  %v15270_v56 = vld [vmem:[%s15819_s24 + $0x11a0] sm:$0xff]   ;;  %v15271_v57 = vld [vmem:[%s15819_s24 + $0x1168] sm:$0xff]  }
 0x220   : > { %13934 = vmatpush3.bf16.msra.mxu0 %v15233_v58  ;;  %v15272_v58 = vld [vmem:[%s15819_s24 + $0x11e8] sm:$0xff]  }
 0x221   : > { %13935 = vmatprep.subr.bf16.mxu0 %v15235_v60  ;;  %13956 = vmatpush3.bf16.msra.mxu1 %v15234_v59  ;;  %v15273_v60 = vld [vmem:[%s15819_s24 + $0x1128] sm:$0xff]  }
 0x222   : > { %13957 = vmatprep.subr.bf16.mxu1 %v15236_v61 }
 0x224   : > { %13936 = vmatpush3.bf16.msra.mxu0 %v15237_v62  ;;  %v15274_v62 = vld [vmem:[%s15819_s24 + $0x11a8] sm:$0xff]  }
 0x225   : > { %13937 = vmatprep.subr.bf16.mxu0 %v15239_v0  ;;  %13958 = vmatpush3.bf16.msra.mxu1 %v15238_v63 }
 0x226   : > { %v13635_v1 = vpop.f32.mrb[36].mxu0  ;;  %13959 = vmatprep.subr.bf16.mxu1 %v15240_v2  ;;  %v15275_v2 = vld [vmem:[%s15819_s24 + $0x1170] sm:$0xff]  }
 0x227   : > { %v13636_v3 = vpop.f32.mrb[37].mxu0  ;;  %v13657_v5 = vpop.f32.mrb[36].mxu1 }
 0x228   : > { %v13637_v7 = vadd.f32 %v13636_v3, %v13635_v1  ;;  %v13638_v8 = vpop.f32.mrb[38].mxu0  ;;  %v13658_v11 = vpop.f32.mrb[37].mxu1  ;;  %13938 = vmatpush3.bf16.msra.mxu0 %v15241_v4  ;;  %v15276_v3 = vld [vmem:[%s15819_s24 + $0x11f0] sm:$0xff]  }
 0x229   : > { %v13639_v12 = vpop.f32.mrb[39].mxu0  ;;  %v13659_v14 = vadd.f32 %v13658_v11, %v13657_v5  ;;  %v13660_v15 = vpop.f32.mrb[38].mxu1  ;;  %13939 = vmatprep.subr.bf16.mxu0 %v15243_v10  ;;  %13960 = vmatpush3.bf16.msra.mxu1 %v15242_v9  ;;  %v15277_v10 = vld [vmem:[%s15819_s24 + $0x1130] sm:$0xff]  }
 0x22a   : > { %v10176_v13 = vadd.f32 %v13637_v7, %v16476_v36  ;;  %v13661_v17 = vpop.f32.mrb[39].mxu1  ;;  %13961 = vmatprep.subr.bf16.mxu1 %v15244_v16  ;;  %v2773_v36 = vcombine.high %v16528_v32, %v16528_v32  ;;  %v15278_v12 = vld [vmem:[%s15819_s24 + $0x11b0] sm:$0xff]   ;;  %v15280_v15 = vld [vmem:[%s15819_s24 + $0x11f8] sm:$0xff]  }
 0x22b   : > { %v15281_v16 = vld [vmem:[%s15819_s24 + $0x1138] sm:$0xff]  }
 0x22c   : > { %v16513_v19 = vadd.f32 %v13659_v14, %v10176_v13  ;;  %13940 = vmatpush3.bf16.msra.mxu0 %v15245_v18  ;;  %v2801_v41 = vrot.slane %v2773_v36, %v15821_v6  ;;  %v15279_v14 = vld [vmem:[%s15819_s24 + $0x1178] sm:$0xff]   ;;  %v2787_v18 = vrot.slane %v16528_v32, %v15821_v6  ;;  %v15300_v36 = vld [vmem:[%s15819_s24 + $0x1260] sm:$0xff]  }
 0x22d   : > { %13941 = vmatprep.subr.bf16.mxu0 %v15247_v21  ;;  %13962 = vmatpush3.bf16.msra.mxu1 %v15246_v20  ;;  %v15282_v17 = vld [vmem:[%s15819_s24 + $0x11b8] sm:$0xff]   ;;  %v15285_v20 = vld [vmem:[%s15819_s24 + $0x12c0] sm:$0xff]  }
 0x22e   : > { %13963 = vmatprep.subr.bf16.mxu1 %v15248_v22  ;;  %v2805_v44 = vcombine.high %v2801_v41, %v2801_v41  ;;  %v15286_v21 = vld [vmem:[%s15819_s24 + $0x1200] sm:$0xff]   ;;  %v15296_v32 = vld [vmem:[%s15819_s24 + $0x1258] sm:$0xff]  }
 0x22f   : > { %v15287_v22 = vld [vmem:[%s15819_s24 + $0x1280] sm:$0xff]  }
 0x230   : > { %13942 = vmatpush3.bf16.msra.mxu0 %v15249_v23  ;;  %v2803_v23 = vcombine.high %v2787_v18, %v2787_v18 }
 0x231   : > { %13971 = vmatprep.subr.bf16.mxu0 %v15251_v26  ;;  %13964 = vmatpush3.bf16.msra.mxu1 %v15250_v28  ;;  %v15290_v26 = vld [vmem:[%s15819_s24 + $0x1208] sm:$0xff]   ;;  %v15292_v28 = vld [vmem:[%s15819_s24 + $0x1250] sm:$0xff]  }
 0x232   : > { %13993 = vmatprep.subr.bf16.mxu1 %v15252_v31  ;;  %v15295_v31 = vld [vmem:[%s15819_s24 + $0x1290] sm:$0xff]  }
 0x233   : > { %10734 = vmatmul.mubr.bf16.vlgmr.msra.gmra.mrb[64].mxu0 %v2780_v30  ;;  %v15294_v30 = vld [vmem:[%s15819_s24 + $0x1210] sm:$0xff]  }
 0x234   : > { %13972 = vmatpush3.bf16.msra.mxu0 %v15253_v33  ;;  %10774 = vmatmul.mubr.bf16.vlgmr.msra.gmra.mrb[64].mxu1 %v2802_v37  ;;  %v15297_v33 = vld [vmem:[%s15819_s24 + $0x12d8] sm:$0xff]   ;;  %v15301_v37 = vld [vmem:[%s15819_s24 + $0x12e0] sm:$0xff]  }
 0x235   : > { %13973 = vmatprep.subr.bf16.mxu0 %v15255_v38  ;;  %13994 = vmatpush3.bf16.msra.mxu1 %v15254_v35  ;;  %v15299_v35 = vld [vmem:[%s15819_s24 + $0x1298] sm:$0xff]   ;;  %v15302_v38 = vld [vmem:[%s15819_s24 + $0x1220] sm:$0xff]  }
 0x236   : > { %10813 = vmatprep.mubr.bf16.mxu0 %v2801_v41  ;;  %13995 = vmatprep.subr.bf16.mxu1 %v15256_v40  ;;  %v15304_v40 = vld [vmem:[%s15819_s24 + $0x1268] sm:$0xff]  }
 0x237   : > { %10853 = vmatprep.mubr.bf16.mxu1 %v2805_v44  ;;  %v15305_v41 = vld [vmem:[%s15819_s24 + $0x12e8] sm:$0xff]  }
 0x238   : > { %13974 = vmatpush3.bf16.msra.mxu0 %v15257_v42 }
 0x239   : > { %13975 = vmatprep.subr.bf16.mxu0 %v15259_v45  ;;  %13996 = vmatpush3.bf16.msra.mxu1 %v15258_v43  ;;  %v15306_v43 = vld [vmem:[%s15819_s24 + $0x1228] sm:$0xff]  }
 0x23a   : > { %13997 = vmatprep.subr.bf16.mxu1 %v15260_v46  ;;  %v15307_v45 = vld [vmem:[%s15819_s24 + $0x12a8] sm:$0xff]  }
 0x23c   : > { %13976 = vmatpush3.bf16.msra.mxu0 %v15261_v47 }
 0x23d   : > { %13977 = vmatprep.subr.bf16.mxu0 %v15263_v49  ;;  %13998 = vmatpush3.bf16.msra.mxu1 %v15262_v48  ;;  %v15308_v49 = vld [vmem:[%s15819_s24 + $0x1270] sm:$0xff]  }
 0x23e   : > { %13999 = vmatprep.subr.bf16.mxu1 %v15264_v50  ;;  %v15309_v50 = vld [vmem:[%s15819_s24 + $0x12f0] sm:$0xff]  }
 0x240   : > { %13978 = vmatpush3.bf16.msra.mxu0 %v15265_v51 }
 0x241   : > { %13979 = vmatprep.subr.bf16.mxu0 %v15267_v53  ;;  %14000 = vmatpush3.bf16.msra.mxu1 %v15266_v52 }
 0x242   : > { %14001 = vmatprep.subr.bf16.mxu1 %v15268_v54 }
 0x244   : > { %13980 = vmatpush3.bf16.msra.mxu0 %v15269_v55 }
 0x245   : > { %13981 = vmatprep.subr.bf16.mxu0 %v15271_v57  ;;  %14002 = vmatpush3.bf16.msra.mxu1 %v15270_v56  ;;  %v15310_v56 = vld [vmem:[%s15819_s24 + $0x1230] sm:$0xff]  }
 0x246   : > { %v13679_v59 = vpop.f32.mrb[40].mxu0  ;;  %14003 = vmatprep.subr.bf16.mxu1 %v15272_v58  ;;  %v15311_v58 = vld [vmem:[%s15819_s24 + $0x12b0] sm:$0xff]  }
 0x247   : > { %v13680_v61 = vpop.f32.mrb[41].mxu0  ;;  %v13701_v63 = vpop.f32.mrb[40].mxu1 }
 0x248   : > { %v13681_v0 = vadd.f32 %v13680_v61, %v13679_v59  ;;  %v13682_v1 = vpop.f32.mrb[42].mxu0  ;;  %v13702_v4 = vpop.f32.mrb[41].mxu1  ;;  %13982 = vmatpush3.bf16.msra.mxu0 %v15273_v60  ;;  %v15312_v60 = vld [vmem:[%s15819_s24 + $0x1278] sm:$0xff]  }
 0x249   : > { %v13683_v5 = vpop.f32.mrb[43].mxu0  ;;  %v13703_v8 = vadd.f32 %v13702_v4, %v13701_v63  ;;  %v13704_v9 = vpop.f32.mrb[42].mxu1  ;;  %13983 = vmatprep.subr.bf16.mxu0 %v15275_v2  ;;  %14004 = vmatpush3.bf16.msra.mxu1 %v15274_v62  ;;  %v15313_v61 = vld [vmem:[%s15819_s24 + $0x12f8] sm:$0xff]   ;;  %v294_v63 = vld [vmem:[%s17178_s0 + $0x48] sm:$0xff]  ;;  %v15316_v1 = vld [vmem:[%s15819_s24 + $0x1340] sm:$0xff]  }
 0x24a   : > { %v10256_v7 = vadd.f32 %v13681_v0, %v16513_v19  ;;  %v13705_v11 = vpop.f32.mrb[43].mxu1  ;;  %14005 = vmatprep.subr.bf16.mxu1 %v15276_v3  ;;  %v15284_v19 = vld [vmem:[%s15819_s24 + $0x1240] sm:$0xff]   ;;  %v15314_v62 = vld [vmem:[%s15819_s24 + $0x1238] sm:$0xff]   ;;  %v2813_v0 = vrot.slane %v294_v63, %v15821_v6  ;;  %v2806_v2 = vcombine.high %v294_v63, %v294_v63  ;;  %v15353_v63 = vld [vmem:[%s15819_s24 + $0x1448] sm:$0xff]  }
 0x24b   : > { %v15315_v3 = vld [vmem:[%s15819_s24 + $0x12b8] sm:$0xff]   ;;  %v15318_v9 = vld [vmem:[%s15819_s24 + $0x1300] sm:$0xff]  }
 0x24c   : > { %v16561_v13 = vadd.f32 %v13703_v8, %v10256_v7  ;;  %13984 = vmatpush3.bf16.msra.mxu0 %v15277_v10  ;;  %v2821_v4 = vcombine.high %v2813_v0, %v2813_v0  ;;  %v2829_v5 = vrot.slane %v2813_v0, %v15821_v6  ;;  %v15317_v7 = vld [vmem:[%s15819_s24 + $0x13c0] sm:$0xff]   ;;  %v16612_v8 = vrot.slane %v2806_v2, %v15821_v6  ;;  %v15354_v0 = vld [vmem:[%s15819_s24 + $0x14c8] sm:$0xff]  }
 0x24d   : > { %13985 = vmatprep.subr.bf16.mxu0 %v15279_v14  ;;  %14006 = vmatpush3.bf16.msra.mxu1 %v15278_v12  ;;  %v15319_v11 = vld [vmem:[%s15819_s24 + $0x1380] sm:$0xff]   ;;  %v15320_v14 = vld [vmem:[%s15819_s24 + $0x1348] sm:$0xff]  }
 0x24e   : > { %14007 = vmatprep.subr.bf16.mxu1 %v15280_v15  ;;  %v2843_v10 = vrot.slane %v2821_v4, %v15821_v6  ;;  %v2822_v12 = vcombine.high %v16612_v8, %v16612_v8  ;;  %v15356_v2 = vld [vmem:[%s15819_s24 + $0x1488] sm:$0xff]   ;;  %v15358_v4 = vld [vmem:[%s15819_s24 + $0x14d0] sm:$0xff]  }
 0x250   : > { %13986 = vmatpush3.bf16.msra.mxu0 %v15281_v16  ;;  %v2853_v15 = vcombine.high %v2843_v10, %v2843_v10  ;;  %v15321_v16 = vld [vmem:[%s15819_s24 + $0x13c8] sm:$0xff]  }
 0x251   : > { %14015 = vmatprep.subr.bf16.mxu0 %v15284_v19  ;;  %14008 = vmatpush3.bf16.msra.mxu1 %v15282_v17  ;;  %v2850_v17 = vrot.slane %v2822_v12, %v15821_v6  ;;  %v15323_v19 = vld [vmem:[%s15819_s24 + $0x1388] sm:$0xff]   ;;  %v15365_v12 = vld [vmem:[%s15819_s24 + $0x1460] sm:$0xff]  }
 0x252   : > { %14037 = vmatprep.subr.bf16.mxu1 %v15285_v20 }
 0x253   : > { %10814 = vmatmul.mubr.bf16.vlgmr.msra.gmra.mrb[68].mxu0 %v2787_v18  ;;  %v15322_v18 = vld [vmem:[%s15819_s24 + $0x1308] sm:$0xff]   ;;  %v2854_v20 = vcombine.high %v2850_v17, %v2850_v17 }
 0x254   : > { %14016 = vmatpush3.bf16.msra.mxu0 %v15286_v21  ;;  %10854 = vmatmul.mubr.bf16.vlgmr.msra.gmra.mrb[68].mxu1 %v2803_v23  ;;  %v15324_v21 = vld [vmem:[%s15819_s24 + $0x1350] sm:$0xff]  }
 0x255   : > { %14017 = vmatprep.subr.bf16.mxu0 %v15288_v24  ;;  %14038 = vmatpush3.bf16.msra.mxu1 %v15287_v22  ;;  %v15325_v22 = vld [vmem:[%s15819_s24 + $0x13d0] sm:$0xff]  }
 0x256   : > { %14039 = vmatprep.subr.bf16.mxu1 %v15289_v25  ;;  %10893 = vmatprep.mubr.bf16.mxu0 %v2843_v10  ;;  %v15326_v23 = vld [vmem:[%s15819_s24 + $0x1310] sm:$0xff]   ;;  %v15328_v25 = vld [vmem:[%s15819_s24 + $0x1358] sm:$0xff]  }
 0x257   : > { %10933 = vmatprep.mubr.bf16.mxu1 %v2853_v15  ;;  %v15327_v24 = vld [vmem:[%s15819_s24 + $0x1390] sm:$0xff]   ;;  %v15363_v10 = vld [vmem:[%s15819_s24 + $0x1418] sm:$0xff]   ;;  %v15368_v15 = vld [vmem:[%s15819_s24 + $0x14a0] sm:$0xff]  }
 0x258   : > { %14018 = vmatpush3.bf16.msra.mxu0 %v15290_v26  ;;  %v15329_v26 = vld [vmem:[%s15819_s24 + $0x13d8] sm:$0xff]  }
 0x259   : > { %14019 = vmatprep.subr.bf16.mxu0 %v15292_v28  ;;  %14040 = vmatpush3.bf16.msra.mxu1 %v15291_v27  ;;  %v15330_v27 = vld [vmem:[%s15819_s24 + $0x1318] sm:$0xff]  }
 0x25a   : > { %14041 = vmatprep.subr.bf16.mxu1 %v15293_v29  ;;  %v15331_v28 = vld [vmem:[%s15819_s24 + $0x1398] sm:$0xff]   ;;  %v15332_v29 = vld [vmem:[%s15819_s24 + $0x1360] sm:$0xff]  }
 0x25c   : > { %14020 = vmatpush3.bf16.msra.mxu0 %v15294_v30  ;;  %v15333_v30 = vld [vmem:[%s15819_s24 + $0x13e0] sm:$0xff]  }
 0x25d   : > { %14021 = vmatprep.subr.bf16.mxu0 %v15296_v32  ;;  %14042 = vmatpush3.bf16.msra.mxu1 %v15295_v31  ;;  %v15334_v31 = vld [vmem:[%s15819_s24 + $0x1320] sm:$0xff]  }
 0x25e   : > { %14043 = vmatprep.subr.bf16.mxu1 %v15297_v33  ;;  %v15335_v32 = vld [vmem:[%s15819_s24 + $0x13a0] sm:$0xff]   ;;  %v15336_v33 = vld [vmem:[%s15819_s24 + $0x1368] sm:$0xff]  }
 0x260   : > { %14022 = vmatpush3.bf16.msra.mxu0 %v15298_v34  ;;  %v15337_v34 = vld [vmem:[%s15819_s24 + $0x13e8] sm:$0xff]  }
 0x261   : > { %14023 = vmatprep.subr.bf16.mxu0 %v15300_v36  ;;  %14044 = vmatpush3.bf16.msra.mxu1 %v15299_v35  ;;  %v15338_v36 = vld [vmem:[%s15819_s24 + $0x1328] sm:$0xff]  }
 0x262   : > { %14045 = vmatprep.subr.bf16.mxu1 %v15301_v37 }
 0x264   : > { %14024 = vmatpush3.bf16.msra.mxu0 %v15302_v38  ;;  %v15339_v38 = vld [vmem:[%s15819_s24 + $0x13a8] sm:$0xff]  }
 0x265   : > { %14025 = vmatprep.subr.bf16.mxu0 %v15304_v40  ;;  %14046 = vmatpush3.bf16.msra.mxu1 %v15303_v39 }
 0x266   : > { %v13723_v42 = vpop.f32.mrb[44].mxu0  ;;  %14047 = vmatprep.subr.bf16.mxu1 %v15305_v41 }
 0x267   : > { %v13724_v44 = vpop.f32.mrb[45].mxu0  ;;  %v13745_v46 = vpop.f32.mrb[44].mxu1 }
 0x268   : > { %v13725_v47 = vadd.f32 %v13724_v44, %v13723_v42  ;;  %v13726_v48 = vpop.f32.mrb[46].mxu0  ;;  %v13746_v51 = vpop.f32.mrb[45].mxu1  ;;  %14026 = vmatpush3.bf16.msra.mxu0 %v15306_v43  ;;  %v15340_v42 = vld [vmem:[%s15819_s24 + $0x1370] sm:$0xff]  }
 0x269   : > { %v13727_v52 = vpop.f32.mrb[47].mxu0  ;;  %v13747_v54 = vadd.f32 %v13746_v51, %v13745_v46  ;;  %v13748_v55 = vpop.f32.mrb[46].mxu1  ;;  %14027 = vmatprep.subr.bf16.mxu0 %v15308_v49  ;;  %14048 = vmatpush3.bf16.msra.mxu1 %v15307_v45  ;;  %v15341_v43 = vld [vmem:[%s15819_s24 + $0x13f0] sm:$0xff]  }
 0x26a   : > { %v10336_v53 = vadd.f32 %v13725_v47, %v16561_v13  ;;  %v13749_v57 = vpop.f32.mrb[47].mxu1  ;;  %14049 = vmatprep.subr.bf16.mxu1 %v15309_v50  ;;  %v2851_v13 = vcombine.high %v2829_v5, %v2829_v5  ;;  %v15342_v49 = vld [vmem:[%s15819_s24 + $0x1330] sm:$0xff]   ;;  %v15346_v55 = vld [vmem:[%s15819_s24 + $0x1338] sm:$0xff]  }
 0x26b   : > { %v15343_v51 = vld [vmem:[%s15819_s24 + $0x13b0] sm:$0xff]   ;;  %v2836_v57 = vrot.slane %v16612_v8, %v15821_v6  ;;  %v15361_v8 = vld [vmem:[%s15819_s24 + $0x1458] sm:$0xff]  }
 0x26c   : > { %v16598_v59 = vadd.f32 %v13747_v54, %v10336_v53  ;;  %14028 = vmatpush3.bf16.msra.mxu0 %v15310_v56  ;;  %v15344_v53 = vld [vmem:[%s15819_s24 + $0x1378] sm:$0xff]  }
 0x26d   : > { %14029 = vmatprep.subr.bf16.mxu0 %v15312_v60  ;;  %14050 = vmatpush3.bf16.msra.mxu1 %v15311_v58  ;;  %v15345_v54 = vld [vmem:[%s15819_s24 + $0x13f8] sm:$0xff]   ;;  %v15349_v58 = vld [vmem:[%s15819_s24 + $0x1440] sm:$0xff]  }
 0x26e   : > { %14051 = vmatprep.subr.bf16.mxu1 %v15313_v61  ;;  %v15347_v56 = vld [vmem:[%s15819_s24 + $0x13b8] sm:$0xff]   ;;  %v15351_v60 = vld [vmem:[%s15819_s24 + $0x1400] sm:$0xff]  }
 0x26f   : > { %v15352_v61 = vld [vmem:[%s15819_s24 + $0x1480] sm:$0xff]  }
 0x270   : > { %14030 = vmatpush3.bf16.msra.mxu0 %v15314_v62  ;;  %v2852_v62 = vcombine.high %v2836_v57, %v2836_v57 }
 0x271   : > { %14059 = vmatprep.subr.bf16.mxu0 %v15316_v1  ;;  %14052 = vmatpush3.bf16.msra.mxu1 %v15315_v3  ;;  %v15355_v1 = vld [vmem:[%s15819_s24 + $0x1408] sm:$0xff]   ;;  %v15357_v3 = vld [vmem:[%s15819_s24 + $0x1450] sm:$0xff]  }
 0x272   : > { %14081 = vmatprep.subr.bf16.mxu1 %v15317_v7  ;;  %v15360_v7 = vld [vmem:[%s15819_s24 + $0x1490] sm:$0xff]  }
 0x273   : > { %10894 = vmatmul.mubr.bf16.vlgmr.msra.gmra.mrb[72].mxu0 %v2829_v5  ;;  %v15359_v5 = vld [vmem:[%s15819_s24 + $0x1410] sm:$0xff]  }
 0x274   : > { %14060 = vmatpush3.bf16.msra.mxu0 %v15318_v9  ;;  %10934 = vmatmul.mubr.bf16.vlgmr.msra.gmra.mrb[72].mxu1 %v2851_v13  ;;  %v15362_v9 = vld [vmem:[%s15819_s24 + $0x14d8] sm:$0xff]   ;;  %v15366_v13 = vld [vmem:[%s15819_s24 + $0x14e0] sm:$0xff]  }
 0x275   : > { %14061 = vmatprep.subr.bf16.mxu0 %v15320_v14  ;;  %14082 = vmatpush3.bf16.msra.mxu1 %v15319_v11  ;;  %v15364_v11 = vld [vmem:[%s15819_s24 + $0x1498] sm:$0xff]   ;;  %v15367_v14 = vld [vmem:[%s15819_s24 + $0x1420] sm:$0xff]  }
 0x276   : > { %10973 = vmatprep.mubr.bf16.mxu0 %v2850_v17  ;;  %14083 = vmatprep.subr.bf16.mxu1 %v15321_v16  ;;  %v15369_v16 = vld [vmem:[%s15819_s24 + $0x1468] sm:$0xff]  }
 0x277   : > { %11013 = vmatprep.mubr.bf16.mxu1 %v2854_v20  ;;  %v15370_v17 = vld [vmem:[%s15819_s24 + $0x14e8] sm:$0xff]  }
 0x278   : > { %14062 = vmatpush3.bf16.msra.mxu0 %v15322_v18 }
 0x279   : > { %14063 = vmatprep.subr.bf16.mxu0 %v15324_v21  ;;  %14084 = vmatpush3.bf16.msra.mxu1 %v15323_v19  ;;  %v15371_v19 = vld [vmem:[%s15819_s24 + $0x1428] sm:$0xff]  }
 0x27a   : > { %14085 = vmatprep.subr.bf16.mxu1 %v15325_v22  ;;  %v15372_v21 = vld [vmem:[%s15819_s24 + $0x14a8] sm:$0xff]  }
 0x27c   : > { %14064 = vmatpush3.bf16.msra.mxu0 %v15326_v23 }
 0x27d   : > { %14065 = vmatprep.subr.bf16.mxu0 %v15328_v25  ;;  %14086 = vmatpush3.bf16.msra.mxu1 %v15327_v24  ;;  %v15373_v25 = vld [vmem:[%s15819_s24 + $0x1470] sm:$0xff]  }
 0x27e   : > { %14087 = vmatprep.subr.bf16.mxu1 %v15329_v26  ;;  %v15374_v26 = vld [vmem:[%s15819_s24 + $0x14f0] sm:$0xff]  }
 0x280   : > { %14066 = vmatpush3.bf16.msra.mxu0 %v15330_v27 }
 0x281   : > { %14067 = vmatprep.subr.bf16.mxu0 %v15332_v29  ;;  %14088 = vmatpush3.bf16.msra.mxu1 %v15331_v28 }
 0x282   : > { %14089 = vmatprep.subr.bf16.mxu1 %v15333_v30 }
 0x284   : > { %14068 = vmatpush3.bf16.msra.mxu0 %v15334_v31 }
 0x285   : > { %14069 = vmatprep.subr.bf16.mxu0 %v15336_v33  ;;  %14090 = vmatpush3.bf16.msra.mxu1 %v15335_v32  ;;  %v15375_v32 = vld [vmem:[%s15819_s24 + $0x1430] sm:$0xff]  }
 0x286   : > { %v13767_v35 = vpop.f32.mrb[48].mxu0  ;;  %14091 = vmatprep.subr.bf16.mxu1 %v15337_v34  ;;  %v15376_v34 = vld [vmem:[%s15819_s24 + $0x14b0] sm:$0xff]  }
 0x287   : > { %v13768_v37 = vpop.f32.mrb[49].mxu0  ;;  %v13789_v39 = vpop.f32.mrb[48].mxu1 }
 0x288   : > { %v13769_v40 = vadd.f32 %v13768_v37, %v13767_v35  ;;  %v13770_v41 = vpop.f32.mrb[50].mxu0  ;;  %v13790_v44 = vpop.f32.mrb[49].mxu1  ;;  %14070 = vmatpush3.bf16.msra.mxu0 %v15338_v36  ;;  %v15377_v36 = vld [vmem:[%s15819_s24 + $0x1478] sm:$0xff]  }
 0x289   : > { %v13771_v45 = vpop.f32.mrb[51].mxu0  ;;  %v13791_v47 = vadd.f32 %v13790_v44, %v13789_v39  ;;  %v13792_v48 = vpop.f32.mrb[50].mxu1  ;;  %14071 = vmatprep.subr.bf16.mxu0 %v15340_v42  ;;  %14092 = vmatpush3.bf16.msra.mxu1 %v15339_v38  ;;  %v15378_v37 = vld [vmem:[%s15819_s24 + $0x14f8] sm:$0xff]   ;;  %v295_v39 = vld [vmem:[%s17178_s0 + $0x50] sm:$0xff]  ;;  %v15381_v41 = vld [vmem:[%s15819_s24 + $0x1540] sm:$0xff]  }
 0x28a   : > { %v10416_v46 = vadd.f32 %v13769_v40, %v16598_v59  ;;  %v13793_v50 = vpop.f32.mrb[51].mxu1  ;;  %14093 = vmatprep.subr.bf16.mxu1 %v15341_v43  ;;  %v15350_v59 = vld [vmem:[%s15819_s24 + $0x14c0] sm:$0xff]   ;;  %v15379_v38 = vld [vmem:[%s15819_s24 + $0x1438] sm:$0xff]   ;;  %v2862_v40 = vrot.slane %v295_v39, %v15821_v6  ;;  %v2855_v42 = vcombine.high %v295_v39, %v295_v39  ;;  %v15418_v39 = vld [vmem:[%s15819_s24 + $0x1648] sm:$0xff]  }
 0x28b   : > { %v15380_v43 = vld [vmem:[%s15819_s24 + $0x14b8] sm:$0xff]   ;;  %v15383_v48 = vld [vmem:[%s15819_s24 + $0x1500] sm:$0xff]  }
 0x28c   : > { %v16645_v52 = vadd.f32 %v13791_v47, %v10416_v46  ;;  %14072 = vmatpush3.bf16.msra.mxu0 %v15342_v49  ;;  %v2870_v44 = vcombine.high %v2862_v40, %v2862_v40  ;;  %v2878_v45 = vrot.slane %v2862_v40, %v15821_v6  ;;  %v15382_v46 = vld [vmem:[%s15819_s24 + $0x15c0] sm:$0xff]   ;;  %v16696_v47 = vrot.slane %v2855_v42, %v15821_v6  ;;  %v15419_v40 = vld [vmem:[%s15819_s24 + $0x16c8] sm:$0xff]  }
 0x28d   : > { %14073 = vmatprep.subr.bf16.mxu0 %v15344_v53  ;;  %14094 = vmatpush3.bf16.msra.mxu1 %v15343_v51  ;;  %v15384_v50 = vld [vmem:[%s15819_s24 + $0x1580] sm:$0xff]   ;;  %v15385_v53 = vld [vmem:[%s15819_s24 + $0x1548] sm:$0xff]  }
 0x28e   : > { %14095 = vmatprep.subr.bf16.mxu1 %v15345_v54  ;;  %v2892_v49 = vrot.slane %v2870_v44, %v15821_v6  ;;  %v2871_v51 = vcombine.high %v16696_v47, %v16696_v47  ;;  %v15421_v42 = vld [vmem:[%s15819_s24 + $0x1688] sm:$0xff]   ;;  %v15423_v44 = vld [vmem:[%s15819_s24 + $0x16d0] sm:$0xff]  }
 0x290   : > { %14074 = vmatpush3.bf16.msra.mxu0 %v15346_v55  ;;  %v2902_v54 = vcombine.high %v2892_v49, %v2892_v49  ;;  %v15386_v55 = vld [vmem:[%s15819_s24 + $0x15c8] sm:$0xff]  }
 0x291   : > { %14103 = vmatprep.subr.bf16.mxu0 %v15349_v58  ;;  %14096 = vmatpush3.bf16.msra.mxu1 %v15347_v56  ;;  %v2899_v56 = vrot.slane %v2871_v51, %v15821_v6  ;;  %v15388_v58 = vld [vmem:[%s15819_s24 + $0x1588] sm:$0xff]   ;;  %v15430_v51 = vld [vmem:[%s15819_s24 + $0x1660] sm:$0xff]  }
 0x292   : > { %14125 = vmatprep.subr.bf16.mxu1 %v15350_v59 }
 0x293   : > { %10974 = vmatmul.mubr.bf16.vlgmr.msra.gmra.mrb[76].mxu0 %v2836_v57  ;;  %v15387_v57 = vld [vmem:[%s15819_s24 + $0x1508] sm:$0xff]   ;;  %v2903_v59 = vcombine.high %v2899_v56, %v2899_v56 }
 0x294   : > { %14104 = vmatpush3.bf16.msra.mxu0 %v15351_v60  ;;  %11014 = vmatmul.mubr.bf16.vlgmr.msra.gmra.mrb[76].mxu1 %v2852_v62  ;;  %v15389_v60 = vld [vmem:[%s15819_s24 + $0x1550] sm:$0xff]  }
 0x295   : > { %14105 = vmatprep.subr.bf16.mxu0 %v15353_v63  ;;  %14126 = vmatpush3.bf16.msra.mxu1 %v15352_v61  ;;  %v15390_v61 = vld [vmem:[%s15819_s24 + $0x15d0] sm:$0xff]  }
 0x296   : > { %14127 = vmatprep.subr.bf16.mxu1 %v15354_v0  ;;  %11053 = vmatprep.mubr.bf16.mxu0 %v2892_v49  ;;  %v15391_v62 = vld [vmem:[%s15819_s24 + $0x1510] sm:$0xff]   ;;  %v15393_v0 = vld [vmem:[%s15819_s24 + $0x1558] sm:$0xff]  }
 0x297   : > { %11093 = vmatprep.mubr.bf16.mxu1 %v2902_v54  ;;  %v15392_v63 = vld [vmem:[%s15819_s24 + $0x1590] sm:$0xff]   ;;  %v15428_v49 = vld [vmem:[%s15819_s24 + $0x1618] sm:$0xff]   ;;  %v15433_v54 = vld [vmem:[%s15819_s24 + $0x16a0] sm:$0xff]  }
 0x298   : > { %14106 = vmatpush3.bf16.msra.mxu0 %v15355_v1  ;;  %v15394_v1 = vld [vmem:[%s15819_s24 + $0x15d8] sm:$0xff]  }
 0x299   : > { %14107 = vmatprep.subr.bf16.mxu0 %v15357_v3  ;;  %14128 = vmatpush3.bf16.msra.mxu1 %v15356_v2  ;;  %v15395_v2 = vld [vmem:[%s15819_s24 + $0x1518] sm:$0xff]  }
 0x29a   : > { %14129 = vmatprep.subr.bf16.mxu1 %v15358_v4  ;;  %v15396_v3 = vld [vmem:[%s15819_s24 + $0x1598] sm:$0xff]   ;;  %v15397_v4 = vld [vmem:[%s15819_s24 + $0x1560] sm:$0xff]  }
 0x29c   : > { %14108 = vmatpush3.bf16.msra.mxu0 %v15359_v5  ;;  %v15398_v5 = vld [vmem:[%s15819_s24 + $0x15e0] sm:$0xff]  }
 0x29d   : > { %14109 = vmatprep.subr.bf16.mxu0 %v15361_v8  ;;  %14130 = vmatpush3.bf16.msra.mxu1 %v15360_v7  ;;  %v15399_v7 = vld [vmem:[%s15819_s24 + $0x1520] sm:$0xff]  }
 0x29e   : > { %14131 = vmatprep.subr.bf16.mxu1 %v15362_v9  ;;  %v15400_v8 = vld [vmem:[%s15819_s24 + $0x15a0] sm:$0xff]   ;;  %v15401_v9 = vld [vmem:[%s15819_s24 + $0x1568] sm:$0xff]  }
 0x2a0   : > { %14110 = vmatpush3.bf16.msra.mxu0 %v15363_v10  ;;  %v15402_v10 = vld [vmem:[%s15819_s24 + $0x15e8] sm:$0xff]  }
 0x2a1   : > { %14111 = vmatprep.subr.bf16.mxu0 %v15365_v12  ;;  %14132 = vmatpush3.bf16.msra.mxu1 %v15364_v11  ;;  %v15403_v12 = vld [vmem:[%s15819_s24 + $0x1528] sm:$0xff]  }
 0x2a2   : > { %14133 = vmatprep.subr.bf16.mxu1 %v15366_v13 }
 0x2a4   : > { %14112 = vmatpush3.bf16.msra.mxu0 %v15367_v14  ;;  %v15404_v14 = vld [vmem:[%s15819_s24 + $0x15a8] sm:$0xff]  }
 0x2a5   : > { %14113 = vmatprep.subr.bf16.mxu0 %v15369_v16  ;;  %14134 = vmatpush3.bf16.msra.mxu1 %v15368_v15 }
 0x2a6   : > { %v13811_v18 = vpop.f32.mrb[52].mxu0  ;;  %14135 = vmatprep.subr.bf16.mxu1 %v15370_v17 }
 0x2a7   : > { %v13812_v20 = vpop.f32.mrb[53].mxu0  ;;  %v13833_v22 = vpop.f32.mrb[52].mxu1 }
 0x2a8   : > { %v13813_v23 = vadd.f32 %v13812_v20, %v13811_v18  ;;  %v13814_v24 = vpop.f32.mrb[54].mxu0  ;;  %v13834_v27 = vpop.f32.mrb[53].mxu1  ;;  %14114 = vmatpush3.bf16.msra.mxu0 %v15371_v19  ;;  %v15405_v18 = vld [vmem:[%s15819_s24 + $0x1570] sm:$0xff]  }
 0x2a9   : > { %v13815_v28 = vpop.f32.mrb[55].mxu0  ;;  %v13835_v30 = vadd.f32 %v13834_v27, %v13833_v22  ;;  %v13836_v31 = vpop.f32.mrb[54].mxu1  ;;  %14115 = vmatprep.subr.bf16.mxu0 %v15373_v25  ;;  %14136 = vmatpush3.bf16.msra.mxu1 %v15372_v21  ;;  %v15406_v19 = vld [vmem:[%s15819_s24 + $0x15f0] sm:$0xff]  }
 0x2aa   : > { %v10496_v29 = vadd.f32 %v13813_v23, %v16645_v52  ;;  %v13837_v33 = vpop.f32.mrb[55].mxu1  ;;  %14137 = vmatprep.subr.bf16.mxu1 %v15374_v26  ;;  %v2900_v52 = vcombine.high %v2878_v45, %v2878_v45  ;;  %v15407_v25 = vld [vmem:[%s15819_s24 + $0x1530] sm:$0xff]   ;;  %v15411_v31 = vld [vmem:[%s15819_s24 + $0x1538] sm:$0xff]  }
 0x2ab   : > { %v15408_v27 = vld [vmem:[%s15819_s24 + $0x15b0] sm:$0xff]   ;;  %v2885_v33 = vrot.slane %v16696_v47, %v15821_v6  ;;  %v15426_v47 = vld [vmem:[%s15819_s24 + $0x1658] sm:$0xff]  }
 0x2ac   : > { %v16682_v35 = vadd.f32 %v13835_v30, %v10496_v29  ;;  %14116 = vmatpush3.bf16.msra.mxu0 %v15375_v32  ;;  %v15409_v29 = vld [vmem:[%s15819_s24 + $0x1578] sm:$0xff]  }
 0x2ad   : > { %14117 = vmatprep.subr.bf16.mxu0 %v15377_v36  ;;  %14138 = vmatpush3.bf16.msra.mxu1 %v15376_v34  ;;  %v15410_v30 = vld [vmem:[%s15819_s24 + $0x15f8] sm:$0xff]   ;;  %v15414_v34 = vld [vmem:[%s15819_s24 + $0x1640] sm:$0xff]  }
 0x2ae   : > { %14139 = vmatprep.subr.bf16.mxu1 %v15378_v37  ;;  %v15412_v32 = vld [vmem:[%s15819_s24 + $0x15b8] sm:$0xff]   ;;  %v15416_v36 = vld [vmem:[%s15819_s24 + $0x1600] sm:$0xff]  }
 0x2af   : > { %v15417_v37 = vld [vmem:[%s15819_s24 + $0x1680] sm:$0xff]  }
 0x2b0   : > { %14118 = vmatpush3.bf16.msra.mxu0 %v15379_v38  ;;  %v2901_v38 = vcombine.high %v2885_v33, %v2885_v33 }
 0x2b1   : > { %14147 = vmatprep.subr.bf16.mxu0 %v15381_v41  ;;  %14140 = vmatpush3.bf16.msra.mxu1 %v15380_v43  ;;  %v15420_v41 = vld [vmem:[%s15819_s24 + $0x1608] sm:$0xff]   ;;  %v15422_v43 = vld [vmem:[%s15819_s24 + $0x1650] sm:$0xff]  }
 0x2b2   : > { %14169 = vmatprep.subr.bf16.mxu1 %v15382_v46  ;;  %v15425_v46 = vld [vmem:[%s15819_s24 + $0x1690] sm:$0xff]  }
 0x2b3   : > { %11054 = vmatmul.mubr.bf16.vlgmr.msra.gmra.mrb[80].mxu0 %v2878_v45  ;;  %v15424_v45 = vld [vmem:[%s15819_s24 + $0x1610] sm:$0xff]  }
 0x2b4   : > { %14148 = vmatpush3.bf16.msra.mxu0 %v15383_v48  ;;  %11094 = vmatmul.mubr.bf16.vlgmr.msra.gmra.mrb[80].mxu1 %v2900_v52  ;;  %v15427_v48 = vld [vmem:[%s15819_s24 + $0x16d8] sm:$0xff]   ;;  %v15431_v52 = vld [vmem:[%s15819_s24 + $0x16e0] sm:$0xff]  }
 0x2b5   : > { %14149 = vmatprep.subr.bf16.mxu0 %v15385_v53  ;;  %14170 = vmatpush3.bf16.msra.mxu1 %v15384_v50  ;;  %v15429_v50 = vld [vmem:[%s15819_s24 + $0x1698] sm:$0xff]   ;;  %v15432_v53 = vld [vmem:[%s15819_s24 + $0x1620] sm:$0xff]  }
 0x2b6   : > { %11133 = vmatprep.mubr.bf16.mxu0 %v2899_v56  ;;  %14171 = vmatprep.subr.bf16.mxu1 %v15386_v55  ;;  %v15434_v55 = vld [vmem:[%s15819_s24 + $0x1668] sm:$0xff]  }
 0x2b7   : > { %11173 = vmatprep.mubr.bf16.mxu1 %v2903_v59  ;;  %v15435_v56 = vld [vmem:[%s15819_s24 + $0x16e8] sm:$0xff]  }
 0x2b8   : > { %14150 = vmatpush3.bf16.msra.mxu0 %v15387_v57 }
 0x2b9   : > { %14151 = vmatprep.subr.bf16.mxu0 %v15389_v60  ;;  %14172 = vmatpush3.bf16.msra.mxu1 %v15388_v58  ;;  %v15436_v58 = vld [vmem:[%s15819_s24 + $0x1628] sm:$0xff]  }
 0x2ba   : > { %14173 = vmatprep.subr.bf16.mxu1 %v15390_v61  ;;  %v15437_v60 = vld [vmem:[%s15819_s24 + $0x16a8] sm:$0xff]  }
 0x2bc   : > { %14152 = vmatpush3.bf16.msra.mxu0 %v15391_v62 }
 0x2bd   : > { %14153 = vmatprep.subr.bf16.mxu0 %v15393_v0  ;;  %14174 = vmatpush3.bf16.msra.mxu1 %v15392_v63  ;;  %v15438_v0 = vld [vmem:[%s15819_s24 + $0x1670] sm:$0xff]  }
 0x2be   : > { %14175 = vmatprep.subr.bf16.mxu1 %v15394_v1  ;;  %v15439_v1 = vld [vmem:[%s15819_s24 + $0x16f0] sm:$0xff]  }
 0x2c0   : > { %14154 = vmatpush3.bf16.msra.mxu0 %v15395_v2 }
 0x2c1   : > { %14155 = vmatprep.subr.bf16.mxu0 %v15397_v4  ;;  %14176 = vmatpush3.bf16.msra.mxu1 %v15396_v3 }
 0x2c2   : > { %14177 = vmatprep.subr.bf16.mxu1 %v15398_v5 }
 0x2c4   : > { %14156 = vmatpush3.bf16.msra.mxu0 %v15399_v7 }
 0x2c5   : > { %14157 = vmatprep.subr.bf16.mxu0 %v15401_v9  ;;  %14178 = vmatpush3.bf16.msra.mxu1 %v15400_v8  ;;  %v15440_v8 = vld [vmem:[%s15819_s24 + $0x1630] sm:$0xff]  }
 0x2c6   : > { %v13855_v11 = vpop.f32.mrb[56].mxu0  ;;  %14179 = vmatprep.subr.bf16.mxu1 %v15402_v10  ;;  %v15441_v10 = vld [vmem:[%s15819_s24 + $0x16b0] sm:$0xff]  }
 0x2c7   : > { %v13856_v13 = vpop.f32.mrb[57].mxu0  ;;  %v13877_v15 = vpop.f32.mrb[56].mxu1 }
 0x2c8   : > { %v13857_v16 = vadd.f32 %v13856_v13, %v13855_v11  ;;  %v13858_v17 = vpop.f32.mrb[58].mxu0  ;;  %v13878_v20 = vpop.f32.mrb[57].mxu1  ;;  %14158 = vmatpush3.bf16.msra.mxu0 %v15403_v12  ;;  %v15442_v12 = vld [vmem:[%s15819_s24 + $0x1678] sm:$0xff]  }
 0x2c9   : > { %v13859_v21 = vpop.f32.mrb[59].mxu0  ;;  %v13879_v23 = vadd.f32 %v13878_v20, %v13877_v15  ;;  %v13880_v24 = vpop.f32.mrb[58].mxu1  ;;  %14159 = vmatprep.subr.bf16.mxu0 %v15405_v18  ;;  %14180 = vmatpush3.bf16.msra.mxu1 %v15404_v14  ;;  %v15443_v13 = vld [vmem:[%s15819_s24 + $0x16f8] sm:$0xff]   ;;  %v15446_v17 = vld [vmem:[%s15819_s24 + $0x1740] sm:$0xff]  }
 0x2ca   : > { %v10576_v22 = vadd.f32 %v13857_v16, %v16682_v35  ;;  %v13881_v26 = vpop.f32.mrb[59].mxu1  ;;  %14181 = vmatprep.subr.bf16.mxu1 %v15406_v19  ;;  %v15415_v35 = vld [vmem:[%s15819_s24 + $0x16c0] sm:$0xff]   ;;  %v15444_v14 = vld [vmem:[%s15819_s24 + $0x1638] sm:$0xff]  }
 0x2cb   : > { %v296_v15 = vld [vmem:[%s17178_s0 + $0x58] sm:$0xff]  ;;  %v15448_v24 = vld [vmem:[%s15819_s24 + $0x1700] sm:$0xff]  }
 0x2cc   : > { %v16729_v28 = vadd.f32 %v13879_v23, %v10576_v22  ;;  %14160 = vmatpush3.bf16.msra.mxu0 %v15407_v25  ;;  %v2911_v16 = vrot.slane %v296_v15, %v15821_v6  ;;  %v2904_v18 = vcombine.high %v296_v15, %v296_v15  ;;  %v15445_v19 = vld [vmem:[%s15819_s24 + $0x16b8] sm:$0xff]   ;;  %v15447_v22 = vld [vmem:[%s15819_s24 + $0x17c0] sm:$0xff]   ;;  %v15483_v15 = vld [vmem:[%s15819_s24 + $0x1848] sm:$0xff]  }
 0x2cd   : > { %14161 = vmatprep.subr.bf16.mxu0 %v15409_v29  ;;  %14182 = vmatpush3.bf16.msra.mxu1 %v15408_v27  ;;  %v15449_v26 = vld [vmem:[%s15819_s24 + $0x1780] sm:$0xff]   ;;  %v15450_v29 = vld [vmem:[%s15819_s24 + $0x1748] sm:$0xff]  }
 0x2ce   : > { %14183 = vmatprep.subr.bf16.mxu1 %v15410_v30  ;;  %v2919_v20 = vcombine.high %v2911_v16, %v2911_v16  ;;  %v2927_v21 = vrot.slane %v2911_v16, %v15821_v6  ;;  %v16780_v23 = vrot.slane %v2904_v18, %v15821_v6  ;;  %v15484_v16 = vld [vmem:[%s15819_s24 + $0x18c8] sm:$0xff]  }
 0x2cf   : > { %v15486_v18 = vld [vmem:[%s15819_s24 + $0x1888] sm:$0xff]  }
 0x2d0   : > { %14162 = vmatpush3.bf16.msra.mxu0 %v15411_v31  ;;  %v2941_v25 = vrot.slane %v2919_v20, %v15821_v6  ;;  %v2920_v27 = vcombine.high %v16780_v23, %v16780_v23  ;;  %v15451_v31 = vld [vmem:[%s15819_s24 + $0x17c8] sm:$0xff]   ;;  %v15488_v20 = vld [vmem:[%s15819_s24 + $0x18d0] sm:$0xff]  }
 0x2d1   : > { %14191 = vmatprep.subr.bf16.mxu0 %v15414_v34  ;;  %14184 = vmatpush3.bf16.msra.mxu1 %v15412_v32  ;;  %v15453_v34 = vld [vmem:[%s15819_s24 + $0x1788] sm:$0xff]  }
 0x2d2   : > { %14213 = vmatprep.subr.bf16.mxu1 %v15415_v35  ;;  %v2951_v30 = vcombine.high %v2941_v25, %v2941_v25  ;;  %v2948_v32 = vrot.slane %v2920_v27, %v15821_v6  ;;  %v15495_v27 = vld [vmem:[%s15819_s24 + $0x1860] sm:$0xff]  }
 0x2d3   : > { %11134 = vmatmul.mubr.bf16.vlgmr.msra.gmra.mrb[84].mxu0 %v2885_v33  ;;  %v15452_v33 = vld [vmem:[%s15819_s24 + $0x1708] sm:$0xff]  }
 0x2d4   : > { %14192 = vmatpush3.bf16.msra.mxu0 %v15416_v36  ;;  %11174 = vmatmul.mubr.bf16.vlgmr.msra.gmra.mrb[84].mxu1 %v2901_v38  ;;  %v2952_v35 = vcombine.high %v2948_v32, %v2948_v32  ;;  %v15454_v36 = vld [vmem:[%s15819_s24 + $0x1750] sm:$0xff]  }
 0x2d5   : > { %14193 = vmatprep.subr.bf16.mxu0 %v15418_v39  ;;  %14214 = vmatpush3.bf16.msra.mxu1 %v15417_v37  ;;  %v15455_v37 = vld [vmem:[%s15819_s24 + $0x17d0] sm:$0xff]  }
 0x2d6   : > { %14215 = vmatprep.subr.bf16.mxu1 %v15419_v40  ;;  %11213 = vmatprep.mubr.bf16.mxu0 %v2941_v25  ;;  %v15456_v38 = vld [vmem:[%s15819_s24 + $0x1710] sm:$0xff]   ;;  %v15458_v40 = vld [vmem:[%s15819_s24 + $0x1758] sm:$0xff]  }
 0x2d7   : > { %11253 = vmatprep.mubr.bf16.mxu1 %v2951_v30  ;;  %v15457_v39 = vld [vmem:[%s15819_s24 + $0x1790] sm:$0xff]   ;;  %v15493_v25 = vld [vmem:[%s15819_s24 + $0x1818] sm:$0xff]   ;;  %v15498_v30 = vld [vmem:[%s15819_s24 + $0x18a0] sm:$0xff]  }
 0x2d8   : > { %14194 = vmatpush3.bf16.msra.mxu0 %v15420_v41  ;;  %v15459_v41 = vld [vmem:[%s15819_s24 + $0x17d8] sm:$0xff]  }
 0x2d9   : > { %14195 = vmatprep.subr.bf16.mxu0 %v15422_v43  ;;  %14216 = vmatpush3.bf16.msra.mxu1 %v15421_v42  ;;  %v15460_v42 = vld [vmem:[%s15819_s24 + $0x1718] sm:$0xff]  }
 0x2da   : > { %14217 = vmatprep.subr.bf16.mxu1 %v15423_v44  ;;  %v15461_v43 = vld [vmem:[%s15819_s24 + $0x1798] sm:$0xff]   ;;  %v15462_v44 = vld [vmem:[%s15819_s24 + $0x1760] sm:$0xff]  }
 0x2dc   : > { %14196 = vmatpush3.bf16.msra.mxu0 %v15424_v45  ;;  %v15463_v45 = vld [vmem:[%s15819_s24 + $0x17e0] sm:$0xff]  }
 0x2dd   : > { %14197 = vmatprep.subr.bf16.mxu0 %v15426_v47  ;;  %14218 = vmatpush3.bf16.msra.mxu1 %v15425_v46  ;;  %v15464_v46 = vld [vmem:[%s15819_s24 + $0x1720] sm:$0xff]  }
 0x2de   : > { %14219 = vmatprep.subr.bf16.mxu1 %v15427_v48  ;;  %v15465_v47 = vld [vmem:[%s15819_s24 + $0x17a0] sm:$0xff]   ;;  %v15466_v48 = vld [vmem:[%s15819_s24 + $0x1768] sm:$0xff]  }
 0x2e0   : > { %14198 = vmatpush3.bf16.msra.mxu0 %v15428_v49  ;;  %v15467_v49 = vld [vmem:[%s15819_s24 + $0x17e8] sm:$0xff]  }
 0x2e1   : > { %14199 = vmatprep.subr.bf16.mxu0 %v15430_v51  ;;  %14220 = vmatpush3.bf16.msra.mxu1 %v15429_v50  ;;  %v15468_v51 = vld [vmem:[%s15819_s24 + $0x1728] sm:$0xff]  }
 0x2e2   : > { %14221 = vmatprep.subr.bf16.mxu1 %v15431_v52 }
 0x2e4   : > { %14200 = vmatpush3.bf16.msra.mxu0 %v15432_v53  ;;  %v15469_v53 = vld [vmem:[%s15819_s24 + $0x17a8] sm:$0xff]  }
 0x2e5   : > { %14201 = vmatprep.subr.bf16.mxu0 %v15434_v55  ;;  %14222 = vmatpush3.bf16.msra.mxu1 %v15433_v54 }
 0x2e6   : > { %v13899_v57 = vpop.f32.mrb[60].mxu0  ;;  %14223 = vmatprep.subr.bf16.mxu1 %v15435_v56 }
 0x2e7   : > { %v13900_v59 = vpop.f32.mrb[61].mxu0  ;;  %v13921_v61 = vpop.f32.mrb[60].mxu1 }
 0x2e8   : > { %v13901_v62 = vadd.f32 %v13900_v59, %v13899_v57  ;;  %v13902_v63 = vpop.f32.mrb[62].mxu0  ;;  %v13922_v2 = vpop.f32.mrb[61].mxu1  ;;  %14202 = vmatpush3.bf16.msra.mxu0 %v15436_v58  ;;  %v15470_v57 = vld [vmem:[%s15819_s24 + $0x1770] sm:$0xff]  }
 0x2e9   : > { %v13903_v3 = vpop.f32.mrb[63].mxu0  ;;  %v13923_v5 = vadd.f32 %v13922_v2, %v13921_v61  ;;  %v13924_v7 = vpop.f32.mrb[62].mxu1  ;;  %14203 = vmatprep.subr.bf16.mxu0 %v15438_v0  ;;  %14224 = vmatpush3.bf16.msra.mxu1 %v15437_v60  ;;  %v15471_v58 = vld [vmem:[%s15819_s24 + $0x17f0] sm:$0xff]  }
 0x2ea   : > { %v10656_v4 = vadd.f32 %v13901_v62, %v16729_v28  ;;  %v13925_v9 = vpop.f32.mrb[63].mxu1  ;;  %14225 = vmatprep.subr.bf16.mxu1 %v15439_v1  ;;  %v2949_v28 = vcombine.high %v2927_v21, %v2927_v21  ;;  %v15472_v0 = vld [vmem:[%s15819_s24 + $0x1730] sm:$0xff]   ;;  %v15476_v7 = vld [vmem:[%s15819_s24 + $0x1738] sm:$0xff]  }
 0x2eb   : > { %v15473_v2 = vld [vmem:[%s15819_s24 + $0x17b0] sm:$0xff]   ;;  %v2934_v9 = vrot.slane %v16780_v23, %v15821_v6  ;;  %v15491_v23 = vld [vmem:[%s15819_s24 + $0x1858] sm:$0xff]  }
 0x2ec   : > { %v16766_v11 = vadd.f32 %v13923_v5, %v10656_v4  ;;  %14204 = vmatpush3.bf16.msra.mxu0 %v15440_v8  ;;  %v15474_v4 = vld [vmem:[%s15819_s24 + $0x1778] sm:$0xff]  }
 0x2ed   : > { %14205 = vmatprep.subr.bf16.mxu0 %v15442_v12  ;;  %14226 = vmatpush3.bf16.msra.mxu1 %v15441_v10  ;;  %v15475_v5 = vld [vmem:[%s15819_s24 + $0x17f8] sm:$0xff]   ;;  %v15479_v10 = vld [vmem:[%s15819_s24 + $0x1840] sm:$0xff]  }
 0x2ee   : > { %14227 = vmatprep.subr.bf16.mxu1 %v15443_v13  ;;  %v15477_v8 = vld [vmem:[%s15819_s24 + $0x17b8] sm:$0xff]   ;;  %v15481_v12 = vld [vmem:[%s15819_s24 + $0x1800] sm:$0xff]  }
 0x2ef   : > { %v15482_v13 = vld [vmem:[%s15819_s24 + $0x1880] sm:$0xff]  }
 0x2f0   : > { %14206 = vmatpush3.bf16.msra.mxu0 %v15444_v14  ;;  %v2950_v14 = vcombine.high %v2934_v9, %v2934_v9 }
 0x2f1   : > { %14235 = vmatprep.subr.bf16.mxu0 %v15446_v17  ;;  %14228 = vmatpush3.bf16.msra.mxu1 %v15445_v19  ;;  %v15485_v17 = vld [vmem:[%s15819_s24 + $0x1808] sm:$0xff]   ;;  %v15487_v19 = vld [vmem:[%s15819_s24 + $0x1850] sm:$0xff]  }
 0x2f2   : > { %14257 = vmatprep.subr.bf16.mxu1 %v15447_v22  ;;  %v15490_v22 = vld [vmem:[%s15819_s24 + $0x1890] sm:$0xff]  }
 0x2f3   : > { %11214 = vmatmul.mubr.bf16.vlgmr.msra.gmra.mrb[88].mxu0 %v2927_v21  ;;  %v15489_v21 = vld [vmem:[%s15819_s24 + $0x1810] sm:$0xff]  }
 0x2f4   : > { %14236 = vmatpush3.bf16.msra.mxu0 %v15448_v24  ;;  %11254 = vmatmul.mubr.bf16.vlgmr.msra.gmra.mrb[88].mxu1 %v2949_v28  ;;  %v15492_v24 = vld [vmem:[%s15819_s24 + $0x18d8] sm:$0xff]   ;;  %v15496_v28 = vld [vmem:[%s15819_s24 + $0x18e0] sm:$0xff]  }
 0x2f5   : > { %14237 = vmatprep.subr.bf16.mxu0 %v15450_v29  ;;  %14258 = vmatpush3.bf16.msra.mxu1 %v15449_v26  ;;  %v15494_v26 = vld [vmem:[%s15819_s24 + $0x1898] sm:$0xff]   ;;  %v15497_v29 = vld [vmem:[%s15819_s24 + $0x1820] sm:$0xff]  }
 0x2f6   : > { %11293 = vmatprep.mubr.bf16.mxu0 %v2948_v32  ;;  %14259 = vmatprep.subr.bf16.mxu1 %v15451_v31  ;;  %v15499_v31 = vld [vmem:[%s15819_s24 + $0x1868] sm:$0xff]  }
 0x2f7   : > { %11333 = vmatprep.mubr.bf16.mxu1 %v2952_v35  ;;  %v15500_v32 = vld [vmem:[%s15819_s24 + $0x18e8] sm:$0xff]  }
 0x2f8   : > { %14238 = vmatpush3.bf16.msra.mxu0 %v15452_v33 }
 0x2f9   : > { %14239 = vmatprep.subr.bf16.mxu0 %v15454_v36  ;;  %14260 = vmatpush3.bf16.msra.mxu1 %v15453_v34  ;;  %v15501_v34 = vld [vmem:[%s15819_s24 + $0x1828] sm:$0xff]  }
 0x2fa   : > { %14261 = vmatprep.subr.bf16.mxu1 %v15455_v37  ;;  %v15502_v36 = vld [vmem:[%s15819_s24 + $0x18a8] sm:$0xff]  }
 0x2fc   : > { %14240 = vmatpush3.bf16.msra.mxu0 %v15456_v38 }
 0x2fd   : > { %14241 = vmatprep.subr.bf16.mxu0 %v15458_v40  ;;  %14262 = vmatpush3.bf16.msra.mxu1 %v15457_v39  ;;  %v15503_v40 = vld [vmem:[%s15819_s24 + $0x1870] sm:$0xff]  }
 0x2fe   : > { %14263 = vmatprep.subr.bf16.mxu1 %v15459_v41  ;;  %v15504_v41 = vld [vmem:[%s15819_s24 + $0x18f0] sm:$0xff]  }
 0x300   : > { %14242 = vmatpush3.bf16.msra.mxu0 %v15460_v42 }
 0x301   : > { %14243 = vmatprep.subr.bf16.mxu0 %v15462_v44  ;;  %14264 = vmatpush3.bf16.msra.mxu1 %v15461_v43 }
 0x302   : > { %14265 = vmatprep.subr.bf16.mxu1 %v15463_v45 }
 0x304   : > { %14244 = vmatpush3.bf16.msra.mxu0 %v15464_v46 }
 0x305   : > { %14245 = vmatprep.subr.bf16.mxu0 %v15466_v48  ;;  %14266 = vmatpush3.bf16.msra.mxu1 %v15465_v47  ;;  %v15505_v47 = vld [vmem:[%s15819_s24 + $0x1830] sm:$0xff]  }
 0x306   : > { %v13943_v50 = vpop.f32.mrb[64].mxu0  ;;  %14267 = vmatprep.subr.bf16.mxu1 %v15467_v49  ;;  %v15506_v49 = vld [vmem:[%s15819_s24 + $0x18b0] sm:$0xff]  }
 0x307   : > { %v13944_v52 = vpop.f32.mrb[65].mxu0  ;;  %v13965_v54 = vpop.f32.mrb[64].mxu1 }
 0x308   : > { %v13945_v55 = vadd.f32 %v13944_v52, %v13943_v50  ;;  %v13946_v56 = vpop.f32.mrb[66].mxu0  ;;  %v13966_v59 = vpop.f32.mrb[65].mxu1  ;;  %14246 = vmatpush3.bf16.msra.mxu0 %v15468_v51  ;;  %v15507_v51 = vld [vmem:[%s15819_s24 + $0x1878] sm:$0xff]  }
 0x309   : > { %v13947_v60 = vpop.f32.mrb[67].mxu0  ;;  %v13967_v62 = vadd.f32 %v13966_v59, %v13965_v54  ;;  %v13968_v63 = vpop.f32.mrb[66].mxu1  ;;  %14247 = vmatprep.subr.bf16.mxu0 %v15470_v57  ;;  %14268 = vmatpush3.bf16.msra.mxu1 %v15469_v53  ;;  %v15508_v52 = vld [vmem:[%s15819_s24 + $0x18f8] sm:$0xff]   ;;  %v297_v54 = vld [vmem:[%s17178_s0 + $0x60] sm:$0xff] }
 0x30a   : > { %v10736_v61 = vadd.f32 %v13945_v55, %v16766_v11  ;;  %v13969_v1 = vpop.f32.mrb[67].mxu1  ;;  %14269 = vmatprep.subr.bf16.mxu1 %v15471_v58  ;;  %v15480_v11 = vld [vmem:[%s15819_s24 + $0x18c0] sm:$0xff]   ;;  %v15509_v53 = vld [vmem:[%s15819_s24 + $0x1838] sm:$0xff]   ;;  %v2960_v55 = vrot.slane %v297_v54, %v15821_v6  ;;  %v2953_v57 = vcombine.high %v297_v54, %v297_v54  ;;  %v15548_v54 = vld [vmem:[%s15819_s24 + $0x1a48] sm:$0xff]  }
 0x30b   : > { %v15511_v56 = vld [vmem:[%s15819_s24 + $0x1940] sm:$0xff]   ;;  %v15510_v58 = vld [vmem:[%s15819_s24 + $0x18b8] sm:$0xff]  }
 0x30c   : > { %v16813_v3 = vadd.f32 %v13967_v62, %v10736_v61  ;;  %14248 = vmatpush3.bf16.msra.mxu0 %v15472_v0  ;;  %v2968_v59 = vcombine.high %v2960_v55, %v2960_v55  ;;  %v2976_v60 = vrot.slane %v2960_v55, %v15821_v6  ;;  %v15512_v61 = vld [vmem:[%s15819_s24 + $0x19c0] sm:$0xff]   ;;  %v16864_v62 = vrot.slane %v2953_v57, %v15821_v6  ;;  %v15549_v55 = vld [vmem:[%s15819_s24 + $0x1ac8] sm:$0xff]  }
 0x30d   : > { %14249 = vmatprep.subr.bf16.mxu0 %v15474_v4  ;;  %14270 = vmatpush3.bf16.msra.mxu1 %v15473_v2  ;;  %v15513_v63 = vld [vmem:[%s15819_s24 + $0x1900] sm:$0xff]   ;;  %v15515_v4 = vld [vmem:[%s15819_s24 + $0x1948] sm:$0xff]  }
 0x30e   : > { %14271 = vmatprep.subr.bf16.mxu1 %v15475_v5  ;;  %v2990_v0 = vrot.slane %v2968_v59, %v15821_v6  ;;  %v15514_v1 = vld [vmem:[%s15819_s24 + $0x1980] sm:$0xff]   ;;  %v2969_v2 = vcombine.high %v16864_v62, %v16864_v62  ;;  %v15551_v57 = vld [vmem:[%s15819_s24 + $0x1a88] sm:$0xff]   ;;  %v15553_v59 = vld [vmem:[%s15819_s24 + $0x1ad0] sm:$0xff]  }
 0x310   : > { %14250 = vmatpush3.bf16.msra.mxu0 %v15476_v7  ;;  %v3000_v5 = vcombine.high %v2990_v0, %v2990_v0  ;;  %v15516_v7 = vld [vmem:[%s15819_s24 + $0x19c8] sm:$0xff]  }
 0x311   : > { %14279 = vmatprep.subr.bf16.mxu0 %v15479_v10  ;;  %14272 = vmatpush3.bf16.msra.mxu1 %v15477_v8  ;;  %v2997_v8 = vrot.slane %v2969_v2, %v15821_v6  ;;  %v15518_v10 = vld [vmem:[%s15819_s24 + $0x1988] sm:$0xff]   ;;  %v15560_v2 = vld [vmem:[%s15819_s24 + $0x1a60] sm:$0xff]  }
 0x312   : > { %14301 = vmatprep.subr.bf16.mxu1 %v15480_v11 }
 0x313   : > { %11294 = vmatmul.mubr.bf16.vlgmr.msra.gmra.mrb[92].mxu0 %v2934_v9  ;;  %v15517_v9 = vld [vmem:[%s15819_s24 + $0x1908] sm:$0xff]   ;;  %v3001_v11 = vcombine.high %v2997_v8, %v2997_v8 }
 0x314   : > { %14280 = vmatpush3.bf16.msra.mxu0 %v15481_v12  ;;  %11334 = vmatmul.mubr.bf16.vlgmr.msra.gmra.mrb[92].mxu1 %v2950_v14  ;;  %v15519_v12 = vld [vmem:[%s15819_s24 + $0x1950] sm:$0xff]  }
 0x315   : > { %14281 = vmatprep.subr.bf16.mxu0 %v15483_v15  ;;  %14302 = vmatpush3.bf16.msra.mxu1 %v15482_v13  ;;  %v15520_v13 = vld [vmem:[%s15819_s24 + $0x19d0] sm:$0xff]  }
 0x316   : > { %14303 = vmatprep.subr.bf16.mxu1 %v15484_v16  ;;  %11373 = vmatprep.mubr.bf16.mxu0 %v2990_v0  ;;  %v15521_v14 = vld [vmem:[%s15819_s24 + $0x1910] sm:$0xff]   ;;  %v15523_v16 = vld [vmem:[%s15819_s24 + $0x1958] sm:$0xff]  }
 0x317   : > { %11413 = vmatprep.mubr.bf16.mxu1 %v3000_v5  ;;  %v15522_v15 = vld [vmem:[%s15819_s24 + $0x1990] sm:$0xff]   ;;  %v15558_v0 = vld [vmem:[%s15819_s24 + $0x1a18] sm:$0xff]   ;;  %v15563_v5 = vld [vmem:[%s15819_s24 + $0x1aa0] sm:$0xff]  }
 0x318   : > { %14282 = vmatpush3.bf16.msra.mxu0 %v15485_v17  ;;  %v15524_v17 = vld [vmem:[%s15819_s24 + $0x19d8] sm:$0xff]  }
 0x319   : > { %14283 = vmatprep.subr.bf16.mxu0 %v15487_v19  ;;  %14304 = vmatpush3.bf16.msra.mxu1 %v15486_v18  ;;  %v15525_v18 = vld [vmem:[%s15819_s24 + $0x1918] sm:$0xff]  }
 0x31a   : > { %14305 = vmatprep.subr.bf16.mxu1 %v15488_v20  ;;  %v15526_v19 = vld [vmem:[%s15819_s24 + $0x1998] sm:$0xff]   ;;  %v15527_v20 = vld [vmem:[%s15819_s24 + $0x1960] sm:$0xff]  }
 0x31c   : > { %14284 = vmatpush3.bf16.msra.mxu0 %v15489_v21  ;;  %v15528_v21 = vld [vmem:[%s15819_s24 + $0x19e0] sm:$0xff]  }
 0x31d   : > { %14285 = vmatprep.subr.bf16.mxu0 %v15491_v23  ;;  %14306 = vmatpush3.bf16.msra.mxu1 %v15490_v22  ;;  %v15529_v22 = vld [vmem:[%s15819_s24 + $0x1920] sm:$0xff]  }
 0x31e   : > { %14307 = vmatprep.subr.bf16.mxu1 %v15492_v24  ;;  %v15530_v23 = vld [vmem:[%s15819_s24 + $0x19a0] sm:$0xff]   ;;  %v15531_v24 = vld [vmem:[%s15819_s24 + $0x1968] sm:$0xff]  }
 0x320   : > { %14286 = vmatpush3.bf16.msra.mxu0 %v15493_v25  ;;  %v15532_v25 = vld [vmem:[%s15819_s24 + $0x19e8] sm:$0xff]  }
 0x321   : > { %14287 = vmatprep.subr.bf16.mxu0 %v15495_v27  ;;  %14308 = vmatpush3.bf16.msra.mxu1 %v15494_v26  ;;  %v15533_v27 = vld [vmem:[%s15819_s24 + $0x1928] sm:$0xff]  }
 0x322   : > { %14309 = vmatprep.subr.bf16.mxu1 %v15496_v28 }
 0x324   : > { %14288 = vmatpush3.bf16.msra.mxu0 %v15497_v29  ;;  %v15534_v29 = vld [vmem:[%s15819_s24 + $0x19a8] sm:$0xff]  }
 0x325   : > { %14289 = vmatprep.subr.bf16.mxu0 %v15499_v31  ;;  %14310 = vmatpush3.bf16.msra.mxu1 %v15498_v30 }
 0x326   : > { %v13987_v33 = vpop.f32.mrb[68].mxu0  ;;  %14311 = vmatprep.subr.bf16.mxu1 %v15500_v32 }
 0x327   : > { %v13988_v35 = vpop.f32.mrb[69].mxu0  ;;  %v14009_v37 = vpop.f32.mrb[68].mxu1 }
 0x328   : > { %v13989_v38 = vadd.f32 %v13988_v35, %v13987_v33  ;;  %v13990_v39 = vpop.f32.mrb[70].mxu0  ;;  %v14010_v42 = vpop.f32.mrb[69].mxu1  ;;  %14290 = vmatpush3.bf16.msra.mxu0 %v15501_v34  ;;  %v15535_v33 = vld [vmem:[%s15819_s24 + $0x1970] sm:$0xff]  }
 0x329   : > { %v13991_v43 = vpop.f32.mrb[71].mxu0  ;;  %v14011_v45 = vadd.f32 %v14010_v42, %v14009_v37  ;;  %v14012_v46 = vpop.f32.mrb[70].mxu1  ;;  %14291 = vmatprep.subr.bf16.mxu0 %v15503_v40  ;;  %14312 = vmatpush3.bf16.msra.mxu1 %v15502_v36  ;;  %v15536_v34 = vld [vmem:[%s15819_s24 + $0x19f0] sm:$0xff]  }
 0x32a   : > { %v10816_v44 = vadd.f32 %v13989_v38, %v16813_v3  ;;  %v14013_v48 = vpop.f32.mrb[71].mxu1  ;;  %14313 = vmatprep.subr.bf16.mxu1 %v15504_v41  ;;  %v2998_v3 = vcombine.high %v2976_v60, %v2976_v60  ;;  %v15537_v40 = vld [vmem:[%s15819_s24 + $0x1930] sm:$0xff]   ;;  %v15541_v46 = vld [vmem:[%s15819_s24 + $0x1938] sm:$0xff]  }
 0x32b   : > { %v15538_v42 = vld [vmem:[%s15819_s24 + $0x19b0] sm:$0xff]   ;;  %v2983_v48 = vrot.slane %v16864_v62, %v15821_v6  ;;  %v15556_v62 = vld [vmem:[%s15819_s24 + $0x1a58] sm:$0xff]  }
 0x32c   : > { %v16850_v50 = vadd.f32 %v14011_v45, %v10816_v44  ;;  %14292 = vmatpush3.bf16.msra.mxu0 %v15505_v47  ;;  %v15539_v44 = vld [vmem:[%s15819_s24 + $0x1978] sm:$0xff]  }
 0x32d   : > { %14293 = vmatprep.subr.bf16.mxu0 %v15507_v51  ;;  %14314 = vmatpush3.bf16.msra.mxu1 %v15506_v49  ;;  %v15540_v45 = vld [vmem:[%s15819_s24 + $0x19f8] sm:$0xff]   ;;  %v15544_v49 = vld [vmem:[%s15819_s24 + $0x1a40] sm:$0xff]  }
 0x32e   : > { %14315 = vmatprep.subr.bf16.mxu1 %v15508_v52  ;;  %v15542_v47 = vld [vmem:[%s15819_s24 + $0x19b8] sm:$0xff]   ;;  %v15546_v51 = vld [vmem:[%s15819_s24 + $0x1a00] sm:$0xff]  }
 0x32f   : > { %v15547_v52 = vld [vmem:[%s15819_s24 + $0x1a80] sm:$0xff]  }
 0x330   : > { %14294 = vmatpush3.bf16.msra.mxu0 %v15509_v53  ;;  %v2999_v53 = vcombine.high %v2983_v48, %v2983_v48 }
 0x331   : > { %14323 = vmatprep.subr.bf16.mxu0 %v15511_v56  ;;  %14316 = vmatpush3.bf16.msra.mxu1 %v15510_v58  ;;  %v15550_v56 = vld [vmem:[%s15819_s24 + $0x1a08] sm:$0xff]   ;;  %v15552_v58 = vld [vmem:[%s15819_s24 + $0x1a50] sm:$0xff]  }
 0x332   : > { %14345 = vmatprep.subr.bf16.mxu1 %v15512_v61  ;;  %v15555_v61 = vld [vmem:[%s15819_s24 + $0x1a90] sm:$0xff]  }
 0x333   : > { %11374 = vmatmul.mubr.bf16.vlgmr.msra.gmra.mrb[96].mxu0 %v2976_v60  ;;  %v15554_v60 = vld [vmem:[%s15819_s24 + $0x1a10] sm:$0xff]  }
 0x334   : > { %14324 = vmatpush3.bf16.msra.mxu0 %v15513_v63  ;;  %11414 = vmatmul.mubr.bf16.vlgmr.msra.gmra.mrb[96].mxu1 %v2998_v3  ;;  %v15557_v63 = vld [vmem:[%s15819_s24 + $0x1ad8] sm:$0xff]   ;;  %v15561_v3 = vld [vmem:[%s15819_s24 + $0x1ae0] sm:$0xff]  }
 0x335   : > { %14325 = vmatprep.subr.bf16.mxu0 %v15515_v4  ;;  %14346 = vmatpush3.bf16.msra.mxu1 %v15514_v1  ;;  %v15559_v1 = vld [vmem:[%s15819_s24 + $0x1a98] sm:$0xff]   ;;  %v15562_v4 = vld [vmem:[%s15819_s24 + $0x1a20] sm:$0xff]  }
 0x336   : > { %11453 = vmatprep.mubr.bf16.mxu0 %v2997_v8  ;;  %14347 = vmatprep.subr.bf16.mxu1 %v15516_v7  ;;  %v15564_v7 = vld [vmem:[%s15819_s24 + $0x1a68] sm:$0xff]  }
 0x337   : > { %11493 = vmatprep.mubr.bf16.mxu1 %v3001_v11  ;;  %v15565_v8 = vld [vmem:[%s15819_s24 + $0x1ae8] sm:$0xff]  }
 0x338   : > { %14326 = vmatpush3.bf16.msra.mxu0 %v15517_v9 }
 0x339   : > { %14327 = vmatprep.subr.bf16.mxu0 %v15519_v12  ;;  %14348 = vmatpush3.bf16.msra.mxu1 %v15518_v10  ;;  %v15566_v10 = vld [vmem:[%s15819_s24 + $0x1a28] sm:$0xff]  }
 0x33a   : > { %14349 = vmatprep.subr.bf16.mxu1 %v15520_v13  ;;  %v15567_v12 = vld [vmem:[%s15819_s24 + $0x1aa8] sm:$0xff]  }
 0x33c   : > { %14328 = vmatpush3.bf16.msra.mxu0 %v15521_v14 }
 0x33d   : > { %14329 = vmatprep.subr.bf16.mxu0 %v15523_v16  ;;  %14350 = vmatpush3.bf16.msra.mxu1 %v15522_v15  ;;  %v15568_v16 = vld [vmem:[%s15819_s24 + $0x1a70] sm:$0xff]  }
 0x33e   : > { %14351 = vmatprep.subr.bf16.mxu1 %v15524_v17  ;;  %v15569_v17 = vld [vmem:[%s15819_s24 + $0x1af0] sm:$0xff]  }
 0x340   : > { %14330 = vmatpush3.bf16.msra.mxu0 %v15525_v18 }
 0x341   : > { %14331 = vmatprep.subr.bf16.mxu0 %v15527_v20  ;;  %14352 = vmatpush3.bf16.msra.mxu1 %v15526_v19 }
 0x342   : > { %14353 = vmatprep.subr.bf16.mxu1 %v15528_v21 }
 0x344   : > { %14332 = vmatpush3.bf16.msra.mxu0 %v15529_v22 }
 0x345   : > { %14333 = vmatprep.subr.bf16.mxu0 %v15531_v24  ;;  %14354 = vmatpush3.bf16.msra.mxu1 %v15530_v23  ;;  %v15570_v23 = vld [vmem:[%s15819_s24 + $0x1a30] sm:$0xff]  }
 0x346   : > { %v14031_v26 = vpop.f32.mrb[72].mxu0  ;;  %14355 = vmatprep.subr.bf16.mxu1 %v15532_v25  ;;  %v15571_v25 = vld [vmem:[%s15819_s24 + $0x1ab0] sm:$0xff]  }
 0x347   : > { %v14032_v28 = vpop.f32.mrb[73].mxu0  ;;  %v14053_v30 = vpop.f32.mrb[72].mxu1 }
 0x348   : > { %v14033_v31 = vadd.f32 %v14032_v28, %v14031_v26  ;;  %v14034_v32 = vpop.f32.mrb[74].mxu0  ;;  %v14054_v35 = vpop.f32.mrb[73].mxu1  ;;  %14334 = vmatpush3.bf16.msra.mxu0 %v15533_v27  ;;  %v15572_v27 = vld [vmem:[%s15819_s24 + $0x1a78] sm:$0xff]  }
 0x349   : > { %v14035_v36 = vpop.f32.mrb[75].mxu0  ;;  %v14055_v38 = vadd.f32 %v14054_v35, %v14053_v30  ;;  %v14056_v39 = vpop.f32.mrb[74].mxu1  ;;  %14335 = vmatprep.subr.bf16.mxu0 %v15535_v33  ;;  %14356 = vmatpush3.bf16.msra.mxu1 %v15534_v29  ;;  %v15573_v28 = vld [vmem:[%s15819_s24 + $0x1af8] sm:$0xff]   ;;  %v298_v30 = vld [vmem:[%s17178_s0 + $0x68] sm:$0xff]  ;;  %v15576_v32 = vld [vmem:[%s15819_s24 + $0x1b40] sm:$0xff]  }
 0x34a   : > { %v10896_v37 = vadd.f32 %v14033_v31, %v16850_v50  ;;  %v14057_v41 = vpop.f32.mrb[75].mxu1  ;;  %14357 = vmatprep.subr.bf16.mxu1 %v15536_v34  ;;  %v15545_v50 = vld [vmem:[%s15819_s24 + $0x1ac0] sm:$0xff]   ;;  %v15574_v29 = vld [vmem:[%s15819_s24 + $0x1a38] sm:$0xff]   ;;  %v3009_v31 = vrot.slane %v298_v30, %v15821_v6  ;;  %v3002_v33 = vcombine.high %v298_v30, %v298_v30  ;;  %v15613_v30 = vld [vmem:[%s15819_s24 + $0x1c48] sm:$0xff]  }
 0x34b   : > { %v15575_v34 = vld [vmem:[%s15819_s24 + $0x1ab8] sm:$0xff]   ;;  %v15578_v39 = vld [vmem:[%s15819_s24 + $0x1b00] sm:$0xff]  }
 0x34c   : > { %v16897_v43 = vadd.f32 %v14055_v38, %v10896_v37  ;;  %14336 = vmatpush3.bf16.msra.mxu0 %v15537_v40  ;;  %v3017_v35 = vcombine.high %v3009_v31, %v3009_v31  ;;  %v3025_v36 = vrot.slane %v3009_v31, %v15821_v6  ;;  %v15577_v37 = vld [vmem:[%s15819_s24 + $0x1bc0] sm:$0xff]   ;;  %v16948_v38 = vrot.slane %v3002_v33, %v15821_v6  ;;  %v15614_v31 = vld [vmem:[%s15819_s24 + $0x1cc8] sm:$0xff]  }
 0x34d   : > { %14337 = vmatprep.subr.bf16.mxu0 %v15539_v44  ;;  %14358 = vmatpush3.bf16.msra.mxu1 %v15538_v42  ;;  %v15579_v41 = vld [vmem:[%s15819_s24 + $0x1b80] sm:$0xff]   ;;  %v15580_v44 = vld [vmem:[%s15819_s24 + $0x1b48] sm:$0xff]  }
 0x34e   : > { %14359 = vmatprep.subr.bf16.mxu1 %v15540_v45  ;;  %v3039_v40 = vrot.slane %v3017_v35, %v15821_v6  ;;  %v3018_v42 = vcombine.high %v16948_v38, %v16948_v38  ;;  %v15616_v33 = vld [vmem:[%s15819_s24 + $0x1c88] sm:$0xff]   ;;  %v15618_v35 = vld [vmem:[%s15819_s24 + $0x1cd0] sm:$0xff]  }
 0x350   : > { %14338 = vmatpush3.bf16.msra.mxu0 %v15541_v46  ;;  %v3049_v45 = vcombine.high %v3039_v40, %v3039_v40  ;;  %v15581_v46 = vld [vmem:[%s15819_s24 + $0x1bc8] sm:$0xff]  }
 0x351   : > { %14367 = vmatprep.subr.bf16.mxu0 %v15544_v49  ;;  %14360 = vmatpush3.bf16.msra.mxu1 %v15542_v47  ;;  %v3046_v47 = vrot.slane %v3018_v42, %v15821_v6  ;;  %v15583_v49 = vld [vmem:[%s15819_s24 + $0x1b88] sm:$0xff]   ;;  %v15625_v42 = vld [vmem:[%s15819_s24 + $0x1c60] sm:$0xff]  }
 0x352   : > { %14389 = vmatprep.subr.bf16.mxu1 %v15545_v50 }
 0x353   : > { %11454 = vmatmul.mubr.bf16.vlgmr.msra.gmra.mrb[100].mxu0 %v2983_v48  ;;  %v15582_v48 = vld [vmem:[%s15819_s24 + $0x1b08] sm:$0xff]   ;;  %v3050_v50 = vcombine.high %v3046_v47, %v3046_v47 }
 0x354   : > { %14368 = vmatpush3.bf16.msra.mxu0 %v15546_v51  ;;  %11494 = vmatmul.mubr.bf16.vlgmr.msra.gmra.mrb[100].mxu1 %v2999_v53  ;;  %v15584_v51 = vld [vmem:[%s15819_s24 + $0x1b50] sm:$0xff]  }
 0x355   : > { %14369 = vmatprep.subr.bf16.mxu0 %v15548_v54  ;;  %14390 = vmatpush3.bf16.msra.mxu1 %v15547_v52  ;;  %v15585_v52 = vld [vmem:[%s15819_s24 + $0x1bd0] sm:$0xff]  }
 0x356   : > { %14391 = vmatprep.subr.bf16.mxu1 %v15549_v55  ;;  %11533 = vmatprep.mubr.bf16.mxu0 %v3039_v40  ;;  %v15586_v53 = vld [vmem:[%s15819_s24 + $0x1b10] sm:$0xff]   ;;  %v15588_v55 = vld [vmem:[%s15819_s24 + $0x1b58] sm:$0xff]  }
 0x357   : > { %11573 = vmatprep.mubr.bf16.mxu1 %v3049_v45  ;;  %v15587_v54 = vld [vmem:[%s15819_s24 + $0x1b90] sm:$0xff]   ;;  %v15623_v40 = vld [vmem:[%s15819_s24 + $0x1c18] sm:$0xff]   ;;  %v15628_v45 = vld [vmem:[%s15819_s24 + $0x1ca0] sm:$0xff]  }
 0x358   : > { %14370 = vmatpush3.bf16.msra.mxu0 %v15550_v56  ;;  %v15589_v56 = vld [vmem:[%s15819_s24 + $0x1bd8] sm:$0xff]  }
 0x359   : > { %14371 = vmatprep.subr.bf16.mxu0 %v15552_v58  ;;  %14392 = vmatpush3.bf16.msra.mxu1 %v15551_v57  ;;  %v15590_v57 = vld [vmem:[%s15819_s24 + $0x1b18] sm:$0xff]  }
 0x35a   : > { %14393 = vmatprep.subr.bf16.mxu1 %v15553_v59  ;;  %v15591_v58 = vld [vmem:[%s15819_s24 + $0x1b98] sm:$0xff]   ;;  %v15592_v59 = vld [vmem:[%s15819_s24 + $0x1b60] sm:$0xff]  }
 0x35c   : > { %14372 = vmatpush3.bf16.msra.mxu0 %v15554_v60  ;;  %v15593_v60 = vld [vmem:[%s15819_s24 + $0x1be0] sm:$0xff]  }
 0x35d   : > { %14373 = vmatprep.subr.bf16.mxu0 %v15556_v62  ;;  %14394 = vmatpush3.bf16.msra.mxu1 %v15555_v61  ;;  %v15594_v61 = vld [vmem:[%s15819_s24 + $0x1b20] sm:$0xff]  }
 0x35e   : > { %14395 = vmatprep.subr.bf16.mxu1 %v15557_v63  ;;  %v15595_v62 = vld [vmem:[%s15819_s24 + $0x1ba0] sm:$0xff]   ;;  %v15596_v63 = vld [vmem:[%s15819_s24 + $0x1b68] sm:$0xff]  }
 0x360   : > { %14374 = vmatpush3.bf16.msra.mxu0 %v15558_v0  ;;  %v15597_v0 = vld [vmem:[%s15819_s24 + $0x1be8] sm:$0xff]  }
 0x361   : > { %14375 = vmatprep.subr.bf16.mxu0 %v15560_v2  ;;  %14396 = vmatpush3.bf16.msra.mxu1 %v15559_v1  ;;  %v15598_v2 = vld [vmem:[%s15819_s24 + $0x1b28] sm:$0xff]  }
 0x362   : > { %14397 = vmatprep.subr.bf16.mxu1 %v15561_v3 }
 0x364   : > { %14376 = vmatpush3.bf16.msra.mxu0 %v15562_v4  ;;  %v15599_v4 = vld [vmem:[%s15819_s24 + $0x1ba8] sm:$0xff]  }
 0x365   : > { %14377 = vmatprep.subr.bf16.mxu0 %v15564_v7  ;;  %14398 = vmatpush3.bf16.msra.mxu1 %v15563_v5 }
 0x366   : > { %v14075_v9 = vpop.f32.mrb[76].mxu0  ;;  %14399 = vmatprep.subr.bf16.mxu1 %v15565_v8 }
 0x367   : > { %v14076_v11 = vpop.f32.mrb[77].mxu0  ;;  %v14097_v13 = vpop.f32.mrb[76].mxu1 }
 0x368   : > { %v14077_v14 = vadd.f32 %v14076_v11, %v14075_v9  ;;  %v14078_v15 = vpop.f32.mrb[78].mxu0  ;;  %v14098_v18 = vpop.f32.mrb[77].mxu1  ;;  %14378 = vmatpush3.bf16.msra.mxu0 %v15566_v10  ;;  %v15600_v9 = vld [vmem:[%s15819_s24 + $0x1b70] sm:$0xff]  }
 0x369   : > { %v14079_v19 = vpop.f32.mrb[79].mxu0  ;;  %v14099_v21 = vadd.f32 %v14098_v18, %v14097_v13  ;;  %v14100_v22 = vpop.f32.mrb[78].mxu1  ;;  %14379 = vmatprep.subr.bf16.mxu0 %v15568_v16  ;;  %14400 = vmatpush3.bf16.msra.mxu1 %v15567_v12  ;;  %v15601_v10 = vld [vmem:[%s15819_s24 + $0x1bf0] sm:$0xff]  }
 0x36a   : > { %v10976_v20 = vadd.f32 %v14077_v14, %v16897_v43  ;;  %v14101_v24 = vpop.f32.mrb[79].mxu1  ;;  %14401 = vmatprep.subr.bf16.mxu1 %v15569_v17  ;;  %v3047_v43 = vcombine.high %v3025_v36, %v3025_v36  ;;  %v15602_v16 = vld [vmem:[%s15819_s24 + $0x1b30] sm:$0xff]   ;;  %v15606_v22 = vld [vmem:[%s15819_s24 + $0x1b38] sm:$0xff]  }
 0x36b   : > { %v15603_v18 = vld [vmem:[%s15819_s24 + $0x1bb0] sm:$0xff]   ;;  %v3032_v24 = vrot.slane %v16948_v38, %v15821_v6  ;;  %v15621_v38 = vld [vmem:[%s15819_s24 + $0x1c58] sm:$0xff]  }
 0x36c   : > { %v16934_v26 = vadd.f32 %v14099_v21, %v10976_v20  ;;  %14380 = vmatpush3.bf16.msra.mxu0 %v15570_v23  ;;  %v15604_v20 = vld [vmem:[%s15819_s24 + $0x1b78] sm:$0xff]  }
 0x36d   : > { %14381 = vmatprep.subr.bf16.mxu0 %v15572_v27  ;;  %14402 = vmatpush3.bf16.msra.mxu1 %v15571_v25  ;;  %v15605_v21 = vld [vmem:[%s15819_s24 + $0x1bf8] sm:$0xff]   ;;  %v15609_v25 = vld [vmem:[%s15819_s24 + $0x1c40] sm:$0xff]  }
 0x36e   : > { %14403 = vmatprep.subr.bf16.mxu1 %v15573_v28  ;;  %v15607_v23 = vld [vmem:[%s15819_s24 + $0x1bb8] sm:$0xff]   ;;  %v15611_v27 = vld [vmem:[%s15819_s24 + $0x1c00] sm:$0xff]  }
 0x36f   : > { %v15612_v28 = vld [vmem:[%s15819_s24 + $0x1c80] sm:$0xff]  }
 0x370   : > { %14382 = vmatpush3.bf16.msra.mxu0 %v15574_v29  ;;  %v3048_v29 = vcombine.high %v3032_v24, %v3032_v24 }
 0x371   : > { %14411 = vmatprep.subr.bf16.mxu0 %v15576_v32  ;;  %14404 = vmatpush3.bf16.msra.mxu1 %v15575_v34  ;;  %v15615_v32 = vld [vmem:[%s15819_s24 + $0x1c08] sm:$0xff]   ;;  %v15617_v34 = vld [vmem:[%s15819_s24 + $0x1c50] sm:$0xff]  }
 0x372   : > { %14433 = vmatprep.subr.bf16.mxu1 %v15577_v37  ;;  %v15620_v37 = vld [vmem:[%s15819_s24 + $0x1c90] sm:$0xff]  }
 0x373   : > { %11534 = vmatmul.mubr.bf16.vlgmr.msra.gmra.mrb[104].mxu0 %v3025_v36  ;;  %v15619_v36 = vld [vmem:[%s15819_s24 + $0x1c10] sm:$0xff]  }
 0x374   : > { %14412 = vmatpush3.bf16.msra.mxu0 %v15578_v39  ;;  %11574 = vmatmul.mubr.bf16.vlgmr.msra.gmra.mrb[104].mxu1 %v3047_v43  ;;  %v15622_v39 = vld [vmem:[%s15819_s24 + $0x1cd8] sm:$0xff]   ;;  %v15626_v43 = vld [vmem:[%s15819_s24 + $0x1ce0] sm:$0xff]  }
 0x375   : > { %14413 = vmatprep.subr.bf16.mxu0 %v15580_v44  ;;  %14434 = vmatpush3.bf16.msra.mxu1 %v15579_v41  ;;  %v15624_v41 = vld [vmem:[%s15819_s24 + $0x1c98] sm:$0xff]   ;;  %v15627_v44 = vld [vmem:[%s15819_s24 + $0x1c20] sm:$0xff]  }
 0x376   : > { %11613 = vmatprep.mubr.bf16.mxu0 %v3046_v47  ;;  %14435 = vmatprep.subr.bf16.mxu1 %v15581_v46  ;;  %v15629_v46 = vld [vmem:[%s15819_s24 + $0x1c68] sm:$0xff]  }
 0x377   : > { %11653 = vmatprep.mubr.bf16.mxu1 %v3050_v50  ;;  %v15630_v47 = vld [vmem:[%s15819_s24 + $0x1ce8] sm:$0xff]  }
 0x378   : > { %14414 = vmatpush3.bf16.msra.mxu0 %v15582_v48 }
 0x379   : > { %14415 = vmatprep.subr.bf16.mxu0 %v15584_v51  ;;  %14436 = vmatpush3.bf16.msra.mxu1 %v15583_v49  ;;  %v15631_v49 = vld [vmem:[%s15819_s24 + $0x1c28] sm:$0xff]  }
 0x37a   : > { %14437 = vmatprep.subr.bf16.mxu1 %v15585_v52  ;;  %v15632_v51 = vld [vmem:[%s15819_s24 + $0x1ca8] sm:$0xff]  }
 0x37c   : > { %14416 = vmatpush3.bf16.msra.mxu0 %v15586_v53 }
 0x37d   : > { %14417 = vmatprep.subr.bf16.mxu0 %v15588_v55  ;;  %14438 = vmatpush3.bf16.msra.mxu1 %v15587_v54  ;;  %v15633_v55 = vld [vmem:[%s15819_s24 + $0x1c70] sm:$0xff]  }
 0x37e   : > { %14439 = vmatprep.subr.bf16.mxu1 %v15589_v56  ;;  %v15634_v56 = vld [vmem:[%s15819_s24 + $0x1cf0] sm:$0xff]  }
 0x380   : > { %14418 = vmatpush3.bf16.msra.mxu0 %v15590_v57 }
 0x381   : > { %14419 = vmatprep.subr.bf16.mxu0 %v15592_v59  ;;  %14440 = vmatpush3.bf16.msra.mxu1 %v15591_v58 }
 0x382   : > { %14441 = vmatprep.subr.bf16.mxu1 %v15593_v60 }
 0x384   : > { %14420 = vmatpush3.bf16.msra.mxu0 %v15594_v61 }
 0x385   : > { %14421 = vmatprep.subr.bf16.mxu0 %v15596_v63  ;;  %14442 = vmatpush3.bf16.msra.mxu1 %v15595_v62  ;;  %v15635_v62 = vld [vmem:[%s15819_s24 + $0x1c30] sm:$0xff]  }
 0x386   : > { %v14119_v1 = vpop.f32.mrb[80].mxu0  ;;  %14443 = vmatprep.subr.bf16.mxu1 %v15597_v0  ;;  %v15636_v0 = vld [vmem:[%s15819_s24 + $0x1cb0] sm:$0xff]  }
 0x387   : > { %v14120_v3 = vpop.f32.mrb[81].mxu0  ;;  %v14141_v5 = vpop.f32.mrb[80].mxu1 }
 0x388   : > { %v14121_v7 = vadd.f32 %v14120_v3, %v14119_v1  ;;  %v14122_v8 = vpop.f32.mrb[82].mxu0  ;;  %v14142_v11 = vpop.f32.mrb[81].mxu1  ;;  %14422 = vmatpush3.bf16.msra.mxu0 %v15598_v2  ;;  %v15637_v2 = vld [vmem:[%s15819_s24 + $0x1c78] sm:$0xff]  }
 0x389   : > { %v14123_v12 = vpop.f32.mrb[83].mxu0  ;;  %v14143_v14 = vadd.f32 %v14142_v11, %v14141_v5  ;;  %v14144_v15 = vpop.f32.mrb[82].mxu1  ;;  %14423 = vmatprep.subr.bf16.mxu0 %v15600_v9  ;;  %14444 = vmatpush3.bf16.msra.mxu1 %v15599_v4  ;;  %v15638_v3 = vld [vmem:[%s15819_s24 + $0x1cf8] sm:$0xff]   ;;  %v299_v5 = vld [vmem:[%s17178_s0 + $0x70] sm:$0xff]  ;;  %v15641_v8 = vld [vmem:[%s15819_s24 + $0x1d40] sm:$0xff]  }
 0x38a   : > { %v11056_v13 = vadd.f32 %v14121_v7, %v16934_v26  ;;  %v14145_v17 = vpop.f32.mrb[83].mxu1  ;;  %14445 = vmatprep.subr.bf16.mxu1 %v15601_v10  ;;  %v15610_v26 = vld [vmem:[%s15819_s24 + $0x1cc0] sm:$0xff]   ;;  %v15639_v4 = vld [vmem:[%s15819_s24 + $0x1c38] sm:$0xff]   ;;  %v3058_v7 = vrot.slane %v299_v5, %v15821_v6  ;;  %v3051_v9 = vcombine.high %v299_v5, %v299_v5  ;;  %v15678_v5 = vld [vmem:[%s15819_s24 + $0x1e48] sm:$0xff]  }
 0x38b   : > { %v15640_v10 = vld [vmem:[%s15819_s24 + $0x1cb8] sm:$0xff]   ;;  %v15643_v15 = vld [vmem:[%s15819_s24 + $0x1d00] sm:$0xff]  }
 0x38c   : > { %v16981_v19 = vadd.f32 %v14143_v14, %v11056_v13  ;;  %14424 = vmatpush3.bf16.msra.mxu0 %v15602_v16  ;;  %v3066_v11 = vcombine.high %v3058_v7, %v3058_v7  ;;  %v3074_v12 = vrot.slane %v3058_v7, %v15821_v6  ;;  %v15642_v13 = vld [vmem:[%s15819_s24 + $0x1dc0] sm:$0xff]   ;;  %v17032_v14 = vrot.slane %v3051_v9, %v15821_v6  ;;  %v15679_v7 = vld [vmem:[%s15819_s24 + $0x1ec8] sm:$0xff]  }
 0x38d   : > { %14425 = vmatprep.subr.bf16.mxu0 %v15604_v20  ;;  %14446 = vmatpush3.bf16.msra.mxu1 %v15603_v18  ;;  %v15644_v17 = vld [vmem:[%s15819_s24 + $0x1d80] sm:$0xff]   ;;  %v15645_v20 = vld [vmem:[%s15819_s24 + $0x1d48] sm:$0xff]  }
 0x38e   : > { %14447 = vmatprep.subr.bf16.mxu1 %v15605_v21  ;;  %v3088_v16 = vrot.slane %v3066_v11, %v15821_v6  ;;  %v3067_v18 = vcombine.high %v17032_v14, %v17032_v14  ;;  %v15681_v9 = vld [vmem:[%s15819_s24 + $0x1e88] sm:$0xff]   ;;  %v15683_v11 = vld [vmem:[%s15819_s24 + $0x1ed0] sm:$0xff]  }
 0x390   : > { %14426 = vmatpush3.bf16.msra.mxu0 %v15606_v22  ;;  %v3098_v21 = vcombine.high %v3088_v16, %v3088_v16  ;;  %v15646_v22 = vld [vmem:[%s15819_s24 + $0x1dc8] sm:$0xff]  }
 0x391   : > { %14455 = vmatprep.subr.bf16.mxu0 %v15609_v25  ;;  %14448 = vmatpush3.bf16.msra.mxu1 %v15607_v23  ;;  %v3095_v23 = vrot.slane %v3067_v18, %v15821_v6  ;;  %v15648_v25 = vld [vmem:[%s15819_s24 + $0x1d88] sm:$0xff]   ;;  %v15690_v18 = vld [vmem:[%s15819_s24 + $0x1e60] sm:$0xff]  }
 0x392   : > { %14477 = vmatprep.subr.bf16.mxu1 %v15610_v26 }
 0x393   : > { %11614 = vmatmul.mubr.bf16.vlgmr.msra.gmra.mrb[108].mxu0 %v3032_v24  ;;  %v15647_v24 = vld [vmem:[%s15819_s24 + $0x1d08] sm:$0xff]   ;;  %v3099_v26 = vcombine.high %v3095_v23, %v3095_v23 }
 0x394   : > { %14456 = vmatpush3.bf16.msra.mxu0 %v15611_v27  ;;  %11654 = vmatmul.mubr.bf16.vlgmr.msra.gmra.mrb[108].mxu1 %v3048_v29  ;;  %v15649_v27 = vld [vmem:[%s15819_s24 + $0x1d50] sm:$0xff]  }
 0x395   : > { %14457 = vmatprep.subr.bf16.mxu0 %v15613_v30  ;;  %14478 = vmatpush3.bf16.msra.mxu1 %v15612_v28  ;;  %v15650_v28 = vld [vmem:[%s15819_s24 + $0x1dd0] sm:$0xff]  }
 0x396   : > { %14479 = vmatprep.subr.bf16.mxu1 %v15614_v31  ;;  %11693 = vmatprep.mubr.bf16.mxu0 %v3088_v16  ;;  %v15651_v29 = vld [vmem:[%s15819_s24 + $0x1d10] sm:$0xff]   ;;  %v15653_v31 = vld [vmem:[%s15819_s24 + $0x1d58] sm:$0xff]  }
 0x397   : > { %11733 = vmatprep.mubr.bf16.mxu1 %v3098_v21  ;;  %v15652_v30 = vld [vmem:[%s15819_s24 + $0x1d90] sm:$0xff]   ;;  %v15688_v16 = vld [vmem:[%s15819_s24 + $0x1e18] sm:$0xff]   ;;  %v15693_v21 = vld [vmem:[%s15819_s24 + $0x1ea0] sm:$0xff]  }
 0x398   : > { %14458 = vmatpush3.bf16.msra.mxu0 %v15615_v32  ;;  %v15654_v32 = vld [vmem:[%s15819_s24 + $0x1dd8] sm:$0xff]  }
 0x399   : > { %14459 = vmatprep.subr.bf16.mxu0 %v15617_v34  ;;  %14480 = vmatpush3.bf16.msra.mxu1 %v15616_v33  ;;  %v15655_v33 = vld [vmem:[%s15819_s24 + $0x1d18] sm:$0xff]  }
 0x39a   : > { %14481 = vmatprep.subr.bf16.mxu1 %v15618_v35  ;;  %v15656_v34 = vld [vmem:[%s15819_s24 + $0x1d98] sm:$0xff]   ;;  %v15657_v35 = vld [vmem:[%s15819_s24 + $0x1d60] sm:$0xff]  }
 0x39c   : > { %14460 = vmatpush3.bf16.msra.mxu0 %v15619_v36  ;;  %v15658_v36 = vld [vmem:[%s15819_s24 + $0x1de0] sm:$0xff]  }
 0x39d   : > { %14461 = vmatprep.subr.bf16.mxu0 %v15621_v38  ;;  %14482 = vmatpush3.bf16.msra.mxu1 %v15620_v37  ;;  %v15659_v37 = vld [vmem:[%s15819_s24 + $0x1d20] sm:$0xff]  }
 0x39e   : > { %14483 = vmatprep.subr.bf16.mxu1 %v15622_v39  ;;  %v15660_v38 = vld [vmem:[%s15819_s24 + $0x1da0] sm:$0xff]   ;;  %v15661_v39 = vld [vmem:[%s15819_s24 + $0x1d68] sm:$0xff]  }
 0x3a0   : > { %14462 = vmatpush3.bf16.msra.mxu0 %v15623_v40  ;;  %v15662_v40 = vld [vmem:[%s15819_s24 + $0x1de8] sm:$0xff]  }
 0x3a1   : > { %14463 = vmatprep.subr.bf16.mxu0 %v15625_v42  ;;  %14484 = vmatpush3.bf16.msra.mxu1 %v15624_v41  ;;  %v15663_v42 = vld [vmem:[%s15819_s24 + $0x1d28] sm:$0xff]  }
 0x3a2   : > { %14485 = vmatprep.subr.bf16.mxu1 %v15626_v43 }
 0x3a4   : > { %14464 = vmatpush3.bf16.msra.mxu0 %v15627_v44  ;;  %v15664_v44 = vld [vmem:[%s15819_s24 + $0x1da8] sm:$0xff]  }
 0x3a5   : > { %14465 = vmatprep.subr.bf16.mxu0 %v15629_v46  ;;  %14486 = vmatpush3.bf16.msra.mxu1 %v15628_v45 }
 0x3a6   : > { %v14163_v48 = vpop.f32.mrb[84].mxu0  ;;  %14487 = vmatprep.subr.bf16.mxu1 %v15630_v47 }
 0x3a7   : > { %v14164_v50 = vpop.f32.mrb[85].mxu0  ;;  %v14185_v52 = vpop.f32.mrb[84].mxu1 }
 0x3a8   : > { %v14165_v53 = vadd.f32 %v14164_v50, %v14163_v48  ;;  %v14166_v54 = vpop.f32.mrb[86].mxu0  ;;  %v14186_v57 = vpop.f32.mrb[85].mxu1  ;;  %14466 = vmatpush3.bf16.msra.mxu0 %v15631_v49  ;;  %v15665_v48 = vld [vmem:[%s15819_s24 + $0x1d70] sm:$0xff]  }
 0x3a9   : > { %v14167_v58 = vpop.f32.mrb[87].mxu0  ;;  %v14187_v60 = vadd.f32 %v14186_v57, %v14185_v52  ;;  %v14188_v61 = vpop.f32.mrb[86].mxu1  ;;  %14467 = vmatprep.subr.bf16.mxu0 %v15633_v55  ;;  %14488 = vmatpush3.bf16.msra.mxu1 %v15632_v51  ;;  %v15666_v49 = vld [vmem:[%s15819_s24 + $0x1df0] sm:$0xff]  }
 0x3aa   : > { %v11136_v59 = vadd.f32 %v14165_v53, %v16981_v19  ;;  %v14189_v63 = vpop.f32.mrb[87].mxu1  ;;  %14489 = vmatprep.subr.bf16.mxu1 %v15634_v56  ;;  %v3096_v19 = vcombine.high %v3074_v12, %v3074_v12  ;;  %v15667_v55 = vld [vmem:[%s15819_s24 + $0x1d30] sm:$0xff]   ;;  %v15671_v61 = vld [vmem:[%s15819_s24 + $0x1d38] sm:$0xff]  }
 0x3ab   : > { %v15668_v57 = vld [vmem:[%s15819_s24 + $0x1db0] sm:$0xff]   ;;  %v3081_v63 = vrot.slane %v17032_v14, %v15821_v6  ;;  %v15686_v14 = vld [vmem:[%s15819_s24 + $0x1e58] sm:$0xff]  }
 0x3ac   : > { %v17018_v1 = vadd.f32 %v14187_v60, %v11136_v59  ;;  %14468 = vmatpush3.bf16.msra.mxu0 %v15635_v62  ;;  %v15669_v59 = vld [vmem:[%s15819_s24 + $0x1d78] sm:$0xff]  }
 0x3ad   : > { %14469 = vmatprep.subr.bf16.mxu0 %v15637_v2  ;;  %14490 = vmatpush3.bf16.msra.mxu1 %v15636_v0  ;;  %v15670_v60 = vld [vmem:[%s15819_s24 + $0x1df8] sm:$0xff]   ;;  %v15674_v0 = vld [vmem:[%s15819_s24 + $0x1e40] sm:$0xff]  }
 0x3ae   : > { %14491 = vmatprep.subr.bf16.mxu1 %v15638_v3  ;;  %v15672_v62 = vld [vmem:[%s15819_s24 + $0x1db8] sm:$0xff]   ;;  %v15676_v2 = vld [vmem:[%s15819_s24 + $0x1e00] sm:$0xff]  }
 0x3af   : > { %v15677_v3 = vld [vmem:[%s15819_s24 + $0x1e80] sm:$0xff]  }
 0x3b0   : > { %14470 = vmatpush3.bf16.msra.mxu0 %v15639_v4  ;;  %v3097_v4 = vcombine.high %v3081_v63, %v3081_v63 }
 0x3b1   : > { %14499 = vmatprep.subr.bf16.mxu0 %v15641_v8  ;;  %14492 = vmatpush3.bf16.msra.mxu1 %v15640_v10  ;;  %v15680_v8 = vld [vmem:[%s15819_s24 + $0x1e08] sm:$0xff]   ;;  %v15682_v10 = vld [vmem:[%s15819_s24 + $0x1e50] sm:$0xff]  }
 0x3b2   : > { %14521 = vmatprep.subr.bf16.mxu1 %v15642_v13  ;;  %v15685_v13 = vld [vmem:[%s15819_s24 + $0x1e90] sm:$0xff]  }
 0x3b3   : > { %11694 = vmatmul.mubr.bf16.vlgmr.msra.gmra.mrb[112].mxu0 %v3074_v12  ;;  %v15684_v12 = vld [vmem:[%s15819_s24 + $0x1e10] sm:$0xff]  }
 0x3b4   : > { %14500 = vmatpush3.bf16.msra.mxu0 %v15643_v15  ;;  %11734 = vmatmul.mubr.bf16.vlgmr.msra.gmra.mrb[112].mxu1 %v3096_v19  ;;  %v15687_v15 = vld [vmem:[%s15819_s24 + $0x1ed8] sm:$0xff]   ;;  %v15691_v19 = vld [vmem:[%s15819_s24 + $0x1ee0] sm:$0xff]  }
 0x3b5   : > { %14501 = vmatprep.subr.bf16.mxu0 %v15645_v20  ;;  %14522 = vmatpush3.bf16.msra.mxu1 %v15644_v17  ;;  %v15689_v17 = vld [vmem:[%s15819_s24 + $0x1e98] sm:$0xff]   ;;  %v15692_v20 = vld [vmem:[%s15819_s24 + $0x1e20] sm:$0xff]  }
 0x3b6   : > { %11773 = vmatprep.mubr.bf16.mxu0 %v3095_v23  ;;  %14523 = vmatprep.subr.bf16.mxu1 %v15646_v22  ;;  %v15694_v22 = vld [vmem:[%s15819_s24 + $0x1e68] sm:$0xff]  }
 0x3b7   : > { %11813 = vmatprep.mubr.bf16.mxu1 %v3099_v26  ;;  %v15695_v23 = vld [vmem:[%s15819_s24 + $0x1ee8] sm:$0xff]  }
 0x3b8   : > { %14502 = vmatpush3.bf16.msra.mxu0 %v15647_v24 }
 0x3b9   : > { %14503 = vmatprep.subr.bf16.mxu0 %v15649_v27  ;;  %14524 = vmatpush3.bf16.msra.mxu1 %v15648_v25  ;;  %v15696_v25 = vld [vmem:[%s15819_s24 + $0x1e28] sm:$0xff]  }
 0x3ba   : > { %14525 = vmatprep.subr.bf16.mxu1 %v15650_v28  ;;  %v15697_v27 = vld [vmem:[%s15819_s24 + $0x1ea8] sm:$0xff]  }
 0x3bc   : > { %14504 = vmatpush3.bf16.msra.mxu0 %v15651_v29 }
 0x3bd   : > { %14505 = vmatprep.subr.bf16.mxu0 %v15653_v31  ;;  %14526 = vmatpush3.bf16.msra.mxu1 %v15652_v30  ;;  %v15698_v31 = vld [vmem:[%s15819_s24 + $0x1e70] sm:$0xff]  }
 0x3be   : > { %14527 = vmatprep.subr.bf16.mxu1 %v15654_v32  ;;  %v15699_v32 = vld [vmem:[%s15819_s24 + $0x1ef0] sm:$0xff]  }
 0x3c0   : > { %14506 = vmatpush3.bf16.msra.mxu0 %v15655_v33 }
 0x3c1   : > { %14507 = vmatprep.subr.bf16.mxu0 %v15657_v35  ;;  %14528 = vmatpush3.bf16.msra.mxu1 %v15656_v34 }
 0x3c2   : > { %14529 = vmatprep.subr.bf16.mxu1 %v15658_v36 }
 0x3c4   : > { %14508 = vmatpush3.bf16.msra.mxu0 %v15659_v37 }
 0x3c5   : > { %14509 = vmatprep.subr.bf16.mxu0 %v15661_v39  ;;  %14530 = vmatpush3.bf16.msra.mxu1 %v15660_v38  ;;  %v15700_v38 = vld [vmem:[%s15819_s24 + $0x1e30] sm:$0xff]  }
 0x3c6   : > { %v14207_v41 = vpop.f32.mrb[88].mxu0  ;;  %14531 = vmatprep.subr.bf16.mxu1 %v15662_v40  ;;  %v15701_v40 = vld [vmem:[%s15819_s24 + $0x1eb0] sm:$0xff]  }
 0x3c7   : > { %v14208_v43 = vpop.f32.mrb[89].mxu0  ;;  %v14229_v45 = vpop.f32.mrb[88].mxu1 }
 0x3c8   : > { %v14209_v46 = vadd.f32 %v14208_v43, %v14207_v41  ;;  %v14210_v47 = vpop.f32.mrb[90].mxu0  ;;  %v14230_v50 = vpop.f32.mrb[89].mxu1  ;;  %14510 = vmatpush3.bf16.msra.mxu0 %v15663_v42  ;;  %v15702_v42 = vld [vmem:[%s15819_s24 + $0x1e78] sm:$0xff]  }
 0x3c9   : > { %v14211_v51 = vpop.f32.mrb[91].mxu0  ;;  %v14231_v53 = vadd.f32 %v14230_v50, %v14229_v45  ;;  %v14232_v54 = vpop.f32.mrb[90].mxu1  ;;  %14511 = vmatprep.subr.bf16.mxu0 %v15665_v48  ;;  %14532 = vmatpush3.bf16.msra.mxu1 %v15664_v44  ;;  %v15703_v43 = vld [vmem:[%s15819_s24 + $0x1ef8] sm:$0xff]   ;;  %v15706_v47 = vld [vmem:[%s15819_s24 + $0x1f40] sm:$0xff]  }
 0x3ca   : > { %v11216_v52 = vadd.f32 %v14209_v46, %v17018_v1  ;;  %v14233_v56 = vpop.f32.mrb[91].mxu1  ;;  %14533 = vmatprep.subr.bf16.mxu1 %v15666_v49  ;;  %v15675_v1 = vld [vmem:[%s15819_s24 + $0x1ec0] sm:$0xff]   ;;  %v15704_v44 = vld [vmem:[%s15819_s24 + $0x1e38] sm:$0xff]  }
 0x3cb   : > { %v300_v45 = vld [vmem:[%s17178_s0 + $0x78] sm:$0xff] }
 0x3cc   : > { %v17065_v58 = vadd.f32 %v14231_v53, %v11216_v52  ;;  %14512 = vmatpush3.bf16.msra.mxu0 %v15667_v55  ;;  %v3107_v46 = vrot.slane %v300_v45, %v15821_v6  ;;  %v3100_v48 = vcombine.high %v300_v45, %v300_v45  ;;  %v15705_v49 = vld [vmem:[%s15819_s24 + $0x1eb8] sm:$0xff]   ;;  %v15707_v52 = vld [vmem:[%s15819_s24 + $0x1fc0] sm:$0xff]  }
 0x3cd   : > { %14513 = vmatprep.subr.bf16.mxu0 %v15669_v59  ;;  %14534 = vmatpush3.bf16.msra.mxu1 %v15668_v57  ;;  %v15708_v55 = vld [vmem:[%s15819_s24 + $0x1f00] sm:$0xff]  }
 0x3ce   : > { %14535 = vmatprep.subr.bf16.mxu1 %v15670_v60  ;;  %v3115_v50 = vcombine.high %v3107_v46, %v3107_v46  ;;  %v3123_v51 = vrot.slane %v3107_v46, %v15821_v6  ;;  %v17116_v53 = vrot.slane %v3100_v48, %v15821_v6  ;;  %v15709_v60 = vld [vmem:[%s15819_s24 + $0x1f80] sm:$0xff]  }
 0x3d0   : > { %14514 = vmatpush3.bf16.msra.mxu0 %v15671_v61  ;;  %v3137_v54 = vrot.slane %v3115_v50, %v15821_v6  ;;  %v3116_v56 = vcombine.high %v17116_v53, %v17116_v53  ;;  %v3145_v57 = vcombine.high %v3123_v51, %v3123_v51 }
 0x3d1   : > { %14543 = vmatprep.subr.bf16.mxu0 %v15674_v0  ;;  %14536 = vmatpush3.bf16.msra.mxu1 %v15672_v62  ;;  %v15711_v62 = vld [vmem:[%s15819_s24 + $0x1fc8] sm:$0xff]  }
 0x3d2   : > { %14565 = vmatprep.subr.bf16.mxu1 %v15675_v1  ;;  %v3147_v59 = vcombine.high %v3137_v54, %v3137_v54  ;;  %v3144_v61 = vrot.slane %v3116_v56, %v15821_v6  ;;  %v15714_v1 = vld [vmem:[%s15819_s24 + $0x1f50] sm:$0xff]  }
 0x3d3   : > { %11774 = vmatmul.mubr.bf16.vlgmr.msra.gmra.mrb[116].mxu0 %v3081_v63  ;;  %v15712_v63 = vld [vmem:[%s15819_s24 + $0x1f08] sm:$0xff]  }
 0x3d4   : > { %14544 = vmatpush3.bf16.msra.mxu0 %v15676_v2  ;;  %11814 = vmatmul.mubr.bf16.vlgmr.msra.gmra.mrb[116].mxu1 %v3097_v4  ;;  %v3148_v0 = vcombine.high %v3144_v61, %v3144_v61  ;;  %v15713_v2 = vld [vmem:[%s15819_s24 + $0x1f88] sm:$0xff]   ;;  %v15716_v4 = vld [vmem:[%s15819_s24 + $0x1f10] sm:$0xff]  }
 0x3d5   : > { %14545 = vmatprep.subr.bf16.mxu0 %v15678_v5  ;;  %14566 = vmatpush3.bf16.msra.mxu1 %v15677_v3  ;;  %v15715_v3 = vld [vmem:[%s15819_s24 + $0x1fd0] sm:$0xff]   ;;  %v15718_v5 = vld [vmem:[%s15819_s24 + $0x1f58] sm:$0xff]  }
 0x3d6   : > { %14567 = vmatprep.subr.bf16.mxu1 %v15679_v7  ;;  %11853 = vmatprep.mubr.bf16.mxu0 %v3137_v54  ;;  %v15717_v7 = vld [vmem:[%s15819_s24 + $0x1f90] sm:$0xff]  }
 0x3d7   : > { %11893 = vmatprep.mubr.bf16.mxu1 %v3147_v59 }
 0x3d8   : > { %14546 = vmatpush3.bf16.msra.mxu0 %v15680_v8  ;;  %v15719_v8 = vld [vmem:[%s15819_s24 + $0x1fd8] sm:$0xff]  }
 0x3d9   : > { %14547 = vmatprep.subr.bf16.mxu0 %v15682_v10  ;;  %14568 = vmatpush3.bf16.msra.mxu1 %v15681_v9  ;;  %v15720_v9 = vld [vmem:[%s15819_s24 + $0x1f18] sm:$0xff]   ;;  %v15722_v10 = vld [vmem:[%s15819_s24 + $0x1f60] sm:$0xff]  }
 0x3da   : > { %14569 = vmatprep.subr.bf16.mxu1 %v15683_v11  ;;  %v15721_v11 = vld [vmem:[%s15819_s24 + $0x1f98] sm:$0xff]  }
 0x3dc   : > { %14548 = vmatpush3.bf16.msra.mxu0 %v15684_v12  ;;  %v15723_v12 = vld [vmem:[%s15819_s24 + $0x1fe0] sm:$0xff]  }
 0x3dd   : > { %14549 = vmatprep.subr.bf16.mxu0 %v15686_v14  ;;  %14570 = vmatpush3.bf16.msra.mxu1 %v15685_v13  ;;  %v15724_v13 = vld [vmem:[%s15819_s24 + $0x1f20] sm:$0xff]   ;;  %v15726_v14 = vld [vmem:[%s15819_s24 + $0x1f68] sm:$0xff]  }
 0x3de   : > { %14571 = vmatprep.subr.bf16.mxu1 %v15687_v15  ;;  %v15725_v15 = vld [vmem:[%s15819_s24 + $0x1fa0] sm:$0xff]  }
 0x3e0   : > { %14550 = vmatpush3.bf16.msra.mxu0 %v15688_v16 }
 0x3e1   : > { %14551 = vmatprep.subr.bf16.mxu0 %v15690_v18  ;;  %14572 = vmatpush3.bf16.msra.mxu1 %v15689_v17  ;;  %v15727_v17 = vld [vmem:[%s15819_s24 + $0x1fe8] sm:$0xff]  }
 0x3e2   : > { %14573 = vmatprep.subr.bf16.mxu1 %v15691_v19  ;;  %v15728_v19 = vld [vmem:[%s15819_s24 + $0x1f28] sm:$0xff]  }
 0x3e4   : > { %14552 = vmatpush3.bf16.msra.mxu0 %v15692_v20 }
 0x3e5   : > { %14553 = vmatprep.subr.bf16.mxu0 %v15694_v22  ;;  %14574 = vmatpush3.bf16.msra.mxu1 %v15693_v21 }
 0x3e6   : > { %v14251_v24 = vpop.f32.mrb[92].mxu0  ;;  %14575 = vmatprep.subr.bf16.mxu1 %v15695_v23  ;;  %v15729_v23 = vld [vmem:[%s15819_s24 + $0x1fa8] sm:$0xff]  }
 0x3e7   : > { %v14252_v26 = vpop.f32.mrb[93].mxu0  ;;  %v14273_v28 = vpop.f32.mrb[92].mxu1 }
 0x3e8   : > { %v14253_v29 = vadd.f32 %v14252_v26, %v14251_v24  ;;  %v14254_v30 = vpop.f32.mrb[94].mxu0  ;;  %v14274_v33 = vpop.f32.mrb[93].mxu1  ;;  %14554 = vmatpush3.bf16.msra.mxu0 %v15696_v25  ;;  %v15730_v24 = vld [vmem:[%s15819_s24 + $0x1f70] sm:$0xff]  }
 0x3e9   : > { %v14255_v34 = vpop.f32.mrb[95].mxu0  ;;  %v14275_v36 = vadd.f32 %v14274_v33, %v14273_v28  ;;  %v14276_v37 = vpop.f32.mrb[94].mxu1  ;;  %14555 = vmatprep.subr.bf16.mxu0 %v15698_v31  ;;  %14576 = vmatpush3.bf16.msra.mxu1 %v15697_v27  ;;  %v15731_v30 = vld [vmem:[%s15819_s24 + $0x1ff0] sm:$0xff]  }
 0x3ea   : > { %v11296_v35 = vadd.f32 %v14253_v29, %v17065_v58  ;;  %v14277_v39 = vpop.f32.mrb[95].mxu1  ;;  %14577 = vmatprep.subr.bf16.mxu1 %v15699_v32  ;;  %v15710_v58 = vld [vmem:[%s15819_s24 + $0x1f48] sm:$0xff]   ;;  %v15732_v32 = vld [vmem:[%s15819_s24 + $0x1f30] sm:$0xff]   ;;  %v15734_v34 = vld [vmem:[%s15819_s24 + $0x1f78] sm:$0xff]  }
 0x3eb   : > { %v15736_v37 = vld [vmem:[%s15819_s24 + $0x1f38] sm:$0xff]  }
 0x3ec   : > { %v17102_v41 = vadd.f32 %v14275_v36, %v11296_v35  ;;  %14556 = vmatpush3.bf16.msra.mxu0 %v15700_v38  ;;  %v15733_v35 = vld [vmem:[%s15819_s24 + $0x1fb0] sm:$0xff]   ;;  %v15735_v36 = vld [vmem:[%s15819_s24 + $0x1ff8] sm:$0xff]   ;;  %v3130_v38 = vrot.slane %v17116_v53, %v15821_v6 }
 0x3ed   : > { %14557 = vmatprep.subr.bf16.mxu0 %v15702_v42  ;;  %14578 = vmatpush3.bf16.msra.mxu1 %v15701_v40  ;;  %v15737_v39 = vld [vmem:[%s15819_s24 + $0x1fb8] sm:$0xff]   ;;  %s13222_s24 = sshll.u32 %s17188_s15, 6 }
 0x3ee   : > { %14579 = vmatprep.subr.bf16.mxu1 %v15703_v43  ;;  %v3146_v40 = vcombine.high %v3130_v38, %v3130_v38  ;;  %s272_s10 = scalar_lea.vmem %s17181_s3, %s13222_s24 }
 0x3f0   : > { %14558 = vmatpush3.bf16.msra.mxu0 %v15704_v44 }
 0x3f1   : > { %14587 = vmatprep.subr.bf16.mxu0 %v15706_v47  ;;  %14580 = vmatpush3.bf16.msra.mxu1 %v15705_v49 }
 0x3f2   : > { %14609 = vmatprep.subr.bf16.mxu1 %v15707_v52 }
 0x3f3   : > { %11854 = vmatmul.mubr.bf16.vlgmr.msra.gmra.mrb[120].mxu0 %v3123_v51 }
 0x3f4   : > { %14588 = vmatpush3.bf16.msra.mxu0 %v15708_v55  ;;  %11894 = vmatmul.mubr.bf16.vlgmr.msra.gmra.mrb[120].mxu1 %v3145_v57 }
 0x3f5   : > { %14589 = vmatprep.subr.bf16.mxu0 %v15710_v58  ;;  %14610 = vmatpush3.bf16.msra.mxu1 %v15709_v60 }
 0x3f6   : > { %11933 = vmatprep.mubr.bf16.mxu0 %v3144_v61  ;;  %14611 = vmatprep.subr.bf16.mxu1 %v15711_v62 }
 0x3f7   : > { %11973 = vmatprep.mubr.bf16.mxu1 %v3148_v0 }
 0x3f8   : > { %14590 = vmatpush3.bf16.msra.mxu0 %v15712_v63 }
 0x3f9   : > { %14591 = vmatprep.subr.bf16.mxu0 %v15714_v1  ;;  %14612 = vmatpush3.bf16.msra.mxu1 %v15713_v2 }
 0x3fa   : > { %14613 = vmatprep.subr.bf16.mxu1 %v15715_v3 }
 0x3fc   : > { %14592 = vmatpush3.bf16.msra.mxu0 %v15716_v4 }
 0x3fd   : > { %14593 = vmatprep.subr.bf16.mxu0 %v15718_v5  ;;  %14614 = vmatpush3.bf16.msra.mxu1 %v15717_v7 }
 0x3fe   : > { %14615 = vmatprep.subr.bf16.mxu1 %v15719_v8 }
 0x400   : > { %14594 = vmatpush3.bf16.msra.mxu0 %v15720_v9 }
 0x401   : > { %14595 = vmatprep.subr.bf16.mxu0 %v15722_v10  ;;  %14616 = vmatpush3.bf16.msra.mxu1 %v15721_v11  ;;  %v15764_v11 = vmov 0.0  }
 0x402   : > { %14617 = vmatprep.subr.bf16.mxu1 %v15723_v12  ;;  %283 = vst.msk [vmem:[#allocation2] sm:$0x3] %vm282_vm0, %v15764_v11 }
 0x404   : > { %14596 = vmatpush3.bf16.msra.mxu0 %v15724_v13 }
 0x405   : > { %14597 = vmatprep.subr.bf16.mxu0 %v15726_v14  ;;  %14618 = vmatpush3.bf16.msra.mxu1 %v15725_v15  ;;  %v11997_v14 = vld [vmem:[%s272_s10] sm:$0xff]  ;;  %v11998_v15 = vld [vmem:[%s272_s10 + $0x8] sm:$0xff] }
 0x406   : > { %v14295_v16 = vpop.f32.mrb[96].mxu0  ;;  %14619 = vmatprep.subr.bf16.mxu1 %v15727_v17  ;;  %v15765_v17 = vmov 0.0|0.0  }
 0x407   : > { %v14296_v18 = vpop.f32.mrb[97].mxu0  ;;  %v14317_v20 = vpop.f32.mrb[96].mxu1 }
 0x408   : > { %v14297_v21 = vadd.f32 %v14296_v18, %v14295_v16  ;;  %v14298_v22 = vpop.f32.mrb[98].mxu0  ;;  %v14318_v25 = vpop.f32.mrb[97].mxu1  ;;  %14598 = vmatpush3.bf16.msra.mxu0 %v15728_v19  ;;  %v11999_v16 = vld [vmem:[%s272_s10 + $0x10] sm:$0xff]  ;;  %v14660_v18 = vpack.c.bf16 %v11998_v15, %v11997_v14  ;;  %v12000_v19 = vld [vmem:[%s272_s10 + $0x18] sm:$0xff] }
 0x409   : > { %v14299_v26 = vpop.f32.mrb[99].mxu0  ;;  %v14319_v28 = vadd.f32 %v14318_v25, %v14317_v20  ;;  %v14320_v29 = vpop.f32.mrb[98].mxu1  ;;  %14599 = vmatprep.subr.bf16.mxu0 %v15730_v24  ;;  %14620 = vmatpush3.bf16.msra.mxu1 %v15729_v23  ;;  %v14663_v20 = vpack.c.bf16 %v12000_v19, %v11999_v16  ;;  %v12002_v22 = vld [vmem:[%s272_s10 + $0x28] sm:$0xff]  ;;  %v12003_v24 = vld [vmem:[%s272_s10 + $0x30] sm:$0xff]  ;;  %v12004_v25 = vld [vmem:[%s272_s10 + $0x38] sm:$0xff] }
 0x40a   : > { %v11376_v27 = vadd.f32 %v14297_v21, %v17102_v41  ;;  %v14321_v31 = vpop.f32.mrb[99].mxu1  ;;  %14621 = vmatprep.subr.bf16.mxu1 %v15731_v30  ;;  %v12001_v21 = vld [vmem:[%s272_s10 + $0x20] sm:$0xff]  ;;  %v14669_v26 = vpack.c.bf16 %v12004_v25, %v12003_v24 }
 0x40b   : > { %v14666_v23 = vpack.c.bf16 %v12002_v22, %v12001_v21 }
 0x40c   : > { %v11416_v33 = vadd.f32 %v14319_v28, %v11376_v27  ;;  %14600 = vmatpush3.bf16.msra.mxu0 %v15732_v32 }
 0x40d   : > { %14601 = vmatprep.subr.bf16.mxu0 %v15734_v34  ;;  %14622 = vmatpush3.bf16.msra.mxu1 %v15733_v35 }
 0x40e   : > { %14623 = vmatprep.subr.bf16.mxu1 %v15735_v36 }
 0x410   : > { %14602 = vmatpush3.bf16.msra.mxu0 %v15736_v37 }
 0x411   : > { %14624 = vmatpush3.bf16.msra.mxu1 %v15737_v39  ;;  %14659 = vmatprep.subr.bf16.mxu0 %v15765_v17 }
 0x413   : > { %11934 = vmatmul.mubr.bf16.vlgmr.msra.gmra.mrb[124].mxu0 %v3130_v38 }
 0x414   : > { %11974 = vmatmul.mubr.bf16.vlgmr.msra.gmra.mrb[124].mxu1 %v3146_v40  ;;  %14661 = vmatpush3.bf16.msra.mxu0 %v14660_v18 }
 0x415   : > { %14662 = vmatprep.subr.bf16.mxu0 %v15765_v17  ;;  %14656 = vmatprep.mubr.msk.f32.mxu0 %vm15766_vm1, %v15764_v11 }
 0x418   : > { %14664 = vmatpush3.bf16.msra.mxu0 %v14663_v20 }
 0x419   : > { %14665 = vmatprep.subr.bf16.mxu0 %v15765_v17 }
 0x41c   : > { %14667 = vmatpush3.bf16.msra.mxu0 %v14666_v23 }
 0x41d   : > { %14668 = vmatprep.subr.bf16.mxu0 %v15765_v17 }
 0x420   : > { %14670 = vmatpush3.bf16.msra.mxu0 %v14669_v26 }
 0x426   : > { %v14339_v41 = vpop.f32.mrb[100].mxu0 }
 0x427   : > { %v14340_v42 = vpop.f32.mrb[101].mxu0  ;;  %v14361_v43 = vpop.f32.mrb[100].mxu1 }
 0x428   : > { %v14341_v44 = vadd.f32 %v14340_v42, %v14339_v41  ;;  %v14342_v45 = vpop.f32.mrb[102].mxu0  ;;  %v14362_v46 = vpop.f32.mrb[101].mxu1 }
 0x429   : > { %v14343_v47 = vpop.f32.mrb[103].mxu0  ;;  %v14363_v49 = vadd.f32 %v14362_v46, %v14361_v43  ;;  %v14364_v50 = vpop.f32.mrb[102].mxu1 }
 0x42a   : > { %v11456_v48 = vadd.f32 %v14341_v44, %v11416_v33  ;;  %v14365_v51 = vpop.f32.mrb[103].mxu1 }
 0x42c   : > { %v11496_v6 = vadd.f32 %v14363_v49, %v11456_v48 }
 0x446   : > { %v14383_v52 = vpop.f32.mrb[104].mxu0 }
 0x447   : > { %v14384_v53 = vpop.f32.mrb[105].mxu0  ;;  %v14405_v54 = vpop.f32.mrb[104].mxu1 }
 0x448   : > { %v14385_v55 = vadd.f32 %v14384_v53, %v14383_v52  ;;  %v14386_v56 = vpop.f32.mrb[106].mxu0  ;;  %v14406_v57 = vpop.f32.mrb[105].mxu1 }
 0x449   : > { %v14387_v58 = vpop.f32.mrb[107].mxu0  ;;  %v14407_v60 = vadd.f32 %v14406_v57, %v14405_v54  ;;  %v14408_v61 = vpop.f32.mrb[106].mxu1 }
 0x44a   : > { %v11536_v59 = vadd.f32 %v14385_v55, %v11496_v6  ;;  %v14409_v62 = vpop.f32.mrb[107].mxu1 }
 0x44c   : > { %v11576_v63 = vadd.f32 %v14407_v60, %v11536_v59 }
 0x466   : > { %v14427_v0 = vpop.f32.mrb[108].mxu0 }
 0x467   : > { %v14428_v1 = vpop.f32.mrb[109].mxu0  ;;  %v14449_v2 = vpop.f32.mrb[108].mxu1 }
 0x468   : > { %v14429_v3 = vadd.f32 %v14428_v1, %v14427_v0  ;;  %v14430_v4 = vpop.f32.mrb[110].mxu0  ;;  %v14450_v5 = vpop.f32.mrb[109].mxu1 }
 0x469   : > { %v14431_v7 = vpop.f32.mrb[111].mxu0  ;;  %v14451_v9 = vadd.f32 %v14450_v5, %v14449_v2  ;;  %v14452_v10 = vpop.f32.mrb[110].mxu1 }
 0x46a   : > { %v11616_v8 = vadd.f32 %v14429_v3, %v11576_v63  ;;  %v14453_v12 = vpop.f32.mrb[111].mxu1  ;;  %v284_v10 = vld [vmem:[#allocation2] sm:$0x3] }
 0x46c   : > { %v11656_v13 = vadd.f32 %v14451_v9, %v11616_v8 }
 0x486   : > { %v14471_v27 = vpop.f32.mrb[112].mxu0 }
 0x487   : > { %v14472_v28 = vpop.f32.mrb[113].mxu0  ;;  %v14493_v29 = vpop.f32.mrb[112].mxu1 }
 0x488   : > { %v14473_v30 = vadd.f32 %v14472_v28, %v14471_v27  ;;  %v14474_v31 = vpop.f32.mrb[114].mxu0  ;;  %v14494_v32 = vpop.f32.mrb[113].mxu1 }
 0x489   : > { %v14475_v33 = vpop.f32.mrb[115].mxu0  ;;  %v14495_v35 = vadd.f32 %v14494_v32, %v14493_v29  ;;  %v14496_v36 = vpop.f32.mrb[114].mxu1 }
 0x48a   : > { %v11696_v34 = vadd.f32 %v14473_v30, %v11656_v13  ;;  %v14497_v37 = vpop.f32.mrb[115].mxu1  ;;  %v13217_v13 = vld [vmem:[%s267_s13] ss:$0 sm:$0xff] }
 0x48c   : > { %v11736_v38 = vadd.f32 %v14495_v35, %v11696_v34 }
 0x4a6   : > { %v14515_v39 = vpop.f32.mrb[116].mxu0 }
 0x4a7   : > { %v14516_v40 = vpop.f32.mrb[117].mxu0  ;;  %v14537_v41 = vpop.f32.mrb[116].mxu1 }
 0x4a8   : > { %v14517_v42 = vadd.f32 %v14516_v40, %v14515_v39  ;;  %v14518_v43 = vpop.f32.mrb[118].mxu0  ;;  %v14538_v44 = vpop.f32.mrb[117].mxu1 }
 0x4a9   : > { %v14519_v45 = vpop.f32.mrb[119].mxu0  ;;  %v14539_v47 = vadd.f32 %v14538_v44, %v14537_v41  ;;  %v14540_v48 = vpop.f32.mrb[118].mxu1 }
 0x4aa   : > { %v11776_v46 = vadd.f32 %v14517_v42, %v11736_v38  ;;  %v14541_v49 = vpop.f32.mrb[119].mxu1 }
 0x4ac   : > { %v11816_v50 = vadd.f32 %v14539_v47, %v11776_v46 }
 0x4c6   : > { %v14559_v51 = vpop.f32.mrb[120].mxu0 }
 0x4c7   : > { %v14560_v6 = vpop.f32.mrb[121].mxu0  ;;  %v14581_v52 = vpop.f32.mrb[120].mxu1 }
 0x4c8   : > { %v14561_v53 = vadd.f32 %v14560_v6, %v14559_v51  ;;  %v14562_v54 = vpop.f32.mrb[122].mxu0  ;;  %v14582_v55 = vpop.f32.mrb[121].mxu1 }
 0x4c9   : > { %v14563_v56 = vpop.f32.mrb[123].mxu0  ;;  %v14583_v58 = vadd.f32 %v14582_v55, %v14581_v52  ;;  %v14584_v59 = vpop.f32.mrb[122].mxu1 }
 0x4ca   : > { %v11856_v57 = vadd.f32 %v14561_v53, %v11816_v50  ;;  %v14585_v60 = vpop.f32.mrb[123].mxu1 }
 0x4cc   : > { %v11896_v61 = vadd.f32 %v14583_v58, %v11856_v57 }
 0x4e6   : > { %v14603_v62 = vpop.f32.mrb[124].mxu0 }
 0x4e7   : > { %v14604_v63 = vpop.f32.mrb[125].mxu0  ;;  %v14625_v0 = vpop.f32.mrb[124].mxu1 }
 0x4e8   : > { %v14605_v1 = vadd.f32 %v14604_v63, %v14603_v62  ;;  %v14606_v2 = vpop.f32.mrb[126].mxu0  ;;  %v14626_v3 = vpop.f32.mrb[125].mxu1 }
 0x4e9   : > { %v14607_v4 = vpop.f32.mrb[127].mxu0  ;;  %v14627_v7 = vadd.f32 %v14626_v3, %v14625_v0  ;;  %v14628_v8 = vpop.f32.mrb[126].mxu1 }
 0x4ea   : > { %v11936_v5 = vadd.f32 %v14605_v1, %v11896_v61  ;;  %v14629_v9 = vpop.f32.mrb[127].mxu1 }
 0x4ec   : > { %v11976_v11 = vadd.f32 %v14627_v7, %v11936_v5 }
 0x4ee   : > { %v11981_v12 = vadd.f32 %v11976_v11, %v284_v10 }
 0x4f0   : > { %11983 = vst.msk [vmem:[#allocation2] sm:$0x3] %vm282_vm0, %v11981_v12 }
 0x4f7   : > { %v11987_v14 = vld [vmem:[#allocation2] sm:$0x3] }
 0x4f8   : > { %v11995_v15 = vadd.f32 %v13217_v13, %v11987_v14 }
 0x4fa   : > { %v11996_v16 = vmax.f32 %v11995_v15, 0.0 }
 0x4fc   : > { %14657 = vmatmul.mubr.msk.f32.vlgmr.msra.gmra.mrb[128].mxu0 %vm12005_vm2, %v11996_v16 }
 0x5cf   : > { %v12075_v17 = vpop.f32.mrb[128].mxu0 }
 0x5d0   : > { %12080 = vst.msk [vmem:[%s276_s21] sm:$0x3] %vm12079_vm3, %v12075_v17  ;;  %v14658_v18 = vpop.f32.mrb[129].mxu0 }
 0x5d1 PF: > { %s14_s17 = sadd.s32 1, %s15761_s17   ;;  %s17183_s15 = smov %s15757_s16 }
 0x5d2   : > { %p11_p5 = scmp.ge.s32.totalorder %s14_s17, 4   ;;  %s17184_s16 = smov %s17186_s18 }
 0x5d4   :  { %13 = sbr.rel (!%p11_p5) target bundleno = 2 (0x2), region = 83 }

</bundles_post_ra>
